<compile_context>
chip_gen: v6e
topology: v6e:2x2x1
jax: 0.10.0
libtpu: 0.0.40
codegen_flags: <defaults>
</compile_context>

<pallas_src>
import jax
import jax.numpy as jnp
from jax.experimental import pallas as pl
from jax.experimental.pallas import tpu as pltpu

_SELU_ALPHA = 1.6732632423543772
_SELU_SCALE = 1.0507009873554805


def _selu(x):
    # scale * (x if x > 0 else alpha * (exp(x) - 1)); clamp exp arg for safety.
    neg = _SELU_ALPHA * (jnp.exp(jnp.minimum(x, 0.0)) - 1.0)
    return _SELU_SCALE * jnp.where(x > 0, x, neg)


# ------------------------ wrapper-side weight preprocessing ------------------------

def _conv_toeplitz(w, wo):
    """Expand a (K,K,Cin,Cout) VALID-conv filter into K block-Toeplitz matrices.

    Returns S with S[di, q*Cin+ci, j*Cout+co] = w[di, q-j, ci, co] for 0 <= q-j < K
    (zero elsewhere), so that for an activation stored 2-D as a2d[r, q*Cin+ci]:
        conv(a)[i, j, co] = sum_di (a2d[i+di, :] @ S[di])[j*Cout + co]
    with Wi = wo + K - 1 input columns.
    """
    k, _, cin, cout = w.shape
    wi = wo + k - 1
    q = jnp.arange(wi)
    j = jnp.arange(wo)
    s = jnp.zeros((k, wi, cin, wo, cout), jnp.float32)
    for dj in range(k):
        oh = (q[:, None] == (j[None, :] + dj)).astype(jnp.float32)          # (wi, wo)
        s = s + oh[None, :, None, :, None] * w[:, dj][:, None, :, None, :]
    return s.reshape(k, wi * cin, wo * cout)


def _even_row_selector(n_out, n_in):
    # (n_out, n_in) one-hot: picks rows 0, 2, 4, ...
    return (jnp.arange(n_in)[None, :] == 2 * jnp.arange(n_out)[:, None]).astype(jnp.float32)


def _even_block_selector(in_blocks, out_blocks, c):
    # (in_blocks*c, out_blocks*c) one-hot: picks lane-blocks 0, 2, 4, ... of width c.
    r = jnp.arange(in_blocks * c)
    col = jnp.arange(out_blocks * c)
    return (((r[:, None] // c) == 2 * (col[None, :] // c))
            & ((r[:, None] % c) == (col[None, :] % c))).astype(jnp.float32)


# ----------------------------------- Pallas kernel ----------------------------------

def _fused_classifier_kernel(x_ref, s1_ref, b1_ref, s2_ref, b2_ref, s3_ref, b3_ref,
                             e1_ref, f1_ref, e2_ref, f2_ref,
                             fw1_ref, fb1_ref, fw2_ref, fb2_ref, o_ref):
    f32 = jnp.float32
    bf16 = jnp.bfloat16

    def conv_rows(act_bf16, s_ref, b_ref, k, ho):
        # VALID conv as sum of K block-Toeplitz matmuls; output (ho, wo*cout).
        acc = jnp.dot(act_bf16[0:ho, :], s_ref[0], preferred_element_type=f32)
        for di in range(1, k):
            acc = acc + jnp.dot(act_bf16[di:di + ho, :], s_ref[di],
                                preferred_element_type=f32)
        return acc + b_ref[...]

    def pool_selu(y, e_ref, f_ref, ho, cout):
        # 2x2/stride-2 max pool on (ho, ho*cout) laid out as [i, j*cout+c], then SELU.
        v = jnp.maximum(y[0:ho - 1, :], y[1:ho, :])                 # row-pair max
        h = jnp.maximum(v[:, 0:(ho - 1) * cout], v[:, cout:ho * cout])  # col-block pair max
        sel = jnp.dot(jnp.dot(e_ref[...], h, preferred_element_type=f32),
                      f_ref[...], preferred_element_type=f32)       # pick even rows/blocks
        return _selu(sel)

    # stage 1: conv1 5x5 (1 -> 32) on the 32x32 image, pool -> (14, 14*32)
    x = x_ref[0].astype(bf16)                                       # (32, 32)
    y1 = conv_rows(x, s1_ref, b1_ref, 5, 28)                        # (28, 896)
    a1 = pool_selu(y1, e1_ref, f1_ref, 28, 32)                      # (14, 448)

    # stage 2: conv2 5x5 (32 -> 64) on 14x14, pool -> (5, 5*64)
    y2 = conv_rows(a1.astype(bf16), s2_ref, b2_ref, 5, 10)          # (10, 640)
    a2 = pool_selu(y2, e2_ref, f2_ref, 10, 64)                      # (5, 320)

    # stage 3: conv3 3x3 (64 -> 64) on 5x5, floor-mode pool of the 3x3 -> (1, 64)
    y3 = conv_rows(a2.astype(bf16), s3_ref, b3_ref, 3, 3)           # (3, 192)
    v3 = jnp.maximum(y3[0:1, :], y3[1:2, :])                        # (1, 192)
    a3 = _selu(jnp.maximum(v3[:, 0:64], v3[:, 64:128]))             # (1, 64)

    # fc head: fc1 + SELU, fc2 + log_softmax -- intermediates never leave VMEM.
    z1 = _selu(jnp.dot(a3, fw1_ref[...], preferred_element_type=f32) + fb1_ref[...])
    z2 = jnp.dot(z1, fw2_ref[...], preferred_element_type=f32) + fb2_ref[...]
    z2 = z2 - jnp.max(z2, axis=-1, keepdims=True)
    o_ref[0] = z2 - jnp.log(jnp.sum(jnp.exp(z2), axis=-1, keepdims=True))


# ------------------------------------ forward ---------------------------------------

def classifier_forward(x_nchw, params):
    """Mirrors _classifier.forward(x) for NCHW (B, 1, 32, 32) input."""
    x = x_nchw.reshape(-1, 32, 32).astype(jnp.float32)              # Cin == 1 squeezed
    batch = x.shape[0]

    # Block-Toeplitz conv weights (bf16 operands, f32 MXU accumulation).
    s1 = _conv_toeplitz(params["conv1_w"], 28).astype(jnp.bfloat16)  # (5,  32, 896)
    s2 = _conv_toeplitz(params["conv2_w"], 10).astype(jnp.bfloat16)  # (5, 448, 640)
    s3 = _conv_toeplitz(params["conv3_w"], 3).astype(jnp.bfloat16)   # (3, 320, 192)
    b1 = jnp.tile(params["conv1_b"], 28).reshape(1, 28 * 32)
    b2 = jnp.tile(params["conv2_b"], 10).reshape(1, 10 * 64)
    b3 = jnp.tile(params["conv3_b"], 3).reshape(1, 3 * 64)
    # exact one-hot selectors for the pool-compaction matmuls
    e1 = _even_row_selector(14, 27)
    f1 = _even_block_selector(27, 14, 32)
    e2 = _even_row_selector(5, 9)
    f2 = _even_block_selector(9, 5, 64)
    fw1 = params["fc1_w"]
    fb1 = params["fc1_b"].reshape(1, 50)
    fw2 = params["fc2_w"]
    fb2 = params["fc2_b"].reshape(1, 10)

    operands = (x, s1, b1, s2, b2, s3, b3, e1, f1, e2, f2, fw1, fb1, fw2, fb2)

    def _whole(a):
        nd = a.ndim
        return pl.BlockSpec(a.shape, lambda b, _nd=nd: (0,) * _nd)

    in_specs = [pl.BlockSpec((1, 32, 32), lambda b: (b, 0, 0))]
    in_specs += [_whole(a) for a in operands[1:]]

    out = pl.pallas_call(
        _fused_classifier_kernel,
        out_shape=jax.ShapeDtypeStruct((batch, 1, 10), jnp.float32),
        grid=(batch,),
        in_specs=in_specs,
        out_specs=pl.BlockSpec((1, 1, 10), lambda b: (b, 0, 0)),
        compiler_params=pltpu.CompilerParams(
            dimension_semantics=("parallel",),          # shard batch across TCs (v7x)
            vmem_limit_bytes=32 * 1024 * 1024,          # explicit; fits every generation
        ),
    )(*operands)
    return out.reshape(batch, 10)


# -------------------------- pure-JAX reference (for checking) -----------------------

def _reference_forward(x_nchw, params):
    x = x_nchw.reshape(-1, 1, 32, 32).astype(jnp.float32)
    x = jnp.transpose(x, (0, 2, 3, 1))                               # NHWC

    def conv(a, w, b):
        return jax.lax.conv_general_dilated(
            a, w, window_strides=(1, 1), padding="VALID",
            dimension_numbers=("NHWC", "HWIO", "NHWC")) + b

    def pool_selu(y):
        n, h, w, c = y.shape
        h2, w2 = h // 2, w // 2
        y = y[:, :2 * h2, :2 * w2, :].reshape(n, h2, 2, w2, 2, c).max(axis=(2, 4))
        return _selu(y)

    x = pool_selu(conv(x, params["conv1_w"], params["conv1_b"]))
    x = pool_selu(conv(x, params["conv2_w"], params["conv2_b"]))
    x = pool_selu(conv(x, params["conv3_w"], params["conv3_b"]))
    x = x.reshape(-1, 64)
    x = _selu(x @ params["fc1_w"] + params["fc1_b"])
    z = x @ params["fc2_w"] + params["fc2_b"]
    return jax.nn.log_softmax(z, axis=-1)


# ----------------------------------- parameters -------------------------------------

def init_params(key):
    """Deterministic xavier-uniform-style weights (synthetic, not a checkpoint)."""
    def xavier(k, shape, fan_in, fan_out):
        bound = (6.0 / (fan_in + fan_out)) ** 0.5
        return jax.random.uniform(k, shape, jnp.float32, -bound, bound)

    ks = jax.random.split(key, 5)
    p = {}
    # conv weights stored as (K, K, Cin, Cout)  (== PyTorch (Cout,Cin,K,K) transposed)
    p["conv1_w"] = xavier(ks[0], (5, 5, 1, 32), 1 * 25, 32 * 25)
    p["conv1_b"] = jnp.zeros((32,), jnp.float32)
    p["conv2_w"] = xavier(ks[1], (5, 5, 32, 64), 32 * 25, 64 * 25)
    p["conv2_b"] = jnp.zeros((64,), jnp.float32)
    p["conv3_w"] = xavier(ks[2], (3, 3, 64, 64), 64 * 9, 64 * 9)
    p["conv3_b"] = jnp.zeros((64,), jnp.float32)
    # fc weights stored as (in, out) (== PyTorch (out, in) transposed); bias = 0.01
    p["fc1_w"] = xavier(ks[3], (64, 50), 64, 50)
    p["fc1_b"] = jnp.full((50,), 0.01, jnp.float32)
    p["fc2_w"] = xavier(ks[4], (50, 10), 50, 10)
    p["fc2_b"] = jnp.full((10,), 0.01, jnp.float32)
    return p


# -------------------------------------- main -----------------------------------------

if __name__ == "__main__":
    key = jax.random.PRNGKey(0)
    kx, kp = jax.random.split(key)
    B = 2
    x = jax.random.normal(kx, (B, 1, 32, 32), jnp.float32)          # NCHW, like PyTorch
    params = init_params(kp)

    out = jax.block_until_ready(jax.jit(classifier_forward)(x, params))

    assert out.shape == (B, 10), out.shape
    # log_softmax rows must sum (in prob space) to ~1
    assert bool(jnp.allclose(jnp.sum(jnp.exp(out), axis=1), 1.0, atol=1e-4))

    # validate against a pure-JAX f32 reference (bf16 conv operands => loose tol)
    ref = jax.block_until_ready(jax.jit(_reference_forward)(x, params))
    max_err = float(jnp.max(jnp.abs(out - ref)))
    assert max_err < 0.1, f"kernel deviates from reference by {max_err}"

    print("KERNEL_OK")
</pallas_src>

<mosaic_0001>
module attributes {stable_mosaic.version = 11 : i64} {
  func.func @_fused_classifier_kernel(%arg0: i32, %arg1: memref<1x32x32xf32, #tpu.memory_space<vmem>>, %arg2: memref<5x32x896xbf16, #tpu.memory_space<vmem>>, %arg3: memref<1x896xf32, #tpu.memory_space<vmem>>, %arg4: memref<5x448x640xbf16, #tpu.memory_space<vmem>>, %arg5: memref<1x640xf32, #tpu.memory_space<vmem>>, %arg6: memref<3x320x192xbf16, #tpu.memory_space<vmem>>, %arg7: memref<1x192xf32, #tpu.memory_space<vmem>>, %arg8: memref<14x27xf32, #tpu.memory_space<vmem>>, %arg9: memref<864x448xf32, #tpu.memory_space<vmem>>, %arg10: memref<5x9xf32, #tpu.memory_space<vmem>>, %arg11: memref<576x320xf32, #tpu.memory_space<vmem>>, %arg12: memref<64x50xf32, #tpu.memory_space<vmem>>, %arg13: memref<1x50xf32, #tpu.memory_space<vmem>>, %arg14: memref<50x10xf32, #tpu.memory_space<vmem>>, %arg15: memref<1x10xf32, #tpu.memory_space<vmem>>, %arg16: memref<1x1x10xf32, #tpu.memory_space<vmem>>) attributes {dimension_semantics = [#tpu.dimension_semantics<parallel>], iteration_bounds = array<i64: 2>, scalar_prefetch = 0 : i64, scratch_operands = 0 : i64, tpu.core_type = #tpu.core_type<tc>, window_params = [{transform_indices = @transform_0, window_bounds = array<i64: 1, 32, 32>}, {pipeline_mode = #tpu.pipeline_mode<synchronous>, transform_indices = @transform_1, window_bounds = array<i64: 5, 32, 896>}, {pipeline_mode = #tpu.pipeline_mode<synchronous>, transform_indices = @transform_2, window_bounds = array<i64: 1, 896>}, {pipeline_mode = #tpu.pipeline_mode<synchronous>, transform_indices = @transform_3, window_bounds = array<i64: 5, 448, 640>}, {pipeline_mode = #tpu.pipeline_mode<synchronous>, transform_indices = @transform_4, window_bounds = array<i64: 1, 640>}, {pipeline_mode = #tpu.pipeline_mode<synchronous>, transform_indices = @transform_5, window_bounds = array<i64: 3, 320, 192>}, {pipeline_mode = #tpu.pipeline_mode<synchronous>, transform_indices = @transform_6, window_bounds = array<i64: 1, 192>}, {pipeline_mode = #tpu.pipeline_mode<synchronous>, transform_indices = @transform_7, window_bounds = array<i64: 14, 27>}, {pipeline_mode = #tpu.pipeline_mode<synchronous>, transform_indices = @transform_8, window_bounds = array<i64: 864, 448>}, {pipeline_mode = #tpu.pipeline_mode<synchronous>, transform_indices = @transform_9, window_bounds = array<i64: 5, 9>}, {pipeline_mode = #tpu.pipeline_mode<synchronous>, transform_indices = @transform_10, window_bounds = array<i64: 576, 320>}, {pipeline_mode = #tpu.pipeline_mode<synchronous>, transform_indices = @transform_11, window_bounds = array<i64: 64, 50>}, {pipeline_mode = #tpu.pipeline_mode<synchronous>, transform_indices = @transform_12, window_bounds = array<i64: 1, 50>}, {pipeline_mode = #tpu.pipeline_mode<synchronous>, transform_indices = @transform_13, window_bounds = array<i64: 50, 10>}, {pipeline_mode = #tpu.pipeline_mode<synchronous>, transform_indices = @transform_14, window_bounds = array<i64: 1, 10>}, {transform_indices = @transform_15, window_bounds = array<i64: 1, 1, 10>}]} {
    %c0 = arith.constant 0 : index
    %c0_0 = arith.constant 0 : index
    %c0_1 = arith.constant 0 : index
    %0 = vector.load %arg1[%c0, %c0_0, %c0_1] : memref<1x32x32xf32, #tpu.memory_space<vmem>>, vector<1x32x32xf32>
    %1 = vector.shape_cast %0 : vector<1x32x32xf32> to vector<32x32xf32>
    %2 = arith.truncf %1 : vector<32x32xf32> to vector<32x32xbf16>
    %3 = vector.extract_strided_slice %2 {offsets = [0, 0], sizes = [28, 32], strides = [1, 1]} : vector<32x32xbf16> to vector<28x32xbf16>
    %c0_2 = arith.constant 0 : index
    %c0_3 = arith.constant 0 : index
    %c0_4 = arith.constant 0 : index
    %4 = vector.load %arg2[%c0_2, %c0_3, %c0_4] : memref<5x32x896xbf16, #tpu.memory_space<vmem>>, vector<1x32x896xbf16>
    %5 = vector.shape_cast %4 : vector<1x32x896xbf16> to vector<32x896xbf16>
    %cst = arith.constant dense<0.000000e+00> : vector<28x896xf32>
    %6 = tpu.matmul %3, %5, %cst {dimension_numbers = #tpu.dot_dimension_numbers<[1], [0], [0], [1], [0, 0, 1, 1], [], []>} : vector<28x32xbf16>, vector<32x896xbf16>, vector<28x896xf32> -> vector<28x896xf32>
    %7 = vector.extract_strided_slice %2 {offsets = [1, 0], sizes = [28, 32], strides = [1, 1]} : vector<32x32xbf16> to vector<28x32xbf16>
    %c1 = arith.constant 1 : index
    %c0_5 = arith.constant 0 : index
    %c0_6 = arith.constant 0 : index
    %8 = vector.load %arg2[%c1, %c0_5, %c0_6] : memref<5x32x896xbf16, #tpu.memory_space<vmem>>, vector<1x32x896xbf16>
    %9 = vector.shape_cast %8 : vector<1x32x896xbf16> to vector<32x896xbf16>
    %cst_7 = arith.constant dense<0.000000e+00> : vector<28x896xf32>
    %10 = tpu.matmul %7, %9, %cst_7 {dimension_numbers = #tpu.dot_dimension_numbers<[1], [0], [0], [1], [0, 0, 1, 1], [], []>} : vector<28x32xbf16>, vector<32x896xbf16>, vector<28x896xf32> -> vector<28x896xf32>
    %11 = arith.addf %6, %10 : vector<28x896xf32>
    %12 = vector.extract_strided_slice %2 {offsets = [2, 0], sizes = [28, 32], strides = [1, 1]} : vector<32x32xbf16> to vector<28x32xbf16>
    %c2 = arith.constant 2 : index
    %c0_8 = arith.constant 0 : index
    %c0_9 = arith.constant 0 : index
    %13 = vector.load %arg2[%c2, %c0_8, %c0_9] : memref<5x32x896xbf16, #tpu.memory_space<vmem>>, vector<1x32x896xbf16>
    %14 = vector.shape_cast %13 : vector<1x32x896xbf16> to vector<32x896xbf16>
    %cst_10 = arith.constant dense<0.000000e+00> : vector<28x896xf32>
    %15 = tpu.matmul %12, %14, %cst_10 {dimension_numbers = #tpu.dot_dimension_numbers<[1], [0], [0], [1], [0, 0, 1, 1], [], []>} : vector<28x32xbf16>, vector<32x896xbf16>, vector<28x896xf32> -> vector<28x896xf32>
    %16 = arith.addf %11, %15 : vector<28x896xf32>
    %17 = vector.extract_strided_slice %2 {offsets = [3, 0], sizes = [28, 32], strides = [1, 1]} : vector<32x32xbf16> to vector<28x32xbf16>
    %c3 = arith.constant 3 : index
    %c0_11 = arith.constant 0 : index
    %c0_12 = arith.constant 0 : index
    %18 = vector.load %arg2[%c3, %c0_11, %c0_12] : memref<5x32x896xbf16, #tpu.memory_space<vmem>>, vector<1x32x896xbf16>
    %19 = vector.shape_cast %18 : vector<1x32x896xbf16> to vector<32x896xbf16>
    %cst_13 = arith.constant dense<0.000000e+00> : vector<28x896xf32>
    %20 = tpu.matmul %17, %19, %cst_13 {dimension_numbers = #tpu.dot_dimension_numbers<[1], [0], [0], [1], [0, 0, 1, 1], [], []>} : vector<28x32xbf16>, vector<32x896xbf16>, vector<28x896xf32> -> vector<28x896xf32>
    %21 = arith.addf %16, %20 : vector<28x896xf32>
    %22 = vector.extract_strided_slice %2 {offsets = [4, 0], sizes = [28, 32], strides = [1, 1]} : vector<32x32xbf16> to vector<28x32xbf16>
    %c4 = arith.constant 4 : index
    %c0_14 = arith.constant 0 : index
    %c0_15 = arith.constant 0 : index
    %23 = vector.load %arg2[%c4, %c0_14, %c0_15] : memref<5x32x896xbf16, #tpu.memory_space<vmem>>, vector<1x32x896xbf16>
    %24 = vector.shape_cast %23 : vector<1x32x896xbf16> to vector<32x896xbf16>
    %cst_16 = arith.constant dense<0.000000e+00> : vector<28x896xf32>
    %25 = tpu.matmul %22, %24, %cst_16 {dimension_numbers = #tpu.dot_dimension_numbers<[1], [0], [0], [1], [0, 0, 1, 1], [], []>} : vector<28x32xbf16>, vector<32x896xbf16>, vector<28x896xf32> -> vector<28x896xf32>
    %26 = arith.addf %21, %25 : vector<28x896xf32>
    %c0_17 = arith.constant 0 : index
    %c0_18 = arith.constant 0 : index
    %27 = vector.load %arg3[%c0_17, %c0_18] : memref<1x896xf32, #tpu.memory_space<vmem>>, vector<1x896xf32>
    %28 = vector.broadcast %27 : vector<1x896xf32> to vector<28x896xf32>
    %29 = arith.addf %26, %28 : vector<28x896xf32>
    %30 = vector.extract_strided_slice %29 {offsets = [0, 0], sizes = [27, 896], strides = [1, 1]} : vector<28x896xf32> to vector<27x896xf32>
    %31 = vector.extract_strided_slice %29 {offsets = [1, 0], sizes = [27, 896], strides = [1, 1]} : vector<28x896xf32> to vector<27x896xf32>
    %32 = arith.maximumf %30, %31 : vector<27x896xf32>
    %33 = vector.extract_strided_slice %32 {offsets = [0, 0], sizes = [27, 864], strides = [1, 1]} : vector<27x896xf32> to vector<27x864xf32>
    %34 = vector.extract_strided_slice %32 {offsets = [0, 32], sizes = [27, 864], strides = [1, 1]} : vector<27x896xf32> to vector<27x864xf32>
    %35 = arith.maximumf %33, %34 : vector<27x864xf32>
    %c0_19 = arith.constant 0 : index
    %c0_20 = arith.constant 0 : index
    %36 = vector.load %arg8[%c0_19, %c0_20] : memref<14x27xf32, #tpu.memory_space<vmem>>, vector<14x27xf32>
    %cst_21 = arith.constant dense<0.000000e+00> : vector<14x864xf32>
    %37 = tpu.matmul %36, %35, %cst_21 {dimension_numbers = #tpu.dot_dimension_numbers<[1], [0], [0], [1], [0, 0, 1, 1], [], []>} : vector<14x27xf32>, vector<27x864xf32>, vector<14x864xf32> -> vector<14x864xf32>
    %c0_22 = arith.constant 0 : index
    %c0_23 = arith.constant 0 : index
    %38 = vector.load %arg9[%c0_22, %c0_23] : memref<864x448xf32, #tpu.memory_space<vmem>>, vector<864x448xf32>
    %cst_24 = arith.constant dense<0.000000e+00> : vector<14x448xf32>
    %39 = tpu.matmul %37, %38, %cst_24 {dimension_numbers = #tpu.dot_dimension_numbers<[1], [0], [0], [1], [0, 0, 1, 1], [], []>} : vector<14x864xf32>, vector<864x448xf32>, vector<14x448xf32> -> vector<14x448xf32>
    %cst_25 = arith.constant 0.000000e+00 : f32
    %40 = vector.broadcast %cst_25 : f32 to vector<14x448xf32>
    %41 = arith.minimumf %39, %40 : vector<14x448xf32>
    %42 = math.exp %41 : vector<14x448xf32>
    %cst_26 = arith.constant 1.000000e+00 : f32
    %43 = vector.broadcast %cst_26 : f32 to vector<14x448xf32>
    %44 = arith.subf %42, %43 : vector<14x448xf32>
    %cst_27 = arith.constant 1.67326319 : f32
    %45 = vector.broadcast %cst_27 : f32 to vector<14x448xf32>
    %46 = arith.mulf %45, %44 : vector<14x448xf32>
    %cst_28 = arith.constant 0.000000e+00 : f32
    %47 = vector.broadcast %cst_28 : f32 to vector<14x448xf32>
    %48 = arith.cmpf ogt, %39, %47 : vector<14x448xf32>
    %49 = arith.select %48, %39, %46 : vector<14x448xi1>, vector<14x448xf32>
    %cst_29 = arith.constant 1.05070102 : f32
    %50 = vector.broadcast %cst_29 : f32 to vector<14x448xf32>
    %51 = arith.mulf %50, %49 : vector<14x448xf32>
    %52 = arith.truncf %51 : vector<14x448xf32> to vector<14x448xbf16>
    %53 = vector.extract_strided_slice %52 {offsets = [0, 0], sizes = [10, 448], strides = [1, 1]} : vector<14x448xbf16> to vector<10x448xbf16>
    %c0_30 = arith.constant 0 : index
    %c0_31 = arith.constant 0 : index
    %c0_32 = arith.constant 0 : index
    %54 = vector.load %arg4[%c0_30, %c0_31, %c0_32] : memref<5x448x640xbf16, #tpu.memory_space<vmem>>, vector<1x448x640xbf16>
    %55 = vector.shape_cast %54 : vector<1x448x640xbf16> to vector<448x640xbf16>
    %cst_33 = arith.constant dense<0.000000e+00> : vector<10x640xf32>
    %56 = tpu.matmul %53, %55, %cst_33 {dimension_numbers = #tpu.dot_dimension_numbers<[1], [0], [0], [1], [0, 0, 1, 1], [], []>} : vector<10x448xbf16>, vector<448x640xbf16>, vector<10x640xf32> -> vector<10x640xf32>
    %57 = vector.extract_strided_slice %52 {offsets = [1, 0], sizes = [10, 448], strides = [1, 1]} : vector<14x448xbf16> to vector<10x448xbf16>
    %c1_34 = arith.constant 1 : index
    %c0_35 = arith.constant 0 : index
    %c0_36 = arith.constant 0 : index
    %58 = vector.load %arg4[%c1_34, %c0_35, %c0_36] : memref<5x448x640xbf16, #tpu.memory_space<vmem>>, vector<1x448x640xbf16>
    %59 = vector.shape_cast %58 : vector<1x448x640xbf16> to vector<448x640xbf16>
    %cst_37 = arith.constant dense<0.000000e+00> : vector<10x640xf32>
    %60 = tpu.matmul %57, %59, %cst_37 {dimension_numbers = #tpu.dot_dimension_numbers<[1], [0], [0], [1], [0, 0, 1, 1], [], []>} : vector<10x448xbf16>, vector<448x640xbf16>, vector<10x640xf32> -> vector<10x640xf32>
    %61 = arith.addf %56, %60 : vector<10x640xf32>
    %62 = vector.extract_strided_slice %52 {offsets = [2, 0], sizes = [10, 448], strides = [1, 1]} : vector<14x448xbf16> to vector<10x448xbf16>
    %c2_38 = arith.constant 2 : index
    %c0_39 = arith.constant 0 : index
    %c0_40 = arith.constant 0 : index
    %63 = vector.load %arg4[%c2_38, %c0_39, %c0_40] : memref<5x448x640xbf16, #tpu.memory_space<vmem>>, vector<1x448x640xbf16>
    %64 = vector.shape_cast %63 : vector<1x448x640xbf16> to vector<448x640xbf16>
    %cst_41 = arith.constant dense<0.000000e+00> : vector<10x640xf32>
    %65 = tpu.matmul %62, %64, %cst_41 {dimension_numbers = #tpu.dot_dimension_numbers<[1], [0], [0], [1], [0, 0, 1, 1], [], []>} : vector<10x448xbf16>, vector<448x640xbf16>, vector<10x640xf32> -> vector<10x640xf32>
    %66 = arith.addf %61, %65 : vector<10x640xf32>
    %67 = vector.extract_strided_slice %52 {offsets = [3, 0], sizes = [10, 448], strides = [1, 1]} : vector<14x448xbf16> to vector<10x448xbf16>
    %c3_42 = arith.constant 3 : index
    %c0_43 = arith.constant 0 : index
    %c0_44 = arith.constant 0 : index
    %68 = vector.load %arg4[%c3_42, %c0_43, %c0_44] : memref<5x448x640xbf16, #tpu.memory_space<vmem>>, vector<1x448x640xbf16>
    %69 = vector.shape_cast %68 : vector<1x448x640xbf16> to vector<448x640xbf16>
    %cst_45 = arith.constant dense<0.000000e+00> : vector<10x640xf32>
    %70 = tpu.matmul %67, %69, %cst_45 {dimension_numbers = #tpu.dot_dimension_numbers<[1], [0], [0], [1], [0, 0, 1, 1], [], []>} : vector<10x448xbf16>, vector<448x640xbf16>, vector<10x640xf32> -> vector<10x640xf32>
    %71 = arith.addf %66, %70 : vector<10x640xf32>
    %72 = vector.extract_strided_slice %52 {offsets = [4, 0], sizes = [10, 448], strides = [1, 1]} : vector<14x448xbf16> to vector<10x448xbf16>
    %c4_46 = arith.constant 4 : index
    %c0_47 = arith.constant 0 : index
    %c0_48 = arith.constant 0 : index
    %73 = vector.load %arg4[%c4_46, %c0_47, %c0_48] : memref<5x448x640xbf16, #tpu.memory_space<vmem>>, vector<1x448x640xbf16>
    %74 = vector.shape_cast %73 : vector<1x448x640xbf16> to vector<448x640xbf16>
    %cst_49 = arith.constant dense<0.000000e+00> : vector<10x640xf32>
    %75 = tpu.matmul %72, %74, %cst_49 {dimension_numbers = #tpu.dot_dimension_numbers<[1], [0], [0], [1], [0, 0, 1, 1], [], []>} : vector<10x448xbf16>, vector<448x640xbf16>, vector<10x640xf32> -> vector<10x640xf32>
    %76 = arith.addf %71, %75 : vector<10x640xf32>
    %c0_50 = arith.constant 0 : index
    %c0_51 = arith.constant 0 : index
    %77 = vector.load %arg5[%c0_50, %c0_51] : memref<1x640xf32, #tpu.memory_space<vmem>>, vector<1x640xf32>
    %78 = vector.broadcast %77 : vector<1x640xf32> to vector<10x640xf32>
    %79 = arith.addf %76, %78 : vector<10x640xf32>
    %80 = vector.extract_strided_slice %79 {offsets = [0, 0], sizes = [9, 640], strides = [1, 1]} : vector<10x640xf32> to vector<9x640xf32>
    %81 = vector.extract_strided_slice %79 {offsets = [1, 0], sizes = [9, 640], strides = [1, 1]} : vector<10x640xf32> to vector<9x640xf32>
    %82 = arith.maximumf %80, %81 : vector<9x640xf32>
    %83 = vector.extract_strided_slice %82 {offsets = [0, 0], sizes = [9, 576], strides = [1, 1]} : vector<9x640xf32> to vector<9x576xf32>
    %84 = vector.extract_strided_slice %82 {offsets = [0, 64], sizes = [9, 576], strides = [1, 1]} : vector<9x640xf32> to vector<9x576xf32>
    %85 = arith.maximumf %83, %84 : vector<9x576xf32>
    %c0_52 = arith.constant 0 : index
    %c0_53 = arith.constant 0 : index
    %86 = vector.load %arg10[%c0_52, %c0_53] : memref<5x9xf32, #tpu.memory_space<vmem>>, vector<5x9xf32>
    %cst_54 = arith.constant dense<0.000000e+00> : vector<5x576xf32>
    %87 = tpu.matmul %86, %85, %cst_54 {dimension_numbers = #tpu.dot_dimension_numbers<[1], [0], [0], [1], [0, 0, 1, 1], [], []>} : vector<5x9xf32>, vector<9x576xf32>, vector<5x576xf32> -> vector<5x576xf32>
    %c0_55 = arith.constant 0 : index
    %c0_56 = arith.constant 0 : index
    %88 = vector.load %arg11[%c0_55, %c0_56] : memref<576x320xf32, #tpu.memory_space<vmem>>, vector<576x320xf32>
    %cst_57 = arith.constant dense<0.000000e+00> : vector<5x320xf32>
    %89 = tpu.matmul %87, %88, %cst_57 {dimension_numbers = #tpu.dot_dimension_numbers<[1], [0], [0], [1], [0, 0, 1, 1], [], []>} : vector<5x576xf32>, vector<576x320xf32>, vector<5x320xf32> -> vector<5x320xf32>
    %cst_58 = arith.constant 0.000000e+00 : f32
    %90 = vector.broadcast %cst_58 : f32 to vector<5x320xf32>
    %91 = arith.minimumf %89, %90 : vector<5x320xf32>
    %92 = math.exp %91 : vector<5x320xf32>
    %cst_59 = arith.constant 1.000000e+00 : f32
    %93 = vector.broadcast %cst_59 : f32 to vector<5x320xf32>
    %94 = arith.subf %92, %93 : vector<5x320xf32>
    %cst_60 = arith.constant 1.67326319 : f32
    %95 = vector.broadcast %cst_60 : f32 to vector<5x320xf32>
    %96 = arith.mulf %95, %94 : vector<5x320xf32>
    %cst_61 = arith.constant 0.000000e+00 : f32
    %97 = vector.broadcast %cst_61 : f32 to vector<5x320xf32>
    %98 = arith.cmpf ogt, %89, %97 : vector<5x320xf32>
    %99 = arith.select %98, %89, %96 : vector<5x320xi1>, vector<5x320xf32>
    %cst_62 = arith.constant 1.05070102 : f32
    %100 = vector.broadcast %cst_62 : f32 to vector<5x320xf32>
    %101 = arith.mulf %100, %99 : vector<5x320xf32>
    %102 = arith.truncf %101 : vector<5x320xf32> to vector<5x320xbf16>
    %103 = vector.extract_strided_slice %102 {offsets = [0, 0], sizes = [3, 320], strides = [1, 1]} : vector<5x320xbf16> to vector<3x320xbf16>
    %c0_63 = arith.constant 0 : index
    %c0_64 = arith.constant 0 : index
    %c0_65 = arith.constant 0 : index
    %104 = vector.load %arg6[%c0_63, %c0_64, %c0_65] : memref<3x320x192xbf16, #tpu.memory_space<vmem>>, vector<1x320x192xbf16>
    %105 = vector.shape_cast %104 : vector<1x320x192xbf16> to vector<320x192xbf16>
    %cst_66 = arith.constant dense<0.000000e+00> : vector<3x192xf32>
    %106 = tpu.matmul %103, %105, %cst_66 {dimension_numbers = #tpu.dot_dimension_numbers<[1], [0], [0], [1], [0, 0, 1, 1], [], []>} : vector<3x320xbf16>, vector<320x192xbf16>, vector<3x192xf32> -> vector<3x192xf32>
    %107 = vector.extract_strided_slice %102 {offsets = [1, 0], sizes = [3, 320], strides = [1, 1]} : vector<5x320xbf16> to vector<3x320xbf16>
    %c1_67 = arith.constant 1 : index
    %c0_68 = arith.constant 0 : index
    %c0_69 = arith.constant 0 : index
    %108 = vector.load %arg6[%c1_67, %c0_68, %c0_69] : memref<3x320x192xbf16, #tpu.memory_space<vmem>>, vector<1x320x192xbf16>
    %109 = vector.shape_cast %108 : vector<1x320x192xbf16> to vector<320x192xbf16>
    %cst_70 = arith.constant dense<0.000000e+00> : vector<3x192xf32>
    %110 = tpu.matmul %107, %109, %cst_70 {dimension_numbers = #tpu.dot_dimension_numbers<[1], [0], [0], [1], [0, 0, 1, 1], [], []>} : vector<3x320xbf16>, vector<320x192xbf16>, vector<3x192xf32> -> vector<3x192xf32>
    %111 = arith.addf %106, %110 : vector<3x192xf32>
    %112 = vector.extract_strided_slice %102 {offsets = [2, 0], sizes = [3, 320], strides = [1, 1]} : vector<5x320xbf16> to vector<3x320xbf16>
    %c2_71 = arith.constant 2 : index
    %c0_72 = arith.constant 0 : index
    %c0_73 = arith.constant 0 : index
    %113 = vector.load %arg6[%c2_71, %c0_72, %c0_73] : memref<3x320x192xbf16, #tpu.memory_space<vmem>>, vector<1x320x192xbf16>
    %114 = vector.shape_cast %113 : vector<1x320x192xbf16> to vector<320x192xbf16>
    %cst_74 = arith.constant dense<0.000000e+00> : vector<3x192xf32>
    %115 = tpu.matmul %112, %114, %cst_74 {dimension_numbers = #tpu.dot_dimension_numbers<[1], [0], [0], [1], [0, 0, 1, 1], [], []>} : vector<3x320xbf16>, vector<320x192xbf16>, vector<3x192xf32> -> vector<3x192xf32>
    %116 = arith.addf %111, %115 : vector<3x192xf32>
    %c0_75 = arith.constant 0 : index
    %c0_76 = arith.constant 0 : index
    %117 = vector.load %arg7[%c0_75, %c0_76] : memref<1x192xf32, #tpu.memory_space<vmem>>, vector<1x192xf32>
    %118 = vector.broadcast %117 : vector<1x192xf32> to vector<3x192xf32>
    %119 = arith.addf %116, %118 : vector<3x192xf32>
    %120 = vector.extract_strided_slice %119 {offsets = [0, 0], sizes = [1, 192], strides = [1, 1]} : vector<3x192xf32> to vector<1x192xf32>
    %121 = vector.extract_strided_slice %119 {offsets = [1, 0], sizes = [1, 192], strides = [1, 1]} : vector<3x192xf32> to vector<1x192xf32>
    %122 = arith.maximumf %120, %121 : vector<1x192xf32>
    %123 = vector.extract_strided_slice %122 {offsets = [0, 0], sizes = [1, 64], strides = [1, 1]} : vector<1x192xf32> to vector<1x64xf32>
    %124 = vector.extract_strided_slice %122 {offsets = [0, 64], sizes = [1, 64], strides = [1, 1]} : vector<1x192xf32> to vector<1x64xf32>
    %125 = arith.maximumf %123, %124 : vector<1x64xf32>
    %cst_77 = arith.constant 0.000000e+00 : f32
    %126 = vector.broadcast %cst_77 : f32 to vector<1x64xf32>
    %127 = arith.minimumf %125, %126 : vector<1x64xf32>
    %128 = math.exp %127 : vector<1x64xf32>
    %cst_78 = arith.constant 1.000000e+00 : f32
    %129 = vector.broadcast %cst_78 : f32 to vector<1x64xf32>
    %130 = arith.subf %128, %129 : vector<1x64xf32>
    %cst_79 = arith.constant 1.67326319 : f32
    %131 = vector.broadcast %cst_79 : f32 to vector<1x64xf32>
    %132 = arith.mulf %131, %130 : vector<1x64xf32>
    %cst_80 = arith.constant 0.000000e+00 : f32
    %133 = vector.broadcast %cst_80 : f32 to vector<1x64xf32>
    %134 = arith.cmpf ogt, %125, %133 : vector<1x64xf32>
    %135 = arith.select %134, %125, %132 : vector<1x64xi1>, vector<1x64xf32>
    %cst_81 = arith.constant 1.05070102 : f32
    %136 = vector.broadcast %cst_81 : f32 to vector<1x64xf32>
    %137 = arith.mulf %136, %135 : vector<1x64xf32>
    %c0_82 = arith.constant 0 : index
    %c0_83 = arith.constant 0 : index
    %138 = vector.load %arg12[%c0_82, %c0_83] : memref<64x50xf32, #tpu.memory_space<vmem>>, vector<64x50xf32>
    %cst_84 = arith.constant dense<0.000000e+00> : vector<1x50xf32>
    %139 = tpu.matmul %137, %138, %cst_84 {dimension_numbers = #tpu.dot_dimension_numbers<[1], [0], [0], [1], [0, 0, 1, 1], [], []>} : vector<1x64xf32>, vector<64x50xf32>, vector<1x50xf32> -> vector<1x50xf32>
    %c0_85 = arith.constant 0 : index
    %c0_86 = arith.constant 0 : index
    %140 = vector.load %arg13[%c0_85, %c0_86] : memref<1x50xf32, #tpu.memory_space<vmem>>, vector<1x50xf32>
    %141 = arith.addf %139, %140 : vector<1x50xf32>
    %cst_87 = arith.constant 0.000000e+00 : f32
    %142 = vector.broadcast %cst_87 : f32 to vector<1x50xf32>
    %143 = arith.minimumf %141, %142 : vector<1x50xf32>
    %144 = math.exp %143 : vector<1x50xf32>
    %cst_88 = arith.constant 1.000000e+00 : f32
    %145 = vector.broadcast %cst_88 : f32 to vector<1x50xf32>
    %146 = arith.subf %144, %145 : vector<1x50xf32>
    %cst_89 = arith.constant 1.67326319 : f32
    %147 = vector.broadcast %cst_89 : f32 to vector<1x50xf32>
    %148 = arith.mulf %147, %146 : vector<1x50xf32>
    %cst_90 = arith.constant 0.000000e+00 : f32
    %149 = vector.broadcast %cst_90 : f32 to vector<1x50xf32>
    %150 = arith.cmpf ogt, %141, %149 : vector<1x50xf32>
    %151 = arith.select %150, %141, %148 : vector<1x50xi1>, vector<1x50xf32>
    %cst_91 = arith.constant 1.05070102 : f32
    %152 = vector.broadcast %cst_91 : f32 to vector<1x50xf32>
    %153 = arith.mulf %152, %151 : vector<1x50xf32>
    %c0_92 = arith.constant 0 : index
    %c0_93 = arith.constant 0 : index
    %154 = vector.load %arg14[%c0_92, %c0_93] : memref<50x10xf32, #tpu.memory_space<vmem>>, vector<50x10xf32>
    %cst_94 = arith.constant dense<0.000000e+00> : vector<1x10xf32>
    %155 = tpu.matmul %153, %154, %cst_94 {dimension_numbers = #tpu.dot_dimension_numbers<[1], [0], [0], [1], [0, 0, 1, 1], [], []>} : vector<1x50xf32>, vector<50x10xf32>, vector<1x10xf32> -> vector<1x10xf32>
    %c0_95 = arith.constant 0 : index
    %c0_96 = arith.constant 0 : index
    %156 = vector.load %arg15[%c0_95, %c0_96] : memref<1x10xf32, #tpu.memory_space<vmem>>, vector<1x10xf32>
    %157 = arith.addf %155, %156 : vector<1x10xf32>
    %cst_97 = arith.constant dense<0xFF800000> : vector<1xf32>
    %158 = vector.multi_reduction <maximumf>, %157, %cst_97 [1] : vector<1x10xf32> to vector<1xf32>
    %159 = vector.shape_cast %158 : vector<1xf32> to vector<1x1xf32>
    %160 = vector.broadcast %159 : vector<1x1xf32> to vector<1x10xf32>
    %161 = arith.subf %157, %160 : vector<1x10xf32>
    %162 = math.exp %161 : vector<1x10xf32>
    %cst_98 = arith.constant dense<0.000000e+00> : vector<1xf32>
    %163 = vector.multi_reduction <add>, %162, %cst_98 [1] : vector<1x10xf32> to vector<1xf32>
    %164 = vector.shape_cast %163 : vector<1xf32> to vector<1x1xf32>
    %165 = math.log %164 : vector<1x1xf32>
    %166 = vector.broadcast %165 : vector<1x1xf32> to vector<1x10xf32>
    %167 = arith.subf %161, %166 : vector<1x10xf32>
    %c0_99 = arith.constant 0 : index
    %c0_100 = arith.constant 0 : index
    %c0_101 = arith.constant 0 : index
    %168 = vector.load %arg16[%c0_99, %c0_100, %c0_101] : memref<1x1x10xf32, #tpu.memory_space<vmem>>, vector<1x1x10xf32>
    %169 = vector.shape_cast %168 : vector<1x1x10xf32> to vector<1x10xf32>
    %170 = vector.shape_cast %167 : vector<1x10xf32> to vector<1x1x10xf32>
    tpu.vector_store %arg16[%c0_99, %c0_100, %c0_101], %170 {strides = array<i32>} : memref<1x1x10xf32, #tpu.memory_space<vmem>>, vector<1x1x10xf32>,
    return
  }
  func.func @transform_0(%arg0: i32) -> (i32, i32, i32) {
    %c0_i32 = arith.constant 0 : i32
    %c0_i32_0 = arith.constant 0 : i32
    %c0_i32_1 = arith.constant 0 : i32
    return %arg0, %c0_i32, %c0_i32_0 : i32, i32, i32
  }
  func.func @transform_1(%arg0: i32) -> (i32, i32, i32) {
    %c0_i32 = arith.constant 0 : i32
    %c0_i32_0 = arith.constant 0 : i32
    %c0_i32_1 = arith.constant 0 : i32
    %c0_i32_2 = arith.constant 0 : i32
    return %c0_i32, %c0_i32_0, %c0_i32_1 : i32, i32, i32
  }
  func.func @transform_2(%arg0: i32) -> (i32, i32) {
    %c0_i32 = arith.constant 0 : i32
    %c0_i32_0 = arith.constant 0 : i32
    %c0_i32_1 = arith.constant 0 : i32
    return %c0_i32, %c0_i32_0 : i32, i32
  }
  func.func @transform_3(%arg0: i32) -> (i32, i32, i32) {
    %c0_i32 = arith.constant 0 : i32
    %c0_i32_0 = arith.constant 0 : i32
    %c0_i32_1 = arith.constant 0 : i32
    %c0_i32_2 = arith.constant 0 : i32
    return %c0_i32, %c0_i32_0, %c0_i32_1 : i32, i32, i32
  }
  func.func @transform_4(%arg0: i32) -> (i32, i32) {
    %c0_i32 = arith.constant 0 : i32
    %c0_i32_0 = arith.constant 0 : i32
    %c0_i32_1 = arith.constant 0 : i32
    return %c0_i32, %c0_i32_0 : i32, i32
  }
  func.func @transform_5(%arg0: i32) -> (i32, i32, i32) {
    %c0_i32 = arith.constant 0 : i32
    %c0_i32_0 = arith.constant 0 : i32
    %c0_i32_1 = arith.constant 0 : i32
    %c0_i32_2 = arith.constant 0 : i32
    return %c0_i32, %c0_i32_0, %c0_i32_1 : i32, i32, i32
  }
  func.func @transform_6(%arg0: i32) -> (i32, i32) {
    %c0_i32 = arith.constant 0 : i32
    %c0_i32_0 = arith.constant 0 : i32
    %c0_i32_1 = arith.constant 0 : i32
    return %c0_i32, %c0_i32_0 : i32, i32
  }
  func.func @transform_7(%arg0: i32) -> (i32, i32) {
    %c0_i32 = arith.constant 0 : i32
    %c0_i32_0 = arith.constant 0 : i32
    %c0_i32_1 = arith.constant 0 : i32
    return %c0_i32, %c0_i32_0 : i32, i32
  }
  func.func @transform_8(%arg0: i32) -> (i32, i32) {
    %c0_i32 = arith.constant 0 : i32
    %c0_i32_0 = arith.constant 0 : i32
    %c0_i32_1 = arith.constant 0 : i32
    return %c0_i32, %c0_i32_0 : i32, i32
  }
  func.func @transform_9(%arg0: i32) -> (i32, i32) {
    %c0_i32 = arith.constant 0 : i32
    %c0_i32_0 = arith.constant 0 : i32
    %c0_i32_1 = arith.constant 0 : i32
    return %c0_i32, %c0_i32_0 : i32, i32
  }
  func.func @transform_10(%arg0: i32) -> (i32, i32) {
    %c0_i32 = arith.constant 0 : i32
    %c0_i32_0 = arith.constant 0 : i32
    %c0_i32_1 = arith.constant 0 : i32
    return %c0_i32, %c0_i32_0 : i32, i32
  }
  func.func @transform_11(%arg0: i32) -> (i32, i32) {
    %c0_i32 = arith.constant 0 : i32
    %c0_i32_0 = arith.constant 0 : i32
    %c0_i32_1 = arith.constant 0 : i32
    return %c0_i32, %c0_i32_0 : i32, i32
  }
  func.func @transform_12(%arg0: i32) -> (i32, i32) {
    %c0_i32 = arith.constant 0 : i32
    %c0_i32_0 = arith.constant 0 : i32
    %c0_i32_1 = arith.constant 0 : i32
    return %c0_i32, %c0_i32_0 : i32, i32
  }
  func.func @transform_13(%arg0: i32) -> (i32, i32) {
    %c0_i32 = arith.constant 0 : i32
    %c0_i32_0 = arith.constant 0 : i32
    %c0_i32_1 = arith.constant 0 : i32
    return %c0_i32, %c0_i32_0 : i32, i32
  }
  func.func @transform_14(%arg0: i32) -> (i32, i32) {
    %c0_i32 = arith.constant 0 : i32
    %c0_i32_0 = arith.constant 0 : i32
    %c0_i32_1 = arith.constant 0 : i32
    return %c0_i32, %c0_i32_0 : i32, i32
  }
  func.func @transform_15(%arg0: i32) -> (i32, i32, i32) {
    %c0_i32 = arith.constant 0 : i32
    %c0_i32_0 = arith.constant 0 : i32
    %c0_i32_1 = arith.constant 0 : i32
    return %arg0, %c0_i32, %c0_i32_0 : i32, i32, i32
  }
}

</mosaic_0001>

<bundles_post_ra>
// kernel: tile.18
= control target key start
LH: loop header
LB: loop body
LE: loop exit
PB: predicated region body
PF: predicated region fallthrough
CT: control target
= control target key end

     0   :  { %s40_s0 = inlined_call_operand.vmem [shape: f32[32], index: 0, kind: input, shape index: {}]   ;;  %s41_s1 = inlined_call_operand.vmem [shape: f32[28,32], index: 1, kind: output, shape index: {}]  }
   0x1   :  { %v4_v0 = vld [vmem:[%s40_s0] ss:$0 sm:$0xff] }
   0x2   :  { %5 = vst [vmem:[%s41_s1] sm:$0xff] %v4_v0  ;;  %12 = vst [vmem:[%s41_s1 + $0x8] sm:$0xff] %v4_v0 }
   0x3   :  { %13 = vst [vmem:[%s41_s1 + $0x10] sm:$0xff] %v4_v0  ;;  %14 = vst [vmem:[%s41_s1 + $0x18] sm:$0xff] %v4_v0 }

// kernel: tile.19
= control target key start
LH: loop header
LB: loop body
LE: loop exit
PB: predicated region body
PF: predicated region fallthrough
CT: control target
= control target key end

     0   :  { %s93_s8 = smov 96   ;;  %vm3_vm0 = vcmask 261120   ;;  %s95_s15 = smov 64   ;;  %vm10_vm1 = vcmask 1048320   ;;  %vm17_vm2 = vcmask 785920   ;;  %vm24_vm3 = vcmask 523520   ;;  %s139_s0 = inlined_call_operand.vmem [shape: f32[28,32], index: 0, kind: input, shape index: {}]   ;;  %s140_s1 = inlined_call_operand.vmem [shape: f32[1,896], index: 1, kind: output, shape index: {}]  }
   0x1   :  { %v81_v0 = vld [vmem:[%s139_s0 + $0x3] ss:$4 sm:$0x7f]   ;;  %v82_v1 = vld [vmem:[%s139_s0 + $0x2] ss:$4 sm:$0x7f]  }
   0x2   :  { %8 = vrot.lane.b32.xlu0 %v81_v0, %s93_s8  ;;  %v83_v2 = vld [vmem:[%s139_s0 + $0x1] ss:$4 sm:$0x7f]   ;;  %v2_v3 = vld [vmem:[%s139_s0] ss:$4 sm:$0x7f]  }
   0x3   :  { %s94_s0 = smov 32   ;;  %4 = vst.msk [vmem:[#allocation0] ss:$8 sm:$0xf] %vm3_vm0, %v2_v3  }
   0x4   :  { %22 = vrot.lane.b32.xlu1 %v83_v2, %s94_s0  ;;  %5 = vst.msk [vmem:[#allocation0] ss:$8 sm:$0x70] %vm3_vm0, %v2_v3  }
   0x6   :  { %15 = vrot.lane.b32.xlu0 %v82_v1, %s95_s15 }
  0x74   :  { %v9_v4 = vpop.permute.xlu0 %8  }
  0x75   :  { %11 = vst.msk [vmem:[#allocation0] ss:$8 sm:$0xf] %vm10_vm1, %v9_v4   ;;  %12 = vst.msk [vmem:[#allocation0] ss:$8 sm:$0x70] %vm10_vm1, %v9_v4  }
  0x76   :  { %v23_v5 = vpop.permute.xlu1 %22  }
  0x78   :  { %v16_v6 = vpop.permute.xlu0 %15  }
  0x79   :  { %18 = vst.msk [vmem:[#allocation0] ss:$8 sm:$0xf] %vm17_vm2, %v16_v6   ;;  %19 = vst.msk [vmem:[#allocation0] ss:$8 sm:$0x70] %vm17_vm2, %v16_v6  }
  0x7a   :  { %25 = vst.msk [vmem:[#allocation0] ss:$8 sm:$0xf] %vm24_vm3, %v23_v5   ;;  %26 = vst.msk [vmem:[#allocation0] ss:$8 sm:$0x70] %vm24_vm3, %v23_v5  }
  0x81   :  { %v31_v7 = vld [vmem:[#allocation0] sm:$0x1]  ;;  %v36_v8 = vld [vmem:[#allocation0 + $0x8] sm:$0x1]  ;;  %v42_v9 = vld [vmem:[#allocation0 + $0x10] sm:$0x1] }
  0x82   :  { %34 = vst [vmem:[%s140_s1] sm:$0x1] %v31_v7  ;;  %84 = vst [vmem:[%s140_s1 + $0x1] sm:$0x1] %v36_v8  ;;  %v49_v10 = vld [vmem:[#allocation0 + $0x18] sm:$0x1] }
  0x83   :  { %85 = vst [vmem:[%s140_s1 + $0x2] sm:$0x1] %v42_v9  ;;  %v56_v11 = vld [vmem:[#allocation0 + $0x20] sm:$0x1]  ;;  %v63_v12 = vld [vmem:[#allocation0 + $0x28] sm:$0x1] }
  0x84   :  { %86 = vst [vmem:[%s140_s1 + $0x3] sm:$0x1] %v49_v10  ;;  %87 = vst [vmem:[%s140_s1 + $0x4] sm:$0x1] %v56_v11  ;;  %v70_v13 = vld [vmem:[#allocation0 + $0x30] sm:$0x1] }
  0x85   :  { %88 = vst [vmem:[%s140_s1 + $0x5] sm:$0x1] %v63_v12  ;;  %89 = vst [vmem:[%s140_s1 + $0x6] sm:$0x1] %v70_v13 }

// kernel: tile.23
= control target key start
LH: loop header
LB: loop body
LE: loop exit
PB: predicated region body
PF: predicated region fallthrough
CT: control target
= control target key end

     0   :  { %s28_s0 = inlined_call_operand.vmem [shape: f32[64], index: 0, kind: input, shape index: {}]   ;;  %s29_s1 = inlined_call_operand.vmem [shape: f32[10,64], index: 1, kind: output, shape index: {}]  }
   0x1   :  { %v4_v0 = vld [vmem:[%s28_s0] ss:$0 sm:$0xff] }
   0x2   :  { %5 = vst [vmem:[%s29_s1] sm:$0xff] %v4_v0  ;;  %8 = vst [vmem:[%s29_s1 + $0x8] sm:$0xff] %v4_v0 }

// kernel: tile.24
= control target key start
LH: loop header
LB: loop body
LE: loop exit
PB: predicated region body
PF: predicated region fallthrough
CT: control target
= control target key end

     0   :  { %vm3_vm0 = vcmask 523264   ;;  %s59_s8 = smov 64   ;;  %vm11_vm1 = vcmask 1048064   ;;  %s91_s0 = inlined_call_operand.vmem [shape: f32[10,64], index: 0, kind: input, shape index: {}]   ;;  %s92_s1 = inlined_call_operand.vmem [shape: f32[1,640], index: 1, kind: output, shape index: {}]  }
   0x1   :  { %v53_v0 = vld [vmem:[%s91_s0 + $0x1] ss:$2 sm:$0x1f]   ;;  %v2_v1 = vld [vmem:[%s91_s0] ss:$2 sm:$0x1f]  }
   0x2   :  { %9 = vrot.lane.b32.xlu0 %v53_v0, %s59_s8  ;;  %4 = vst.msk [vmem:[#allocation0] ss:$8 sm:$0xf] %vm3_vm0, %v2_v1   ;;  %6 = vst.msk [vmem:[#allocation0 + $0x1c] sm:$0x10] %vm3_vm0, %v2_v1  }
  0x74   :  { %v10_v2 = vpop.permute.xlu0 %9  }
  0x75   :  { %12 = vst.msk [vmem:[#allocation0] ss:$8 sm:$0xf] %vm11_vm1, %v10_v2   ;;  %14 = vst.msk [vmem:[#allocation0 + $0x1c] sm:$0x10] %vm11_vm1, %v10_v2  }
  0x7c   :  { %v19_v3 = vld [vmem:[#allocation0] sm:$0x1]  ;;  %v24_v4 = vld [vmem:[#allocation0 + $0x8] sm:$0x1]  ;;  %v30_v5 = vld [vmem:[#allocation0 + $0x10] sm:$0x1] }
  0x7d   :  { %22 = vst [vmem:[%s92_s1] sm:$0x1] %v19_v3  ;;  %54 = vst [vmem:[%s92_s1 + $0x1] sm:$0x1] %v24_v4  ;;  %v37_v6 = vld [vmem:[#allocation0 + $0x18] sm:$0x1] }
  0x7e   :  { %55 = vst [vmem:[%s92_s1 + $0x2] sm:$0x1] %v30_v5  ;;  %v44_v7 = vld [vmem:[#allocation0 + $0x20] sm:$0x1]  ;;  %56 = vst [vmem:[%s92_s1 + $0x3] sm:$0x1] %v37_v6 }
  0x7f   :  { %57 = vst [vmem:[%s92_s1 + $0x4] sm:$0x1] %v44_v7 }

// kernel: tile.28
= control target key start
LH: loop header
LB: loop body
LE: loop exit
PB: predicated region body
PF: predicated region fallthrough
CT: control target
= control target key end

     0   :  { %s22_s0 = inlined_call_operand.vmem [shape: f32[64], index: 0, kind: input, shape index: {}]   ;;  %s23_s1 = inlined_call_operand.vmem [shape: f32[3,64], index: 1, kind: output, shape index: {}]  }
   0x1   :  { %v4_v0 = vld [vmem:[%s22_s0] ss:$0 sm:$0xff] }
   0x2   :  { %5 = vst [vmem:[%s23_s1] sm:$0xf] %v4_v0 }

// kernel: tile.29
= control target key start
LH: loop header
LB: loop body
LE: loop exit
PB: predicated region body
PF: predicated region fallthrough
CT: control target
= control target key end

     0   :  { %vm9_vm0 = vcmask 523264   ;;  %s33_s8 = smov 64   ;;  %vm15_vm1 = vcmask 1048064   ;;  %s53_s0 = inlined_call_operand.vmem [shape: f32[3,64], index: 0, kind: input, shape index: {}]   ;;  %s54_s1 = inlined_call_operand.vmem [shape: f32[1,192], index: 1, kind: output, shape index: {}]  }
   0x1   :  { %v5_v0 = vld [vmem:[%s53_s0] sm:$0xf]  ;;  %s7_s0 = smov 3 }
   0x2   :  { %6 = vst [vmem:[#allocation1] sm:$0xf] %v5_v0 }
   0x9   :  { %v12_v1 = vld [vmem:[#allocation1 + $0x1] sm:$0x1]   ;;  %v8_v2 = vld [vmem:[#allocation1] ss:$2 sm:%s7_s0]  }
   0xa   :  { %13 = vrot.lane.b32.xlu0 %v12_v1, %s33_s8  ;;  %10 = vst.msk [vmem:[#allocation0] ss:$8 sm:$0x3] %vm9_vm0, %v8_v2  }
  0x11   :  { %v26_v3 = vld [vmem:[#allocation0 + $0x8] sm:$0x1] }
  0x12   :  { %31 = vst [vmem:[%s54_s1 + $0x1] sm:$0x1] %v26_v3 }
  0x7c   :  { %v14_v4 = vpop.permute.xlu0 %13  }
  0x7d   :  { %16 = vst.msk [vmem:[#allocation0] sm:$0x1] %vm15_vm1, %v14_v4  }
  0x84   :  { %v21_v5 = vld [vmem:[#allocation0] sm:$0x1] }
  0x85   :  { %24 = vst [vmem:[%s54_s1] sm:$0x1] %v21_v5 }

// kernel: classifier_forward.1
= control target key start
LH: loop header
LB: loop body
LE: loop exit
PB: predicated region body
PF: predicated region fallthrough
CT: control target
= control target key end

     0   :  { %20 = vsyncpa [#allocation3], 0  ;;  %s21876_s0 = inlined_call_operand.vmem [shape: f32[2,32,32], index: 0, kind: input, shape index: {}]   ;;  %s21877_s1 = inlined_call_operand.vmem [shape: bf16[5,32,896], index: 1, kind: input, shape index: {}]   ;;  %s21878_s2 = inlined_call_operand.vmem [shape: f32[1,896], index: 2, kind: input, shape index: {}]   ;;  %s21879_s3 = inlined_call_operand.vmem [shape: bf16[5,448,640], index: 3, kind: input, shape index: {}]   ;;  %s21880_s4 = inlined_call_operand.vmem [shape: f32[1,640], index: 4, kind: input, shape index: {}]   ;;  %s21881_s5 = inlined_call_operand.vmem [shape: bf16[3,320,192], index: 5, kind: input, shape index: {}]   ;;  %s21882_s6 = inlined_call_operand.vmem [shape: f32[1,192], index: 6, kind: input, shape index: {}]   ;;  %s21883_s7 = inlined_call_operand.vmem [shape: f32[14,27], index: 7, kind: input, shape index: {}]   ;;  %s21884_s8 = inlined_call_operand.vmem [shape: f32[864,448], index: 8, kind: input, shape index: {}]   ;;  %s21885_s9 = inlined_call_operand.vmem [shape: f32[5,9], index: 9, kind: input, shape index: {}]   ;;  %s21886_s10 = inlined_call_operand.vmem [shape: f32[576,320], index: 10, kind: input, shape index: {}]   ;;  %s21887_s11 = inlined_call_operand.vmem [shape: f32[64,50], index: 11, kind: input, shape index: {}]   ;;  %s21888_s12 = inlined_call_operand.vmem [shape: f32[1,50], index: 12, kind: input, shape index: {}]   ;;  %s21889_s13 = inlined_call_operand.vmem [shape: f32[50,10], index: 13, kind: input, shape index: {}]   ;;  %s21890_s14 = inlined_call_operand.vmem [shape: f32[1,10], index: 14, kind: input, shape index: {}]   ;;  %s21891_s15 = inlined_call_operand.hbm [shape: f32[2,1,10], index: 15, kind: output, shape index: {}]  }
   0x1   :  { %22 = vsyncpa [#allocation3 + $0x1], 0  ;;  %s15796_s18 = smov 0   ;;  %s15798_s19 = smov 0  }
   0x2   :  { %s15800_s20 = smov 0   ;;  %s15802_s21 = smov 0  }
   0x3 LB: > { %21902 = sst [smem:[#allocation5_spill]] %s15696_s18  ;;  %s15817_s22 = sadd.s32 4294967295, %s15708_s21   ;;  %s15708_s21 = sphi %s15802_s21, %s21978_s21   ;;  %s15704_s20 = sphi %s15800_s20, %s21980_s20   ;;  %s15700_s19 = sphi %s15798_s19, %s21982_s19   ;;  %s15696_s18 = sphi %s15796_s18, %s21981_s18  }
   0x4   : > { %21903 = sst [smem:[#allocation6_spill]] %s15704_s20  ;;  %s12143_s23 = sadd.s32 4294967294, %s15708_s21  }
   0x5   : > { %21904 = sst [smem:[#allocation7_spill]] %s15708_s21  ;;  %s15821_s24 = sadd.s32 1, %s15708_s21  }
   0x6   : > { %21905 = sst [smem:[#allocation8_spill]] %s15821_s24  ;;  %s355_s25 = sadd.s32 1, %s15704_s20 }
   0x7   : > { %s352_s26 = ssub.s32 %s15708_s21, %s15821_s24  ;;  %p365_p0 = scmp.ne.s32.totalorder %s15704_s20, %s15700_s19 }
   0x8   : > { %p353_p1 = scmp.eq.s32.totalorder %s352_s26, 0  ;;  %p366_p2 = scmp.eq.s32.totalorder %s15817_s22, 1 }
   0x9   : > { %p371_p3 = scmp.ne.s32.totalorder %s15700_s19, %s15696_s18  ;;  %p372_p4 = scmp.eq.s32.totalorder %s12143_s23, 1 }
   0xa   : > { %s15832_s27 = scalar_select %p353_p1, %s15704_s20, %s355_s25  }
   0xb   : > { %p15834_p5 = por %p366_p2, %p365_p0  ;;  %p15838_p6 = por %p372_p4, %p371_p3 }
   0xc   : > { %21906 = sst [smem:[#allocation9_spill]] %s15832_s27  ;;  %p12146_p7 = scmp.ge.s32.totalorder %s15708_s21, 1 }
   0xd   : > { %s21908_s29 = scalar_select %p15838_p6, 1, 0 }
   0xe   : > { %p440_p8 = scmp.lt.s32.totalorder %s15708_s21, 3 }
   0xf   : > { %21909 = sst [smem:[#allocation10_spill]] %s21908_s29 }
  0x10   : > { %p441_p9 = pnand %p12146_p7, %p440_p8 }
  0x12   : > { %444 = sbr.rel (%p441_p9) target bundleno = 3807 (0xedf), region = 80 }
  0x17   : > { %v14358_v0 = vld [vmem:[%s21877_s1 + $0xb4] ss:$28 sps:$4 sm:$0xff]   ;;  %p487_p10 = scmp.lt.s32.totalorder %s15817_s22, 1  ;;  %v14360_v1 = vld [vmem:[%s21877_s1 + $0xac] ss:$28 sps:$4 sm:$0xff]   ;;  %v21898_v2 = vmov 0  }
  0x18   : > { %722 = vmatprep.mubr.bf16.mxu1 %v21898_v2  ;;  %659 = vmatprep.mubr.bf16.mxu0 %v21898_v2  ;;  %v14362_v3 = vld [vmem:[%s21877_s1 + $0xb0] ss:$28 sps:$4 sm:$0xff]   ;;  %v14363_v4 = vld [vmem:[%s21877_s1 + $0xa8] ss:$28 sps:$4 sm:$0xff]   ;;  %v14364_v5 = vld [vmem:[%s21877_s1 + $0x7c] ss:$28 sps:$4 sm:$0xff]  }
  0x19   : > { %14310 = vmatprep.subr.bf16.mxu1 %v14358_v0  ;;  %s488_s16 = scalar_select %p487_p10, %s15817_s22, 1  ;;  %639 = vmatprep.subr.bf16.mxu0 %v14360_v1  ;;  %v14366_v6 = vld [vmem:[%s21877_s1 + $0x74] ss:$28 sps:$4 sm:$0xff]   ;;  %v14370_v11 = vld [vmem:[%s21877_s1 + $0xc0] ss:$28 sps:$4 sm:$0xff]   ;;  %vm620_vm0 = vcmask 261120  }
  0x1a   : > { %14312 = vmatpush1.bf16.msra.mxu1 %v14362_v3  ;;  %640 = vmatpush1.bf16.msra.mxu0 %v14363_v4  ;;  %v14368_v7 = vld [vmem:[%s21877_s1 + $0x78] ss:$28 sps:$4 sm:$0xff]   ;;  %v14369_v8 = vld [vmem:[%s21877_s1 + $0x70] ss:$28 sps:$4 sm:$0xff]   ;;  %vm532_vm1 = vsmask.f32 7424 }
  0x1b   : > { %s13961_s25 = sshll.u32 %s488_s16, 5  ;;  %14311 = vmatprep.subr.bf16.mxu1 %v14364_v5  ;;  %641 = vmatprep.subr.bf16.mxu0 %v14366_v6  ;;  %v14371_v27 = vld [vmem:[%s21877_s1 + $0x88] ss:$28 sps:$4 sm:$0xff]   ;;  %vm1473_vm2 = vsmask.f32 6400  ;;  %vm1812_vm3 = vcmask 1045504  }
  0x1c   : > { %s491_s20 = scalar_lea.vmem %s21876_s0, %s13961_s25  ;;  %v14374_v34 = vld [vmem:[%s21877_s1 + $0x3c] ss:$28 sps:$4 sm:$0xff]   ;;  %v14377_v39 = vld [vmem:[%s21877_s1 + $0x4] ss:$28 sps:$4 sm:$0xff]   ;;  %v14386_v41 = vld [vmem:[%s21877_s1 + $0x4c] ss:$28 sps:$4 sm:$0xff]  }
  0x1d   : > { %v495_v9 = vld [vmem:[%s491_s20 + $0x10] sm:$0xff]  ;;  %v496_v10 = vld [vmem:[%s491_s20 + $0x18] sm:$0xff]  ;;  %v493_v13 = vld [vmem:[%s491_s20] sm:$0xff]  ;;  %vm1138_vm4 = vcmask 1046528   ;;  %s15711_s23 = smov 96   ;;  %vm2413_vm5 = vcmask 785408  }
  0x1e   : > { %v15878_v12 = vpack.c.bf16 %v496_v10, %v495_v9  ;;  %v494_v14 = vld [vmem:[%s491_s20 + $0x8] sm:$0xff]  ;;  %14313 = vmatpush1.bf16.msra.mxu1 %v14368_v7  ;;  %642 = vmatpush1.bf16.msra.mxu0 %v14369_v8  ;;  %v14380_v37 = vld [vmem:[%s21877_s1 + $0xbc] ss:$28 sps:$4 sm:$0xff]   ;;  %v14389_v43 = vld [vmem:[%s21877_s1 + $0x14] ss:$28 sps:$4 sm:$0xff]   ;;  %vm2503_vm6 = vcmask 1042432  }
  0x1f   : > { %v15880_v15 = vpack.c.bf16 %v494_v14, %v493_v13  ;;  %14197 = vmatprep.subr.bf16.mxu1 %v14370_v11  ;;  %692 = vmatprep.subr.bf16.mxu0 %v14358_v0  ;;  %v14372_v38 = vld [vmem:[%s21877_s1 + $0x38] ss:$28 sps:$4 sm:$0xff]   ;;  %v14375_v40 = vld [vmem:[%s21877_s1] ss:$28 sps:$4 sm:$0xff]   ;;  %v14384_v42 = vld [vmem:[%s21877_s1 + $0x48] ss:$28 sps:$4 sm:$0xff]  }
  0x20   : > { %v541_v16 = vshll.u32 %v15878_v12, 16  ;;  %v545_v17 = vshrl.u32 %v15878_v12, 16  ;;  %v15897_v33 = vrot.slane %v15878_v12, 2  ;;  %v14378_v44 = vld [vmem:[%s21877_s1 + $0xb8] ss:$28 sps:$4 sm:$0xff]   ;;  %v16004_v60 = vrot.slane %v15878_v12, 1 }
  0x21   : > { %v534_v18 = vshrl.u32 %v15880_v15, 16  ;;  %v536_v19 = vshll.u32 %v15880_v15, 16  ;;  %v1813_v30 = vrot.slane %v15880_v15, 2  ;;  %v14383_v45 = vld [vmem:[%s21877_s1 + $0x84] ss:$28 sps:$4 sm:$0xff]   ;;  %v1139_v59 = vrot.slane %v15880_v15, 1 }
  0x22   : > { %v543_v20 = vrot.slane %v541_v16, 1  ;;  %v1477_v21 = vrot.slane %v545_v17, 1  ;;  %v1478_v22 = vrot.slane %v541_v16, 2  ;;  %v14387_v46 = vld [vmem:[%s21877_s1 + $0x10] ss:$28 sps:$4 sm:$0xff]   ;;  %vm2496_vm7 = vcmask 220160  }
  0x23   : > { %v538_v23 = vrot.slane %v536_v19, 1  ;;  %v1474_v24 = vrot.slane %v534_v18, 1  ;;  %v1475_v29 = vrot.slane %v536_v19, 2  ;;  %v15908_v36 = vsel %vm1812_vm3, %v1813_v30, %v15897_v33  ;;  %v14398_v47 = vld [vmem:[%s21877_s1 + $0x124] ss:$28 sps:$4 sm:$0xff]   ;;  %s15713_s26 = smov 64  }
  0x24   : > { %v15886_v25 = vor.u32 %v545_v17, %v543_v20  ;;  %v15888_v26 = vor.u32 %v1478_v22, %v1477_v21  ;;  %v14381_v48 = vld [vmem:[%s21877_s1 + $0x80] ss:$28 sps:$4 sm:$0xff]   ;;  %v14395_v51 = vld [vmem:[%s21877_s1 + $0xc] ss:$28 sps:$4 sm:$0xff]   ;;  %v14403_v58 = vld [vmem:[%s21877_s1 + $0x18] ss:$28 sps:$4 sm:$0xff]   ;;  %v1141_v63 = vsel %vm1138_vm4, %v1139_v59, %v16004_v60 }
  0x25   : > { %v539_v28 = vor.u32 %v538_v23, %v534_v18  ;;  %v1476_v32 = vor.u32 %v1475_v29, %v1474_v24  ;;  %v14392_v49 = vld [vmem:[%s21877_s1 + $0x44] ss:$28 sps:$4 sm:$0xff]   ;;  %v14402_v53 = vld [vmem:[%s21877_s1 + $0x50] ss:$28 sps:$4 sm:$0xff]   ;;  %v14407_v61 = vld [vmem:[%s21877_s1 + $0x11c] ss:$28 sps:$4 sm:$0xff]  }
  0x26   : > { %12182 = vmatmul.mubr.msk.bf16.vlgmr.msra.gmra.mxu1 %vm620_vm0, %v15886_v25  ;;  %v14390_v50 = vld [vmem:[%s21877_s1 + $0x40] ss:$28 sps:$4 sm:$0xff]   ;;  %v14393_v52 = vld [vmem:[%s21877_s1 + $0x8] ss:$28 sps:$4 sm:$0xff]   ;;  %v14404_v57 = vld [vmem:[%s21877_s1 + $0x130] ss:$28 sps:$4 sm:$0xff]  }
  0x27   : > { %v544_v31 = vsel %vm532_vm1, %v539_v28, %v543_v20  ;;  %14198 = vmatpush3.bf16.msra.mxu1 %v14370_v11  ;;  %v15905_v35 = vsel %vm1473_vm2, %v1476_v32, %v15888_v26  ;;  %v14396_v54 = vld [vmem:[%s21877_s1 + $0x120] ss:$28 sps:$4 sm:$0xff]   ;;  %v14401_v55 = vld [vmem:[%s21877_s1 + $0xec] ss:$28 sps:$4 sm:$0xff]   ;;  %v14408_v62 = vld [vmem:[%s21877_s1 + $0xf8] ss:$28 sps:$4 sm:$0xff]  }
  0x28   : > { %12179 = vmatmul.mubr.msk.bf16.vlgmr.msra.gmra.mxu0 %vm620_vm0, %v544_v31  ;;  %14199 = vmatprep.subr.bf16.mxu1 %v14371_v27  ;;  %v14399_v56 = vld [vmem:[%s21877_s1 + $0xe8] ss:$28 sps:$4 sm:$0xff]   ;;  %v14405_v1 = vld [vmem:[%s21877_s1 + $0x118] ss:$28 sps:$4 sm:$0xff]   ;;  %v14409_v4 = vld [vmem:[%s21877_s1 + $0xe0] ss:$28 sps:$4 sm:$0xff]  }
  0x29   : > { %693 = vmatpush1.bf16.msra.mxu0 %v14362_v3  ;;  %14201 = vmatprep.mubr.msk.bf16.mxu1 %vm620_vm0, %v544_v31  ;;  %v14414_v0 = vld [vmem:[%s21877_s1 + $0x18c] ss:$28 sps:$4 sm:$0xff]   ;;  %v14411_v3 = vld [vmem:[%s21877_s1 + $0xe4] ss:$28 sps:$4 sm:$0xff]   ;;  %v14423_v9 = vld [vmem:[%s21877_s1 + $0xf4] ss:$28 sps:$4 sm:$0xff]  }
  0x2a   : > { %669 = vmatprep.mubr.bf16.mxu0 %v21898_v2  ;;  %694 = vmatprep.subr.bf16.mxu0 %v14364_v5  ;;  %v14420_v5 = vld [vmem:[%s21877_s1 + $0x12c] ss:$28 sps:$4 sm:$0xff]   ;;  %v14426_v11 = vld [vmem:[%s21877_s1 + $0x19c] ss:$28 sps:$4 sm:$0xff]   ;;  %v14432_v13 = vld [vmem:[%s21877_s1 + $0x194] ss:$28 sps:$4 sm:$0xff]  }
  0x2b   : > { %14200 = vmatpush3.bf16.msra.mxu1 %v14371_v27  ;;  %v14412_v6 = vld [vmem:[%s21877_s1 + $0x188] ss:$28 sps:$4 sm:$0xff]   ;;  %v14415_v10 = vld [vmem:[%s21877_s1 + $0x150] ss:$28 sps:$4 sm:$0xff]   ;;  %v14424_v14 = vld [vmem:[%s21877_s1 + $0x198] ss:$28 sps:$4 sm:$0xff]  }
  0x2c   : > { %923 = vmatprep.subr.bf16.mxu1 %v14374_v34  ;;  %v14418_v8 = vld [vmem:[%s21877_s1 + $0x128] ss:$28 sps:$4 sm:$0xff]   ;;  %v14427_v16 = vld [vmem:[%s21877_s1 + $0x160] ss:$28 sps:$4 sm:$0xff]   ;;  %v14430_v18 = vld [vmem:[%s21877_s1 + $0x190] ss:$28 sps:$4 sm:$0xff]  }
  0x2d   : > { %695 = vmatpush1.bf16.msra.mxu0 %v14368_v7  ;;  %v14417_v7 = vld [vmem:[%s21877_s1 + $0x154] ss:$28 sps:$4 sm:$0xff]   ;;  %v14438_v17 = vld [vmem:[%s21877_s1 + $0x204] ss:$28 sps:$4 sm:$0xff]   ;;  %v14435_v19 = vld [vmem:[%s21877_s1 + $0x15c] ss:$28 sps:$4 sm:$0xff]  }
  0x2e   : > { %14202 = vmatmul.mubr.msk.bf16.vlgmr.msra.gmra.mxu1 %vm620_vm0, %v15886_v25  ;;  %745 = vmatprep.subr.bf16.mxu0 %v14380_v37  ;;  %v14433_v20 = vld [vmem:[%s21877_s1 + $0x158] ss:$28 sps:$4 sm:$0xff]   ;;  %v14442_v21 = vld [vmem:[%s21877_s1 + $0x1a0] ss:$28 sps:$4 sm:$0xff]   ;;  %v14441_v23 = vld [vmem:[%s21877_s1 + $0x1cc] ss:$28 sps:$4 sm:$0xff]  }
  0x2f   : > { %924 = vmatpush1.bf16.msra.mxu1 %v14372_v38  ;;  %943 = vmatprep.mubr.bf16.mxu1 %v21898_v2  ;;  %v14436_v22 = vld [vmem:[%s21877_s1 + $0x200] ss:$28 sps:$4 sm:$0xff]   ;;  %v14439_v24 = vld [vmem:[%s21877_s1 + $0x1c8] ss:$28 sps:$4 sm:$0xff]   ;;  %v14448_v29 = vld [vmem:[%s21877_s1 + $0x1d8] ss:$28 sps:$4 sm:$0xff]  }
  0x30   : > { %12180 = vmatmul.mubr.msk.bf16.gmra.mxu0 %vm620_vm0, %v15886_v25  ;;  %925 = vmatprep.subr.bf16.mxu1 %v14377_v39  ;;  %v14443_v27 = vld [vmem:[%s21877_s1 + $0x168] ss:$28 sps:$4 sm:$0xff]   ;;  %v14447_v28 = vld [vmem:[%s21877_s1 + $0x1fc] ss:$28 sps:$4 sm:$0xff]   ;;  %v14457_v37 = vld [vmem:[%s21877_s1 + $0x1d4] ss:$28 sps:$4 sm:$0xff]  }
  0x31   : > { %712 = vmatprep.mubr.bf16.mxu0 %v21898_v2  ;;  %v14445_v30 = vld [vmem:[%s21877_s1 + $0x1f8] ss:$28 sps:$4 sm:$0xff]   ;;  %v14449_v32 = vld [vmem:[%s21877_s1 + $0x1c0] ss:$28 sps:$4 sm:$0xff]   ;;  %v14454_v34 = vld [vmem:[%s21877_s1 + $0x20c] ss:$28 sps:$4 sm:$0xff]  }
  0x32   : > { %vm9961_vm1 = vcmask 1040384   ;;  %vm9957_vm2 = vcmask 72704   ;;  %vm15714_vm3 = vmmov 0   ;;  %s485_s17 = sand.u32 1, %s15700_s19   ;;  %s13958_s18 = sshll.u32 %s15817_s22, 4 }
  0x33   : > { %926 = vmatpush1.bf16.msra.mxu1 %v14375_v40  ;;  %s486_s21 = scalar_lea.vmem [#allocation2], %s485_s17  ;;  %s12086_s25 = scalar_lea.hbm %s21891_s15, %s13958_s18 }
  0x34   : > { %1029 = vmatprep.subr.bf16.mxu1 %v14386_v41  ;;  %s12088_s29 = sshll.u32 %s486_s21, 4  ;;  %s12076_s27 = scalar_lea.sflag [#allocation3], %s485_s17  ;;  %s12089_s29 = int_to_ptr.vmem [resolvable:$true] %s12088_s29 }
  0x35   : > { %s15648_s30 = scalar_lea.vmem %s12089_s29, 16  ;;  %s15715_s20 = smov [#allocation2]  }
  0x36   : > { %12201 = vmatmul.mubr.msk.bf16.vlgmr.msra.gmra.mxu1 %vm620_vm0, %v15880_v15  ;;  %p15649_p11 = scmp.ne.s32.totalorder %s12089_s29, %s15648_s30 }
  0x37   : > { %953 = vmatprep.mubr.bf16.mxu1 %v21898_v2  ;;  %1030 = vmatpush1.bf16.msra.mxu1 %v14384_v42 }
  0x38   : > { %12181 = vmatmul.mubr.msk.bf16.vlgmr.msra.gmra.mxu0 %vm620_vm0, %v544_v31  ;;  %1031 = vmatprep.subr.bf16.mxu1 %v14389_v43  ;;  %p15650_p12 = pnand %p15649_p11, %p15834_p5 }
  0x39   : > { %746 = vmatpush1.bf16.msra.mxu0 %v14378_v44  ;;  %765 = vmatprep.mubr.bf16.mxu0 %v21898_v2 }
  0x3a   : > { %747 = vmatprep.subr.bf16.mxu0 %v14383_v45  ;;  %p15651_p13 = pneg %p15650_p12 }
  0x3b   : > { %1032 = vmatpush1.bf16.msra.mxu1 %v14387_v46 }
  0x3c   : > { %1285 = vmatprep.subr.bf16.mxu1 %v14398_v47 }
  0x3d   : > { %748 = vmatpush1.bf16.msra.mxu0 %v14381_v48 }
  0x3e   : > { %12202 = vmatmul.mubr.msk.bf16.gmra.mxu1 %vm620_vm0, %v15878_v12  ;;  %976 = vmatprep.subr.bf16.mxu0 %v14392_v49 }
  0x3f   : > { %1049 = vmatprep.mubr.bf16.mxu1 %v21898_v2 }
  0x40   : > { %12183 = vmatmul.mubr.msk.bf16.vlgmr.msra.gmra.mxu0 %vm620_vm0, %v544_v31  ;;  %v14451_v31 = vld [vmem:[%s21877_s1 + $0x1c4] ss:$28 sps:$4 sm:$0xff]  }
  0x41   : > { %977 = vmatpush1.bf16.msra.mxu0 %v14390_v50  ;;  %775 = vmatprep.mubr.bf16.mxu0 %v21898_v2 }
  0x42   : > { %978 = vmatprep.subr.bf16.mxu0 %v14395_v51 }
  0x45   : > { %979 = vmatpush1.bf16.msra.mxu0 %v14393_v52 }
  0x46   : > { %12205 = vmatmul.mubr.msk.bf16.vlgmr.msra.gmra.mxu1 %vm620_vm0, %v15880_v15  ;;  %14205 = vmatprep.subr.bf16.mxu0 %v14402_v53 }
  0x47   : > { %1059 = vmatprep.mubr.bf16.mxu1 %v21898_v2  ;;  %1286 = vmatpush1.bf16.msra.mxu1 %v14396_v54 }
  0x48   : > { %12184 = vmatmul.mubr.msk.bf16.gmra.mxu0 %vm620_vm0, %v15886_v25  ;;  %1287 = vmatprep.subr.bf16.mxu1 %v14401_v55  ;;  %v14444_v25 = vld [vmem:[%s21877_s1 + $0x210] ss:$28 sps:$4 sm:$0xff]  }
  0x49   : > { %996 = vmatprep.mubr.bf16.mxu0 %v21898_v2 }
  0x4b   : > { %1288 = vmatpush1.bf16.msra.mxu1 %v14399_v56 }
  0x4c   : > { %14213 = vmatprep.subr.bf16.mxu1 %v14404_v57 }
  0x4e   : > { %12206 = vmatmul.mubr.msk.bf16.gmra.mxu1 %vm620_vm0, %v15878_v12 }
  0x4f   : > { %1305 = vmatprep.mubr.bf16.mxu1 %v21898_v2 }
  0x50   : > { %12203 = vmatmul.mubr.msk.bf16.vlgmr.msra.gmra.mxu0 %vm620_vm0, %v15880_v15 }
  0x51   : > { %14206 = vmatpush3.bf16.msra.mxu0 %v14402_v53  ;;  %1006 = vmatprep.mubr.bf16.mxu0 %v21898_v2 }
  0x52   : > { %14207 = vmatprep.subr.bf16.mxu0 %v14403_v58 }
  0x55   : > { %14208 = vmatpush3.bf16.msra.mxu0 %v14403_v58 }
  0x56   : > { %12241 = vmatmul.mubr.msk.bf16.vlgmr.msra.gmra.mxu1 %vm620_vm0, %v1141_v63  ;;  %1232 = vmatprep.subr.bf16.mxu0 %v14407_v61 }
  0x57   : > { %1315 = vmatprep.mubr.bf16.mxu1 %v21898_v2  ;;  %14214 = vmatpush3.bf16.msra.mxu1 %v14404_v57 }
  0x58   : > { %12204 = vmatmul.mubr.msk.bf16.gmra.mxu0 %vm620_vm0, %v15878_v12  ;;  %14215 = vmatprep.subr.bf16.mxu1 %v14408_v62 }
  0x59   : > { %14209 = vmatprep.mubr.msk.bf16.mxu0 %vm620_vm0, %v15880_v15  ;;  %v14429_v15 = vld [vmem:[%s21877_s1 + $0x164] ss:$28 sps:$4 sm:$0xff]  }
  0x5b   : > { %14216 = vmatpush3.bf16.msra.mxu1 %v14408_v62 }
  0x5c   : > { %1571 = vmatprep.subr.bf16.mxu1 %v14414_v0 }
  0x5e   : > { %12242 = vmatmul.mubr.msk.bf16.gmra.mxu1 %vm620_vm0, %v16004_v60 }
  0x5f   : > { %14217 = vmatprep.mubr.msk.bf16.mxu1 %vm620_vm0, %v1141_v63 }
  0x60   : > { %14210 = vmatmul.mubr.msk.bf16.vlgmr.msra.gmra.mxu0 %vm620_vm0, %v15878_v12  ;;  %v14421_v12 = vld [vmem:[%s21877_s1 + $0xf0] ss:$28 sps:$4 sm:$0xff]  }
  0x61   : > { %1233 = vmatpush1.bf16.msra.mxu0 %v14405_v1  ;;  %1252 = vmatprep.mubr.bf16.mxu0 %v21898_v2 }
  0x62   : > { %1234 = vmatprep.subr.bf16.mxu0 %v14411_v3 }
  0x65   : > { %1235 = vmatpush1.bf16.msra.mxu0 %v14409_v4 }
  0x66   : > { %14218 = vmatmul.mubr.msk.bf16.vlgmr.msra.gmra.mxu1 %vm620_vm0, %v16004_v60  ;;  %1338 = vmatprep.subr.bf16.mxu0 %v14420_v5 }
  0x67   : > { %1572 = vmatpush1.bf16.msra.mxu1 %v14412_v6  ;;  %1591 = vmatprep.mubr.bf16.mxu1 %v21898_v2 }
  0x68   : > { %12239 = vmatmul.mubr.msk.bf16.vlgmr.msra.gmra.mxu0 %vm620_vm0, %v1141_v63  ;;  %1573 = vmatprep.subr.bf16.mxu1 %v14417_v7 }
  0x69   : > { %1339 = vmatpush1.bf16.msra.mxu0 %v14418_v8  ;;  %1262 = vmatprep.mubr.bf16.mxu0 %v21898_v2 }
  0x6a   : > { %1340 = vmatprep.subr.bf16.mxu0 %v14423_v9 }
  0x6b   : > { %1574 = vmatpush1.bf16.msra.mxu1 %v14415_v10 }
  0x6c   : > { %1677 = vmatprep.subr.bf16.mxu1 %v14426_v11 }
  0x6d   : > { %1341 = vmatpush1.bf16.msra.mxu0 %v14421_v12 }
  0x6e   : > { %12277 = vmatmul.mubr.msk.bf16.vlgmr.msra.gmra.mxu1 %vm620_vm0, %v15905_v35  ;;  %1624 = vmatprep.subr.bf16.mxu0 %v14432_v13 }
  0x6f   : > { %1601 = vmatprep.mubr.bf16.mxu1 %v21898_v2  ;;  %1678 = vmatpush1.bf16.msra.mxu1 %v14424_v14 }
  0x70   : > { %12240 = vmatmul.mubr.msk.bf16.gmra.mxu0 %vm620_vm0, %v16004_v60  ;;  %1679 = vmatprep.subr.bf16.mxu1 %v14429_v15 }
  0x71   : > { %1358 = vmatprep.mubr.bf16.mxu0 %v21898_v2 }
  0x73   : > { %1680 = vmatpush1.bf16.msra.mxu1 %v14427_v16 }
  0x74   : > { %1959 = vmatprep.subr.bf16.mxu1 %v14438_v17 }
  0x76   : > { %12278 = vmatmul.mubr.msk.bf16.gmra.mxu1 %vm620_vm0, %v15888_v26 }
  0x77   : > { %1697 = vmatprep.mubr.bf16.mxu1 %v21898_v2 }
  0x78   : > { %12243 = vmatmul.mubr.msk.bf16.vlgmr.msra.gmra.mxu0 %vm620_vm0, %v1141_v63 }
  0x79   : > { %1625 = vmatpush1.bf16.msra.mxu0 %v14430_v18  ;;  %1368 = vmatprep.mubr.bf16.mxu0 %v21898_v2 }
  0x7a   : > { %1626 = vmatprep.subr.bf16.mxu0 %v14435_v19 }
  0x7d   : > { %1627 = vmatpush1.bf16.msra.mxu0 %v14433_v20 }
  0x7e   : > { %12281 = vmatmul.mubr.msk.bf16.vlgmr.msra.gmra.mxu1 %vm620_vm0, %v15905_v35  ;;  %14221 = vmatprep.subr.bf16.mxu0 %v14442_v21 }
  0x7f   : > { %1707 = vmatprep.mubr.bf16.mxu1 %v21898_v2  ;;  %1960 = vmatpush1.bf16.msra.mxu1 %v14436_v22 }
  0x80   : > { %12244 = vmatmul.mubr.msk.bf16.gmra.mxu0 %vm620_vm0, %v16004_v60  ;;  %1961 = vmatprep.subr.bf16.mxu1 %v14441_v23 }
  0x81   : > { %1644 = vmatprep.mubr.bf16.mxu0 %v21898_v2 }
  0x83   : > { %1962 = vmatpush1.bf16.msra.mxu1 %v14439_v24 }
  0x84   : > { %14229 = vmatprep.subr.bf16.mxu1 %v14444_v25 }
  0x86   : > { %12282 = vmatmul.mubr.msk.bf16.gmra.mxu1 %vm620_vm0, %v15888_v26 }
  0x87   : > { %1979 = vmatprep.mubr.bf16.mxu1 %v21898_v2 }
  0x88   : > { %12279 = vmatmul.mubr.msk.bf16.vlgmr.msra.gmra.mxu0 %vm620_vm0, %v15905_v35 }
  0x89   : > { %14222 = vmatpush3.bf16.msra.mxu0 %v14442_v21  ;;  %1654 = vmatprep.mubr.bf16.mxu0 %v21898_v2 }
  0x8a   : > { %14223 = vmatprep.subr.bf16.mxu0 %v14443_v27 }
  0x8d   : > { %14224 = vmatpush3.bf16.msra.mxu0 %v14443_v27 }
  0x8e   : > { %12317 = vmatmul.mubr.msk.bf16.vlgmr.msra.gmra.mxu1 %vm620_vm0, %v15908_v36  ;;  %1906 = vmatprep.subr.bf16.mxu0 %v14447_v28 }
  0x8f   : > { %1989 = vmatprep.mubr.bf16.mxu1 %v21898_v2  ;;  %14230 = vmatpush3.bf16.msra.mxu1 %v14444_v25 }
  0x90   : > { %12280 = vmatmul.mubr.msk.bf16.gmra.mxu0 %vm620_vm0, %v15888_v26  ;;  %14231 = vmatprep.subr.bf16.mxu1 %v14448_v29 }
  0x91   : > { %14225 = vmatprep.mubr.msk.bf16.mxu0 %vm620_vm0, %v15905_v35  ;;  %v14452_v35 = vld [vmem:[%s21877_s1 + $0x208] ss:$28 sps:$4 sm:$0xff]  }
  0x93   : > { %14232 = vmatpush3.bf16.msra.mxu1 %v14448_v29 }
  0x96   : > { %12318 = vmatmul.mubr.msk.bf16.gmra.mxu1 %vm620_vm0, %v15897_v33 }
  0x97   : > { %14233 = vmatprep.mubr.msk.bf16.mxu1 %vm620_vm0, %v15908_v36 }
  0x98   : > { %14226 = vmatmul.mubr.msk.bf16.vlgmr.msra.gmra.mxu0 %vm620_vm0, %v15888_v26  ;;  %v14455_v26 = vld [vmem:[%s21877_s1 + $0x1d0] ss:$28 sps:$4 sm:$0xff]  }
  0x99   : > { %1907 = vmatpush1.bf16.msra.mxu0 %v14445_v30  ;;  %1926 = vmatprep.mubr.bf16.mxu0 %v21898_v2 }
  0x9a   : > { %1908 = vmatprep.subr.bf16.mxu0 %v14451_v31 }
  0x9d   : > { %1909 = vmatpush1.bf16.msra.mxu0 %v14449_v32 }
  0x9e   : > { %14234 = vmatmul.mubr.msk.bf16.vlgmr.msra.gmra.mxu1 %vm620_vm0, %v15897_v33  ;;  %2012 = vmatprep.subr.bf16.mxu0 %v14454_v34 }
  0xa0   : > { %12315 = vmatmul.mubr.msk.bf16.vlgmr.msra.gmra.mxu0 %vm620_vm0, %v15908_v36 }
  0xa1   : > { %2013 = vmatpush1.bf16.msra.mxu0 %v14452_v35  ;;  %1936 = vmatprep.mubr.bf16.mxu0 %v21898_v2 }
  0xa2   : > { %2014 = vmatprep.subr.bf16.mxu0 %v14457_v37 }
  0xa5   : > { %2015 = vmatpush1.bf16.msra.mxu0 %v14455_v26 }
  0xa8   : > { %12316 = vmatmul.mubr.msk.bf16.gmra.mxu0 %vm620_vm0, %v15897_v33 }
  0xa9   : > { %2032 = vmatprep.mubr.bf16.mxu0 %v21898_v2 }
  0xb0   : > { %12319 = vmatmul.mubr.msk.bf16.vlgmr.msra.gmra.mxu0 %vm620_vm0, %v15908_v36 }
  0xb1   : > { %2042 = vmatprep.mubr.bf16.mxu0 %v21898_v2 }
  0xb8   : > { %12320 = vmatmul.mubr.msk.bf16.gmra.mxu0 %vm620_vm0, %v15897_v33  ;;  %vm5049_vm0 = vcmask 523264  }
  0xe6   : > { %v16189_v38 = vpop.f32.mrf.mxu1 }
  0xe8   : > { %v661_v39 = vpop.f32.mrf.mxu0  ;;  %v16191_v40 = vpop.f32.mrf.mxu1 }
  0xea   : > { %v16193_v41 = vpop.f32.mrf.mxu0  ;;  %v16195_v42 = vpop.f32.mrf.mxu1 }
  0xec   : > { %v665_v43 = vpop.f32.mrf.mxu0  ;;  %v16197_v44 = vpop.f32.mrf.mxu1 }
  0xee   : > { %v16199_v45 = vpop.f32.mrf.mxu0  ;;  %v14203_v36 = vpop.f32.mrf.mxu1 }
  0xf0   : > { %v671_v46 = vpop.f32.mrf.mxu0  ;;  %v16201_v47 = vpop.f32.mrf.mxu1 }
  0xf2   : > { %v16203_v48 = vpop.f32.mrf.mxu0  ;;  %v16205_v33 = vpop.f32.mrf.mxu1 }
  0xf4   : > { %v675_v49 = vpop.f32.mrf.mxu0  ;;  %v16207_v50 = vpop.f32.mrf.mxu1 }
  0xf6   : > { %v16209_v51 = vpop.f32.mrf.mxu0  ;;  %v945_v52 = vpop.f32.mrf.mxu1 }
  0xf7   : > { %v16211_v53 = vadd.f32 %v945_v52, %v661_v39 }
  0xf8   : > { %v714_v54 = vpop.f32.mrf.mxu0  ;;  %v16213_v55 = vpop.f32.mrf.mxu1 }
  0xfa   : > { %v16215_v56 = vpop.f32.mrf.mxu0  ;;  %v949_v57 = vpop.f32.mrf.mxu1 }
  0xfb   : > { %v16217_v58 = vadd.f32 %v949_v57, %v665_v43 }
  0xfc   : > { %v718_v59 = vpop.f32.mrf.mxu0  ;;  %v16219_v60 = vpop.f32.mrf.mxu1 }
  0xfe   : > { %v16221_v61 = vpop.f32.mrf.mxu0  ;;  %v955_v62 = vpop.f32.mrf.mxu1 }
  0xff   : > { %v16223_v63 = vadd.f32 %v955_v62, %v671_v46 }
 0x100   : > { %v767_v0 = vpop.f32.mrf.mxu0  ;;  %v16225_v1 = vpop.f32.mrf.mxu1 }
 0x102   : > { %v16227_v3 = vpop.f32.mrf.mxu0  ;;  %v959_v4 = vpop.f32.mrf.mxu1 }
 0x103   : > { %v16229_v5 = vadd.f32 %v959_v4, %v675_v49 }
 0x104   : > { %v771_v6 = vpop.f32.mrf.mxu0  ;;  %v16231_v7 = vpop.f32.mrf.mxu1 }
 0x106   : > { %v16233_v8 = vpop.f32.mrf.mxu0  ;;  %v1051_v9 = vpop.f32.mrf.mxu1 }
 0x107   : > { %v16235_v10 = vadd.f32 %v1051_v9, %v767_v0 }
 0x108   : > { %v777_v11 = vpop.f32.mrf.mxu0  ;;  %v16237_v12 = vpop.f32.mrf.mxu1 }
 0x109   : > { %21910 = vst [vmem:[#allocation11_spill] sm:$0xff] %v16235_v10 }
 0x10a   : > { %v16239_v13 = vpop.f32.mrf.mxu0  ;;  %v1055_v14 = vpop.f32.mrf.mxu1 }
 0x10b   : > { %v16241_v15 = vadd.f32 %v1055_v14, %v771_v6 }
 0x10c   : > { %v781_v16 = vpop.f32.mrf.mxu0  ;;  %v16243_v17 = vpop.f32.mrf.mxu1 }
 0x10d   : > { %21911 = vst [vmem:[#allocation12_spill] sm:$0xff] %v16241_v15 }
 0x10e   : > { %v16245_v18 = vpop.f32.mrf.mxu0  ;;  %v1061_v19 = vpop.f32.mrf.mxu1 }
 0x10f   : > { %21912 = vst [vmem:[#allocation13_spill] sm:$0xff] %v16245_v18  ;;  %v16247_v20 = vadd.f32 %v1061_v19, %v777_v11 }
 0x110   : > { %v998_v21 = vpop.f32.mrf.mxu0  ;;  %v16249_v22 = vpop.f32.mrf.mxu1 }
 0x111   : > { %21913 = vst [vmem:[#allocation14_spill] sm:$0xff] %v16247_v20  ;;  %v999_v23 = vadd.f32 %v998_v21, %v714_v54 }
 0x112   : > { %v16251_v24 = vpop.f32.mrf.mxu0  ;;  %v1065_v25 = vpop.f32.mrf.mxu1 }
 0x113   : > { %v16253_v27 = vadd.f32 %v1065_v25, %v781_v16 }
 0x114   : > { %v1002_v28 = vpop.f32.mrf.mxu0  ;;  %v16255_v29 = vpop.f32.mrf.mxu1 }
 0x115   : > { %21914 = vst [vmem:[#allocation15_spill] sm:$0xff] %v16253_v27  ;;  %21915 = vst [vmem:[#allocation16_spill] sm:$0xff] %v16255_v29  ;;  %v16257_v30 = vadd.f32 %v1002_v28, %v718_v59 }
 0x116   : > { %v16259_v31 = vpop.f32.mrf.mxu0  ;;  %v1307_v32 = vpop.f32.mrf.mxu1 }
 0x117   : > { %v16261_v34 = vadd.f32 %v1307_v32, %v999_v23 }
 0x118   : > { %v16263_v35 = vpop.f32.mrf.mxu0  ;;  %v16265_v37 = vpop.f32.mrf.mxu1 }
 0x11a   : > { %v16267_v26 = vpop.f32.mrf.mxu0  ;;  %v16269_v39 = vpop.f32.mrf.mxu1 }
 0x11c   : > { %v16271_v43 = vpop.f32.mrf.mxu0  ;;  %v16273_v46 = vpop.f32.mrf.mxu1 }
 0x11e   : > { %v16275_v49 = vpop.f32.mrf.mxu0  ;;  %v16277_v52 = vpop.f32.mrf.mxu1 }
 0x120   : > { %v14211_v54 = vpop.f32.mrf.mxu0  ;;  %v16279_v57 = vpop.f32.mrf.mxu1 }
 0x121   : > { %v1113_v59 = vadd.f32 %v14211_v54, %v14203_v36 }
 0x122   : > { %v1104_v62 = vpop.f32.mrf.mxu0  ;;  %v16281_v0 = vpop.f32.mrf.mxu1 }
 0x123   : > { %v1105_v16 = vadd.f32 %v1104_v62, %v16201_v47 }
 0x124   : > { %v14212_v4 = vpop.f32.mrf.mxu0  ;;  %v16283_v6 = vpop.f32.mrf.mxu1 }
 0x125   : > { %v1116_v9 = vadd.f32 %v14212_v4, %v16205_v33 }
 0x126   : > { %v16286_v11 = vpop.f32.mrf.mxu0  ;;  %v14219_v14 = vpop.f32.mrf.mxu1 }
 0x127   : > { %v16289_v19 = vadd.f32 %v14219_v14, %v1113_v59 }
 0x128   : > { %v1254_v21 = vpop.f32.mrf.mxu0  ;;  %v1413_v23 = vpop.f32.mrf.mxu1 }
 0x129   : > { %v1428_v25 = vadd.f32 %v1254_v21, %v16211_v53  ;;  %v16292_v36 = vadd.f32 %v1413_v23, %v1105_v16 }
 0x12a   : > { %v16294_v28 = vpop.f32.mrf.mxu0  ;;  %v14220_v32 = vpop.f32.mrf.mxu1 }
 0x12b   : > { %v16296_v54 = vadd.f32 %v14220_v32, %v1116_v9 }
 0x12c   : > { %v1258_v2 = vpop.f32.mrf.mxu0  ;;  %v16298_v33 = vpop.f32.mrf.mxu1 }
 0x12d   : > { %21916 = vst [vmem:[#allocation17_spill] sm:$0xff] %v16296_v54  ;;  %v1435_v4 = vadd.f32 %v1258_v2, %v16217_v58 }
 0x12e   : > { %v16301_v27 = vpop.f32.mrf.mxu0  ;;  %v1593_v47 = vpop.f32.mrf.mxu1 }
 0x12f   : > { %v16303_v59 = vadd.f32 %v1593_v47, %v1428_v25 }
 0x130   : > { %v16305_v62 = vpop.f32.mrf.mxu0  ;;  %v16307_v53 = vpop.f32.mrf.mxu1 }
 0x131   : > { %21917 = vst [vmem:[#allocation18_spill] sm:$0xff] %v16303_v59 }
 0x132   : > { %v16309_v14 = vpop.f32.mrf.mxu0  ;;  %v1597_v16 = vpop.f32.mrf.mxu1 }
 0x133   : > { %v16311_v21 = vadd.f32 %v1597_v16, %v1435_v4  ;;  %v1058_v16 = vadd.f32 %v16243_v17, %v16233_v8  ;;  %v1064_v8 = vadd.f32 %v16249_v22, %v16239_v13 }
 0x134   : > { %v16313_v9 = vpop.f32.mrf.mxu0  ;;  %v16315_v23 = vpop.f32.mrf.mxu1 }
 0x135   : > { %21918 = vst [vmem:[#allocation19_spill] sm:$0xff] %v16311_v21 }
 0x136   : > { %v16317_v32 = vpop.f32.mrf.mxu0  ;;  %v16319_v2 = vpop.f32.mrf.mxu1 }
 0x138   : > { %v16321_v58 = vpop.f32.mrf.mxu0  ;;  %v16323_v25 = vpop.f32.mrf.mxu1 }
 0x139   : > { %21919 = vst [vmem:[#allocation20_spill] sm:$0xff] %v16321_v58  ;;  %21920 = vst [vmem:[#allocation21_spill] sm:$0xff] %v16323_v25  ;;  %v2132_v25 = vlaneseq }
 0x13a   : > { %v16325_v47 = vpop.f32.mrf.mxu0  ;;  %v16327_v29 = vpop.f32.mrf.mxu1 }
 0x13b   : > { %21921 = vst [vmem:[#allocation22_spill] sm:$0xff] %v16325_v47  ;;  %21922 = vst [vmem:[#allocation23_spill] sm:$0xff] %v16327_v29 }
 0x13c   : > { %v16329_v18 = vpop.f32.mrf.mxu0  ;;  %v16331_v4 = vpop.f32.mrf.mxu1 }
 0x13d   : > { %21923 = vst [vmem:[#allocation24_spill] sm:$0xff] %v16329_v18  ;;  %21924 = vst [vmem:[#allocation25_spill] sm:$0xff] %v16331_v4  ;;  %v16349_v4 = vshrl.u32 %v2132_v25, 7  ;;  %v16364_v25 = vld [vmem:[%s21878_s2] sm:$0xff] }
 0x13e   : > { %v1366_v20 = vpop.f32.mrf.mxu0  ;;  %v16335_v15 = vpop.f32.mrf.mxu1 }
 0x13f   : > { %21925 = vst [vmem:[#allocation26_spill] sm:$0xff] %v16335_v15  ;;  %v16337_v21 = vadd.f32 %v1366_v20, %v1058_v16  ;;  %v2158_v22 = vsub.s32 6, %v16349_v4 }
 0x140   : > { %v16339_v54 = vpop.f32.mrf.mxu0  ;;  %v16341_v59 = vpop.f32.mrf.mxu1 }
 0x141   : > { %21926 = vst [vmem:[#allocation27_spill] sm:$0xff] %v16337_v21  ;;  %21927 = vst [vmem:[#allocation28_spill] sm:$0xff] %v16339_v54 }
 0x142   : > { %21928 = vst [vmem:[#allocation29_spill] sm:$0xff] %v16341_v59  ;;  %v1372_v47 = vpop.f32.mrf.mxu0  ;;  %v16343_v58 = vpop.f32.mrf.mxu1 }
 0x143   : > { %21929 = vst [vmem:[#allocation30_spill] sm:$0xff] %v16343_v58  ;;  %v1447_v16 = vadd.f32 %v1372_v47, %v1064_v8  ;;  %v16370_v47 = vsub.s32 0, %v16349_v4  ;;  %v1001_v8 = vadd.f32 %v16251_v24, %v16215_v56  ;;  %v1005_v56 = vadd.f32 %v16259_v31, %v16221_v61 }
 0x144   : > { %v16345_v29 = vpop.f32.mrf.mxu0  ;;  %v16347_v18 = vpop.f32.mrf.mxu1  ;;  %v1437_v24 = vadd.f32 %v16269_v39, %v16257_v30  ;;  %v21940_v61 = vsub.s32 1, %v16349_v4  ;;  %v1009_v31 = vadd.f32 %v16263_v35, %v16189_v38  ;;  %v1011_v35 = vadd.f32 %v16267_v26, %v16191_v40 }
 0x145   : > { %21930 = vst [vmem:[#allocation31_spill] sm:$0xff] %v16345_v29  ;;  %21931 = vst [vmem:[#allocation32_spill] sm:$0xff] %v16347_v18  ;;  %v21938_v18 = vsub.s32 2, %v16349_v4  ;;  %v1438_v39 = vadd.f32 %v16273_v46, %v1005_v56 }
 0x146   : > { %v16353_v17 = vpop.f32.mrf.mxu0  ;;  %v16355_v20 = vpop.f32.mrf.mxu1  ;;  %21936 = vst [vmem:[#allocation37_spill] sm:$0xff] %v16370_v47  ;;  %v16404_v30 = vrot.slane %v16364_v25, %v21940_v61  ;;  %v1444_v46 = vadd.f32 %v16277_v52, %v1009_v31  ;;  %v1445_v40 = vadd.f32 %v16279_v57, %v1011_v35 }
 0x147   : > { %21932 = vst [vmem:[#allocation33_spill] sm:$0xff] %v16353_v17  ;;  %21933 = vst [vmem:[#allocation34_spill] sm:$0xff] %v16355_v20  ;;  %v16383_v10 = vrot.slane %v16364_v25, %v21938_v18  ;;  %v16399_v18 = vrot.slane %v16364_v25, %v16370_v47 }
 0x148   : > { %v1646_v21 = vpop.f32.mrf.mxu0  ;;  %v1711_v54 = vpop.f32.mrf.mxu1 }
 0x149   : > { %v16359_v15 = vadd.f32 %v1711_v54, %v1447_v16  ;;  %v1769_v17 = vadd.f32 %v1646_v21, %v16261_v34  ;;  %v21939_v54 = vsub.s32 3, %v16349_v4  ;;  %v16395_v34 = vrot.slane %v16364_v25, %v2158_v22 }
 0x14a   : > { %v1648_v29 = vpop.f32.mrf.mxu0  ;;  %v16366_v13 = vpop.f32.mrf.mxu1 }
 0x14b   : > { %21934 = vst [vmem:[#allocation35_spill] sm:$0xff] %v16359_v15  ;;  %21935 = vst [vmem:[#allocation36_spill] sm:$0xff] %v16366_v13  ;;  %v1431_v15 = vadd.f32 %v16265_v37, %v1001_v8  ;;  %v16392_v16 = vrot.slane %v16364_v25, %v21939_v54  ;;  %v958_v54 = vadd.f32 %v16225_v1, %v16203_v48 }
 0x14c   : > { %v1650_v59 = vpop.f32.mrf.mxu0  ;;  %v16374_v58 = vpop.f32.mrf.mxu1 }
 0x14d   : > { %21937 = vst [vmem:[#allocation38_spill] sm:$0xff] %v16374_v58  ;;  %v1770_v37 = vadd.f32 %v1648_v29, %v1431_v15  ;;  %v1776_v22 = vadd.f32 %v1650_v59, %v1437_v24  ;;  %v21941_v15 = vsub.s32 4, %v16349_v4  ;;  %v962_v24 = vadd.f32 %v16231_v7, %v16209_v51 }
 0x14e   : > { %v1652_v13 = vpop.f32.mrf.mxu0  ;;  %v1981_v20 = vpop.f32.mrf.mxu1  ;;  %v1015_v51 = vadd.f32 %v16275_v49, %v16197_v44 }
 0x14f   : > { %v2104_v21 = vadd.f32 %v1981_v20, %v1769_v17  ;;  %v16412_v29 = vrot.slane %v16364_v25, %v21941_v15  ;;  %v948_v17 = vadd.f32 %v16213_v55, %v16193_v41  ;;  %v952_v20 = vadd.f32 %v16219_v60, %v16199_v45 }
 0x150   : > { %v1656_v8 = vpop.f32.mrf.mxu0  ;;  %v1983_v58 = vpop.f32.mrf.mxu1  ;;  %v1777_v59 = vadd.f32 %v1652_v13, %v1438_v39  ;;  %v16427_v41 = vadd.f32 %v16237_v12, %v16227_v3  ;;  %v1013_v45 = vadd.f32 %v16271_v43, %v16195_v42  ;;  %v1108_v3 = vadd.f32 %v16286_v11, %v16207_v50 }
 0x151   : > { %v2105_v61 = vadd.f32 %v1983_v58, %v1770_v37  ;;  %v2169_v48 = vadd.f32 %v16383_v10, %v2104_v21  ;;  %v1783_v1 = vadd.f32 %v1656_v8, %v1444_v46  ;;  %v1452_v21 = vadd.f32 %v16283_v6, %v1015_v51 }
 0x152   : > { %v1658_v47 = vpop.f32.mrf.mxu0  ;;  %v1985_v38 = vpop.f32.mrf.mxu1  ;;  %v1451_v7 = vadd.f32 %v16281_v0, %v1013_v45  ;;  %v1429_v8 = vadd.f32 %v16294_v28, %v948_v17  ;;  %v1441_v44 = vadd.f32 %v16298_v33, %v1108_v3  ;;  %v1442_v15 = vadd.f32 %v16305_v62, %v16223_v63 }
 0x153   : > { %v2111_v56 = vadd.f32 %v1985_v38, %v1776_v22  ;;  %v2170_v42 = vadd.f32 %v16392_v16, %v2105_v61  ;;  %v1784_v58 = vadd.f32 %v1658_v47, %v1445_v40  ;;  %v2230_v49 = vrot.slane %v2169_v48, 1 }
 0x154   : > { %v1660_v55 = vpop.f32.mrf.mxu0  ;;  %v1987_v60 = vpop.f32.mrf.mxu1  ;;  %v1436_v47 = vadd.f32 %v16301_v27, %v952_v20 }
 0x155   : > { %v2176_v26 = vadd.f32 %v16383_v10, %v2111_v56  ;;  %v2112_v52 = vadd.f32 %v1987_v60, %v1777_v59  ;;  %v1790_v39 = vadd.f32 %v1660_v55, %v1451_v7  ;;  %v2233_v61 = vrot.slane %v2170_v42, 1 }
 0x156   : > { %v1662_v12 = vpop.f32.mrf.mxu0  ;;  %v1991_v43 = vpop.f32.mrf.mxu1  ;;  %v1768_v59 = vadd.f32 %v16307_v53, %v1429_v8  ;;  %v1443_v56 = vadd.f32 %v16309_v14, %v958_v54  ;;  %v1775_v53 = vadd.f32 %v16315_v23, %v1436_v47  ;;  %v21947_v8 = vld [vmem:[#allocation17_spill] sm:$0xff] }
 0x157   : > { %v2231_v13 = vrot.slane %v2176_v26, 1  ;;  %v2177_v57 = vadd.f32 %v16392_v16, %v2112_v52  ;;  %v2118_v37 = vadd.f32 %v1991_v43, %v1783_v1  ;;  %v1791_v17 = vadd.f32 %v1662_v12, %v1452_v21  ;;  %v21942_v43 = vld [vmem:[#allocation11_spill] sm:$0xff] }
 0x158   : > { %v14227_v0 = vpop.f32.mrf.mxu0  ;;  %v1993_v31 = vpop.f32.mrf.mxu1  ;;  %v1449_v1 = vadd.f32 %v16313_v9, %v16229_v5  ;;  %v1781_v12 = vadd.f32 %v16319_v2, %v1442_v15  ;;  %v21946_v2 = vld [vmem:[#allocation22_spill] sm:$0xff] }
 0x159   : > { %v2234_v50 = vrot.slane %v2177_v57, 1  ;;  %v2183_v11 = vadd.f32 %v16383_v10, %v2118_v37  ;;  %v2119_v22 = vadd.f32 %v1993_v31, %v1784_v58  ;;  %v2232_v28 = vsel %vm1138_vm4, %v2230_v49, %v2231_v13  ;;  %v21945_v37 = vld [vmem:[#allocation18_spill] sm:$0xff] }
 0x15a   : > { %v1752_v38 = vpop.f32.mrf.mxu0  ;;  %v1995_v6 = vpop.f32.mrf.mxu1  ;;  %v16455_v63 = vmax.f32 %v2169_v48, %v2232_v28  ;;  %v1787_v62 = vadd.f32 %v14227_v0, %v16289_v19  ;;  %v16483_v21 = vadd.f32 %v21946_v2, %v16427_v41  ;;  %v21948_v28 = vld [vmem:[#allocation23_spill] sm:$0xff] }
 0x15b   : > { %v2249_v33 = vrot.slane %v2183_v11, 1  ;;  %v16450_v35 = vadd.f32 %v16392_v16, %v2119_v22  ;;  %v2125_v46 = vadd.f32 %v1995_v6, %v1790_v39  ;;  %v2235_v20 = vsel %vm1138_vm4, %v2233_v61, %v2234_v50 }
 0x15c   : > { %v14228_v45 = vpop.f32.mrf.mxu0  ;;  %v1997_v27 = vpop.f32.mrf.mxu1  ;;  %v16463_v54 = vmax.f32 %v2170_v42, %v2235_v20  ;;  %v1773_v48 = vadd.f32 %v1752_v38, %v16292_v36  ;;  %v21943_v36 = vld [vmem:[#allocation20_spill] sm:$0xff] }
 0x15d   : > { %v2251_v55 = vrot.slane %v16450_v35, 1  ;;  %v2190_v60 = vadd.f32 %v16383_v10, %v2125_v46  ;;  %v2126_v40 = vadd.f32 %v1997_v27, %v1791_v17  ;;  %v2250_v51 = vsel %vm1138_vm4, %v2231_v13, %v2249_v33 }
 0x15e   : > { %v1755_v52 = vpop.f32.mrf.mxu0  ;;  %v14235_v14 = vpop.f32.mrf.mxu1  ;;  %v1450_v10 = vadd.f32 %v16317_v32, %v962_v24  ;;  %2363 = vrot.lane.b32.xlu1 %v16463_v54, %s15711_s23  ;;  %v16473_v42 = vmax.f32 %v2176_v26, %v2250_v51  ;;  %v16477_v58 = vadd.f32 %v21943_v36, %v21942_v43  ;;  %v1794_v49 = vadd.f32 %v14228_v45, %v21947_v8 }
 0x15f   : > { %v2263_v7 = vrot.slane %v2190_v60, 1  ;;  %v2191_v19 = vadd.f32 %v16392_v16, %v2126_v40  ;;  %v2122_v3 = vadd.f32 %v14235_v14, %v1787_v62  ;;  %v2252_v23 = vsel %vm1138_vm4, %v2234_v50, %v2251_v55  ;;  %v21944_v16 = vld [vmem:[#allocation21_spill] sm:$0xff] }
 0x160   : > { %v1928_v5 = vpop.f32.mrf.mxu0  ;;  %v2087_v9 = vpop.f32.mrf.mxu1  ;;  %v1782_v13 = vadd.f32 %v21944_v16, %v1443_v56  ;;  %v16486_v39 = vmax.f32 %v2177_v57, %v2252_v23  ;;  %v1780_v22 = vadd.f32 %v1755_v52, %v1441_v44  ;;  %v1788_v17 = vadd.f32 %v21948_v28, %v1449_v1 }
 0x161   : > { %v2102_v32 = vadd.f32 %v1928_v5, %v21945_v37  ;;  %v2108_v24 = vadd.f32 %v2087_v9, %v1773_v48  ;;  %v2264_v26 = vsel %vm1138_vm4, %v2249_v33, %v2263_v7  ;;  %v2265_v50 = vrot.slane %v2191_v19, 1  ;;  %v21949_v33 = vld [vmem:[#allocation25_spill] sm:$0xff] }
 0x162   : > { %v1930_v0 = vpop.f32.mrf.mxu0  ;;  %v14236_v31 = vpop.f32.mrf.mxu1  ;;  %v2187_v47 = vadd.f32 %v16395_v34, %v2122_v3  ;;  %2377 = vrot.lane.b32.xlu0 %v16486_v39, %s15711_s23  ;;  %2375 = vrot.lane.b32.xlu1 %v16473_v42, %s15711_s23  ;;  %v16495_v57 = vmax.f32 %v2183_v11, %v2264_v26  ;;  %v1789_v44 = vadd.f32 %v21949_v33, %v1450_v10  ;;  %v21951_v26 = vld [vmem:[#allocation26_spill] sm:$0xff]  ;;  %v21952_v33 = vld [vmem:[#allocation12_spill] sm:$0xff] }
 0x163   : > { %v2103_v15 = vadd.f32 %v1930_v0, %v1768_v59  ;;  %v2167_v61 = vadd.f32 %v16399_v18, %v2102_v32  ;;  %v2129_v38 = vadd.f32 %v14236_v31, %v1794_v49  ;;  %v2173_v46 = vadd.f32 %v16395_v34, %v2108_v24  ;;  %v21950_v59 = vld [vmem:[#allocation19_spill] sm:$0xff] }
 0x164   : > { %v1932_v41 = vpop.f32.mrf.mxu0  ;;  %v2090_v6 = vpop.f32.mrf.mxu1  ;;  %v16505_v40 = vmax.f32 %v2190_v60, %v2263_v7  ;;  %v2257_v52 = vrot.slane %v2187_v47, 1  ;;  %v2266_v1 = vsel %vm1138_vm4, %v2251_v55, %v2265_v50  ;;  %v16515_v60 = vmax.f32 %v2191_v19, %v2265_v50 }
 0x165   : > { %v2109_v56 = vadd.f32 %v1932_v41, %v21950_v59  ;;  %v2168_v45 = vadd.f32 %v16404_v30, %v2103_v15  ;;  %v16503_v27 = vadd.f32 %v16395_v34, %v2129_v38  ;;  %v2115_v20 = vadd.f32 %v2090_v6, %v1780_v22 }
 0x166   : > { %v1934_v62 = vpop.f32.mrf.mxu0  ;;  %v2224_v51 = vrot.slane %v2167_v61, 1  ;;  %2389 = vrot.lane.b32.xlu0 %v16495_v57, %s15711_s23  ;;  %2403 = vrot.lane.b32.xlu1 %v16505_v40, %s15711_s23  ;;  %v2242_v7 = vrot.slane %v2173_v46, 1  ;;  %v16519_v36 = vmax.f32 %v16450_v35, %v2266_v1  ;;  %v2154_v35 = vsub.s32 5, %v16349_v4 }
 0x167   : > { %v2174_v11 = vadd.f32 %v16399_v18, %v2109_v56  ;;  %v2110_v14 = vadd.f32 %v1934_v62, %v1775_v53  ;;  %v2271_v48 = vrot.slane %v16503_v27, 1  ;;  %v2180_v3 = vadd.f32 %v16395_v34, %v2115_v20  ;;  %v21954_v56 = vld [vmem:[#allocation29_spill] sm:$0xff] }
 0x168   : > { %v1938_v10 = vpop.f32.mrf.mxu0  ;;  %v2227_v55 = vrot.slane %v2168_v45, 1  ;;  %v1771_v50 = vadd.f32 %v21951_v26, %v16477_v58  ;;  %v1772_v20 = vadd.f32 %v21954_v56, %v16483_v21  ;;  %v2155_v1 = vrot.slane %v16364_v25, %v2154_v35  ;;  %v21961_v26 = vld [vmem:[#allocation13_spill] sm:$0xff] }
 0x169   : > { %v2225_v5 = vrot.slane %v2174_v11, 1  ;;  %v2175_v53 = vadd.f32 %v16404_v30, %v2110_v14  ;;  %v2116_v9 = vadd.f32 %v1938_v10, %v1781_v12  ;;  %v2243_v23 = vrot.slane %v2180_v3, 1  ;;  %v21955_v10 = vld [vmem:[#allocation30_spill] sm:$0xff] }
 0x16a   : > { %v1940_v43 = vpop.f32.mrf.mxu0  ;;  %v2272_v34 = vsel %vm1138_vm4, %v2257_v52, %v2271_v48  ;;  %2405 = vrot.lane.b32.xlu0 %v16515_v60, %s15711_s23  ;;  %2391 = vrot.lane.b32.xlu1 %v16519_v36, %s15711_s23 }
 0x16b   : > { %v2228_v16 = vrot.slane %v2175_v53, 1  ;;  %v2181_v37 = vadd.f32 %v16399_v18, %v2116_v9  ;;  %v2117_v19 = vadd.f32 %v1940_v43, %v1782_v13  ;;  %v2226_v32 = vsel %vm1138_vm4, %v2224_v51, %v2225_v5  ;;  %v21956_v9 = vld [vmem:[#allocation14_spill] sm:$0xff]  ;;  %v21958_v43 = vld [vmem:[#allocation27_spill] sm:$0xff] }
 0x16c   : > { %v1942_v12 = vpop.f32.mrf.mxu0  ;;  %v16531_v24 = vmax.f32 %v2167_v61, %v2226_v32  ;;  %v16533_v2 = vmax.f32 %v2187_v47, %v2272_v34  ;;  %v2244_v8 = vsel %vm1138_vm4, %v2242_v7, %v2243_v23  ;;  %v2258_v61 = vsel %vm1138_vm4, %v2243_v23, %v2257_v52  ;;  %v21959_v34 = vld [vmem:[#allocation32_spill] sm:$0xff] }
 0x16d   : > { %v2245_v49 = vrot.slane %v2181_v37, 1  ;;  %v2182_v13 = vadd.f32 %v16404_v30, %v2117_v19  ;;  %v2123_v0 = vadd.f32 %v1942_v12, %v1788_v17  ;;  %v2229_v31 = vsel %vm1138_vm4, %v2227_v55, %v2228_v16  ;;  %v21953_v17 = vld [vmem:[#allocation24_spill] sm:$0xff] }
 0x16e   : > { %v1944_v22 = vpop.f32.mrf.mxu0  ;;  %v16540_v15 = vmax.f32 %v2168_v45, %v2229_v31  ;;  %v16542_v38 = vmax.f32 %v2173_v46, %v2244_v8  ;;  %v1439_v59 = vadd.f32 %v21953_v17, %v21952_v33  ;;  %v16553_v45 = vmax.f32 %v2180_v3, %v2258_v61  ;;  %v21957_v3 = vld [vmem:[#allocation28_spill] sm:$0xff]  ;;  %v21963_v61 = vld [vmem:[#allocation15_spill] sm:$0xff] }
 0x16f   : > { %v2247_v47 = vrot.slane %v2182_v13, 1  ;;  %v2188_v41 = vadd.f32 %v16399_v18, %v2123_v0  ;;  %v2124_v6 = vadd.f32 %v1944_v22, %v1789_v44  ;;  %v2246_v28 = vsel %vm1138_vm4, %v2225_v5, %v2245_v49 }
 0x170   : > { %v2034_v58 = vpop.f32.mrf.mxu0  ;;  %v16551_v62 = vmax.f32 %v2174_v11, %v2246_v28  ;;  %v1778_v7 = vadd.f32 %v21955_v10, %v1439_v59  ;;  %v1446_v55 = vadd.f32 %v21957_v3, %v21956_v9  ;;  %v1779_v25 = vadd.f32 %v21959_v34, %v21958_v43  ;;  %v21965_v59 = vld [vmem:[#allocation33_spill] sm:$0xff]  ;;  %v21968_v9 = vld [vmem:[#allocation38_spill] sm:$0xff] }
 0x171   : > { %v2259_v46 = vrot.slane %v2188_v41, 1  ;;  %v2189_v52 = vadd.f32 %v16404_v30, %v2124_v6  ;;  %v2106_v14 = vadd.f32 %v2034_v58, %v1771_v50  ;;  %v2248_v18 = vsel %vm1138_vm4, %v2228_v16, %v2247_v47  ;;  %v21962_v50 = vld [vmem:[#allocation16_spill] sm:$0xff]  ;;  %v21964_v6 = vld [vmem:[#allocation31_spill] sm:$0xff] }
 0x172   : > { %v2036_v44 = vpop.f32.mrf.mxu0  ;;  %v16558_v51 = vmax.f32 %v2175_v53, %v2248_v18  ;;  %v1068_v22 = vadd.f32 %v21962_v50, %v21961_v26 }
 0x173   : > { %v2261_v5 = vrot.slane %v2189_v52, 1  ;;  %v2107_v21 = vadd.f32 %v2036_v44, %v1772_v20  ;;  %v2260_v11 = vsel %vm1138_vm4, %v2245_v49, %v2259_v46  ;;  %v2171_v53 = vadd.f32 %v16412_v29, %v2106_v14  ;;  %v21960_v49 = vld [vmem:[#allocation34_spill] sm:$0xff]  ;;  %v21966_v20 = vld [vmem:[#allocation36_spill] sm:$0xff] }
 0x174   : > { %v2038_v23 = vpop.f32.mrf.mxu0  ;;  %2373 = vrot.lane.b32.xlu1 %v16558_v51, %s15711_s23  ;;  %v16566_v30 = vmax.f32 %v2181_v37, %v2260_v11  ;;  %v16574_v35 = vmax.f32 %v2188_v41, %v2259_v46  ;;  %v1785_v37 = vadd.f32 %v21960_v49, %v1446_v55  ;;  %v1454_v56 = vadd.f32 %v21965_v59, %v1068_v22 }
 0x175   : > { %v2113_v16 = vadd.f32 %v2038_v23, %v1778_v7  ;;  %v2262_v19 = vsel %vm1138_vm4, %v2247_v47, %v2261_v5  ;;  %v2172_v32 = vadd.f32 %v2155_v1, %v2107_v21  ;;  %v1453_v47 = vadd.f32 %v21964_v6, %v21963_v61  ;;  %v21967_v7 = vld [vmem:[#allocation35_spill] sm:$0xff] }
 0x176   : > { %v2040_v12 = vpop.f32.mrf.mxu0  ;;  %2385 = vrot.lane.b32.xlu0 %v16566_v30, %s15711_s23  ;;  %v16576_v8 = vmax.f32 %v2182_v13, %v2262_v19  ;;  %v2236_v33 = vrot.slane %v2171_v53, 1  ;;  %v16590_v18 = vmax.f32 %v2189_v52, %v2261_v5  ;;  %v1793_v3 = vadd.f32 %v21968_v9, %v1454_v56 }
 0x177   : > { %v2178_v0 = vadd.f32 %v16412_v29, %v2113_v16  ;;  %v2114_v31 = vadd.f32 %v2040_v12, %v1779_v25  ;;  %v1792_v58 = vadd.f32 %v21966_v20, %v1453_v47  ;;  %v2239_v46 = vrot.slane %v2172_v32, 1 }
 0x178   : > { %v2044_v28 = vpop.f32.mrf.mxu0  ;;  %2399 = vrot.lane.b32.xlu1 %v16574_v35, %s15711_s23  ;;  %v15712_v47 = vmov 0.0  }
 0x179   : > { %v2237_v41 = vrot.slane %v2178_v0, 1  ;;  %v2179_v17 = vadd.f32 %v2155_v1, %v2114_v31  ;;  %v2120_v13 = vadd.f32 %v2044_v28, %v1785_v37  ;;  %2666 = vmatprep.mubr.f32.mxu0 %v15712_v47  ;;  %2589 = vmatprep.mubr.f32.mxu1 %v15712_v47  ;;  %v16643_v28 = vmax.f32 %v16503_v27, %v2271_v48 }
 0x17a   : > { %v2046_v14 = vpop.f32.mrf.mxu0  ;;  %2387 = vrot.lane.b32.xlu0 %v16576_v8, %s15711_s23 }
 0x17b   : > { %v2240_v44 = vrot.slane %v2179_v17, 1  ;;  %v2185_v10 = vadd.f32 %v16412_v29, %v2120_v13  ;;  %v2121_v21 = vadd.f32 %v2046_v14, %v21967_v7  ;;  %v2238_v11 = vsel %vm1138_vm4, %v2236_v33, %v2237_v41 }
 0x17c   : > { %v2048_v55 = vpop.f32.mrf.mxu0  ;;  %2401 = vrot.lane.b32.xlu1 %v16590_v18, %s15711_s23  ;;  %v16598_v23 = vmax.f32 %v2171_v53, %v2238_v11 }
 0x17d   : > { %v2253_v43 = vrot.slane %v2185_v10, 1  ;;  %v2186_v34 = vadd.f32 %v2155_v1, %v2121_v21  ;;  %v2127_v25 = vadd.f32 %v2048_v55, %v1792_v58  ;;  %v2241_v52 = vsel %vm1138_vm4, %v2239_v46, %v2240_v44 }
 0x17e   : > { %v2050_v5 = vpop.f32.mrf.mxu0  ;;  %2365 = vrot.lane.b32.xlu0 %v16598_v23, %s15711_s23  ;;  %v16603_v16 = vmax.f32 %v2172_v32, %v2241_v52 }
 0x17f   : > { %v2255_v19 = vrot.slane %v2186_v34, 1  ;;  %v2192_v12 = vadd.f32 %v16412_v29, %v2127_v25  ;;  %v2128_v49 = vadd.f32 %v2050_v5, %v1793_v3  ;;  %v2254_v37 = vsel %vm1138_vm4, %v2237_v41, %v2253_v43 }
 0x180   : > { %v16607_v31 = vmax.f32 %v2178_v0, %v2254_v37 }
 0x181   : > { %v2267_v53 = vrot.slane %v2192_v12, 1  ;;  %v2193_v26 = vadd.f32 %v2155_v1, %v2128_v49  ;;  %v2256_v50 = vsel %vm1138_vm4, %v2240_v44, %v2255_v19 }
 0x182   : > { %2379 = vrot.lane.b32.xlu1 %v16607_v31, %s15711_s23  ;;  %v16612_v22 = vmax.f32 %v2179_v17, %v2256_v50 }
 0x183   : > { %v2269_v61 = vrot.slane %v2193_v26, 1  ;;  %v16614_v32 = vmax.f32 %v2192_v12, %v2267_v53  ;;  %v2268_v6 = vsel %vm1138_vm4, %v2253_v43, %v2267_v53 }
 0x184   : > { %v16617_v29 = vmax.f32 %v2185_v10, %v2268_v6 }
 0x185   : > { %2407 = vrot.lane.b32.xlu0 %v16614_v32, %s15711_s23  ;;  %v2270_v0 = vsel %vm1138_vm4, %v2255_v19, %v2269_v61  ;;  %v16653_v33 = vmax.f32 %v2193_v26, %v2269_v61 }
 0x186   : > { %2371 = vrot.lane.b32.xlu1 %v16551_v62, %s15711_s23  ;;  %v16624_v1 = vmax.f32 %v2186_v34, %v2270_v0 }
 0x189   : > { %2393 = vrot.lane.b32.xlu0 %v16617_v29, %s15711_s23 }
 0x18a   : > { %2357 = vrot.lane.b32.xlu1 %v16531_v24, %s15711_s23 }
 0x18d   : > { %2361 = vrot.lane.b32.xlu0 %v16455_v63, %s15711_s23 }
 0x18e   : > { %2397 = vrot.lane.b32.xlu1 %v16533_v2, %s15711_s23 }
 0x191   : > { %2359 = vrot.lane.b32.xlu0 %v16540_v15, %s15711_s23 }
 0x192   : > { %2369 = vrot.lane.b32.xlu1 %v16542_v38, %s15711_s23 }
 0x195   : > { %2411 = vrot.lane.b32.xlu0 %v16643_v28, %s15711_s23 }
 0x196   : > { %2395 = vrot.lane.b32.xlu1 %v16624_v1, %s15711_s23 }
 0x199   : > { %2383 = vrot.lane.b32.xlu0 %v16553_v45, %s15711_s23 }
 0x19a   : > { %2367 = vrot.lane.b32.xlu1 %v16603_v16, %s15711_s23 }
 0x19d   : > { %2409 = vrot.lane.b32.xlu0 %v16653_v33, %s15711_s23 }
 0x1a1   : > { %2381 = vrot.lane.b32.xlu0 %v16612_v22, %s15711_s23 }
 0x1d0   : > { %v2364_v27 = vpop.permute.xlu1 %2363 }
 0x1d4   : > { %v2376_v48 = vpop.permute.xlu1 %2375  ;;  %v2378_v41 = vpop.permute.xlu0 %2377 }
 0x1d5   : > { %v2422_v61 = vsel %vm2413_vm5, %v2376_v48, %v2378_v41 }
 0x1d8   : > { %v2404_v17 = vpop.permute.xlu1 %2403  ;;  %v2390_v13 = vpop.permute.xlu0 %2389 }
 0x1dc   : > { %v2392_v59 = vpop.permute.xlu1 %2391  ;;  %v2406_v56 = vpop.permute.xlu0 %2405 }
 0x1dd   : > { %v2428_v37 = vsel %vm2413_vm5, %v2390_v13, %v2392_v59 }
 0x1e6   : > { %v2374_v20 = vpop.permute.xlu1 %2373 }
 0x1e7   : > { %v2421_v55 = vsel %vm2413_vm5, %v2374_v20, %v2376_v48 }
 0x1e8   : > { %v2386_v58 = vpop.permute.xlu0 %2385  ;;  %v2474_v52 = vmax.f32 %v16558_v51, %v2421_v55 }
 0x1ea   : > { %v2400_v46 = vpop.permute.xlu1 %2399 }
 0x1ec   : > { %v2388_v14 = vpop.permute.xlu0 %2387 }
 0x1ed   : > { %v2427_v10 = vsel %vm2413_vm5, %v2388_v14, %v2390_v13  ;;  %v2426_v11 = vsel %vm2413_vm5, %v2386_v58, %v2388_v14  ;;  %v2475_v13 = vmax.f32 %v16473_v42, %v2422_v61  ;;  %v2999_v61 = vld [vmem:[%s21884_s8 + $0x540] sm:$0xff] }
 0x1ee   : > { %v2402_v44 = vpop.permute.xlu1 %2401  ;;  %v2481_v43 = vmax.f32 %v16576_v8, %v2427_v10  ;;  %v2480_v34 = vmax.f32 %v16566_v30, %v2426_v11  ;;  %v3020_v10 = vld [vmem:[%s21884_s8 + $0x5e8] sm:$0xff] }
 0x1ef   : > { %v2432_v7 = vsel %vm2413_vm5, %v2400_v46, %v2402_v44  ;;  %v2433_v21 = vsel %vm2413_vm5, %v2402_v44, %v2404_v17 }
 0x1f0   : > { %v2487_v9 = vmax.f32 %v16574_v35, %v2432_v7  ;;  %v2488_v3 = vmax.f32 %v16590_v18, %v2433_v21  ;;  %v16669_v25 = vpop.permute.xlu0 %2365  ;;  %v2434_v35 = vsel %vm2413_vm5, %v2404_v17, %v2406_v56 }
 0x1f1   : > { %v2489_v49 = vmax.f32 %v16505_v40, %v2434_v35  ;;  %v2417_v6 = vsel %vm2413_vm5, %v2364_v27, %v16669_v25 }
 0x1f2   : > { %12323 = vmatprep.subr.msk.mxu1 %vm2503_vm6, %v2488_v3 }
 0x1f3   : > { %12324 = vmatpush1.msk.msra.mxu1 %vm2503_vm6, %v2487_v9 }
 0x1f4   : > { %2551 = vmatprep.subr.mxu1 %v2481_v43  ;;  %v16673_v5 = vpop.permute.xlu1 %2379  ;;  %v3016_v43 = vld [vmem:[%s21884_s8 + $0x5c8] sm:$0xff] }
 0x1f5   : > { %2552 = vmatpush1.msra.mxu1 %v2480_v34  ;;  %v2423_v26 = vsel %vm2413_vm5, %v2378_v41, %v16673_v5  ;;  %v16715_v41 = vld [vmem:[%s21883_s7 + $0x8] sm:$0x3f]  ;;  %v3015_v34 = vld [vmem:[%s21884_s8 + $0x5c0] sm:$0xff] }
 0x1f6   : > { %2553 = vmatprep.subr.mxu1 %v2474_v52  ;;  %v2476_v0 = vmax.f32 %v16486_v39, %v2423_v26  ;;  %v3000_v26 = vld [vmem:[%s21884_s8 + $0x548] sm:$0xff] }
 0x1f7   : > { %v16676_v18 = vpop.permute.xlu0 %2407 }
 0x1f8   : > { %v2435_v8 = vsel %vm2413_vm5, %v2406_v56, %v16676_v18  ;;  %v2372_v19 = vpop.permute.xlu1 %2371 }
 0x1f9   : > { %v2490_v30 = vmax.f32 %v16515_v60, %v2435_v8  ;;  %v2420_v12 = vsel %vm2413_vm5, %v2372_v19, %v2374_v20  ;;  %v2469_v20 = vmax.f32 %v16463_v54, %v2417_v6  ;;  %v2879_v6 = vld [vmem:[%s21884_s8 + $0x180] sm:$0xff] }
 0x1fa   : > { %v2473_v51 = vmax.f32 %v16551_v62, %v2420_v12  ;;  %v2482_v62 = vmax.f32 %v16495_v57, %v2428_v37  ;;  %v16703_v57 = vld [vmem:[%s21883_s7] sm:$0xff] }
 0x1fb   : > { %12327 = vmatprep.subr.msk.mxu0 %vm2503_vm6, %v2490_v30  ;;  %v2394_v53 = vpop.permute.xlu0 %2393  ;;  %v2891_v37 = vld [vmem:[%s21884_s8 + $0x1e0] sm:$0xff] }
 0x1fc   : > { %v2429_v50 = vsel %vm2413_vm5, %v2392_v59, %v2394_v53  ;;  %2554 = vmatpush1.msra.mxu1 %v2473_v51  ;;  %12328 = vmatpush1.msk.msra.mxu0 %vm2503_vm6, %v2489_v49  ;;  %v2358_v60 = vpop.permute.xlu1 %2357  ;;  %v3007_v49 = vld [vmem:[%s21884_s8 + $0x580] sm:$0xff] }
 0x1fd   : > { %v2483_v40 = vmax.f32 %v16519_v36, %v2429_v50  ;;  %v2884_v50 = vld [vmem:[%s21884_s8 + $0x1a8] sm:$0xff] }
 0x1ff   : > { %2628 = vmatprep.subr.mxu0 %v2483_v40  ;;  %v2362_v17 = vpop.permute.xlu0 %2361  ;;  %v2880_v40 = vld [vmem:[%s21884_s8 + $0x188] sm:$0xff] }
 0x200   : > { %v2416_v59 = vsel %vm2413_vm5, %v2362_v17, %v2364_v27  ;;  %2629 = vmatpush1.msra.mxu0 %v2482_v62  ;;  %v2398_v56 = vpop.permute.xlu1 %2397  ;;  %v2996_v62 = vld [vmem:[%s21884_s8 + $0x528] sm:$0xff] }
 0x201   : > { %v2468_v48 = vmax.f32 %v16455_v63, %v2416_v59  ;;  %2630 = vmatprep.subr.mxu0 %v2476_v0  ;;  %v2995_v0 = vld [vmem:[%s21884_s8 + $0x520] sm:$0xff] }
 0x202   : > { %2631 = vmatpush1.msra.mxu0 %v2475_v13  ;;  %v2992_v13 = vld [vmem:[%s21884_s8 + $0x508] sm:$0xff]  ;;  %v2875_v59 = vld [vmem:[%s21884_s8 + $0x160] sm:$0xff] }
 0x203   : > { %2632 = vmatprep.subr.mxu0 %v2469_v20  ;;  %v2360_v39 = vpop.permute.xlu0 %2359  ;;  %v2872_v20 = vld [vmem:[%s21884_s8 + $0x148] sm:$0xff] }
 0x204   : > { %v2414_v42 = vsel %vm2413_vm5, %v2358_v60, %v2360_v39  ;;  %v2415_v36 = vsel %vm2413_vm5, %v2360_v39, %v2362_v17  ;;  %2633 = vmatpush1.msra.mxu0 %v2468_v48  ;;  %v2370_v63 = vpop.permute.xlu1 %2369  ;;  %v2883_v60 = vld [vmem:[%s21884_s8 + $0x1a0] sm:$0xff]  ;;  %v2876_v17 = vld [vmem:[%s21884_s8 + $0x168] sm:$0xff] }
 0x205   : > { %v2466_v27 = vmax.f32 %v16531_v24, %v2414_v42  ;;  %v2467_v54 = vmax.f32 %v16540_v15, %v2415_v36  ;;  %12329 = vmatmul.mubr.msk.f32.vlgmr.msra.gmra.mxu0 %vm2496_vm7, %v16703_v57  ;;  %v2486_v24 = vmax.f32 %v16533_v2, %v2398_v56  ;;  %v2472_v2 = vmax.f32 %v16542_v38, %v2370_v63  ;;  %v3019_v38 = vld [vmem:[%s21884_s8 + $0x5e0] sm:$0xff]  ;;  %v2988_v48 = vld [vmem:[%s21884_s8 + $0x4e8] sm:$0xff] }
 0x206   : > { %2672 = vmatprep.mubr.f32.mxu0 %v15712_v47  ;;  %v2987_v39 = vld [vmem:[%s21884_s8 + $0x4e0] sm:$0xff]  ;;  %v2868_v42 = vld [vmem:[%s21884_s8 + $0x128] sm:$0xff] }
 0x207   : > { %2555 = vmatprep.subr.mxu1 %v2467_v54  ;;  %v2412_v58 = vpop.permute.xlu0 %2411  ;;  %v2984_v36 = vld [vmem:[%s21884_s8 + $0x4c8] sm:$0xff]  ;;  %v2983_v54 = vld [vmem:[%s21884_s8 + $0x4c0] sm:$0xff] }
 0x208   : > { %v2493_v46 = vmax.f32 %v16643_v28, %v2412_v58  ;;  %2556 = vmatpush1.msra.mxu1 %v2466_v27  ;;  %v2396_v15 = vpop.permute.xlu1 %2395  ;;  %v2867_v27 = vld [vmem:[%s21884_s8 + $0x120] sm:$0xff] }
 0x209   : > { %12325 = vmatmul.mubr.msk.f32.vlgmr.msra.gmra.mxu1 %vm2496_vm7, %v16703_v57  ;;  %12330 = vmatmul.mubr.msk.f32.gmra.mxu0 %vm2496_vm7, %v16715_v41  ;;  %v2430_v7 = vsel %vm2413_vm5, %v2394_v53, %v2396_v15  ;;  %v2887_v53 = vld [vmem:[%s21884_s8 + $0x1c0] sm:$0xff] }
 0x20a   : > { %14237 = vmatprep.subr.msk.mxu0 %vm2503_vm6, %v2493_v46  ;;  %2595 = vmatprep.mubr.f32.mxu1 %v15712_v47  ;;  %v2484_v52 = vmax.f32 %v16617_v29, %v2430_v7  ;;  %v3011_v29 = vld [vmem:[%s21884_s8 + $0x5a0] sm:$0xff] }
 0x20b   : > { %14238 = vmatpush3.msk.msra.mxu0 %vm2503_vm6, %v2493_v46  ;;  %v2384_v14 = vpop.permute.xlu0 %2383  ;;  %14245 = vmatprep.mubr.msk.f32.mxu0 %vm2496_vm7, %v16703_v57  ;;  %v2979_v46 = vld [vmem:[%s21884_s8 + $0x4a0] sm:$0xff] }
 0x20c   : > { %v2479_v28 = vmax.f32 %v16553_v45, %v2384_v14  ;;  %14239 = vmatprep.subr.mxu0 %v2486_v24  ;;  %v2431_v45 = vsel %vm2413_vm5, %v2396_v15, %v2398_v56  ;;  %v2368_v9 = vpop.permute.xlu1 %2367  ;;  %v2991_v56 = vld [vmem:[%s21884_s8 + $0x500] sm:$0xff]  ;;  %v2976_v15 = vld [vmem:[%s21884_s8 + $0x488] sm:$0xff] }
 0x20d   : > { %14240 = vmatpush3.msra.mxu0 %v2486_v24  ;;  %12326 = vmatmul.mubr.msk.f32.gmra.mxu1 %vm2496_vm7, %v16715_v41  ;;  %v2485_v35 = vmax.f32 %v16624_v1, %v2431_v45  ;;  %v2418_v1 = vsel %vm2413_vm5, %v16669_v25, %v2368_v9  ;;  %v2892_v25 = vld [vmem:[%s21884_s8 + $0x1e8] sm:$0xff]  ;;  %v2971_v7 = vld [vmem:[%s21884_s8 + $0x460] sm:$0xff] }
 0x20e   : > { %14241 = vmatprep.subr.mxu0 %v2479_v28  ;;  %2743 = vmatprep.mubr.f32.mxu1 %v15712_v47  ;;  %v2860_v24 = vld [vmem:[%s21884_s8 + $0xe8] sm:$0xff] }
 0x20f   : > { %14242 = vmatpush3.msra.mxu0 %v2479_v28  ;;  %v2410_v44 = vpop.permute.xlu0 %2409  ;;  %v2975_v28 = vld [vmem:[%s21884_s8 + $0x480] sm:$0xff]  ;;  %v2852_v45 = vld [vmem:[%s21884_s8 + $0xa8] sm:$0xff] }
 0x210   : > { %v2436_v21 = vsel %vm2413_vm5, %v16676_v18, %v2410_v44  ;;  %v2437_v11 = vsel %vm2413_vm5, %v2410_v44, %v2412_v58  ;;  %14243 = vmatprep.subr.mxu0 %v2472_v2  ;;  %v2419_v18 = vsel %vm2413_vm5, %v2368_v9, %v2370_v63  ;;  %v2864_v63 = vld [vmem:[%s21884_s8 + $0x108] sm:$0xff]  ;;  %v2863_v58 = vld [vmem:[%s21884_s8 + $0x100] sm:$0xff] }
 0x211   : > { %v2491_v3 = vmax.f32 %v16614_v32, %v2436_v21  ;;  %v2492_v55 = vmax.f32 %v16653_v33, %v2437_v11  ;;  %14244 = vmatpush3.msra.mxu0 %v2472_v2  ;;  %v3012_v33 = vld [vmem:[%s21884_s8 + $0x5a8] sm:$0xff]  ;;  %v2471_v51 = vmax.f32 %v16603_v16, %v2419_v18  ;;  %v2851_v11 = vld [vmem:[%s21884_s8 + $0xa0] sm:$0xff] }
 0x212   : > { %14246 = vmatmul.mubr.msk.f32.vlgmr.msra.gmra.mxu0 %vm2496_vm7, %v16715_v41  ;;  %3346 = vmatprep.subr.mxu0 %v3020_v10  ;;  %v2888_v16 = vld [vmem:[%s21884_s8 + $0x1c8] sm:$0xff]  ;;  %v2855_v10 = vld [vmem:[%s21884_s8 + $0xc0] sm:$0xff] }
 0x213   : > { %12331 = vmatprep.subr.msk.mxu1 %vm2503_vm6, %v2492_v55  ;;  %v2382_v32 = vpop.permute.xlu0 %2381  ;;  %3347 = vmatpush1.msra.mxu0 %v3019_v38  ;;  %v2856_v2 = vld [vmem:[%s21884_s8 + $0xc8] sm:$0xff]  ;;  %v2967_v38 = vld [vmem:[%s21884_s8 + $0x440] sm:$0xff] }
 0x214   : > { %v2424_v8 = vsel %vm2413_vm5, %v16673_v5, %v2382_v32  ;;  %v2425_v19 = vsel %vm2413_vm5, %v2382_v32, %v2384_v14  ;;  %12332 = vmatpush1.msk.msra.mxu1 %vm2503_vm6, %v2491_v3  ;;  %3348 = vmatprep.subr.mxu0 %v3016_v43  ;;  %v3008_v5 = vld [vmem:[%s21884_s8 + $0x588] sm:$0xff]  ;;  %v2859_v14 = vld [vmem:[%s21884_s8 + $0xe0] sm:$0xff] }
 0x215   : > { %v2477_v30 = vmax.f32 %v16607_v31, %v2424_v8  ;;  %v2478_v12 = vmax.f32 %v16612_v22, %v2425_v19  ;;  %2705 = vmatprep.subr.mxu1 %v2485_v35  ;;  %3349 = vmatpush1.msra.mxu0 %v3015_v34  ;;  %v3004_v31 = vld [vmem:[%s21884_s8 + $0x568] sm:$0xff]  ;;  %v2470_v22 = vmax.f32 %v16598_v23, %v2418_v1  ;;  %v3003_v23 = vld [vmem:[%s21884_s8 + $0x560] sm:$0xff] }
 0x216   : > { %2706 = vmatpush1.msra.mxu1 %v2484_v52  ;;  %3350 = vmatprep.subr.mxu0 %v3012_v33  ;;  %v2972_v44 = vld [vmem:[%s21884_s8 + $0x468] sm:$0xff]  ;;  %v2847_v55 = vld [vmem:[%s21884_s8 + $0x80] sm:$0xff] }
 0x217   : > { %2707 = vmatprep.subr.mxu1 %v2478_v12  ;;  %3351 = vmatpush1.msra.mxu0 %v3011_v29  ;;  %v2968_v21 = vld [vmem:[%s21884_s8 + $0x448] sm:$0xff]  ;;  %v2963_v43 = vld [vmem:[%s21884_s8 + $0x420] sm:$0xff] }
 0x218   : > { %2708 = vmatpush1.msra.mxu1 %v2477_v30  ;;  %3352 = vmatprep.subr.mxu0 %v3008_v5  ;;  %v2848_v9 = vld [vmem:[%s21884_s8 + $0x88] sm:$0xff]  ;;  %v2843_v35 = vld [vmem:[%s21884_s8 + $0x60] sm:$0xff] }
 0x219   : > { %2709 = vmatprep.subr.mxu1 %v2471_v51  ;;  %3353 = vmatpush1.msra.mxu0 %v3007_v49  ;;  %v2964_v3 = vld [vmem:[%s21884_s8 + $0x428] sm:$0xff]  ;;  %v2959_v32 = vld [vmem:[%s21884_s8 + $0x400] sm:$0xff] }
 0x21a   : > { %2710 = vmatpush1.msra.mxu1 %v2470_v22  ;;  %3354 = vmatprep.subr.mxu0 %v3004_v31  ;;  %v2844_v34 = vld [vmem:[%s21884_s8 + $0x68] sm:$0xff]  ;;  %v2839_v8 = vld [vmem:[%s21884_s8 + $0x40] sm:$0xff] }
 0x21b   : > { %12333 = vmatmul.mubr.msk.f32.vlgmr.msra.gmra.mxu1 %vm2496_vm7, %v16703_v57  ;;  %3269 = vmatprep.subr.mxu1 %v2892_v25  ;;  %v2871_v57 = vld [vmem:[%s21884_s8 + $0x140] sm:$0xff]  ;;  %v2960_v52 = vld [vmem:[%s21884_s8 + $0x408] sm:$0xff] }
 0x21c   : > { %2749 = vmatprep.mubr.f32.mxu1 %v15712_v47  ;;  %3270 = vmatpush1.msra.mxu1 %v2891_v37  ;;  %v2840_v33 = vld [vmem:[%s21884_s8 + $0x48] sm:$0xff]  ;;  %v3083_v19 = vld [vmem:[%s21884_s8 + $0x7e0] sm:$0xff] }
 0x21d   : > { %3271 = vmatprep.subr.mxu1 %v2888_v16  ;;  %3355 = vmatpush1.msra.mxu0 %v3003_v23  ;;  %v3084_v18 = vld [vmem:[%s21884_s8 + $0x7e8] sm:$0xff]  ;;  %v2835_v30 = vld [vmem:[%s21884_s8 + $0x20] sm:$0xff] }
 0x21e   : > { %3272 = vmatpush1.msra.mxu1 %v2887_v53  ;;  %3356 = vmatprep.subr.mxu0 %v3000_v26  ;;  %v2836_v29 = vld [vmem:[%s21884_s8 + $0x28] sm:$0xff]  ;;  %v3079_v12 = vld [vmem:[%s21884_s8 + $0x7c0] sm:$0xff] }
 0x21f   : > { %12334 = vmatmul.mubr.msk.f32.gmra.mxu1 %vm2496_vm7, %v16715_v41  ;;  %3273 = vmatprep.subr.mxu1 %v2884_v50  ;;  %v2980_v41 = vld [vmem:[%s21884_s8 + $0x4a8] sm:$0xff]  ;;  %v2831_v51 = vld [vmem:[%s21884_s8] sm:$0xff] }
 0x220   : > { %3274 = vmatpush1.msra.mxu1 %v2883_v60  ;;  %3357 = vmatpush1.msra.mxu0 %v2999_v61  ;;  %v3080_v1 = vld [vmem:[%s21884_s8 + $0x7c8] sm:$0xff]  ;;  %v3075_v31 = vld [vmem:[%s21884_s8 + $0x7a0] sm:$0xff] }
 0x221   : > { %3275 = vmatprep.subr.mxu1 %v2880_v40  ;;  %3358 = vmatprep.subr.mxu0 %v2996_v62  ;;  %v2832_v5 = vld [vmem:[%s21884_s8 + $0x8] sm:$0xff]  ;;  %v2955_v37 = vld [vmem:[%s21884_s8 + $0x3e0] sm:$0xff] }
 0x222   : > { %3276 = vmatpush1.msra.mxu1 %v2879_v6  ;;  %3359 = vmatpush1.msra.mxu0 %v2995_v0  ;;  %v3076_v49 = vld [vmem:[%s21884_s8 + $0x7a8] sm:$0xff]  ;;  %v3071_v16 = vld [vmem:[%s21884_s8 + $0x780] sm:$0xff] }
 0x223   : > { %3277 = vmatprep.subr.mxu1 %v2876_v17  ;;  %3360 = vmatprep.subr.mxu0 %v2992_v13  ;;  %v2956_v22 = vld [vmem:[%s21884_s8 + $0x3e8] sm:$0xff]  ;;  %v2951_v26 = vld [vmem:[%s21884_s8 + $0x3c0] sm:$0xff] }
 0x224   : > { %3278 = vmatpush1.msra.mxu1 %v2875_v59  ;;  %3361 = vmatpush1.msra.mxu0 %v2991_v56  ;;  %v3072_v25 = vld [vmem:[%s21884_s8 + $0x788] sm:$0xff]  ;;  %v3067_v50 = vld [vmem:[%s21884_s8 + $0x760] sm:$0xff] }
 0x225   : > { %3279 = vmatprep.subr.mxu1 %v2872_v20  ;;  %3362 = vmatprep.subr.mxu0 %v2988_v48  ;;  %v2952_v23 = vld [vmem:[%s21884_s8 + $0x3c8] sm:$0xff]  ;;  %v2947_v40 = vld [vmem:[%s21884_s8 + $0x3a0] sm:$0xff] }
 0x226   : > { %3280 = vmatpush1.msra.mxu1 %v2871_v57  ;;  %3363 = vmatpush1.msra.mxu0 %v2987_v39  ;;  %v3068_v53 = vld [vmem:[%s21884_s8 + $0x768] sm:$0xff]  ;;  %v3063_v62 = vld [vmem:[%s21884_s8 + $0x740] sm:$0xff] }
 0x227   : > { %3281 = vmatprep.subr.mxu1 %v2868_v42  ;;  %3364 = vmatprep.subr.mxu0 %v2984_v36  ;;  %v2948_v60 = vld [vmem:[%s21884_s8 + $0x3a8] sm:$0xff]  ;;  %v2943_v17 = vld [vmem:[%s21884_s8 + $0x380] sm:$0xff] }
 0x228   : > { %3282 = vmatpush1.msra.mxu1 %v2867_v27  ;;  %3365 = vmatpush1.msra.mxu0 %v2983_v54  ;;  %v3064_v61 = vld [vmem:[%s21884_s8 + $0x748] sm:$0xff]  ;;  %v3059_v13 = vld [vmem:[%s21884_s8 + $0x720] sm:$0xff] }
 0x229   : > { %3283 = vmatprep.subr.mxu1 %v2864_v63  ;;  %3366 = vmatprep.subr.mxu0 %v2980_v41  ;;  %v2944_v6 = vld [vmem:[%s21884_s8 + $0x388] sm:$0xff]  ;;  %v2939_v20 = vld [vmem:[%s21884_s8 + $0x360] sm:$0xff] }
 0x22a   : > { %3284 = vmatpush1.msra.mxu1 %v2863_v58  ;;  %3367 = vmatpush1.msra.mxu0 %v2979_v46  ;;  %v3060_v0 = vld [vmem:[%s21884_s8 + $0x728] sm:$0xff]  ;;  %v3055_v48 = vld [vmem:[%s21884_s8 + $0x700] sm:$0xff] }
 0x22b   : > { %3285 = vmatprep.subr.mxu1 %v2860_v24  ;;  %3368 = vmatprep.subr.mxu0 %v2976_v15  ;;  %v2940_v59 = vld [vmem:[%s21884_s8 + $0x368] sm:$0xff]  ;;  %v2935_v42 = vld [vmem:[%s21884_s8 + $0x340] sm:$0xff] }
 0x22c   : > { %3286 = vmatpush1.msra.mxu1 %v2859_v14  ;;  %3369 = vmatpush1.msra.mxu0 %v2975_v28  ;;  %v3056_v56 = vld [vmem:[%s21884_s8 + $0x708] sm:$0xff]  ;;  %v3051_v36 = vld [vmem:[%s21884_s8 + $0x6e0] sm:$0xff] }
 0x22d   : > { %3287 = vmatprep.subr.mxu1 %v2856_v2  ;;  %3370 = vmatprep.subr.mxu0 %v2972_v44  ;;  %v2936_v57 = vld [vmem:[%s21884_s8 + $0x348] sm:$0xff]  ;;  %v2931_v63 = vld [vmem:[%s21884_s8 + $0x320] sm:$0xff] }
 0x22e   : > { %3288 = vmatpush1.msra.mxu1 %v2855_v10  ;;  %3371 = vmatpush1.msra.mxu0 %v2971_v7  ;;  %v3052_v39 = vld [vmem:[%s21884_s8 + $0x6e8] sm:$0xff]  ;;  %v3047_v41 = vld [vmem:[%s21884_s8 + $0x6c0] sm:$0xff] }
 0x22f   : > { %3289 = vmatprep.subr.mxu1 %v2852_v45  ;;  %3372 = vmatprep.subr.mxu0 %v2968_v21  ;;  %v2932_v27 = vld [vmem:[%s21884_s8 + $0x328] sm:$0xff]  ;;  %v2927_v24 = vld [vmem:[%s21884_s8 + $0x300] sm:$0xff] }
 0x230   : > { %3290 = vmatpush1.msra.mxu1 %v2851_v11  ;;  %3373 = vmatpush1.msra.mxu0 %v2967_v38  ;;  %v3048_v54 = vld [vmem:[%s21884_s8 + $0x6c8] sm:$0xff]  ;;  %v3043_v15 = vld [vmem:[%s21884_s8 + $0x6a0] sm:$0xff] }
 0x231   : > { %3291 = vmatprep.subr.mxu1 %v2848_v9  ;;  %3374 = vmatprep.subr.mxu0 %v2964_v3  ;;  %v2928_v58 = vld [vmem:[%s21884_s8 + $0x308] sm:$0xff]  ;;  %v2923_v2 = vld [vmem:[%s21884_s8 + $0x2e0] sm:$0xff] }
 0x232   : > { %3292 = vmatpush1.msra.mxu1 %v2847_v55  ;;  %3375 = vmatpush1.msra.mxu0 %v2963_v43  ;;  %v3044_v46 = vld [vmem:[%s21884_s8 + $0x6a8] sm:$0xff]  ;;  %v3039_v44 = vld [vmem:[%s21884_s8 + $0x680] sm:$0xff] }
 0x233   : > { %3293 = vmatprep.subr.mxu1 %v2844_v34  ;;  %3376 = vmatprep.subr.mxu0 %v2960_v52  ;;  %v2924_v14 = vld [vmem:[%s21884_s8 + $0x2e8] sm:$0xff]  ;;  %v2919_v45 = vld [vmem:[%s21884_s8 + $0x2c0] sm:$0xff] }
 0x234   : > { %3294 = vmatpush1.msra.mxu1 %v2843_v35  ;;  %3377 = vmatpush1.msra.mxu0 %v2959_v32  ;;  %v3040_v28 = vld [vmem:[%s21884_s8 + $0x688] sm:$0xff]  ;;  %v3035_v21 = vld [vmem:[%s21884_s8 + $0x660] sm:$0xff] }
 0x235   : > { %3295 = vmatprep.subr.mxu1 %v2840_v33  ;;  %3378 = vmatprep.subr.mxu0 %v3084_v18  ;;  %v2920_v10 = vld [vmem:[%s21884_s8 + $0x2c8] sm:$0xff]  ;;  %v2915_v9 = vld [vmem:[%s21884_s8 + $0x2a0] sm:$0xff] }
 0x236   : > { %3296 = vmatpush1.msra.mxu1 %v2839_v8  ;;  %3379 = vmatpush2.msra.mxu0 %v3083_v19  ;;  %v3036_v7 = vld [vmem:[%s21884_s8 + $0x668] sm:$0xff]  ;;  %v3031_v3 = vld [vmem:[%s21884_s8 + $0x640] sm:$0xff] }
 0x237   : > { %3297 = vmatprep.subr.mxu1 %v2836_v29  ;;  %3380 = vmatprep.subr.mxu0 %v3080_v1  ;;  %v2916_v11 = vld [vmem:[%s21884_s8 + $0x2a8] sm:$0xff]  ;;  %v2911_v34 = vld [vmem:[%s21884_s8 + $0x280] sm:$0xff] }
 0x238   : > { %3298 = vmatpush1.msra.mxu1 %v2835_v30  ;;  %3381 = vmatpush2.msra.mxu0 %v3079_v12  ;;  %v3032_v38 = vld [vmem:[%s21884_s8 + $0x648] sm:$0xff]  ;;  %v3027_v52 = vld [vmem:[%s21884_s8 + $0x620] sm:$0xff] }
 0x239   : > { %3299 = vmatprep.subr.mxu1 %v2832_v5  ;;  %3382 = vmatprep.subr.mxu0 %v3076_v49  ;;  %v2912_v55 = vld [vmem:[%s21884_s8 + $0x288] sm:$0xff]  ;;  %v2907_v33 = vld [vmem:[%s21884_s8 + $0x260] sm:$0xff] }
 0x23a   : > { %3300 = vmatpush1.msra.mxu1 %v2831_v51  ;;  %3383 = vmatpush2.msra.mxu0 %v3075_v31  ;;  %v3028_v43 = vld [vmem:[%s21884_s8 + $0x628] sm:$0xff]  ;;  %v3023_v18 = vld [vmem:[%s21884_s8 + $0x600] sm:$0xff] }
 0x23b   : > { %3301 = vmatprep.subr.mxu1 %v2956_v22  ;;  %3384 = vmatprep.subr.mxu0 %v3072_v25  ;;  %v2908_v35 = vld [vmem:[%s21884_s8 + $0x268] sm:$0xff]  ;;  %v2903_v29 = vld [vmem:[%s21884_s8 + $0x240] sm:$0xff] }
 0x23c   : > { %3302 = vmatpush2.msra.mxu1 %v2955_v37  ;;  %3385 = vmatpush2.msra.mxu0 %v3071_v16  ;;  %v3024_v32 = vld [vmem:[%s21884_s8 + $0x608] sm:$0xff]  ;;  %v2899_v30 = vld [vmem:[%s21884_s8 + $0x220] sm:$0xff] }
 0x23d   : > { %3303 = vmatprep.subr.mxu1 %v2952_v23  ;;  %3386 = vmatprep.subr.mxu0 %v3068_v53  ;;  %v2904_v8 = vld [vmem:[%s21884_s8 + $0x248] sm:$0xff]  ;;  %v2895_v5 = vld [vmem:[%s21884_s8 + $0x200] sm:$0xff] }
 0x23e   : > { %3304 = vmatpush2.msra.mxu1 %v2951_v26  ;;  %3387 = vmatpush2.msra.mxu0 %v3067_v50  ;;  %v3260_v19 = vld [vmem:[%s21884_s8 + $0xd68] sm:$0xff]  ;;  %v3259_v22 = vld [vmem:[%s21884_s8 + $0xd60] sm:$0xff] }
 0x23f   : > { %3305 = vmatprep.subr.mxu1 %v2948_v60  ;;  %3388 = vmatprep.subr.mxu0 %v3064_v61  ;;  %v2900_v1 = vld [vmem:[%s21884_s8 + $0x228] sm:$0xff]  ;;  %v3255_v16 = vld [vmem:[%s21884_s8 + $0xd40] sm:$0xff] }
 0x240   : > { %3306 = vmatpush2.msra.mxu1 %v2947_v40  ;;  %3389 = vmatpush2.msra.mxu0 %v3063_v62  ;;  %v2896_v12 = vld [vmem:[%s21884_s8 + $0x208] sm:$0xff]  ;;  %v3147_v26 = vld [vmem:[%s21884_s8 + $0x9e0] sm:$0xff] }
 0x241   : > { %3307 = vmatprep.subr.mxu1 %v2944_v6  ;;  %3390 = vmatprep.subr.mxu0 %v3060_v0  ;;  %v3148_v49 = vld [vmem:[%s21884_s8 + $0x9e8] sm:$0xff]  ;;  %v3251_v50 = vld [vmem:[%s21884_s8 + $0xd20] sm:$0xff] }
 0x242   : > { %3308 = vmatpush2.msra.mxu1 %v2943_v17  ;;  %3391 = vmatpush2.msra.mxu0 %v3059_v13  ;;  %v3256_v25 = vld [vmem:[%s21884_s8 + $0xd48] sm:$0xff]  ;;  %v3143_v40 = vld [vmem:[%s21884_s8 + $0x9c0] sm:$0xff] }
 0x243   : > { %3309 = vmatprep.subr.mxu1 %v2940_v59  ;;  %3392 = vmatprep.subr.mxu0 %v3056_v56  ;;  %v3252_v23 = vld [vmem:[%s21884_s8 + $0xd28] sm:$0xff]  ;;  %v3247_v62 = vld [vmem:[%s21884_s8 + $0xd00] sm:$0xff] }
 0x244   : > { %3310 = vmatpush2.msra.mxu1 %v2939_v20  ;;  %3393 = vmatpush2.msra.mxu0 %v3055_v48  ;;  %v3144_v60 = vld [vmem:[%s21884_s8 + $0x9c8] sm:$0xff]  ;;  %v3139_v17 = vld [vmem:[%s21884_s8 + $0x9a0] sm:$0xff] }
 0x245   : > { %3311 = vmatprep.subr.mxu1 %v2936_v57  ;;  %3394 = vmatprep.subr.mxu0 %v3052_v39  ;;  %v3248_v61 = vld [vmem:[%s21884_s8 + $0xd08] sm:$0xff]  ;;  %v3243_v13 = vld [vmem:[%s21884_s8 + $0xce0] sm:$0xff] }
 0x246   : > { %3312 = vmatpush2.msra.mxu1 %v2935_v42  ;;  %3395 = vmatpush2.msra.mxu0 %v3051_v36  ;;  %v3140_v6 = vld [vmem:[%s21884_s8 + $0x9a8] sm:$0xff]  ;;  %v3135_v20 = vld [vmem:[%s21884_s8 + $0x980] sm:$0xff] }
 0x247   : > { %3313 = vmatprep.subr.mxu1 %v2932_v27  ;;  %3396 = vmatprep.subr.mxu0 %v3048_v54  ;;  %v3244_v0 = vld [vmem:[%s21884_s8 + $0xce8] sm:$0xff]  ;;  %v3239_v48 = vld [vmem:[%s21884_s8 + $0xcc0] sm:$0xff] }
 0x248   : > { %3314 = vmatpush2.msra.mxu1 %v2931_v63  ;;  %3397 = vmatpush2.msra.mxu0 %v3047_v41  ;;  %v3136_v59 = vld [vmem:[%s21884_s8 + $0x988] sm:$0xff]  ;;  %v3131_v42 = vld [vmem:[%s21884_s8 + $0x960] sm:$0xff] }
 0x249   : > { %3315 = vmatprep.subr.mxu1 %v2928_v58  ;;  %3398 = vmatprep.subr.mxu0 %v3044_v46  ;;  %v3240_v56 = vld [vmem:[%s21884_s8 + $0xcc8] sm:$0xff]  ;;  %v3235_v36 = vld [vmem:[%s21884_s8 + $0xca0] sm:$0xff] }
 0x24a   : > { %3316 = vmatpush2.msra.mxu1 %v2927_v24  ;;  %3399 = vmatpush2.msra.mxu0 %v3043_v15  ;;  %v3132_v57 = vld [vmem:[%s21884_s8 + $0x968] sm:$0xff]  ;;  %v3127_v63 = vld [vmem:[%s21884_s8 + $0x940] sm:$0xff] }
 0x24b   : > { %3317 = vmatprep.subr.mxu1 %v2924_v14  ;;  %3400 = vmatprep.subr.mxu0 %v3040_v28  ;;  %v3236_v39 = vld [vmem:[%s21884_s8 + $0xca8] sm:$0xff]  ;;  %v3231_v41 = vld [vmem:[%s21884_s8 + $0xc80] sm:$0xff] }
 0x24c   : > { %3318 = vmatpush2.msra.mxu1 %v2923_v2  ;;  %3401 = vmatpush2.msra.mxu0 %v3039_v44  ;;  %v3128_v27 = vld [vmem:[%s21884_s8 + $0x948] sm:$0xff]  ;;  %v3123_v15 = vld [vmem:[%s21884_s8 + $0x920] sm:$0xff] }
 0x24d   : > { %3319 = vmatprep.subr.mxu1 %v2920_v10  ;;  %3402 = vmatprep.subr.mxu0 %v3036_v7  ;;  %v3232_v54 = vld [vmem:[%s21884_s8 + $0xc88] sm:$0xff]  ;;  %v3227_v14 = vld [vmem:[%s21884_s8 + $0xc60] sm:$0xff] }
 0x24e   : > { %3320 = vmatpush2.msra.mxu1 %v2919_v45  ;;  %3403 = vmatpush2.msra.mxu0 %v3035_v21  ;;  %v3124_v46 = vld [vmem:[%s21884_s8 + $0x928] sm:$0xff]  ;;  %v3119_v7 = vld [vmem:[%s21884_s8 + $0x900] sm:$0xff] }
 0x24f   : > { %3321 = vmatprep.subr.mxu1 %v2916_v11  ;;  %3404 = vmatprep.subr.mxu0 %v3032_v38  ;;  %v3228_v24 = vld [vmem:[%s21884_s8 + $0xc68] sm:$0xff]  ;;  %v3223_v45 = vld [vmem:[%s21884_s8 + $0xc40] sm:$0xff] }
 0x250   : > { %3322 = vmatpush2.msra.mxu1 %v2915_v9  ;;  %3405 = vmatpush2.msra.mxu0 %v3031_v3  ;;  %v3120_v2 = vld [vmem:[%s21884_s8 + $0x908] sm:$0xff]  ;;  %v3115_v9 = vld [vmem:[%s21884_s8 + $0x8e0] sm:$0xff] }
 0x251   : > { %3323 = vmatprep.subr.mxu1 %v2912_v55  ;;  %3406 = vmatprep.subr.mxu0 %v3028_v43  ;;  %v3224_v44 = vld [vmem:[%s21884_s8 + $0xc48] sm:$0xff]  ;;  %v3219_v55 = vld [vmem:[%s21884_s8 + $0xc20] sm:$0xff] }
 0x252   : > { %3324 = vmatpush2.msra.mxu1 %v2911_v34  ;;  %3407 = vmatpush2.msra.mxu0 %v3027_v52  ;;  %v3116_v21 = vld [vmem:[%s21884_s8 + $0x8e8] sm:$0xff]  ;;  %v3111_v52 = vld [vmem:[%s21884_s8 + $0x8c0] sm:$0xff] }
 0x253   : > { %3325 = vmatprep.subr.mxu1 %v2908_v35  ;;  %3408 = vmatprep.subr.mxu0 %v3024_v32  ;;  %v3220_v11 = vld [vmem:[%s21884_s8 + $0xc28] sm:$0xff]  ;;  %v3215_v35 = vld [vmem:[%s21884_s8 + $0xc00] sm:$0xff] }
 0x254   : > { %3326 = vmatpush2.msra.mxu1 %v2907_v33  ;;  %3409 = vmatpush2.msra.mxu0 %v3023_v18  ;;  %v3112_v43 = vld [vmem:[%s21884_s8 + $0x8c8] sm:$0xff]  ;;  %v2894_v18 = vld [vmem:[%s21884_s8 + $0x1f8] sm:$0xff] }
 0x255   : > { %3327 = vmatprep.subr.mxu1 %v2904_v8  ;;  %3508 = vmatprep.subr.mxu0 %v3260_v19  ;;  %v3216_v34 = vld [vmem:[%s21884_s8 + $0xc08] sm:$0xff]  ;;  %v3107_v8 = vld [vmem:[%s21884_s8 + $0x8a0] sm:$0xff]  ;;  %v2893_v19 = vld [vmem:[%s21884_s8 + $0x1f0] sm:$0xff] }
 0x256   : > { %3328 = vmatpush2.msra.mxu1 %v2903_v29  ;;  %v3108_v32 = vld [vmem:[%s21884_s8 + $0x8a8] sm:$0xff] }
 0x257   : > { %3329 = vmatprep.subr.mxu1 %v2900_v1  ;;  %v3104_v29 = vld [vmem:[%s21884_s8 + $0x888] sm:$0xff]  ;;  %v2890_v1 = vld [vmem:[%s21884_s8 + $0x1d8] sm:$0xff] }
 0x258   : > { %3330 = vmatpush2.msra.mxu1 %v2899_v30  ;;  %v3103_v30 = vld [vmem:[%s21884_s8 + $0x880] sm:$0xff] }
 0x259   : > { %3331 = vmatprep.subr.mxu1 %v2896_v12  ;;  %v2889_v12 = vld [vmem:[%s21884_s8 + $0x1d0] sm:$0xff] }
 0x25a   : > { %3332 = vmatpush2.msra.mxu1 %v2895_v5  ;;  %v3100_v5 = vld [vmem:[%s21884_s8 + $0x868] sm:$0xff] }
 0x25b   : > { %3423 = vmatprep.subr.mxu1 %v3148_v49  ;;  %v2886_v49 = vld [vmem:[%s21884_s8 + $0x1b8] sm:$0xff] }
 0x2c5   : > { %v17151_v51 = vpop.f32.mrf.mxu0 }
 0x2c7   : > { %v17153_v31 = vpop.f32.mrf.mxu0 }
 0x2c8   : > { %3410 = vmatprep.mubr.f32.mxu0 %v17153_v31 }
 0x2c9   : > { %v17162_v37 = vpop.f32.mrf.mxu1  ;;  %3411 = vmatmul.mubr.f32.vlgmr.msra.gmra.mxu0 %v17151_v51  ;;  %v17241_v58 = vpop.f32.mrf.mxu0 }
 0x2ca   : > { %3509 = vmatpush1.msra.mxu0 %v3259_v22  ;;  %v3099_v22 = vld [vmem:[%s21884_s8 + $0x860] sm:$0xff] }
 0x2cb   : > { %3510 = vmatprep.subr.mxu0 %v3256_v25  ;;  %v17171_v53 = vpop.f32.mrf.mxu1  ;;  %v17263_v10 = vpop.f32.mrf.mxu0  ;;  %v2885_v25 = vld [vmem:[%s21884_s8 + $0x1b0] sm:$0xff] }
 0x2cc   : > { %3511 = vmatpush1.msra.mxu0 %v3255_v16  ;;  %3333 = vmatprep.mubr.f32.mxu1 %v17171_v53  ;;  %v3096_v16 = vld [vmem:[%s21884_s8 + $0x848] sm:$0xff] }
 0x2cd   : > { %3512 = vmatprep.subr.mxu0 %v3252_v23  ;;  %3334 = vmatmul.mubr.f32.vlgmr.msra.gmra.mxu1 %v17162_v37  ;;  %v17255_v28 = vpop.f32.mrf.mxu1  ;;  %v2882_v23 = vld [vmem:[%s21884_s8 + $0x198] sm:$0xff] }
 0x2ce   : > { %3424 = vmatpush1.msra.mxu1 %v3147_v26  ;;  %3513 = vmatpush1.msra.mxu0 %v3251_v50  ;;  %v3095_v26 = vld [vmem:[%s21884_s8 + $0x840] sm:$0xff]  ;;  %v2881_v50 = vld [vmem:[%s21884_s8 + $0x190] sm:$0xff] }
 0x2cf   : > { %3425 = vmatprep.subr.mxu1 %v3144_v60  ;;  %3514 = vmatprep.subr.mxu0 %v3248_v61  ;;  %v17278_v38 = vpop.f32.mrf.mxu1  ;;  %v3092_v60 = vld [vmem:[%s21884_s8 + $0x828] sm:$0xff]  ;;  %v2878_v61 = vld [vmem:[%s21884_s8 + $0x178] sm:$0xff] }
 0x2d0   : > { %3426 = vmatpush1.msra.mxu1 %v3143_v40  ;;  %3515 = vmatpush1.msra.mxu0 %v3247_v62  ;;  %v3091_v40 = vld [vmem:[%s21884_s8 + $0x820] sm:$0xff]  ;;  %v2877_v62 = vld [vmem:[%s21884_s8 + $0x170] sm:$0xff] }
 0x2d1   : > { %3427 = vmatprep.subr.mxu1 %v3140_v6  ;;  %3516 = vmatprep.subr.mxu0 %v3244_v0  ;;  %v3088_v6 = vld [vmem:[%s21884_s8 + $0x808] sm:$0xff]  ;;  %v3087_v0 = vld [vmem:[%s21884_s8 + $0x800] sm:$0xff] }
 0x2d2   : > { %3428 = vmatpush1.msra.mxu1 %v3139_v17  ;;  %3517 = vmatpush1.msra.mxu0 %v3243_v13  ;;  %v17283_v3 = vpop.f32.mrf.mxu0  ;;  %v2873_v17 = vld [vmem:[%s21884_s8 + $0x150] sm:$0xff]  ;;  %v3212_v13 = vld [vmem:[%s21884_s8 + $0xbe8] sm:$0xff] }
 0x2d3   : > { %3429 = vmatprep.subr.mxu1 %v3136_v59  ;;  %3518 = vmatprep.subr.mxu0 %v3240_v56  ;;  %v2870_v59 = vld [vmem:[%s21884_s8 + $0x138] sm:$0xff]  ;;  %v3211_v56 = vld [vmem:[%s21884_s8 + $0xbe0] sm:$0xff] }
 0x2d4   : > { %3430 = vmatpush1.msra.mxu1 %v3135_v20  ;;  %3519 = vmatpush1.msra.mxu0 %v3239_v48  ;;  %v17306_v33 = vpop.f32.mrf.mxu0  ;;  %v2869_v20 = vld [vmem:[%s21884_s8 + $0x130] sm:$0xff]  ;;  %v3208_v48 = vld [vmem:[%s21884_s8 + $0xbc8] sm:$0xff] }
 0x2d5   : > { %3431 = vmatprep.subr.mxu1 %v3132_v57  ;;  %3520 = vmatprep.subr.mxu0 %v3236_v39  ;;  %v2866_v57 = vld [vmem:[%s21884_s8 + $0x118] sm:$0xff]  ;;  %v3207_v39 = vld [vmem:[%s21884_s8 + $0xbc0] sm:$0xff] }
 0x2d6   : > { %3432 = vmatpush1.msra.mxu1 %v3131_v42  ;;  %3521 = vmatpush1.msra.mxu0 %v3235_v36  ;;  %v2865_v42 = vld [vmem:[%s21884_s8 + $0x110] sm:$0xff]  ;;  %v3204_v36 = vld [vmem:[%s21884_s8 + $0xba8] sm:$0xff] }
 0x2d7   : > { %3433 = vmatprep.subr.mxu1 %v3128_v27  ;;  %3522 = vmatprep.subr.mxu0 %v3232_v54  ;;  %v2862_v27 = vld [vmem:[%s21884_s8 + $0xf8] sm:$0xff]  ;;  %v3203_v54 = vld [vmem:[%s21884_s8 + $0xba0] sm:$0xff] }
 0x2d8   : > { %3434 = vmatpush1.msra.mxu1 %v3127_v63  ;;  %3523 = vmatpush1.msra.mxu0 %v3231_v41  ;;  %v2861_v63 = vld [vmem:[%s21884_s8 + $0xf0] sm:$0xff]  ;;  %v3200_v41 = vld [vmem:[%s21884_s8 + $0xb88] sm:$0xff] }
 0x2d9   : > { %3435 = vmatprep.subr.mxu1 %v3124_v46  ;;  %3524 = vmatprep.subr.mxu0 %v3228_v24  ;;  %v2858_v46 = vld [vmem:[%s21884_s8 + $0xd8] sm:$0xff]  ;;  %v3199_v24 = vld [vmem:[%s21884_s8 + $0xb80] sm:$0xff] }
 0x2da   : > { %3436 = vmatpush1.msra.mxu1 %v3123_v15  ;;  %3525 = vmatpush1.msra.mxu0 %v3227_v14  ;;  %v2857_v15 = vld [vmem:[%s21884_s8 + $0xd0] sm:$0xff]  ;;  %v3196_v14 = vld [vmem:[%s21884_s8 + $0xb68] sm:$0xff] }
 0x2db   : > { %3437 = vmatprep.subr.mxu1 %v3120_v2  ;;  %3526 = vmatprep.subr.mxu0 %v3224_v44  ;;  %v2854_v2 = vld [vmem:[%s21884_s8 + $0xb8] sm:$0xff]  ;;  %v3195_v44 = vld [vmem:[%s21884_s8 + $0xb60] sm:$0xff] }
 0x2dc   : > { %3416 = vmatprep.mubr.f32.mxu0 %v17263_v10  ;;  %3438 = vmatpush1.msra.mxu1 %v3119_v7  ;;  %v2853_v7 = vld [vmem:[%s21884_s8 + $0xb0] sm:$0xff] }
 0x2dd   : > { %3527 = vmatpush1.msra.mxu0 %v3223_v45  ;;  %3439 = vmatprep.subr.mxu1 %v3116_v21  ;;  %v3192_v45 = vld [vmem:[%s21884_s8 + $0xb48] sm:$0xff]  ;;  %v2850_v21 = vld [vmem:[%s21884_s8 + $0x98] sm:$0xff] }
 0x2de   : > { %3417 = vmatmul.mubr.f32.gmra.mxu0 %v17241_v58  ;;  %3528 = vmatprep.subr.mxu0 %v3220_v11  ;;  %v3191_v11 = vld [vmem:[%s21884_s8 + $0xb40] sm:$0xff] }
 0x2df   : > { %3339 = vmatprep.mubr.f32.mxu1 %v17278_v38  ;;  %3440 = vmatpush1.msra.mxu1 %v3115_v9  ;;  %v2849_v9 = vld [vmem:[%s21884_s8 + $0x90] sm:$0xff] }
 0x2e0   : > { %3529 = vmatpush1.msra.mxu0 %v3219_v55  ;;  %3340 = vmatmul.mubr.f32.gmra.mxu1 %v17255_v28  ;;  %v3188_v55 = vld [vmem:[%s21884_s8 + $0xb28] sm:$0xff] }
 0x2e1   : > { %3441 = vmatprep.subr.mxu1 %v3112_v43  ;;  %3530 = vmatprep.subr.mxu0 %v3216_v34  ;;  %v2846_v43 = vld [vmem:[%s21884_s8 + $0x78] sm:$0xff]  ;;  %v3187_v34 = vld [vmem:[%s21884_s8 + $0xb20] sm:$0xff] }
 0x2e2   : > { %3442 = vmatpush1.msra.mxu1 %v3111_v52  ;;  %3531 = vmatpush1.msra.mxu0 %v3215_v35  ;;  %v2845_v52 = vld [vmem:[%s21884_s8 + $0x70] sm:$0xff]  ;;  %v3184_v35 = vld [vmem:[%s21884_s8 + $0xb08] sm:$0xff] }
 0x2e3   : > { %3564 = vmatprep.mubr.f32.mxu0 %v15712_v47  ;;  %3443 = vmatprep.subr.mxu1 %v3108_v32  ;;  %v2842_v32 = vld [vmem:[%s21884_s8 + $0x58] sm:$0xff] }
 0x2e4   : > { %12338 = vmatmul.mubr.msk.f32.vlgmr.msra.gmra.mxu0 %vm2413_vm5, %v17306_v33  ;;  %3577 = vmatprep.subr.mxu0 %v2894_v18  ;;  %v3183_v18 = vld [vmem:[%s21884_s8 + $0xb00] sm:$0xff] }
 0x2e5   : > { %3444 = vmatpush1.msra.mxu1 %v3107_v8  ;;  %3578 = vmatpush1.msra.mxu0 %v2893_v19  ;;  %v2841_v8 = vld [vmem:[%s21884_s8 + $0x50] sm:$0xff]  ;;  %v3180_v19 = vld [vmem:[%s21884_s8 + $0xae8] sm:$0xff] }
 0x2e6   : > { %3445 = vmatprep.subr.mxu1 %v3104_v29  ;;  %3579 = vmatprep.subr.mxu0 %v2890_v1  ;;  %v2838_v29 = vld [vmem:[%s21884_s8 + $0x38] sm:$0xff]  ;;  %v3179_v1 = vld [vmem:[%s21884_s8 + $0xae0] sm:$0xff] }
 0x2e7   : > { %3446 = vmatpush1.msra.mxu1 %v3103_v30  ;;  %3570 = vmatprep.mubr.f32.mxu0 %v15712_v47  ;;  %v2837_v30 = vld [vmem:[%s21884_s8 + $0x30] sm:$0xff] }
 0x2e8   : > { %3580 = vmatpush1.msra.mxu0 %v2889_v12  ;;  %3447 = vmatprep.subr.mxu1 %v3100_v5  ;;  %v3176_v12 = vld [vmem:[%s21884_s8 + $0xac8] sm:$0xff]  ;;  %v2834_v5 = vld [vmem:[%s21884_s8 + $0x18] sm:$0xff] }
 0x2e9   : > { %12339 = vmatmul.mubr.msk.f32.gmra.mxu0 %vm2413_vm5, %v17283_v3  ;;  %3581 = vmatprep.subr.mxu0 %v2886_v49  ;;  %v3175_v49 = vld [vmem:[%s21884_s8 + $0xac0] sm:$0xff] }
 0x2ea   : > { %3448 = vmatpush1.msra.mxu1 %v3099_v22  ;;  %3582 = vmatpush1.msra.mxu0 %v2885_v25  ;;  %v2833_v22 = vld [vmem:[%s21884_s8 + $0x10] sm:$0xff]  ;;  %v3172_v25 = vld [vmem:[%s21884_s8 + $0xaa8] sm:$0xff] }
 0x2eb   : > { %3641 = vmatprep.mubr.f32.mxu0 %v17171_v53  ;;  %3449 = vmatprep.subr.mxu1 %v3096_v16  ;;  %v2874_v53 = vld [vmem:[%s21884_s8 + $0x158] sm:$0xff] }
 0x2ec   : > { %3583 = vmatprep.subr.mxu0 %v2882_v23  ;;  %3450 = vmatpush1.msra.mxu1 %v3095_v26  ;;  %v2958_v16 = vld [vmem:[%s21884_s8 + $0x3f8] sm:$0xff]  ;;  %v3171_v23 = vld [vmem:[%s21884_s8 + $0xaa0] sm:$0xff]  ;;  %v2957_v26 = vld [vmem:[%s21884_s8 + $0x3f0] sm:$0xff] }
 0x2ed   : > { %3584 = vmatpush1.msra.mxu0 %v2881_v50  ;;  %3451 = vmatprep.subr.mxu1 %v3092_v60  ;;  %v3168_v50 = vld [vmem:[%s21884_s8 + $0xa88] sm:$0xff]  ;;  %v2954_v60 = vld [vmem:[%s21884_s8 + $0x3d8] sm:$0xff] }
 0x2ee   : > { %3585 = vmatprep.subr.mxu0 %v2878_v61  ;;  %3452 = vmatpush1.msra.mxu1 %v3091_v40  ;;  %v3167_v61 = vld [vmem:[%s21884_s8 + $0xa80] sm:$0xff]  ;;  %v2953_v40 = vld [vmem:[%s21884_s8 + $0x3d0] sm:$0xff] }
 0x2ef   : > { %3586 = vmatpush1.msra.mxu0 %v2877_v62  ;;  %3453 = vmatprep.subr.mxu1 %v3088_v6  ;;  %v3164_v62 = vld [vmem:[%s21884_s8 + $0xa68] sm:$0xff]  ;;  %v17531_v6 = vpop.f32.mrf.mxu1 }
 0x2f0   : > { %3587 = vmatprep.subr.mxu0 %v2874_v53  ;;  %3454 = vmatpush1.msra.mxu1 %v3087_v0  ;;  %v2950_v53 = vld [vmem:[%s21884_s8 + $0x3b8] sm:$0xff]  ;;  %v3163_v0 = vld [vmem:[%s21884_s8 + $0xa60] sm:$0xff] }
 0x2f1   : > { %3588 = vmatpush1.msra.mxu0 %v2873_v17  ;;  %3455 = vmatprep.subr.mxu1 %v3212_v13  ;;  %v2949_v17 = vld [vmem:[%s21884_s8 + $0x3b0] sm:$0xff]  ;;  %v3160_v13 = vld [vmem:[%s21884_s8 + $0xa48] sm:$0xff] }
 0x2f2   : > { %3589 = vmatprep.subr.mxu0 %v2870_v59  ;;  %3456 = vmatpush2.msra.mxu1 %v3211_v56  ;;  %v2946_v59 = vld [vmem:[%s21884_s8 + $0x398] sm:$0xff]  ;;  %v3159_v56 = vld [vmem:[%s21884_s8 + $0xa40] sm:$0xff] }
 0x2f3   : > { %3590 = vmatpush1.msra.mxu0 %v2869_v20  ;;  %3457 = vmatprep.subr.mxu1 %v3208_v48  ;;  %v2945_v20 = vld [vmem:[%s21884_s8 + $0x390] sm:$0xff]  ;;  %v3156_v48 = vld [vmem:[%s21884_s8 + $0xa28] sm:$0xff] }
 0x2f4   : > { %3591 = vmatprep.subr.mxu0 %v2866_v57  ;;  %3458 = vmatpush2.msra.mxu1 %v3207_v39  ;;  %v17557_v57 = vpop.f32.mrf.mxu1  ;;  %v2942_v39 = vld [vmem:[%s21884_s8 + $0x378] sm:$0xff] }
 0x2f5   : > { %3592 = vmatpush1.msra.mxu0 %v2865_v42  ;;  %3459 = vmatprep.subr.mxu1 %v3204_v36  ;;  %v3155_v42 = vld [vmem:[%s21884_s8 + $0xa20] sm:$0xff]  ;;  %v2941_v36 = vld [vmem:[%s21884_s8 + $0x370] sm:$0xff] }
 0x2f6   : > { %3593 = vmatprep.subr.mxu0 %v2862_v27  ;;  %3460 = vmatpush2.msra.mxu1 %v3203_v54  ;;  %v3152_v27 = vld [vmem:[%s21884_s8 + $0xa08] sm:$0xff]  ;;  %v2938_v54 = vld [vmem:[%s21884_s8 + $0x358] sm:$0xff] }
 0x2f7   : > { %3594 = vmatpush1.msra.mxu0 %v2861_v63  ;;  %3461 = vmatprep.subr.mxu1 %v3200_v41  ;;  %v3151_v63 = vld [vmem:[%s21884_s8 + $0xa00] sm:$0xff]  ;;  %v2937_v41 = vld [vmem:[%s21884_s8 + $0x350] sm:$0xff] }
 0x2f8   : > { %3595 = vmatprep.subr.mxu0 %v2858_v46  ;;  %3462 = vmatpush2.msra.mxu1 %v3199_v24  ;;  %v17580_v46 = vpop.f32.mrf.mxu1  ;;  %v2934_v24 = vld [vmem:[%s21884_s8 + $0x338] sm:$0xff] }
 0x2f9   : > { %3596 = vmatpush1.msra.mxu0 %v2857_v15  ;;  %3463 = vmatprep.subr.mxu1 %v3196_v14  ;;  %v3022_v15 = vld [vmem:[%s21884_s8 + $0x5f8] sm:$0xff]  ;;  %v2933_v14 = vld [vmem:[%s21884_s8 + $0x330] sm:$0xff] }
 0x2fa   : > { %3597 = vmatprep.subr.mxu0 %v2854_v2  ;;  %3464 = vmatpush2.msra.mxu1 %v3195_v44  ;;  %v3021_v2 = vld [vmem:[%s21884_s8 + $0x5f0] sm:$0xff]  ;;  %v2930_v44 = vld [vmem:[%s21884_s8 + $0x318] sm:$0xff] }
 0x2fb   : > { %3598 = vmatpush1.msra.mxu0 %v2853_v7  ;;  %3465 = vmatprep.subr.mxu1 %v3192_v45  ;;  %v17599_v7 = vpop.f32.mrf.mxu1  ;;  %v3018_v45 = vld [vmem:[%s21884_s8 + $0x5d8] sm:$0xff] }
 0x2fc   : > { %3599 = vmatprep.subr.mxu0 %v2850_v21  ;;  %3466 = vmatpush2.msra.mxu1 %v3191_v11  ;;  %v2929_v21 = vld [vmem:[%s21884_s8 + $0x310] sm:$0xff] }
 0x2fd   : > { %3600 = vmatpush1.msra.mxu0 %v2849_v9  ;;  %3467 = vmatprep.subr.mxu1 %v3188_v55  ;;  %v3017_v11 = vld [vmem:[%s21884_s8 + $0x5d0] sm:$0xff]  ;;  %v2926_v9 = vld [vmem:[%s21884_s8 + $0x2f8] sm:$0xff] }
 0x2fe   : > { %3601 = vmatprep.subr.mxu0 %v2846_v43  ;;  %3468 = vmatpush2.msra.mxu1 %v3187_v34  ;;  %v3014_v55 = vld [vmem:[%s21884_s8 + $0x5b8] sm:$0xff]  ;;  %v2925_v43 = vld [vmem:[%s21884_s8 + $0x2f0] sm:$0xff] }
 0x2ff   : > { %3602 = vmatpush1.msra.mxu0 %v2845_v52  ;;  %3469 = vmatprep.subr.mxu1 %v3184_v35  ;;  %v3013_v34 = vld [vmem:[%s21884_s8 + $0x5b0] sm:$0xff]  ;;  %v2922_v52 = vld [vmem:[%s21884_s8 + $0x2d8] sm:$0xff] }
 0x300   : > { %3603 = vmatprep.subr.mxu0 %v2842_v32  ;;  %3470 = vmatpush2.msra.mxu1 %v3183_v18  ;;  %v3010_v35 = vld [vmem:[%s21884_s8 + $0x598] sm:$0xff]  ;;  %v2921_v32 = vld [vmem:[%s21884_s8 + $0x2d0] sm:$0xff] }
 0x301   : > { %3604 = vmatpush1.msra.mxu0 %v2841_v8  ;;  %3471 = vmatprep.subr.mxu1 %v3180_v19  ;;  %v3009_v18 = vld [vmem:[%s21884_s8 + $0x590] sm:$0xff]  ;;  %v2918_v8 = vld [vmem:[%s21884_s8 + $0x2b8] sm:$0xff] }
 0x302   : > { %3605 = vmatprep.subr.mxu0 %v2838_v29  ;;  %3472 = vmatpush2.msra.mxu1 %v3179_v1  ;;  %v3006_v19 = vld [vmem:[%s21884_s8 + $0x578] sm:$0xff]  ;;  %v2917_v29 = vld [vmem:[%s21884_s8 + $0x2b0] sm:$0xff] }
 0x303   : > { %3606 = vmatpush1.msra.mxu0 %v2837_v30  ;;  %3473 = vmatprep.subr.mxu1 %v3176_v12  ;;  %v3005_v1 = vld [vmem:[%s21884_s8 + $0x570] sm:$0xff]  ;;  %v3002_v30 = vld [vmem:[%s21884_s8 + $0x558] sm:$0xff] }
 0x304   : > { %3607 = vmatprep.subr.mxu0 %v2834_v5  ;;  %3474 = vmatpush2.msra.mxu1 %v3175_v49  ;;  %v2913_v12 = vld [vmem:[%s21884_s8 + $0x290] sm:$0xff]  ;;  %v2910_v49 = vld [vmem:[%s21884_s8 + $0x278] sm:$0xff] }
 0x305   : > { %3608 = vmatpush1.msra.mxu0 %v2833_v22  ;;  %3475 = vmatprep.subr.mxu1 %v3172_v25  ;;  %v3001_v5 = vld [vmem:[%s21884_s8 + $0x550] sm:$0xff]  ;;  %v2998_v22 = vld [vmem:[%s21884_s8 + $0x538] sm:$0xff] }
 0x306   : > { %3609 = vmatprep.subr.mxu0 %v2958_v16  ;;  %3476 = vmatpush2.msra.mxu1 %v3171_v23  ;;  %v2909_v25 = vld [vmem:[%s21884_s8 + $0x270] sm:$0xff]  ;;  %v2906_v23 = vld [vmem:[%s21884_s8 + $0x258] sm:$0xff] }
 0x307   : > { %3610 = vmatpush2.msra.mxu0 %v2957_v26  ;;  %3477 = vmatprep.subr.mxu1 %v3168_v50  ;;  %v2997_v16 = vld [vmem:[%s21884_s8 + $0x530] sm:$0xff]  ;;  %v2994_v26 = vld [vmem:[%s21884_s8 + $0x518] sm:$0xff] }
 0x308   : > { %3611 = vmatprep.subr.mxu0 %v2954_v60  ;;  %3478 = vmatpush2.msra.mxu1 %v3167_v61  ;;  %v2905_v50 = vld [vmem:[%s21884_s8 + $0x250] sm:$0xff]  ;;  %v2902_v61 = vld [vmem:[%s21884_s8 + $0x238] sm:$0xff] }
 0x309   : > { %3612 = vmatpush2.msra.mxu0 %v2953_v40  ;;  %3479 = vmatprep.subr.mxu1 %v3164_v62  ;;  %v2993_v60 = vld [vmem:[%s21884_s8 + $0x510] sm:$0xff]  ;;  %v2990_v40 = vld [vmem:[%s21884_s8 + $0x4f8] sm:$0xff] }
 0x30a   : > { %3613 = vmatprep.subr.mxu0 %v2950_v53  ;;  %3480 = vmatpush2.msra.mxu1 %v3163_v0  ;;  %v2901_v62 = vld [vmem:[%s21884_s8 + $0x230] sm:$0xff]  ;;  %v2898_v0 = vld [vmem:[%s21884_s8 + $0x218] sm:$0xff] }
 0x30b   : > { %3614 = vmatpush2.msra.mxu0 %v2949_v17  ;;  %3481 = vmatprep.subr.mxu1 %v3160_v13  ;;  %v2989_v53 = vld [vmem:[%s21884_s8 + $0x4f0] sm:$0xff]  ;;  %v2986_v17 = vld [vmem:[%s21884_s8 + $0x4d8] sm:$0xff] }
 0x30c   : > { %3615 = vmatprep.subr.mxu0 %v2946_v59  ;;  %3482 = vmatpush2.msra.mxu1 %v3159_v56  ;;  %v2897_v13 = vld [vmem:[%s21884_s8 + $0x210] sm:$0xff]  ;;  %v2982_v56 = vld [vmem:[%s21884_s8 + $0x4b8] sm:$0xff] }
 0x30d   : > { %3616 = vmatpush2.msra.mxu0 %v2945_v20  ;;  %3483 = vmatprep.subr.mxu1 %v3156_v48  ;;  %v2985_v59 = vld [vmem:[%s21884_s8 + $0x4d0] sm:$0xff]  ;;  %v3150_v20 = vld [vmem:[%s21884_s8 + $0x9f8] sm:$0xff] }
 0x30e   : > { %3617 = vmatprep.subr.mxu0 %v2942_v39  ;;  %3484 = vmatpush2.msra.mxu1 %v3155_v42  ;;  %v2981_v48 = vld [vmem:[%s21884_s8 + $0x4b0] sm:$0xff]  ;;  %v2978_v42 = vld [vmem:[%s21884_s8 + $0x498] sm:$0xff] }
 0x30f   : > { %3618 = vmatpush2.msra.mxu0 %v2941_v36  ;;  %3485 = vmatprep.subr.mxu1 %v3152_v27  ;;  %v3149_v39 = vld [vmem:[%s21884_s8 + $0x9f0] sm:$0xff]  ;;  %v3146_v36 = vld [vmem:[%s21884_s8 + $0x9d8] sm:$0xff] }
 0x310   : > { %3619 = vmatprep.subr.mxu0 %v2938_v54  ;;  %3486 = vmatpush2.msra.mxu1 %v3151_v63  ;;  %v2977_v27 = vld [vmem:[%s21884_s8 + $0x490] sm:$0xff]  ;;  %v2974_v54 = vld [vmem:[%s21884_s8 + $0x478] sm:$0xff] }
 0x311   : > { %3487 = vmatprep.mubr.f32.mxu1 %v17557_v57  ;;  %3620 = vmatpush2.msra.mxu0 %v2937_v41  ;;  %v2973_v63 = vld [vmem:[%s21884_s8 + $0x470] sm:$0xff] }
 0x312   : > { %3488 = vmatmul.mubr.f32.vlgmr.msra.gmra.mxu1 %v17531_v6  ;;  %3621 = vmatprep.subr.mxu0 %v2934_v24  ;;  %v3141_v41 = vld [vmem:[%s21884_s8 + $0x9b0] sm:$0xff]  ;;  %v2970_v24 = vld [vmem:[%s21884_s8 + $0x458] sm:$0xff] }
 0x313   : > { %3654 = vmatprep.subr.mxu1 %v3022_v15  ;;  %3622 = vmatpush2.msra.mxu0 %v2933_v14  ;;  %v3138_v15 = vld [vmem:[%s21884_s8 + $0x998] sm:$0xff]  ;;  %v2969_v14 = vld [vmem:[%s21884_s8 + $0x450] sm:$0xff] }
 0x314   : > { %3655 = vmatpush1.msra.mxu1 %v3021_v2  ;;  %3623 = vmatprep.subr.mxu0 %v2930_v44  ;;  %v3137_v2 = vld [vmem:[%s21884_s8 + $0x990] sm:$0xff]  ;;  %v3134_v44 = vld [vmem:[%s21884_s8 + $0x978] sm:$0xff] }
 0x315   : > { %3656 = vmatprep.subr.mxu1 %v3018_v45  ;;  %3493 = vmatprep.mubr.f32.mxu1 %v17599_v7  ;;  %v2965_v45 = vld [vmem:[%s21884_s8 + $0x430] sm:$0xff] }
 0x316   : > { %3624 = vmatpush2.msra.mxu0 %v2929_v21  ;;  %3657 = vmatpush1.msra.mxu1 %v3017_v11  ;;  %v3133_v21 = vld [vmem:[%s21884_s8 + $0x970] sm:$0xff]  ;;  %v3130_v11 = vld [vmem:[%s21884_s8 + $0x958] sm:$0xff] }
 0x317   : > { %3494 = vmatmul.mubr.f32.gmra.mxu1 %v17580_v46  ;;  %3625 = vmatprep.subr.mxu0 %v2926_v9  ;;  %v2961_v9 = vld [vmem:[%s21884_s8 + $0x410] sm:$0xff] }
 0x318   : > { %3658 = vmatprep.subr.mxu1 %v3014_v55  ;;  %3626 = vmatpush2.msra.mxu0 %v2925_v43  ;;  %v3129_v55 = vld [vmem:[%s21884_s8 + $0x950] sm:$0xff]  ;;  %v3086_v43 = vld [vmem:[%s21884_s8 + $0x7f8] sm:$0xff] }
 0x319   : > { %3659 = vmatpush1.msra.mxu1 %v3013_v34  ;;  %3718 = vmatprep.mubr.f32.mxu1 %v17153_v31  ;;  %v2914_v31 = vld [vmem:[%s21884_s8 + $0x298] sm:$0xff] }
 0x31a   : > { %3627 = vmatprep.subr.mxu0 %v2922_v52  ;;  %3660 = vmatprep.subr.mxu1 %v3010_v35  ;;  %v3126_v34 = vld [vmem:[%s21884_s8 + $0x938] sm:$0xff]  ;;  %v3085_v52 = vld [vmem:[%s21884_s8 + $0x7f0] sm:$0xff] }
 0x31b   : > { %3628 = vmatpush2.msra.mxu0 %v2921_v32  ;;  %3661 = vmatpush1.msra.mxu1 %v3009_v18  ;;  %v3125_v35 = vld [vmem:[%s21884_s8 + $0x930] sm:$0xff]  ;;  %v3082_v32 = vld [vmem:[%s21884_s8 + $0x7d8] sm:$0xff] }
 0x31c   : > { %3629 = vmatprep.subr.mxu0 %v2918_v8  ;;  %3662 = vmatprep.subr.mxu1 %v3006_v19  ;;  %v3122_v18 = vld [vmem:[%s21884_s8 + $0x918] sm:$0xff]  ;;  %v3081_v8 = vld [vmem:[%s21884_s8 + $0x7d0] sm:$0xff] }
 0x31d   : > { %3630 = vmatpush2.msra.mxu0 %v2917_v29  ;;  %3663 = vmatpush1.msra.mxu1 %v3005_v1  ;;  %v3121_v19 = vld [vmem:[%s21884_s8 + $0x910] sm:$0xff]  ;;  %v3078_v29 = vld [vmem:[%s21884_s8 + $0x7b8] sm:$0xff] }
 0x31e   : > { %3631 = vmatprep.subr.mxu0 %v2914_v31  ;;  %3664 = vmatprep.subr.mxu1 %v3002_v30  ;;  %v3118_v1 = vld [vmem:[%s21884_s8 + $0x8f8] sm:$0xff]  ;;  %v3077_v31 = vld [vmem:[%s21884_s8 + $0x7b0] sm:$0xff] }
 0x31f   : > { %3632 = vmatpush2.msra.mxu0 %v2913_v12  ;;  %3665 = vmatpush1.msra.mxu1 %v3001_v5  ;;  %v3117_v30 = vld [vmem:[%s21884_s8 + $0x8f0] sm:$0xff]  ;;  %v3074_v12 = vld [vmem:[%s21884_s8 + $0x798] sm:$0xff] }
 0x320   : > { %3633 = vmatprep.subr.mxu0 %v2910_v49  ;;  %3666 = vmatprep.subr.mxu1 %v2998_v22  ;;  %v3114_v5 = vld [vmem:[%s21884_s8 + $0x8d8] sm:$0xff]  ;;  %v3073_v49 = vld [vmem:[%s21884_s8 + $0x790] sm:$0xff] }
 0x321   : > { %3634 = vmatpush2.msra.mxu0 %v2909_v25  ;;  %3667 = vmatpush1.msra.mxu1 %v2997_v16  ;;  %v3113_v22 = vld [vmem:[%s21884_s8 + $0x8d0] sm:$0xff]  ;;  %v3070_v25 = vld [vmem:[%s21884_s8 + $0x778] sm:$0xff] }
 0x322   : > { %3635 = vmatprep.subr.mxu0 %v2906_v23  ;;  %3668 = vmatprep.subr.mxu1 %v2994_v26  ;;  %v3110_v16 = vld [vmem:[%s21884_s8 + $0x8b8] sm:$0xff]  ;;  %v3069_v23 = vld [vmem:[%s21884_s8 + $0x770] sm:$0xff] }
 0x323   : > { %3636 = vmatpush2.msra.mxu0 %v2905_v50  ;;  %3669 = vmatpush1.msra.mxu1 %v2993_v60  ;;  %v3109_v26 = vld [vmem:[%s21884_s8 + $0x8b0] sm:$0xff]  ;;  %v3066_v50 = vld [vmem:[%s21884_s8 + $0x758] sm:$0xff] }
 0x324   : > { %3637 = vmatprep.subr.mxu0 %v2902_v61  ;;  %3670 = vmatprep.subr.mxu1 %v2990_v40  ;;  %v3106_v60 = vld [vmem:[%s21884_s8 + $0x898] sm:$0xff]  ;;  %v3065_v61 = vld [vmem:[%s21884_s8 + $0x750] sm:$0xff] }
 0x325   : > { %3638 = vmatpush2.msra.mxu0 %v2901_v62  ;;  %3671 = vmatpush1.msra.mxu1 %v2989_v53  ;;  %v3105_v40 = vld [vmem:[%s21884_s8 + $0x890] sm:$0xff]  ;;  %v3062_v62 = vld [vmem:[%s21884_s8 + $0x738] sm:$0xff] }
 0x326   : > { %3639 = vmatprep.subr.mxu0 %v2898_v0  ;;  %3672 = vmatprep.subr.mxu1 %v2986_v17  ;;  %v3102_v53 = vld [vmem:[%s21884_s8 + $0x878] sm:$0xff]  ;;  %v3061_v0 = vld [vmem:[%s21884_s8 + $0x730] sm:$0xff] }
 0x327   : > { %3640 = vmatpush2.msra.mxu0 %v2897_v13  ;;  %3673 = vmatpush1.msra.mxu1 %v2985_v59  ;;  %v3101_v17 = vld [vmem:[%s21884_s8 + $0x870] sm:$0xff]  ;;  %v3058_v13 = vld [vmem:[%s21884_s8 + $0x718] sm:$0xff] }
 0x328   : > { %3642 = vmatmul.mubr.f32.vlgmr.msra.gmra.mxu0 %v17162_v37  ;;  %3674 = vmatprep.subr.mxu1 %v2982_v56  ;;  %v3145_v37 = vld [vmem:[%s21884_s8 + $0x9d0] sm:$0xff]  ;;  %v3098_v59 = vld [vmem:[%s21884_s8 + $0x858] sm:$0xff] }
 0x329   : > { %3731 = vmatprep.subr.mxu0 %v3150_v20  ;;  %3647 = vmatprep.mubr.f32.mxu0 %v17278_v38  ;;  %v3142_v38 = vld [vmem:[%s21884_s8 + $0x9b8] sm:$0xff]  ;;  %v3057_v56 = vld [vmem:[%s21884_s8 + $0x710] sm:$0xff] }
 0x32a   : > { %3675 = vmatpush1.msra.mxu1 %v2981_v48  ;;  %3732 = vmatpush1.msra.mxu0 %v3149_v39  ;;  %v3097_v20 = vld [vmem:[%s21884_s8 + $0x850] sm:$0xff]  ;;  %v3054_v48 = vld [vmem:[%s21884_s8 + $0x6f8] sm:$0xff] }
 0x32b   : > { %3676 = vmatprep.subr.mxu1 %v2978_v42  ;;  %3733 = vmatprep.subr.mxu0 %v3146_v36  ;;  %v3094_v39 = vld [vmem:[%s21884_s8 + $0x838] sm:$0xff]  ;;  %v3053_v42 = vld [vmem:[%s21884_s8 + $0x6f0] sm:$0xff] }
 0x32c   : > { %3677 = vmatpush1.msra.mxu1 %v2977_v27  ;;  %3734 = vmatpush1.msra.mxu0 %v3145_v37  ;;  %v3093_v36 = vld [vmem:[%s21884_s8 + $0x830] sm:$0xff]  ;;  %v3050_v27 = vld [vmem:[%s21884_s8 + $0x6d8] sm:$0xff] }
 0x32d   : > { %3648 = vmatmul.mubr.f32.gmra.mxu0 %v17255_v28  ;;  %3678 = vmatprep.subr.mxu1 %v2974_v54  ;;  %v2966_v28 = vld [vmem:[%s21884_s8 + $0x438] sm:$0xff]  ;;  %v3049_v54 = vld [vmem:[%s21884_s8 + $0x6d0] sm:$0xff] }
 0x32e   : > { %3735 = vmatprep.subr.mxu0 %v3142_v38  ;;  %3679 = vmatpush1.msra.mxu1 %v2973_v63  ;;  %v3090_v37 = vld [vmem:[%s21884_s8 + $0x818] sm:$0xff]  ;;  %v3089_v38 = vld [vmem:[%s21884_s8 + $0x810] sm:$0xff] }
 0x32f   : > { %3736 = vmatpush1.msra.mxu0 %v3141_v41  ;;  %3795 = vmatprep.mubr.f32.mxu0 %v17557_v57  ;;  %v2962_v57 = vld [vmem:[%s21884_s8 + $0x418] sm:$0xff] }
 0x330   : > { %3680 = vmatprep.subr.mxu1 %v2970_v24  ;;  %3737 = vmatprep.subr.mxu0 %v3138_v15  ;;  %v3046_v63 = vld [vmem:[%s21884_s8 + $0x6b8] sm:$0xff]  ;;  %v3045_v24 = vld [vmem:[%s21884_s8 + $0x6b0] sm:$0xff] }
 0x331   : > { %3681 = vmatpush1.msra.mxu1 %v2969_v14  ;;  %3738 = vmatpush1.msra.mxu0 %v3137_v2  ;;  %v3214_v41 = vld [vmem:[%s21884_s8 + $0xbf8] sm:$0xff]  ;;  %v3213_v15 = vld [vmem:[%s21884_s8 + $0xbf0] sm:$0xff] }
 0x332   : > { %3682 = vmatprep.subr.mxu1 %v2966_v28  ;;  %3739 = vmatprep.subr.mxu0 %v3134_v44  ;;  %v3042_v14 = vld [vmem:[%s21884_s8 + $0x698] sm:$0xff]  ;;  %v3041_v28 = vld [vmem:[%s21884_s8 + $0x690] sm:$0xff] }
 0x333   : > { %3683 = vmatpush1.msra.mxu1 %v2965_v45  ;;  %3740 = vmatpush1.msra.mxu0 %v3133_v21  ;;  %v3210_v2 = vld [vmem:[%s21884_s8 + $0xbd8] sm:$0xff]  ;;  %v3209_v44 = vld [vmem:[%s21884_s8 + $0xbd0] sm:$0xff] }
 0x334   : > { %3684 = vmatprep.subr.mxu1 %v2962_v57  ;;  %3741 = vmatprep.subr.mxu0 %v3130_v11  ;;  %v3038_v45 = vld [vmem:[%s21884_s8 + $0x678] sm:$0xff]  ;;  %v3037_v57 = vld [vmem:[%s21884_s8 + $0x670] sm:$0xff] }
 0x335   : > { %3685 = vmatpush1.msra.mxu1 %v2961_v9  ;;  %3742 = vmatpush1.msra.mxu0 %v3129_v55  ;;  %v3206_v21 = vld [vmem:[%s21884_s8 + $0xbb8] sm:$0xff]  ;;  %v3205_v11 = vld [vmem:[%s21884_s8 + $0xbb0] sm:$0xff] }
 0x336   : > { %3686 = vmatprep.subr.mxu1 %v3086_v43  ;;  %3743 = vmatprep.subr.mxu0 %v3126_v34  ;;  %v3034_v9 = vld [vmem:[%s21884_s8 + $0x658] sm:$0xff]  ;;  %v3033_v43 = vld [vmem:[%s21884_s8 + $0x650] sm:$0xff] }
 0x337   : > { %3687 = vmatpush2.msra.mxu1 %v3085_v52  ;;  %3744 = vmatpush1.msra.mxu0 %v3125_v35  ;;  %v3202_v55 = vld [vmem:[%s21884_s8 + $0xb98] sm:$0xff]  ;;  %v3201_v34 = vld [vmem:[%s21884_s8 + $0xb90] sm:$0xff] }
 0x338   : > { %3688 = vmatprep.subr.mxu1 %v3082_v32  ;;  %3745 = vmatprep.subr.mxu0 %v3122_v18  ;;  %v3030_v52 = vld [vmem:[%s21884_s8 + $0x638] sm:$0xff]  ;;  %v3029_v32 = vld [vmem:[%s21884_s8 + $0x630] sm:$0xff] }
 0x339   : > { %3689 = vmatpush2.msra.mxu1 %v3081_v8  ;;  %3746 = vmatpush1.msra.mxu0 %v3121_v19  ;;  %v3198_v35 = vld [vmem:[%s21884_s8 + $0xb78] sm:$0xff]  ;;  %v3197_v18 = vld [vmem:[%s21884_s8 + $0xb70] sm:$0xff] }
 0x33a   : > { %3690 = vmatprep.subr.mxu1 %v3078_v29  ;;  %3747 = vmatprep.subr.mxu0 %v3118_v1  ;;  %v3026_v8 = vld [vmem:[%s21884_s8 + $0x618] sm:$0xff]  ;;  %v3025_v29 = vld [vmem:[%s21884_s8 + $0x610] sm:$0xff] }
 0x33b   : > { %3691 = vmatpush2.msra.mxu1 %v3077_v31  ;;  %3748 = vmatpush1.msra.mxu0 %v3117_v30  ;;  %v3194_v19 = vld [vmem:[%s21884_s8 + $0xb58] sm:$0xff]  ;;  %v3193_v1 = vld [vmem:[%s21884_s8 + $0xb50] sm:$0xff] }
 0x33c   : > { %3692 = vmatprep.subr.mxu1 %v3074_v12  ;;  %3749 = vmatprep.subr.mxu0 %v3114_v5  ;;  %v3190_v31 = vld [vmem:[%s21884_s8 + $0xb38] sm:$0xff]  ;;  %v3189_v12 = vld [vmem:[%s21884_s8 + $0xb30] sm:$0xff] }
 0x33d   : > { %3693 = vmatpush2.msra.mxu1 %v3073_v49  ;;  %3750 = vmatpush1.msra.mxu0 %v3113_v22  ;;  %v3262_v30 = vld [vmem:[%s21884_s8 + $0xd78] sm:$0xff]  ;;  %v3261_v5 = vld [vmem:[%s21884_s8 + $0xd70] sm:$0xff] }
 0x33e   : > { %3694 = vmatprep.subr.mxu1 %v3070_v25  ;;  %3751 = vmatprep.subr.mxu0 %v3110_v16  ;;  %v3186_v49 = vld [vmem:[%s21884_s8 + $0xb18] sm:$0xff]  ;;  %v3185_v25 = vld [vmem:[%s21884_s8 + $0xb10] sm:$0xff] }
 0x33f   : > { %3695 = vmatpush2.msra.mxu1 %v3069_v23  ;;  %3752 = vmatpush1.msra.mxu0 %v3109_v26  ;;  %v3258_v22 = vld [vmem:[%s21884_s8 + $0xd58] sm:$0xff]  ;;  %v3181_v23 = vld [vmem:[%s21884_s8 + $0xaf0] sm:$0xff] }
 0x340   : > { %3696 = vmatprep.subr.mxu1 %v3066_v50  ;;  %3753 = vmatprep.subr.mxu0 %v3106_v60  ;;  %v3182_v16 = vld [vmem:[%s21884_s8 + $0xaf8] sm:$0xff]  ;;  %v3253_v26 = vld [vmem:[%s21884_s8 + $0xd30] sm:$0xff] }
 0x341   : > { %3697 = vmatpush2.msra.mxu1 %v3065_v61  ;;  %3754 = vmatpush1.msra.mxu0 %v3105_v40  ;;  %v3178_v50 = vld [vmem:[%s21884_s8 + $0xad8] sm:$0xff]  ;;  %v3177_v61 = vld [vmem:[%s21884_s8 + $0xad0] sm:$0xff] }
 0x342   : > { %3698 = vmatprep.subr.mxu1 %v3062_v62  ;;  %3755 = vmatprep.subr.mxu0 %v3102_v53  ;;  %v3250_v60 = vld [vmem:[%s21884_s8 + $0xd18] sm:$0xff]  ;;  %v3249_v40 = vld [vmem:[%s21884_s8 + $0xd10] sm:$0xff] }
 0x343   : > { %3699 = vmatpush2.msra.mxu1 %v3061_v0  ;;  %3756 = vmatpush1.msra.mxu0 %v3101_v17  ;;  %v3174_v62 = vld [vmem:[%s21884_s8 + $0xab8] sm:$0xff]  ;;  %v3173_v53 = vld [vmem:[%s21884_s8 + $0xab0] sm:$0xff] }
 0x344   : > { %3700 = vmatprep.subr.mxu1 %v3058_v13  ;;  %3757 = vmatprep.subr.mxu0 %v3098_v59  ;;  %v3245_v0 = vld [vmem:[%s21884_s8 + $0xcf0] sm:$0xff]  ;;  %v3170_v17 = vld [vmem:[%s21884_s8 + $0xa98] sm:$0xff] }
 0x345   : > { %3701 = vmatpush2.msra.mxu1 %v3057_v56  ;;  %3758 = vmatpush1.msra.mxu0 %v3097_v20  ;;  %v3242_v13 = vld [vmem:[%s21884_s8 + $0xcd8] sm:$0xff]  ;;  %v3169_v59 = vld [vmem:[%s21884_s8 + $0xa90] sm:$0xff] }
 0x346   : > { %3702 = vmatprep.subr.mxu1 %v3054_v48  ;;  %3759 = vmatprep.subr.mxu0 %v3094_v39  ;;  %v3241_v56 = vld [vmem:[%s21884_s8 + $0xcd0] sm:$0xff]  ;;  %v3166_v20 = vld [vmem:[%s21884_s8 + $0xa78] sm:$0xff] }
 0x347   : > { %3703 = vmatpush2.msra.mxu1 %v3053_v42  ;;  %3760 = vmatpush1.msra.mxu0 %v3093_v36  ;;  %v3238_v48 = vld [vmem:[%s21884_s8 + $0xcb8] sm:$0xff]  ;;  %v3165_v39 = vld [vmem:[%s21884_s8 + $0xa70] sm:$0xff] }
 0x348   : > { %3704 = vmatprep.subr.mxu1 %v3050_v27  ;;  %3761 = vmatprep.subr.mxu0 %v3090_v37  ;;  %v3237_v42 = vld [vmem:[%s21884_s8 + $0xcb0] sm:$0xff]  ;;  %v3162_v36 = vld [vmem:[%s21884_s8 + $0xa58] sm:$0xff] }
 0x349   : > { %3705 = vmatpush2.msra.mxu1 %v3049_v54  ;;  %3762 = vmatpush1.msra.mxu0 %v3089_v38  ;;  %v3234_v27 = vld [vmem:[%s21884_s8 + $0xc98] sm:$0xff]  ;;  %v3161_v37 = vld [vmem:[%s21884_s8 + $0xa50] sm:$0xff] }
 0x34a   : > { %3706 = vmatprep.subr.mxu1 %v3046_v63  ;;  %3763 = vmatprep.subr.mxu0 %v3214_v41  ;;  %v3233_v54 = vld [vmem:[%s21884_s8 + $0xc90] sm:$0xff]  ;;  %v3158_v38 = vld [vmem:[%s21884_s8 + $0xa38] sm:$0xff] }
 0x34b   : > { %3707 = vmatpush2.msra.mxu1 %v3045_v24  ;;  %3764 = vmatpush2.msra.mxu0 %v3213_v15  ;;  %v3230_v63 = vld [vmem:[%s21884_s8 + $0xc78] sm:$0xff]  ;;  %v3157_v41 = vld [vmem:[%s21884_s8 + $0xa30] sm:$0xff] }
 0x34c   : > { %3708 = vmatprep.subr.mxu1 %v3042_v14  ;;  %3765 = vmatprep.subr.mxu0 %v3210_v2  ;;  %v3229_v24 = vld [vmem:[%s21884_s8 + $0xc70] sm:$0xff]  ;;  %v3154_v15 = vld [vmem:[%s21884_s8 + $0xa18] sm:$0xff] }
 0x34d   : > { %3709 = vmatpush2.msra.mxu1 %v3041_v28  ;;  %3766 = vmatpush2.msra.mxu0 %v3209_v44  ;;  %v3226_v14 = vld [vmem:[%s21884_s8 + $0xc58] sm:$0xff]  ;;  %v3153_v2 = vld [vmem:[%s21884_s8 + $0xa10] sm:$0xff] }
 0x34e   : > { %3710 = vmatprep.subr.mxu1 %v3038_v45  ;;  %3767 = vmatprep.subr.mxu0 %v3206_v21  ;;  %v3225_v28 = vld [vmem:[%s21884_s8 + $0xc50] sm:$0xff]  ;;  %v3222_v44 = vld [vmem:[%s21884_s8 + $0xc38] sm:$0xff] }
 0x34f   : > { %3711 = vmatpush2.msra.mxu1 %v3037_v57  ;;  %3768 = vmatpush2.msra.mxu0 %v3205_v11  ;;  %v3221_v45 = vld [vmem:[%s21884_s8 + $0xc30] sm:$0xff]  ;;  %v3218_v21 = vld [vmem:[%s21884_s8 + $0xc18] sm:$0xff] }
 0x350   : > { %3712 = vmatprep.subr.mxu1 %v3034_v9  ;;  %3769 = vmatprep.subr.mxu0 %v3202_v55  ;;  %v3217_v57 = vld [vmem:[%s21884_s8 + $0xc10] sm:$0xff]  ;;  %v14466_v55 = vld [vmem:[%s21879_s3 + $0x52c] ss:$20 sps:$4 sm:$0xff]  }
 0x351   : > { %3713 = vmatpush2.msra.mxu1 %v3033_v43  ;;  %3770 = vmatpush2.msra.mxu0 %v3201_v34  ;;  %v14460_v11 = vld [vmem:[%s21879_s3 + $0x57c] ss:$20 sps:$4 sm:$0xff]   ;;  %v14467_v43 = vld [vmem:[%s21879_s3 + $0x500] ss:$20 sps:$4 sm:$0xff]   ;;  %v14470_v34 = vld [vmem:[%s21879_s3 + $0x4d8] ss:$20 sps:$4 sm:$0xff]  }
 0x352   : > { %3714 = vmatprep.subr.mxu1 %v3030_v52  ;;  %3771 = vmatprep.subr.mxu0 %v3198_v35  ;;  %v14461_v9 = vld [vmem:[%s21879_s3 + $0x550] ss:$20 sps:$4 sm:$0xff]   ;;  %v14475_v52 = vld [vmem:[%s21879_s3 + $0x4b4] ss:$20 sps:$4 sm:$0xff]  }
 0x353   : > { %3715 = vmatpush2.msra.mxu1 %v3029_v32  ;;  %3772 = vmatpush2.msra.mxu0 %v3197_v18  ;;  %v14473_v35 = vld [vmem:[%s21879_s3 + $0x4b0] ss:$20 sps:$4 sm:$0xff]   ;;  %v14478_v32 = vld [vmem:[%s21879_s3 + $0x48c] ss:$20 sps:$4 sm:$0xff]   ;;  %v14476_v18 = vld [vmem:[%s21879_s3 + $0x488] ss:$20 sps:$4 sm:$0xff]  }
 0x354   : > { %3716 = vmatprep.subr.mxu1 %v3026_v8  ;;  %3773 = vmatprep.subr.mxu0 %v3194_v19  ;;  %v14481_v8 = vld [vmem:[%s21879_s3 + $0x464] ss:$20 sps:$4 sm:$0xff]   ;;  %v14479_v19 = vld [vmem:[%s21879_s3 + $0x460] ss:$20 sps:$4 sm:$0xff]  }
 0x355   : > { %3717 = vmatpush2.msra.mxu1 %v3025_v29  ;;  %3774 = vmatpush2.msra.mxu0 %v3193_v1  ;;  %v14484_v29 = vld [vmem:[%s21879_s3 + $0x6bc] ss:$20 sps:$4 sm:$0xff]   ;;  %v14482_v1 = vld [vmem:[%s21879_s3 + $0x6b8] ss:$20 sps:$4 sm:$0xff]  }
 0x356   : > { %3719 = vmatmul.mubr.f32.vlgmr.msra.gmra.mxu1 %v17151_v51  ;;  %3775 = vmatprep.subr.mxu0 %v3190_v31  ;;  %v3257_v51 = vld [vmem:[%s21884_s8 + $0xd50] sm:$0xff] }
 0x357   : > { %3816 = vmatprep.subr.mxu1 %v3262_v30  ;;  %3724 = vmatprep.mubr.f32.mxu1 %v17263_v10  ;;  %v3254_v10 = vld [vmem:[%s21884_s8 + $0xd38] sm:$0xff]  ;;  %v14487_v31 = vld [vmem:[%s21879_s3 + $0x694] ss:$20 sps:$4 sm:$0xff]   ;;  %v14485_v30 = vld [vmem:[%s21879_s3 + $0x690] ss:$20 sps:$4 sm:$0xff]  }
 0x358   : > { %3776 = vmatpush2.msra.mxu0 %v3189_v12  ;;  %3817 = vmatpush1.msra.mxu1 %v3261_v5  ;;  %v14490_v12 = vld [vmem:[%s21879_s3 + $0x66c] ss:$20 sps:$4 sm:$0xff]   ;;  %v14488_v5 = vld [vmem:[%s21879_s3 + $0x668] ss:$20 sps:$4 sm:$0xff]  }
 0x359   : > { %3777 = vmatprep.subr.mxu0 %v3186_v49  ;;  %3818 = vmatprep.subr.mxu1 %v3258_v22  ;;  %v14493_v49 = vld [vmem:[%s21879_s3 + $0x644] ss:$20 sps:$4 sm:$0xff]   ;;  %v14491_v22 = vld [vmem:[%s21879_s3 + $0x640] ss:$20 sps:$4 sm:$0xff]  }
 0x35a   : > { %3778 = vmatpush2.msra.mxu0 %v3185_v25  ;;  %3819 = vmatpush1.msra.mxu1 %v3257_v51  ;;  %v14496_v25 = vld [vmem:[%s21879_s3 + $0x61c] ss:$20 sps:$4 sm:$0xff]   ;;  %v14494_v51 = vld [vmem:[%s21879_s3 + $0x618] ss:$20 sps:$4 sm:$0xff]  }
 0x35b   : > { %3725 = vmatmul.mubr.f32.gmra.mxu1 %v17241_v58  ;;  %3779 = vmatprep.subr.mxu0 %v3182_v16  ;;  %v3246_v58 = vld [vmem:[%s21884_s8 + $0xcf8] sm:$0xff]  ;;  %v14499_v16 = vld [vmem:[%s21879_s3 + $0x5f4] ss:$20 sps:$4 sm:$0xff]  }
 0x35c   : > { %3820 = vmatprep.subr.mxu1 %v3254_v10  ;;  %3780 = vmatpush2.msra.mxu0 %v3181_v23  ;;  %v14506_v10 = vld [vmem:[%s21879_s3 + $0x7f8] ss:$20 sps:$4 sm:$0xff]   ;;  %v14508_v23 = vld [vmem:[%s21879_s3 + $0x7fc] ss:$20 sps:$4 sm:$0xff]  }
 0x35d   : > { %3821 = vmatpush1.msra.mxu1 %v3253_v26  ;;  %3781 = vmatprep.subr.mxu0 %v3178_v50  ;;  %v14497_v26 = vld [vmem:[%s21879_s3 + $0x5f0] ss:$20 sps:$4 sm:$0xff]   ;;  %v14502_v50 = vld [vmem:[%s21879_s3 + $0x5cc] ss:$20 sps:$4 sm:$0xff]  }
 0x35e   : > { %3822 = vmatprep.subr.mxu1 %v3250_v60  ;;  %3782 = vmatpush2.msra.mxu0 %v3177_v61  ;;  %v14500_v60 = vld [vmem:[%s21879_s3 + $0x5c8] ss:$20 sps:$4 sm:$0xff]   ;;  %v14505_v61 = vld [vmem:[%s21879_s3 + $0x5a4] ss:$20 sps:$4 sm:$0xff]  }
 0x35f   : > { %3823 = vmatpush1.msra.mxu1 %v3249_v40  ;;  %3783 = vmatprep.subr.mxu0 %v3174_v62  ;;  %v14503_v40 = vld [vmem:[%s21879_s3 + $0x5a0] ss:$20 sps:$4 sm:$0xff]   ;;  %v14511_v62 = vld [vmem:[%s21879_s3 + $0x804] ss:$20 sps:$4 sm:$0xff]  }
 0x360   : > { %3824 = vmatprep.subr.mxu1 %v3246_v58  ;;  %3784 = vmatpush2.msra.mxu0 %v3173_v53  ;;  %v14514_v58 = vld [vmem:[%s21879_s3 + $0x7d4] ss:$20 sps:$4 sm:$0xff]   ;;  %v14512_v53 = vld [vmem:[%s21879_s3 + $0x7d0] ss:$20 sps:$4 sm:$0xff]  }
 0x361   : > { %3825 = vmatpush1.msra.mxu1 %v3245_v0  ;;  %3785 = vmatprep.subr.mxu0 %v3170_v17  ;;  %v14520_v0 = vld [vmem:[%s21879_s3 + $0x7ac] ss:$20 sps:$4 sm:$0xff]   ;;  %v14518_v17 = vld [vmem:[%s21879_s3 + $0x7a8] ss:$20 sps:$4 sm:$0xff]  }
 0x362   : > { %3826 = vmatprep.subr.mxu1 %v3242_v13  ;;  %3786 = vmatpush2.msra.mxu0 %v3169_v59  ;;  %v14526_v13 = vld [vmem:[%s21879_s3 + $0x784] ss:$20 sps:$4 sm:$0xff]   ;;  %v14524_v59 = vld [vmem:[%s21879_s3 + $0x780] ss:$20 sps:$4 sm:$0xff]  }
 0x363   : > { %3827 = vmatpush1.msra.mxu1 %v3241_v56  ;;  %3787 = vmatprep.subr.mxu0 %v3166_v20  ;;  %v14532_v56 = vld [vmem:[%s21879_s3 + $0x75c] ss:$20 sps:$4 sm:$0xff]   ;;  %v14530_v20 = vld [vmem:[%s21879_s3 + $0x758] ss:$20 sps:$4 sm:$0xff]  }
 0x364   : > { %3828 = vmatprep.subr.mxu1 %v3238_v48  ;;  %3788 = vmatpush2.msra.mxu0 %v3165_v39  ;;  %v14538_v48 = vld [vmem:[%s21879_s3 + $0x734] ss:$20 sps:$4 sm:$0xff]   ;;  %v14536_v39 = vld [vmem:[%s21879_s3 + $0x730] ss:$20 sps:$4 sm:$0xff]  }
 0x365   : > { %3829 = vmatpush1.msra.mxu1 %v3237_v42  ;;  %3789 = vmatprep.subr.mxu0 %v3162_v36  ;;  %v14544_v42 = vld [vmem:[%s21879_s3 + $0x70c] ss:$20 sps:$4 sm:$0xff]   ;;  %v14542_v36 = vld [vmem:[%s21879_s3 + $0x708] ss:$20 sps:$4 sm:$0xff]  }
 0x366   : > { %3830 = vmatprep.subr.mxu1 %v3234_v27  ;;  %3790 = vmatpush2.msra.mxu0 %v3161_v37  ;;  %v14550_v37 = vld [vmem:[%s21879_s3 + $0x6e4] ss:$20 sps:$4 sm:$0xff]  }
 0x367   : > { %3831 = vmatpush1.msra.mxu1 %v3233_v54  ;;  %3791 = vmatprep.subr.mxu0 %v3158_v38  ;;  %v14548_v38 = vld [vmem:[%s21879_s3 + $0x6e0] ss:$20 sps:$4 sm:$0xff]  }
 0x368   : > { %3832 = vmatprep.subr.mxu1 %v3230_v63  ;;  %3792 = vmatpush2.msra.mxu0 %v3157_v41 }
 0x369   : > { %3833 = vmatpush1.msra.mxu1 %v3229_v24  ;;  %3793 = vmatprep.subr.mxu0 %v3154_v15  ;;  %v14556_v24 = vld [vmem:[%s21879_s3 + $0x89c] ss:$20 sps:$4 sm:$0xff]  }
 0x36a   : > { %3834 = vmatprep.subr.mxu1 %v3226_v14  ;;  %3794 = vmatpush2.msra.mxu0 %v3153_v2  ;;  %v14554_v14 = vld [vmem:[%s21879_s3 + $0x898] ss:$20 sps:$4 sm:$0xff]  }
 0x36b   : > { %3835 = vmatpush1.msra.mxu1 %v3225_v28  ;;  %3796 = vmatmul.mubr.f32.vlgmr.msra.gmra.mxu0 %v17531_v6  ;;  %v14458_v6 = vld [vmem:[%s21879_s3 + $0x578] ss:$20 sps:$4 sm:$0xff]  }
 0x36c   : > { %3836 = vmatprep.subr.mxu1 %v3222_v44  ;;  %3801 = vmatprep.mubr.f32.mxu0 %v17599_v7  ;;  %v14463_v7 = vld [vmem:[%s21879_s3 + $0x554] ss:$20 sps:$4 sm:$0xff]  }
 0x36d   : > { %3837 = vmatpush1.msra.mxu1 %v3221_v45  ;;  %3872 = vmatprep.mubr.f32.mxu1 %v15712_v47  ;;  %v14562_v44 = vld [vmem:[%s21879_s3 + $0x874] ss:$20 sps:$4 sm:$0xff]   ;;  %v14560_v45 = vld [vmem:[%s21879_s3 + $0x870] ss:$20 sps:$4 sm:$0xff]  }
 0x36e   : > { %3838 = vmatprep.subr.mxu1 %v3218_v21  ;;  %5096 = vmatprep.subr.bf16.mxu0 %v14508_v23 }
 0x36f   : > { %3839 = vmatpush1.msra.mxu1 %v3217_v57  ;;  %3802 = vmatmul.mubr.f32.gmra.mxu0 %v17580_v46  ;;  %v14469_v46 = vld [vmem:[%s21879_s3 + $0x504] ss:$20 sps:$4 sm:$0xff]  }
 0x370   : > { %12340 = vmatmul.mubr.msk.f32.vlgmr.msra.gmra.mxu1 %vm2413_vm5, %v17306_v33  ;;  %5053 = vmatprep.subr.bf16.mxu1 %v14460_v11  ;;  %v14464_v33 = vld [vmem:[%s21879_s3 + $0x528] ss:$20 sps:$4 sm:$0xff]  }
 0x371   : > { %3878 = vmatprep.mubr.f32.mxu1 %v15712_v47  ;;  %5054 = vmatpush1.bf16.msra.mxu1 %v14458_v6  ;;  %v14568_v6 = vld [vmem:[%s21879_s3 + $0x84c] ss:$20 sps:$4 sm:$0xff]  }
 0x372   : > { %5055 = vmatprep.subr.bf16.mxu1 %v14463_v7  ;;  %5097 = vmatpush1.bf16.msra.mxu0 %v14506_v10 }
 0x373   : > { %5098 = vmatprep.subr.bf16.mxu0 %v14514_v58 }
 0x374   : > { %12341 = vmatmul.mubr.msk.f32.gmra.mxu1 %vm2413_vm5, %v17283_v3  ;;  %v14472_v3 = vld [vmem:[%s21879_s3 + $0x4dc] ss:$20 sps:$4 sm:$0xff]  }
 0x375   : > { %5056 = vmatpush1.bf16.msra.mxu1 %v14461_v9  ;;  %v14566_v9 = vld [vmem:[%s21879_s3 + $0x848] ss:$20 sps:$4 sm:$0xff]  }
 0x376   : > { %5057 = vmatprep.subr.bf16.mxu1 %v14466_v55  ;;  %5099 = vmatpush1.bf16.msra.mxu0 %v14512_v53 }
 0x377   : > { %5100 = vmatprep.subr.bf16.mxu0 %v14520_v0 }
 0x379   : > { %5058 = vmatpush1.bf16.msra.mxu1 %v14464_v33 }
 0x37a   : > { %5059 = vmatprep.subr.bf16.mxu1 %v14469_v46  ;;  %5101 = vmatpush1.bf16.msra.mxu0 %v14518_v17 }
 0x37b   : > { %5102 = vmatprep.subr.bf16.mxu0 %v14526_v13 }
 0x37d   : > { %5060 = vmatpush1.bf16.msra.mxu1 %v14467_v43  ;;  %v14574_v43 = vld [vmem:[%s21879_s3 + $0x824] ss:$20 sps:$4 sm:$0xff]  }
 0x37e   : > { %5061 = vmatprep.subr.bf16.mxu1 %v14472_v3  ;;  %5103 = vmatpush1.bf16.msra.mxu0 %v14524_v59 }
 0x37f   : > { %5104 = vmatprep.subr.bf16.mxu0 %v14532_v56 }
 0x381   : > { %5062 = vmatpush1.bf16.msra.mxu1 %v14470_v34  ;;  %v14572_v34 = vld [vmem:[%s21879_s3 + $0x820] ss:$20 sps:$4 sm:$0xff]  }
 0x382   : > { %5063 = vmatprep.subr.bf16.mxu1 %v14475_v52  ;;  %5105 = vmatpush1.bf16.msra.mxu0 %v14530_v20 }
 0x383   : > { %5106 = vmatprep.subr.bf16.mxu0 %v14538_v48 }
 0x385   : > { %5064 = vmatpush1.bf16.msra.mxu1 %v14473_v35 }
 0x386   : > { %5065 = vmatprep.subr.bf16.mxu1 %v14478_v32  ;;  %5107 = vmatpush1.bf16.msra.mxu0 %v14536_v39 }
 0x387   : > { %5108 = vmatprep.subr.bf16.mxu0 %v14544_v42 }
 0x389   : > { %5066 = vmatpush1.bf16.msra.mxu1 %v14476_v18  ;;  %v3412_v27 = vpop.f32.mrf.mxu0 }
 0x38a   : > { %5067 = vmatprep.subr.bf16.mxu1 %v14481_v8  ;;  %5109 = vmatpush1.bf16.msra.mxu0 %v14542_v36 }
 0x38b   : > { %v3414_v63 = vpop.f32.mrf.mxu0  ;;  %5110 = vmatprep.subr.bf16.mxu0 %v14550_v37 }
 0x38d   : > { %5068 = vmatpush1.bf16.msra.mxu1 %v14479_v19  ;;  %v3335_v54 = vpop.f32.mrf.mxu1 }
 0x38e   : > { %5069 = vmatprep.subr.bf16.mxu1 %v14484_v29  ;;  %5111 = vmatpush1.bf16.msra.mxu0 %v14548_v38  ;;  %v3413_v11 = vadd.f32 %v3412_v27, %v3335_v54 }
 0x38f   : > { %v3337_v15 = vpop.f32.mrf.mxu1  ;;  %5120 = vmatprep.subr.bf16.mxu0 %v14556_v24 }
 0x390   : > { %v3415_v55 = vadd.f32 %v3414_v63, %v3337_v15 }
 0x391   : > { %5070 = vmatpush2.bf16.msra.mxu1 %v14482_v1 }
 0x392   : > { %5071 = vmatprep.subr.bf16.mxu1 %v14487_v31  ;;  %5121 = vmatpush2.bf16.msra.mxu0 %v14554_v14 }
 0x393   : > { %5122 = vmatprep.subr.bf16.mxu0 %v14562_v44 }
 0x395   : > { %5072 = vmatpush2.bf16.msra.mxu1 %v14485_v30 }
 0x396   : > { %5073 = vmatprep.subr.bf16.mxu1 %v14490_v12  ;;  %5123 = vmatpush2.bf16.msra.mxu0 %v14560_v45 }
 0x397   : > { %5124 = vmatprep.subr.bf16.mxu0 %v14568_v6 }
 0x399   : > { %5074 = vmatpush2.bf16.msra.mxu1 %v14488_v5 }
 0x39a   : > { %5075 = vmatprep.subr.bf16.mxu1 %v14493_v49  ;;  %5125 = vmatpush2.bf16.msra.mxu0 %v14566_v9 }
 0x39b   : > { %5126 = vmatprep.subr.bf16.mxu0 %v14574_v43  ;;  %v14517_v43 = vld [vmem:[%s21879_s3 + $0x7dc] ss:$20 sps:$4 sm:$0xff]  }
 0x39d   : > { %5076 = vmatpush2.bf16.msra.mxu1 %v14491_v22 }
 0x39e   : > { %5077 = vmatprep.subr.bf16.mxu1 %v14496_v25  ;;  %v3418_v41 = vpop.f32.mrf.mxu0  ;;  %5127 = vmatpush2.bf16.msra.mxu0 %v14572_v34  ;;  %v14580_v25 = vld [vmem:[%s21879_s3 + $0x584] ss:$20 sps:$4 sm:$0xff]   ;;  %v14523_v34 = vld [vmem:[%s21879_s3 + $0x7b4] ss:$20 sps:$4 sm:$0xff]  }
 0x39f   : > { %5139 = vmatprep.subr.bf16.mxu0 %v14580_v25  ;;  %v14565_v25 = vld [vmem:[%s21879_s3 + $0x87c] ss:$20 sps:$4 sm:$0xff]  }
 0x3a0   : > { %v3341_v2 = vpop.f32.mrf.mxu1  ;;  %v3420_v28 = vpop.f32.mrf.mxu0 }
 0x3a1   : > { %5078 = vmatpush2.bf16.msra.mxu1 %v14494_v51  ;;  %v3419_v32 = vadd.f32 %v3418_v41, %v3341_v2 }
 0x3a2   : > { %5079 = vmatprep.subr.bf16.mxu1 %v14499_v16  ;;  %v3343_v57 = vpop.f32.mrf.mxu1 }
 0x3a3   : > { %v3421_v1 = vadd.f32 %v3420_v28, %v3343_v57 }
 0x3a4   : > { %v3566_v21 = vpop.f32.mrf.mxu0 }
 0x3a5   : > { %5080 = vmatpush2.bf16.msra.mxu1 %v14497_v26 }
 0x3a6   : > { %5081 = vmatprep.subr.bf16.mxu1 %v14502_v50  ;;  %v3568_v33 = vpop.f32.mrf.mxu0 }
 0x3a9   : > { %5082 = vmatpush2.bf16.msra.mxu1 %v14500_v60  ;;  %v3572_v18 = vpop.f32.mrf.mxu0 }
 0x3aa   : > { %5083 = vmatprep.subr.bf16.mxu1 %v14505_v61 }
 0x3ab   : > { %v3574_v51 = vpop.f32.mrf.mxu0 }
 0x3ad   : > { %5084 = vmatpush2.bf16.msra.mxu1 %v14503_v40 }
 0x3ae   : > { %5182 = vmatprep.subr.bf16.mxu1 %v14511_v62 }
 0x3d2   : > { %v3489_v7 = vpop.f32.mrf.mxu1 }
 0x3d3   : > { %v3490_v46 = vadd.f32 %v3489_v7, %v3413_v11 }
 0x3d4   : > { %v3491_v3 = vpop.f32.mrf.mxu1 }
 0x3d5   : > { %v3567_v52 = vadd.f32 %v3566_v21, %v3490_v46  ;;  %v3492_v35 = vadd.f32 %v3491_v3, %v3415_v55  ;;  %v14509_v55 = vld [vmem:[%s21879_s3 + $0x800] ss:$20 sps:$4 sm:$0xff]   ;;  %v14515_v3 = vld [vmem:[%s21879_s3 + $0x7d8] ss:$20 sps:$4 sm:$0xff]  }
 0x3d7   : > { %v3885_v8 = vmin.f32 %v3567_v52, 0.0  ;;  %v3569_v19 = vadd.f32 %v3568_v33, %v3492_v35  ;;  %v3495_v29 = vpop.f32.mrf.mxu1  ;;  %vm3925_vm8 = vcmp.gt.f32.partialorder %v3567_v52, 0.0  ;;  %v14529_v35 = vld [vmem:[%s21879_s3 + $0x78c] ss:$20 sps:$4 sm:$0xff]  }
 0x3d8   : > { %v3496_v31 = vadd.f32 %v3495_v29, %v3419_v32  ;;  %v14527_v32 = vld [vmem:[%s21879_s3 + $0x788] ss:$20 sps:$4 sm:$0xff]   ;;  %v14539_v29 = vld [vmem:[%s21879_s3 + $0x738] ss:$20 sps:$4 sm:$0xff]  }
 0x3d9   : > { %v3893_v30 = vmul.f32 1.442695, %v3885_v8  ;;  %v3886_v12 = vmin.f32 %v3569_v19, 0.0  ;;  %v3497_v5 = vpop.f32.mrf.mxu1  ;;  %vm3926_vm9 = vcmp.gt.f32.partialorder %v3569_v19, 0.0  ;;  %v14533_v8 = vld [vmem:[%s21879_s3 + $0x760] ss:$20 sps:$4 sm:$0xff]  }
 0x3da   : > { %v3573_v49 = vadd.f32 %v3572_v18, %v3496_v31  ;;  %v3498_v22 = vadd.f32 %v3497_v5, %v3421_v1  ;;  %v14535_v18 = vld [vmem:[%s21879_s3 + $0x764] ss:$20 sps:$4 sm:$0xff]   ;;  %v14547_v1 = vld [vmem:[%s21879_s3 + $0x714] ss:$20 sps:$4 sm:$0xff]  }
 0x3db   : > { %15618 = vpow2.f32 %v3893_v30  ;;  %v3895_v16 = vmul.f32 1.442695, %v3886_v12  ;;  %v14545_v31 = vld [vmem:[%s21879_s3 + $0x710] ss:$20 sps:$4 sm:$0xff]   ;;  %v14553_v30 = vld [vmem:[%s21879_s3 + $0x6ec] ss:$20 sps:$4 sm:$0xff]  }
 0x3dc   : > { %v3889_v10 = vmin.f32 %v3573_v49, 0.0  ;;  %v3575_v23 = vadd.f32 %v3574_v51, %v3498_v22  ;;  %vm3929_vm10 = vcmp.gt.f32.partialorder %v3573_v49, 0.0  ;;  %v14551_v12 = vld [vmem:[%s21879_s3 + $0x6e8] ss:$20 sps:$4 sm:$0xff]   ;;  %v14559_v5 = vld [vmem:[%s21879_s3 + $0x8a4] ss:$20 sps:$4 sm:$0xff]  }
 0x3dd   : > { %15620 = vpow2.f32 %v3895_v16  ;;  %v14557_v22 = vld [vmem:[%s21879_s3 + $0x8a0] ss:$20 sps:$4 sm:$0xff]   ;;  %v14563_v16 = vld [vmem:[%s21879_s3 + $0x878] ss:$20 sps:$4 sm:$0xff]  }
 0x3de   : > { %v3901_v26 = vmul.f32 1.442695, %v3889_v10  ;;  %v3890_v50 = vmin.f32 %v3575_v23, 0.0  ;;  %vm3930_vm11 = vcmp.gt.f32.partialorder %v3575_v23, 0.0 }
 0x3e0   : > { %15622 = vpow2.f32 %v3901_v26  ;;  %v3903_v60 = vmul.f32 1.442695, %v3890_v50  ;;  %v14569_v50 = vld [vmem:[%s21879_s3 + $0x850] ss:$20 sps:$4 sm:$0xff]  }
 0x3e2   : > { %15624 = vpow2.f32 %v3903_v60 }
 0x3e8   : > { %v15619_v61 = vpop.eup %15618 }
 0x3e9   : > { %v12342_v40 = vadd.f32 -1.0, %v15619_v61  ;;  %v14577_v61 = vld [vmem:[%s21879_s3 + $0x82c] ss:$20 sps:$4 sm:$0xff]  }
 0x3ea   : > { %v15621_v62 = vpop.eup %15620 }
 0x3eb   : > { %v12343_v58 = vadd.f32 -1.0, %v15621_v62  ;;  %v3917_v53 = vmul.f32 1.6732632, %v12342_v40  ;;  %v14575_v62 = vld [vmem:[%s21879_s3 + $0x828] ss:$20 sps:$4 sm:$0xff]  }
 0x3ed   : > { %v15623_v0 = vpop.eup %15622  ;;  %v3918_v17 = vmul.f32 1.6732632, %v12343_v58  ;;  %v3933_v56 = vsel %vm3925_vm8, %v3567_v52, %v3917_v53  ;;  %v14521_v52 = vld [vmem:[%s21879_s3 + $0x7b0] ss:$20 sps:$4 sm:$0xff]   ;;  %v14581_v53 = vld [vmem:[%s21879_s3 + $0x6c8] ss:$20 sps:$4 sm:$0xff]  }
 0x3ee   : > { %v12346_v13 = vadd.f32 -1.0, %v15623_v0  ;;  %v3941_v27 = vmul.f32 1.050701, %v3933_v56  ;;  %vm11987_vm8 = vcmask 1041408  }
 0x3ef   : > { %v15625_v59 = vpop.eup %15624  ;;  %v3934_v39 = vsel %vm3926_vm9, %v3569_v19, %v3918_v17  ;;  %v14541_v19 = vld [vmem:[%s21879_s3 + $0x73c] ss:$20 sps:$4 sm:$0xff]  }
 0x3f0   : > { %v3921_v20 = vmul.f32 1.6732632, %v12346_v13  ;;  %v12347_v48 = vadd.f32 -1.0, %v15625_v59  ;;  %v3942_v38 = vmul.f32 1.050701, %v3934_v39 }
 0x3f2   : > { %v3937_v42 = vsel %vm3929_vm10, %v3573_v49, %v3921_v20  ;;  %v3922_v36 = vmul.f32 1.6732632, %v12347_v48  ;;  %v3643_v49 = vpop.f32.mrf.mxu0  ;;  %vm11983_vm10 = vcmask 408576  }
 0x3f3   : > { %v3945_v37 = vmul.f32 1.050701, %v3937_v42 }
 0x3f4   : > { %v3938_v54 = vsel %vm3930_vm11, %v3575_v23, %v3922_v36  ;;  %v3645_v51 = vpop.f32.mrf.mxu0  ;;  %v14571_v23 = vld [vmem:[%s21879_s3 + $0x854] ss:$20 sps:$4 sm:$0xff]   ;;  %vm12061_vm11 = vcmask 73728  }
 0x3f5   : > { %v18295_v63 = vpack.c.bf16 %v3945_v37, %v3941_v27  ;;  %v3946_v41 = vmul.f32 1.050701, %v3938_v54 }
 0x3f6   : > { %v3649_v26 = vpop.f32.mrf.mxu0 }
 0x3f7   : > { %v18297_v24 = vpack.c.bf16 %v3946_v41, %v3942_v38  ;;  %v4291_v15 = vshrl.u32 %v18295_v63, 16  ;;  %v4293_v14 = vshll.u32 %v18295_v63, 16 }
 0x3f8   : > { %v3651_v40 = vpop.f32.mrf.mxu0 }
 0x3f9   : > { %v4298_v2 = vshrl.u32 %v18297_v24, 16  ;;  %v4300_v28 = vshll.u32 %v18297_v24, 16  ;;  %v4295_v44 = vrot.slane %v4293_v14, 1  ;;  %v7635_v45 = vrot.slane %v4291_v15, 1 }
 0x3fa   : > { %v7636_v21 = vrot.slane %v4293_v14, 2 }
 0x3fb   : > { %v4302_v57 = vrot.slane %v4300_v28, 1  ;;  %v7638_v11 = vrot.slane %v4298_v2, 1  ;;  %v7639_v6 = vrot.slane %v4300_v28, 2  ;;  %v18312_v46 = vor.u32 %v4295_v44, %v4291_v15 }
 0x3fc   : > { %v18303_v7 = vor.u32 %v7636_v21, %v7635_v45 }
 0x3fd   : > { %v18305_v9 = vor.u32 %v4302_v57, %v4298_v2  ;;  %v18310_v33 = vor.u32 %v7639_v6, %v7638_v11 }
 0x3ff   : > { %5085 = vmatprep.mubr.bf16.mxu1 %v18305_v9 }
 0x400   : > { %5086 = vmatmul.mubr.bf16.vlgmr.msra.gmra.mxu1 %v18312_v46 }
 0x401   : > { %5183 = vmatpush1.bf16.msra.mxu1 %v14509_v55 }
 0x402   : > { %5184 = vmatprep.subr.bf16.mxu1 %v14517_v43 }
 0x405   : > { %5185 = vmatpush1.bf16.msra.mxu1 %v14515_v3 }
 0x406   : > { %5186 = vmatprep.subr.bf16.mxu1 %v14523_v34 }
 0x409   : > { %5187 = vmatpush1.bf16.msra.mxu1 %v14521_v52 }
 0x40a   : > { %5188 = vmatprep.subr.bf16.mxu1 %v14529_v35 }
 0x40d   : > { %5189 = vmatpush1.bf16.msra.mxu1 %v14527_v32 }
 0x40e   : > { %5190 = vmatprep.subr.bf16.mxu1 %v14535_v18 }
 0x411   : > { %5191 = vmatpush1.bf16.msra.mxu1 %v14533_v8 }
 0x412   : > { %5192 = vmatprep.subr.bf16.mxu1 %v14541_v19 }
 0x415   : > { %5193 = vmatpush1.bf16.msra.mxu1 %v14539_v29 }
 0x416   : > { %5194 = vmatprep.subr.bf16.mxu1 %v14547_v1  ;;  %v3720_v10 = vpop.f32.mrf.mxu1 }
 0x417   : > { %v3721_v17 = vadd.f32 %v3720_v10, %v3643_v49 }
 0x418   : > { %v3722_v60 = vpop.f32.mrf.mxu1 }
 0x419   : > { %5195 = vmatpush1.bf16.msra.mxu1 %v14545_v31  ;;  %v3723_v56 = vadd.f32 %v3722_v60, %v3645_v51 }
 0x41a   : > { %5196 = vmatprep.subr.bf16.mxu1 %v14553_v30 }
 0x41b   : > { %v3726_v58 = vpop.f32.mrf.mxu1 }
 0x41c   : > { %v3727_v42 = vadd.f32 %v3726_v58, %v3649_v26 }
 0x41d   : > { %5197 = vmatpush1.bf16.msra.mxu1 %v14551_v12  ;;  %v3728_v59 = vpop.f32.mrf.mxu1 }
 0x41e   : > { %5206 = vmatprep.subr.bf16.mxu1 %v14559_v5  ;;  %v3729_v14 = vadd.f32 %v3728_v59, %v3651_v40 }
 0x421   : > { %5207 = vmatpush2.bf16.msra.mxu1 %v14557_v22 }
 0x422   : > { %5208 = vmatprep.subr.bf16.mxu1 %v14565_v25 }
 0x425   : > { %5209 = vmatpush2.bf16.msra.mxu1 %v14563_v16 }
 0x426   : > { %5210 = vmatprep.subr.bf16.mxu1 %v14571_v23 }
 0x429   : > { %5211 = vmatpush2.bf16.msra.mxu1 %v14569_v50 }
 0x42a   : > { %5212 = vmatprep.subr.bf16.mxu1 %v14577_v61 }
 0x42b   : > { %v3797_v0 = vpop.f32.mrf.mxu0 }
 0x42c   : > { %v3798_v20 = vadd.f32 %v3797_v0, %v3721_v17 }
 0x42d   : > { %v3799_v13 = vpop.f32.mrf.mxu0  ;;  %5213 = vmatpush2.bf16.msra.mxu1 %v14575_v62 }
 0x42e   : > { %13988 = vmatprep.subr.bf16.mxu1 %v14581_v53  ;;  %v3800_v36 = vadd.f32 %v3799_v13, %v3723_v56 }
 0x42f   : > { %v3803_v48 = vpop.f32.mrf.mxu0 }
 0x430   : > { %v3874_v39 = vpop.f32.mrf.mxu1  ;;  %v3804_v54 = vadd.f32 %v3803_v48, %v3727_v42  ;;  %v14582_v42 = vld [vmem:[%s21879_s3 + $0x588] ss:$20 sps:$4 sm:$0xff]  }
 0x431   : > { %v3875_v27 = vadd.f32 %v3874_v39, %v3798_v20  ;;  %v3805_v41 = vpop.f32.mrf.mxu0  ;;  %v14578_v39 = vld [vmem:[%s21879_s3 + $0x580] ss:$20 sps:$4 sm:$0xff]  }
 0x432   : > { %v3876_v37 = vpop.f32.mrf.mxu1  ;;  %v3806_v21 = vadd.f32 %v3805_v41, %v3729_v14  ;;  %v14587_v41 = vld [vmem:[%s21879_s3 + $0x560] ss:$20 sps:$4 sm:$0xff]   ;;  %v14591_v14 = vld [vmem:[%s21879_s3 + $0x678] ss:$20 sps:$4 sm:$0xff]  }
 0x433   : > { %v3887_v38 = vmin.f32 %v3875_v27, 0.0  ;;  %v3877_v15 = vadd.f32 %v3876_v37, %v3800_v36  ;;  %vm3927_vm12 = vcmp.gt.f32.partialorder %v3875_v27, 0.0  ;;  %v14585_v37 = vld [vmem:[%s21879_s3 + $0x55c] ss:$20 sps:$4 sm:$0xff]  }
 0x434   : > { %v3880_v2 = vpop.f32.mrf.mxu1 }
 0x435   : > { %v3897_v28 = vmul.f32 1.442695, %v3887_v38  ;;  %v3888_v44 = vmin.f32 %v3877_v15, 0.0  ;;  %v3881_v45 = vadd.f32 %v3880_v2, %v3804_v54  ;;  %vm3928_vm14 = vcmp.gt.f32.partialorder %v3877_v15, 0.0  ;;  %v14586_v54 = vld [vmem:[%s21879_s3 + $0x6a0] ss:$20 sps:$4 sm:$0xff]  }
 0x436   : > { %v3882_v57 = vpop.f32.mrf.mxu1  ;;  %v14583_v38 = vld [vmem:[%s21879_s3 + $0x558] ss:$20 sps:$4 sm:$0xff]   ;;  %v14588_v2 = vld [vmem:[%s21879_s3 + $0x530] ss:$20 sps:$4 sm:$0xff]  }
 0x437   : > { %15626 = vpow2.f32 %v3897_v28  ;;  %v3899_v11 = vmul.f32 1.442695, %v3888_v44  ;;  %v3891_v6 = vmin.f32 %v3881_v45, 0.0  ;;  %v3883_v55 = vadd.f32 %v3882_v57, %v3806_v21  ;;  %v14595_v28 = vld [vmem:[%s21879_s3 + $0x50c] ss:$20 sps:$4 sm:$0xff]  }
 0x438   : > { %vm3931_vm13 = vcmp.gt.f32.partialorder %v3881_v45, 0.0  ;;  %v14596_v44 = vld [vmem:[%s21879_s3 + $0x650] ss:$20 sps:$4 sm:$0xff]  }
 0x439   : > { %15628 = vpow2.f32 %v3899_v11  ;;  %v3905_v43 = vmul.f32 1.442695, %v3891_v6  ;;  %v3892_v3 = vmin.f32 %v3883_v55, 0.0  ;;  %vm3932_vm15 = vcmp.gt.f32.partialorder %v3883_v55, 0.0  ;;  %v14597_v21 = vld [vmem:[%s21879_s3 + $0x510] ss:$20 sps:$4 sm:$0xff]  }
 0x43a   : > { %v14600_v57 = vld [vmem:[%s21879_s3 + $0x4e4] ss:$20 sps:$4 sm:$0xff]   ;;  %v14601_v11 = vld [vmem:[%s21879_s3 + $0x628] ss:$20 sps:$4 sm:$0xff]   ;;  %v14598_v6 = vld [vmem:[%s21879_s3 + $0x4e0] ss:$20 sps:$4 sm:$0xff]  }
 0x43b   : > { %15630 = vpow2.f32 %v3905_v43  ;;  %v3907_v34 = vmul.f32 1.442695, %v3892_v3  ;;  %v14605_v43 = vld [vmem:[%s21879_s3 + $0x4bc] ss:$20 sps:$4 sm:$0xff]   ;;  %v14606_v3 = vld [vmem:[%s21879_s3 + $0x600] ss:$20 sps:$4 sm:$0xff]  }
 0x43d   : > { %15632 = vpow2.f32 %v3907_v34  ;;  %v14603_v34 = vld [vmem:[%s21879_s3 + $0x4b8] ss:$20 sps:$4 sm:$0xff]  }
 0x444   : > { %v15627_v52 = vpop.eup %15626 }
 0x445   : > { %v12344_v35 = vadd.f32 -1.0, %v15627_v52  ;;  %v14607_v52 = vld [vmem:[%s21879_s3 + $0x4c0] ss:$20 sps:$4 sm:$0xff]  }
 0x446   : > { %v15629_v32 = vpop.eup %15628 }
 0x447   : > { %v3919_v18 = vmul.f32 1.6732632, %v12344_v35  ;;  %v12345_v8 = vadd.f32 -1.0, %v15629_v32  ;;  %v14610_v35 = vld [vmem:[%s21879_s3 + $0x494] ss:$20 sps:$4 sm:$0xff]  }
 0x448   : > { %v15631_v19 = vpop.eup %15630  ;;  %v14611_v32 = vld [vmem:[%s21879_s3 + $0x5d8] ss:$20 sps:$4 sm:$0xff]  }
 0x449   : > { %v12348_v29 = vadd.f32 -1.0, %v15631_v19  ;;  %v3920_v1 = vmul.f32 1.6732632, %v12345_v8  ;;  %v3935_v30 = vsel %vm3927_vm12, %v3875_v27, %v3919_v18  ;;  %v14608_v18 = vld [vmem:[%s21879_s3 + $0x490] ss:$20 sps:$4 sm:$0xff]  }
 0x44a   : > { %v15633_v31 = vpop.eup %15632  ;;  %v3943_v22 = vmul.f32 1.050701, %v3935_v30  ;;  %v14612_v8 = vld [vmem:[%s21879_s3 + $0x498] ss:$20 sps:$4 sm:$0xff]  }
 0x44b   : > { %v3923_v12 = vmul.f32 1.6732632, %v12348_v29  ;;  %v12349_v5 = vadd.f32 -1.0, %v15633_v31  ;;  %v3936_v25 = vsel %vm3928_vm14, %v3877_v15, %v3920_v1  ;;  %v14590_v15 = vld [vmem:[%s21879_s3 + $0x534] ss:$20 sps:$4 sm:$0xff]  }
 0x44c   : > { %v3944_v26 = vmul.f32 1.050701, %v3936_v25  ;;  %v14615_v19 = vld [vmem:[%s21879_s3 + $0x46c] ss:$20 sps:$4 sm:$0xff]   ;;  %v14616_v29 = vld [vmem:[%s21879_s3 + $0x5b0] ss:$20 sps:$4 sm:$0xff]  }
 0x44d   : > { %v3939_v49 = vsel %vm3931_vm13, %v3881_v45, %v3923_v12  ;;  %v3924_v16 = vmul.f32 1.6732632, %v12349_v5  ;;  %v14593_v45 = vld [vmem:[%s21879_s3 + $0x508] ss:$20 sps:$4 sm:$0xff]   ;;  %v14617_v31 = vld [vmem:[%s21879_s3 + $0x470] ss:$20 sps:$4 sm:$0xff]  }
 0x44e   : > { %v3947_v51 = vmul.f32 1.050701, %v3939_v49  ;;  %v14613_v1 = vld [vmem:[%s21879_s3 + $0x468] ss:$20 sps:$4 sm:$0xff]   ;;  %v14620_v30 = vld [vmem:[%s21879_s3 + $0x6c4] ss:$20 sps:$4 sm:$0xff]  }
 0x44f   : > { %v3940_v23 = vsel %vm3932_vm15, %v3883_v55, %v3924_v16  ;;  %v14602_v55 = vld [vmem:[%s21879_s3 + $0x4e8] ss:$20 sps:$4 sm:$0xff]   ;;  %v14618_v5 = vld [vmem:[%s21879_s3 + $0x6c0] ss:$20 sps:$4 sm:$0xff]   ;;  %v14621_v49 = vld [vmem:[%s21879_s3 + $0x118] ss:$20 sps:$4 sm:$0xff]  }
 0x450   : > { %v18385_v10 = vpack.c.bf16 %v3947_v51, %v3943_v22  ;;  %v3948_v50 = vmul.f32 1.050701, %v3940_v23  ;;  %v14623_v12 = vld [vmem:[%s21879_s3 + $0x11c] ss:$20 sps:$4 sm:$0xff]   ;;  %v14629_v25 = vld [vmem:[%s21879_s3 + $0xf4] ss:$20 sps:$4 sm:$0xff]  }
 0x451   : > { %v14626_v22 = vld [vmem:[%s21879_s3 + $0x69c] ss:$20 sps:$4 sm:$0xff]   ;;  %v14624_v51 = vld [vmem:[%s21879_s3 + $0x698] ss:$20 sps:$4 sm:$0xff]   ;;  %v14632_v23 = vld [vmem:[%s21879_s3 + $0x674] ss:$20 sps:$4 sm:$0xff]  }
 0x452   : > { %v4305_v60 = vshrl.u32 %v18385_v10, 16  ;;  %v4307_v61 = vshll.u32 %v18385_v10, 16  ;;  %v18389_v40 = vpack.c.bf16 %v3948_v50, %v3944_v26  ;;  %v14627_v16 = vld [vmem:[%s21879_s3 + $0xf0] ss:$20 sps:$4 sm:$0xff]   ;;  %v14635_v26 = vld [vmem:[%s21879_s3 + $0xcc] ss:$20 sps:$4 sm:$0xff]  }
 0x453   : > { %v14630_v50 = vld [vmem:[%s21879_s3 + $0x670] ss:$20 sps:$4 sm:$0xff]  }
 0x454   : > { %v7641_v62 = vrot.slane %v4305_v60, 1  ;;  %v7642_v58 = vrot.slane %v4307_v61, 2  ;;  %v4312_v53 = vshrl.u32 %v18389_v40, 16  ;;  %v4314_v0 = vshll.u32 %v18389_v40, 16 }
 0x455   : > { %v4309_v17 = vrot.slane %v4307_v61, 1  ;;  %v14638_v61 = vld [vmem:[%s21879_s3 + $0x64c] ss:$20 sps:$4 sm:$0xff]  }
 0x456   : > { %v18393_v13 = vor.u32 %v7642_v58, %v7641_v62  ;;  %v4316_v59 = vrot.slane %v4314_v0, 1  ;;  %v7644_v56 = vrot.slane %v4312_v53, 1  ;;  %v7645_v20 = vrot.slane %v4314_v0, 2  ;;  %v14641_v62 = vld [vmem:[%s21879_s3 + $0xa4] ss:$20 sps:$4 sm:$0xff]  }
 0x457   : > { %v18405_v27 = vor.u32 %v4309_v17, %v4305_v60  ;;  %v14633_v60 = vld [vmem:[%s21879_s3 + $0xc8] ss:$20 sps:$4 sm:$0xff]   ;;  %v14644_v0 = vld [vmem:[%s21879_s3 + $0x624] ss:$20 sps:$4 sm:$0xff]  }
 0x458   : > { %v18395_v48 = vor.u32 %v4316_v59, %v4312_v53  ;;  %v18403_v36 = vor.u32 %v7645_v20, %v7644_v56  ;;  %v14636_v58 = vld [vmem:[%s21879_s3 + $0x648] ss:$20 sps:$4 sm:$0xff]   ;;  %v14639_v53 = vld [vmem:[%s21879_s3 + $0xa0] ss:$20 sps:$4 sm:$0xff]   ;;  %v14645_v56 = vld [vmem:[%s21879_s3 + $0x78] ss:$20 sps:$4 sm:$0xff]  }
 0x459   : > { %v14647_v17 = vld [vmem:[%s21879_s3 + $0x7c] ss:$20 sps:$4 sm:$0xff]   ;;  %v14642_v59 = vld [vmem:[%s21879_s3 + $0x620] ss:$20 sps:$4 sm:$0xff]  }
 0x45a   : > { %12658 = vmatprep.mubr.msk.bf16.mxu0 %vm5049_vm0, %v18395_v48  ;;  %12659 = vmatprep.mubr.msk.bf16.mxu1 %vm5049_vm0, %v18395_v48  ;;  %v14650_v20 = vld [vmem:[%s21879_s3 + $0x5fc] ss:$20 sps:$4 sm:$0xff]  }
 0x45b   : > { %5129 = vmatmul.mubr.bf16.vlgmr.msra.gmra.mxu0 %v18405_v27  ;;  %5215 = vmatmul.mubr.bf16.vlgmr.msra.gmra.mxu1 %v18405_v27 }
 0x45c   : > { %5140 = vmatpush1.bf16.msra.mxu0 %v14578_v39  ;;  %13989 = vmatpush3.bf16.msra.mxu1 %v14582_v42  ;;  %v14653_v39 = vld [vmem:[%s21879_s3 + $0x54] ss:$20 sps:$4 sm:$0xff]   ;;  %v14648_v42 = vld [vmem:[%s21879_s3 + $0x5f8] ss:$20 sps:$4 sm:$0xff]  }
 0x45d   : > { %5171 = vmatprep.mubr.bf16.mxu0 %v18305_v9  ;;  %5257 = vmatprep.mubr.bf16.mxu1 %v18305_v9  ;;  %v14592_v9 = vld [vmem:[%s21879_s3 + $0x538] ss:$20 sps:$4 sm:$0xff]  }
 0x45e   : > { %5141 = vmatprep.subr.bf16.mxu0 %v14585_v37  ;;  %13990 = vmatprep.subr.bf16.mxu1 %v14586_v54  ;;  %v14651_v37 = vld [vmem:[%s21879_s3 + $0x50] ss:$20 sps:$4 sm:$0xff]   ;;  %v14656_v54 = vld [vmem:[%s21879_s3 + $0x5d4] ss:$20 sps:$4 sm:$0xff]  }
 0x460   : > { %5142 = vmatpush1.bf16.msra.mxu0 %v14583_v38  ;;  %13991 = vmatpush3.bf16.msra.mxu1 %v14587_v41  ;;  %v14659_v38 = vld [vmem:[%s21879_s3 + $0x2c] ss:$20 sps:$4 sm:$0xff]   ;;  %v14654_v41 = vld [vmem:[%s21879_s3 + $0x5d0] ss:$20 sps:$4 sm:$0xff]  }
 0x461   : > { %5143 = vmatprep.subr.bf16.mxu0 %v14590_v15  ;;  %13992 = vmatprep.subr.bf16.mxu1 %v14591_v14  ;;  %v14657_v15 = vld [vmem:[%s21879_s3 + $0x28] ss:$20 sps:$4 sm:$0xff]   ;;  %v14662_v14 = vld [vmem:[%s21879_s3 + $0x5ac] ss:$20 sps:$4 sm:$0xff]  }
 0x464   : > { %5144 = vmatpush1.bf16.msra.mxu0 %v14588_v2  ;;  %13993 = vmatpush3.bf16.msra.mxu1 %v14592_v9  ;;  %v14665_v2 = vld [vmem:[%s21879_s3 + $0x4] ss:$20 sps:$4 sm:$0xff]   ;;  %v14660_v9 = vld [vmem:[%s21879_s3 + $0x5a8] ss:$20 sps:$4 sm:$0xff]  }
 0x465   : > { %5145 = vmatprep.subr.bf16.mxu0 %v14595_v28  ;;  %13994 = vmatprep.subr.bf16.mxu1 %v14596_v44  ;;  %v14663_v28 = vld [vmem:[%s21879_s3] ss:$20 sps:$4 sm:$0xff]   ;;  %v14668_v44 = vld [vmem:[%s21879_s3 + $0x25c] ss:$20 sps:$4 sm:$0xff]  }
 0x468   : > { %5146 = vmatpush1.bf16.msra.mxu0 %v14593_v45  ;;  %13995 = vmatpush3.bf16.msra.mxu1 %v14597_v21  ;;  %v14669_v45 = vld [vmem:[%s21879_s3 + $0x808] ss:$20 sps:$4 sm:$0xff]   ;;  %v21969_v21 = vmov 0  }
 0x469   : > { %5147 = vmatprep.subr.bf16.mxu0 %v14600_v57  ;;  %13996 = vmatprep.subr.bf16.mxu1 %v14601_v11  ;;  %v14666_v57 = vld [vmem:[%s21879_s3 + $0x258] ss:$20 sps:$4 sm:$0xff]   ;;  %v14672_v11 = vld [vmem:[%s21879_s3 + $0x234] ss:$20 sps:$4 sm:$0xff]  }
 0x46c   : > { %5148 = vmatpush1.bf16.msra.mxu0 %v14598_v6  ;;  %13997 = vmatpush3.bf16.msra.mxu1 %v14602_v55  ;;  %v14673_v6 = vld [vmem:[%s21879_s3 + $0x7e0] ss:$20 sps:$4 sm:$0xff]   ;;  %v14670_v55 = vld [vmem:[%s21879_s3 + $0x230] ss:$20 sps:$4 sm:$0xff]  }
 0x46d   : > { %5149 = vmatprep.subr.bf16.mxu0 %v14605_v43  ;;  %13998 = vmatprep.subr.bf16.mxu1 %v14606_v3  ;;  %v14674_v43 = vld [vmem:[%s21879_s3 + $0x208] ss:$20 sps:$4 sm:$0xff]   ;;  %v14680_v3 = vld [vmem:[%s21879_s3 + $0x1e4] ss:$20 sps:$4 sm:$0xff]  }
 0x470   : > { %5150 = vmatpush1.bf16.msra.mxu0 %v14603_v34  ;;  %13999 = vmatpush3.bf16.msra.mxu1 %v14607_v52  ;;  %v14681_v34 = vld [vmem:[%s21879_s3 + $0x790] ss:$20 sps:$4 sm:$0xff]   ;;  %v14678_v52 = vld [vmem:[%s21879_s3 + $0x1e0] ss:$20 sps:$4 sm:$0xff]  }
 0x471   : > { %5151 = vmatprep.subr.bf16.mxu0 %v14610_v35  ;;  %14000 = vmatprep.subr.bf16.mxu1 %v14611_v32  ;;  %v14684_v35 = vld [vmem:[%s21879_s3 + $0x1bc] ss:$20 sps:$4 sm:$0xff]  }
 0x472   : > { %v14685_v32 = vld [vmem:[%s21879_s3 + $0x768] ss:$20 sps:$4 sm:$0xff]  }
 0x474   : > { %5152 = vmatpush1.bf16.msra.mxu0 %v14608_v18  ;;  %14001 = vmatpush3.bf16.msra.mxu1 %v14612_v8  ;;  %v14682_v18 = vld [vmem:[%s21879_s3 + $0x1b8] ss:$20 sps:$4 sm:$0xff]   ;;  %v14688_v8 = vld [vmem:[%s21879_s3 + $0x194] ss:$20 sps:$4 sm:$0xff]  }
 0x475   : > { %5153 = vmatprep.subr.bf16.mxu0 %v14615_v19  ;;  %14002 = vmatprep.subr.bf16.mxu1 %v14616_v29  ;;  %v14689_v19 = vld [vmem:[%s21879_s3 + $0x740] ss:$20 sps:$4 sm:$0xff]   ;;  %v14686_v29 = vld [vmem:[%s21879_s3 + $0x190] ss:$20 sps:$4 sm:$0xff]  }
 0x478   : > { %5154 = vmatpush1.bf16.msra.mxu0 %v14613_v1  ;;  %14003 = vmatpush3.bf16.msra.mxu1 %v14617_v31  ;;  %v14692_v1 = vld [vmem:[%s21879_s3 + $0x16c] ss:$20 sps:$4 sm:$0xff]  }
 0x479   : > { %5155 = vmatprep.subr.bf16.mxu0 %v14620_v30  ;;  %6037 = vmatprep.subr.bf16.mxu1 %v14623_v12  ;;  %v14693_v31 = vld [vmem:[%s21879_s3 + $0x718] ss:$20 sps:$4 sm:$0xff]   ;;  %v14690_v30 = vld [vmem:[%s21879_s3 + $0x168] ss:$20 sps:$4 sm:$0xff]  }
 0x47a   : > { %v14696_v12 = vld [vmem:[%s21879_s3 + $0x144] ss:$20 sps:$4 sm:$0xff]  }
 0x47b   : > { %5258 = vmatmul.mubr.bf16.vlgmr.msra.gmra.mxu1 %v18312_v46 }
 0x47c   : > { %5156 = vmatpush2.bf16.msra.mxu0 %v14618_v5  ;;  %6038 = vmatpush1.bf16.msra.mxu1 %v14621_v49  ;;  %v14697_v5 = vld [vmem:[%s21879_s3 + $0x6f0] ss:$20 sps:$4 sm:$0xff]   ;;  %v14694_v49 = vld [vmem:[%s21879_s3 + $0x140] ss:$20 sps:$4 sm:$0xff]  }
 0x47d   : > { %6069 = vmatprep.mubr.bf16.mxu1 %v18297_v24  ;;  %5157 = vmatprep.subr.bf16.mxu0 %v14626_v22  ;;  %v14700_v22 = vld [vmem:[%s21879_s3 + $0x124] ss:$20 sps:$4 sm:$0xff]  }
 0x47e   : > { %6039 = vmatprep.subr.bf16.mxu1 %v14629_v25  ;;  %v14701_v25 = vld [vmem:[%s21879_s3 + $0x8a8] ss:$20 sps:$4 sm:$0xff]  }
 0x480   : > { %5158 = vmatpush2.bf16.msra.mxu0 %v14624_v51  ;;  %6040 = vmatpush1.bf16.msra.mxu1 %v14627_v16  ;;  %v14698_v51 = vld [vmem:[%s21879_s3 + $0x120] ss:$20 sps:$4 sm:$0xff]   ;;  %v14704_v16 = vld [vmem:[%s21879_s3 + $0xfc] ss:$20 sps:$4 sm:$0xff]  }
 0x481   : > { %5159 = vmatprep.subr.bf16.mxu0 %v14632_v23  ;;  %6041 = vmatprep.subr.bf16.mxu1 %v14635_v26  ;;  %v14705_v23 = vld [vmem:[%s21879_s3 + $0x880] ss:$20 sps:$4 sm:$0xff]   ;;  %v14702_v26 = vld [vmem:[%s21879_s3 + $0xf8] ss:$20 sps:$4 sm:$0xff]  }
 0x484   : > { %5160 = vmatpush2.bf16.msra.mxu0 %v14630_v50  ;;  %6042 = vmatpush1.bf16.msra.mxu1 %v14633_v60  ;;  %v14708_v50 = vld [vmem:[%s21879_s3 + $0xd4] ss:$20 sps:$4 sm:$0xff]   ;;  %v14709_v60 = vld [vmem:[%s21879_s3 + $0x858] ss:$20 sps:$4 sm:$0xff]  }
 0x485   : > { %5161 = vmatprep.subr.bf16.mxu0 %v14638_v61  ;;  %6043 = vmatprep.subr.bf16.mxu1 %v14641_v62  ;;  %v14706_v61 = vld [vmem:[%s21879_s3 + $0xd0] ss:$20 sps:$4 sm:$0xff]   ;;  %v14712_v62 = vld [vmem:[%s21879_s3 + $0xac] ss:$20 sps:$4 sm:$0xff]  }
 0x488   : > { %5162 = vmatpush2.bf16.msra.mxu0 %v14636_v58  ;;  %6044 = vmatpush1.bf16.msra.mxu1 %v14639_v53  ;;  %v14713_v58 = vld [vmem:[%s21879_s3 + $0x830] ss:$20 sps:$4 sm:$0xff]   ;;  %v14710_v53 = vld [vmem:[%s21879_s3 + $0xa8] ss:$20 sps:$4 sm:$0xff]  }
 0x489   : > { %5163 = vmatprep.subr.bf16.mxu0 %v14644_v0  ;;  %6045 = vmatprep.subr.bf16.mxu1 %v14647_v17  ;;  %v14716_v0 = vld [vmem:[%s21879_s3 + $0x39c] ss:$20 sps:$4 sm:$0xff]   ;;  %v14719_v17 = vld [vmem:[%s21879_s3 + $0x84] ss:$20 sps:$4 sm:$0xff]  }
 0x48c   : > { %5164 = vmatpush2.bf16.msra.mxu0 %v14642_v59  ;;  %6046 = vmatpush1.bf16.msra.mxu1 %v14645_v56  ;;  %v14714_v59 = vld [vmem:[%s21879_s3 + $0x398] ss:$20 sps:$4 sm:$0xff]   ;;  %v14717_v56 = vld [vmem:[%s21879_s3 + $0x80] ss:$20 sps:$4 sm:$0xff]  }
 0x48d   : > { %5165 = vmatprep.subr.bf16.mxu0 %v14650_v20  ;;  %6047 = vmatprep.subr.bf16.mxu1 %v14653_v39  ;;  %v14722_v20 = vld [vmem:[%s21879_s3 + $0x374] ss:$20 sps:$4 sm:$0xff]   ;;  %v14725_v39 = vld [vmem:[%s21879_s3 + $0x5c] ss:$20 sps:$4 sm:$0xff]  }
 0x490   : > { %5166 = vmatpush2.bf16.msra.mxu0 %v14648_v42  ;;  %6048 = vmatpush1.bf16.msra.mxu1 %v14651_v37  ;;  %v14720_v42 = vld [vmem:[%s21879_s3 + $0x370] ss:$20 sps:$4 sm:$0xff]   ;;  %v14723_v37 = vld [vmem:[%s21879_s3 + $0x58] ss:$20 sps:$4 sm:$0xff]  }
 0x491   : > { %5167 = vmatprep.subr.bf16.mxu0 %v14656_v54  ;;  %6049 = vmatprep.subr.bf16.mxu1 %v14659_v38  ;;  %v14728_v54 = vld [vmem:[%s21879_s3 + $0x34c] ss:$20 sps:$4 sm:$0xff]   ;;  %v14726_v38 = vld [vmem:[%s21879_s3 + $0x348] ss:$20 sps:$4 sm:$0xff]  }
 0x494   : > { %5168 = vmatpush2.bf16.msra.mxu0 %v14654_v41  ;;  %6050 = vmatpush1.bf16.msra.mxu1 %v14657_v15  ;;  %v14729_v41 = vld [vmem:[%s21879_s3 + $0x30] ss:$20 sps:$4 sm:$0xff]  }
 0x495   : > { %5169 = vmatprep.subr.bf16.mxu0 %v14662_v14  ;;  %6051 = vmatprep.subr.bf16.mxu1 %v14665_v2  ;;  %v14734_v15 = vld [vmem:[%s21879_s3 + $0x324] ss:$20 sps:$4 sm:$0xff]   ;;  %v14737_v14 = vld [vmem:[%s21879_s3 + $0xc] ss:$20 sps:$4 sm:$0xff]  }
 0x496   : > { %v14732_v2 = vld [vmem:[%s21879_s3 + $0x320] ss:$20 sps:$4 sm:$0xff]  }
 0x498   : > { %5170 = vmatpush2.bf16.msra.mxu0 %v14660_v9  ;;  %6052 = vmatpush1.bf16.msra.mxu1 %v14663_v28  ;;  %v14735_v9 = vld [vmem:[%s21879_s3 + $0x8] ss:$20 sps:$4 sm:$0xff]  }
 0x499   : > { %5266 = vmatprep.subr.bf16.mxu0 %v21969_v21  ;;  %6053 = vmatprep.subr.bf16.mxu1 %v14668_v44  ;;  %v14740_v28 = vld [vmem:[%s21879_s3 + $0x2fc] ss:$20 sps:$4 sm:$0xff]   ;;  %v14743_v44 = vld [vmem:[%s21879_s3 + $0x264] ss:$20 sps:$4 sm:$0xff]  }
 0x49b   : > { %5172 = vmatmul.mubr.bf16.vlgmr.msra.gmra.mxu0 %v18312_v46  ;;  %v14676_v46 = vld [vmem:[%s21879_s3 + $0x20c] ss:$20 sps:$4 sm:$0xff]  }
 0x49c   : > { %5267 = vmatpush1.bf16.msra.mxu0 %v14669_v45  ;;  %12660 = vmatprep.mubr.msk.bf16.mxu0 %vm5049_vm0, %v18395_v48  ;;  %v14677_v48 = vld [vmem:[%s21879_s3 + $0x7b8] ss:$20 sps:$4 sm:$0xff]  }
 0x49d   : > { %6054 = vmatpush2.bf16.msra.mxu1 %v14666_v57  ;;  %5268 = vmatprep.subr.bf16.mxu0 %v21969_v21  ;;  %v14738_v45 = vld [vmem:[%s21879_s3 + $0x2f8] ss:$20 sps:$4 sm:$0xff]   ;;  %v14741_v57 = vld [vmem:[%s21879_s3 + $0x260] ss:$20 sps:$4 sm:$0xff]  }
 0x49e   : > { %6055 = vmatprep.subr.bf16.mxu1 %v14672_v11  ;;  %v14746_v11 = vld [vmem:[%s21879_s3 + $0x2d4] ss:$20 sps:$4 sm:$0xff]  }
 0x4a0   : > { %5269 = vmatpush1.bf16.msra.mxu0 %v14673_v6  ;;  %v14749_v6 = vld [vmem:[%s21879_s3 + $0x23c] ss:$20 sps:$4 sm:$0xff]  }
 0x4a1   : > { %6056 = vmatpush2.bf16.msra.mxu1 %v14670_v55  ;;  %5270 = vmatprep.subr.bf16.mxu0 %v21969_v21  ;;  %v14744_v55 = vld [vmem:[%s21879_s3 + $0x2d0] ss:$20 sps:$4 sm:$0xff]  }
 0x4a2   : > { %6057 = vmatprep.subr.bf16.mxu1 %v14676_v46  ;;  %v14747_v46 = vld [vmem:[%s21879_s3 + $0x238] ss:$20 sps:$4 sm:$0xff]  }
 0x4a4   : > { %5271 = vmatpush1.bf16.msra.mxu0 %v14677_v48  ;;  %v14752_v48 = vld [vmem:[%s21879_s3 + $0x2ac] ss:$20 sps:$4 sm:$0xff]  }
 0x4a5   : > { %6058 = vmatpush2.bf16.msra.mxu1 %v14674_v43  ;;  %5272 = vmatprep.subr.bf16.mxu0 %v21969_v21  ;;  %v14755_v43 = vld [vmem:[%s21879_s3 + $0x214] ss:$20 sps:$4 sm:$0xff]  }
 0x4a6   : > { %6059 = vmatprep.subr.bf16.mxu1 %v14680_v3  ;;  %v14750_v3 = vld [vmem:[%s21879_s3 + $0x2a8] ss:$20 sps:$4 sm:$0xff]  }
 0x4a8   : > { %5273 = vmatpush1.bf16.msra.mxu0 %v14681_v34  ;;  %v14753_v34 = vld [vmem:[%s21879_s3 + $0x210] ss:$20 sps:$4 sm:$0xff]  }
 0x4a9   : > { %6060 = vmatpush2.bf16.msra.mxu1 %v14678_v52  ;;  %5274 = vmatprep.subr.bf16.mxu0 %v21969_v21  ;;  %v14758_v52 = vld [vmem:[%s21879_s3 + $0x284] ss:$20 sps:$4 sm:$0xff]  }
 0x4aa   : > { %6061 = vmatprep.subr.bf16.mxu1 %v14684_v35  ;;  %v14761_v35 = vld [vmem:[%s21879_s3 + $0x1ec] ss:$20 sps:$4 sm:$0xff]  }
 0x4ac   : > { %5275 = vmatpush1.bf16.msra.mxu0 %v14685_v32  ;;  %v14756_v32 = vld [vmem:[%s21879_s3 + $0x280] ss:$20 sps:$4 sm:$0xff]  }
 0x4ad   : > { %6062 = vmatpush2.bf16.msra.mxu1 %v14682_v18  ;;  %5276 = vmatprep.subr.bf16.mxu0 %v21969_v21  ;;  %v14759_v18 = vld [vmem:[%s21879_s3 + $0x1e8] ss:$20 sps:$4 sm:$0xff]  }
 0x4ae   : > { %6063 = vmatprep.subr.bf16.mxu1 %v14688_v8  ;;  %v14764_v8 = vld [vmem:[%s21879_s3 + $0x43c] ss:$20 sps:$4 sm:$0xff]  }
 0x4b0   : > { %5277 = vmatpush1.bf16.msra.mxu0 %v14689_v19  ;;  %v14767_v19 = vld [vmem:[%s21879_s3 + $0x1c4] ss:$20 sps:$4 sm:$0xff]  }
 0x4b1   : > { %6064 = vmatpush2.bf16.msra.mxu1 %v14686_v29  ;;  %5278 = vmatprep.subr.bf16.mxu0 %v21969_v21  ;;  %v14762_v29 = vld [vmem:[%s21879_s3 + $0x438] ss:$20 sps:$4 sm:$0xff]  }
 0x4b2   : > { %6065 = vmatprep.subr.bf16.mxu1 %v14692_v1  ;;  %v14765_v1 = vld [vmem:[%s21879_s3 + $0x1c0] ss:$20 sps:$4 sm:$0xff]  }
 0x4b4   : > { %5279 = vmatpush1.bf16.msra.mxu0 %v14693_v31  ;;  %v14770_v31 = vld [vmem:[%s21879_s3 + $0x414] ss:$20 sps:$4 sm:$0xff]  }
 0x4b5   : > { %6066 = vmatpush2.bf16.msra.mxu1 %v14690_v30  ;;  %5280 = vmatprep.subr.bf16.mxu0 %v21969_v21  ;;  %v14773_v30 = vld [vmem:[%s21879_s3 + $0x19c] ss:$20 sps:$4 sm:$0xff]  }
 0x4b6   : > { %6067 = vmatprep.subr.bf16.mxu1 %v14696_v12  ;;  %v14768_v12 = vld [vmem:[%s21879_s3 + $0x410] ss:$20 sps:$4 sm:$0xff]  }
 0x4b8   : > { %5281 = vmatpush1.bf16.msra.mxu0 %v14697_v5  ;;  %v14771_v5 = vld [vmem:[%s21879_s3 + $0x198] ss:$20 sps:$4 sm:$0xff]  }
 0x4b9   : > { %6068 = vmatpush2.bf16.msra.mxu1 %v14694_v49  ;;  %5290 = vmatprep.subr.bf16.mxu0 %v21969_v21  ;;  %v14776_v49 = vld [vmem:[%s21879_s3 + $0x3ec] ss:$20 sps:$4 sm:$0xff]  }
 0x4ba   : > { %6123 = vmatprep.subr.bf16.mxu1 %v14700_v22  ;;  %v14779_v22 = vld [vmem:[%s21879_s3 + $0x174] ss:$20 sps:$4 sm:$0xff]  }
 0x4bc   : > { %6070 = vmatmul.mubr.bf16.vlgmr.msra.gmra.mxu1 %v18295_v63  ;;  %5291 = vmatpush2.bf16.msra.mxu0 %v14701_v25  ;;  %v14774_v25 = vld [vmem:[%s21879_s3 + $0x3e8] ss:$20 sps:$4 sm:$0xff]  }
 0x4bd   : > { %6124 = vmatpush1.bf16.msra.mxu1 %v14698_v51  ;;  %6155 = vmatprep.mubr.bf16.mxu1 %v18297_v24  ;;  %v14777_v51 = vld [vmem:[%s21879_s3 + $0x170] ss:$20 sps:$4 sm:$0xff]  }
 0x4be   : > { %5292 = vmatprep.subr.bf16.mxu0 %v21969_v21  ;;  %6125 = vmatprep.subr.bf16.mxu1 %v14704_v16  ;;  %v14782_v16 = vld [vmem:[%s21879_s3 + $0x3c4] ss:$20 sps:$4 sm:$0xff]  }
 0x4c0   : > { %5293 = vmatpush2.bf16.msra.mxu0 %v14705_v23  ;;  %v14785_v23 = vld [vmem:[%s21879_s3 + $0x14c] ss:$20 sps:$4 sm:$0xff]  }
 0x4c1   : > { %6126 = vmatpush1.bf16.msra.mxu1 %v14702_v26  ;;  %5294 = vmatprep.subr.bf16.mxu0 %v21969_v21  ;;  %v14780_v26 = vld [vmem:[%s21879_s3 + $0x3c0] ss:$20 sps:$4 sm:$0xff]  }
 0x4c2   : > { %6127 = vmatprep.subr.bf16.mxu1 %v14708_v50  ;;  %v14783_v50 = vld [vmem:[%s21879_s3 + $0x148] ss:$20 sps:$4 sm:$0xff]  }
 0x4c4   : > { %5295 = vmatpush2.bf16.msra.mxu0 %v14709_v60  ;;  %v14788_v60 = vld [vmem:[%s21879_s3 + $0x3a4] ss:$20 sps:$4 sm:$0xff]  }
 0x4c5   : > { %6128 = vmatpush1.bf16.msra.mxu1 %v14706_v61  ;;  %5296 = vmatprep.subr.bf16.mxu0 %v21969_v21  ;;  %v14786_v61 = vld [vmem:[%s21879_s3 + $0x3a0] ss:$20 sps:$4 sm:$0xff]  }
 0x4c6   : > { %6129 = vmatprep.subr.bf16.mxu1 %v14712_v62  ;;  %v14789_v62 = vld [vmem:[%s21879_s3 + $0x3a8] ss:$20 sps:$4 sm:$0xff]  }
 0x4c8   : > { %5297 = vmatpush2.bf16.msra.mxu0 %v14713_v58  ;;  %v14792_v58 = vld [vmem:[%s21879_s3 + $0x37c] ss:$20 sps:$4 sm:$0xff]  }
 0x4c9   : > { %6130 = vmatpush1.bf16.msra.mxu1 %v14710_v53  ;;  %6080 = vmatprep.subr.bf16.mxu0 %v14716_v0  ;;  %v14790_v53 = vld [vmem:[%s21879_s3 + $0x378] ss:$20 sps:$4 sm:$0xff]   ;;  %v14793_v0 = vld [vmem:[%s21879_s3 + $0x380] ss:$20 sps:$4 sm:$0xff]  }
 0x4ca   : > { %6131 = vmatprep.subr.bf16.mxu1 %v14719_v17  ;;  %v14796_v17 = vld [vmem:[%s21879_s3 + $0x354] ss:$20 sps:$4 sm:$0xff]  }
 0x4cb   : > { %5299 = vmatmul.mubr.bf16.vlgmr.msra.gmra.mxu0 %v18405_v27  ;;  %v14731_v27 = vld [vmem:[%s21879_s3 + $0x34] ss:$20 sps:$4 sm:$0xff]  }
 0x4cc   : > { %6081 = vmatpush1.bf16.msra.mxu0 %v14714_v59  ;;  %12801 = vmatprep.mubr.msk.bf16.mxu0 %vm5049_vm0, %v18389_v40  ;;  %v14794_v59 = vld [vmem:[%s21879_s3 + $0x350] ss:$20 sps:$4 sm:$0xff]  }
 0x4cd   : > { %6132 = vmatpush1.bf16.msra.mxu1 %v14717_v56  ;;  %6082 = vmatprep.subr.bf16.mxu0 %v14722_v20  ;;  %v14797_v56 = vld [vmem:[%s21879_s3 + $0x358] ss:$20 sps:$4 sm:$0xff]  }
 0x4ce   : > { %6133 = vmatprep.subr.bf16.mxu1 %v14725_v39  ;;  %v14800_v20 = vld [vmem:[%s21879_s3 + $0x32c] ss:$20 sps:$4 sm:$0xff]   ;;  %v14798_v39 = vld [vmem:[%s21879_s3 + $0x328] ss:$20 sps:$4 sm:$0xff]  }
 0x4d0   : > { %6083 = vmatpush1.bf16.msra.mxu0 %v14720_v42  ;;  %v14801_v42 = vld [vmem:[%s21879_s3 + $0x330] ss:$20 sps:$4 sm:$0xff]  }
 0x4d1   : > { %6134 = vmatpush1.bf16.msra.mxu1 %v14723_v37  ;;  %6084 = vmatprep.subr.bf16.mxu0 %v14728_v54  ;;  %v14804_v37 = vld [vmem:[%s21879_s3 + $0x304] ss:$20 sps:$4 sm:$0xff]   ;;  %v14802_v54 = vld [vmem:[%s21879_s3 + $0x300] ss:$20 sps:$4 sm:$0xff]  }
 0x4d2   : > { %6135 = vmatprep.subr.bf16.mxu1 %v14731_v27  ;;  %v14805_v27 = vld [vmem:[%s21879_s3 + $0x308] ss:$20 sps:$4 sm:$0xff]  }
 0x4d4   : > { %6085 = vmatpush1.bf16.msra.mxu0 %v14726_v38  ;;  %v14808_v38 = vld [vmem:[%s21879_s3 + $0x2dc] ss:$20 sps:$4 sm:$0xff]  }
 0x4d5   : > { %6136 = vmatpush1.bf16.msra.mxu1 %v14729_v41  ;;  %6086 = vmatprep.subr.bf16.mxu0 %v14734_v15  ;;  %v14806_v41 = vld [vmem:[%s21879_s3 + $0x2d8] ss:$20 sps:$4 sm:$0xff]   ;;  %v14809_v15 = vld [vmem:[%s21879_s3 + $0x2e0] ss:$20 sps:$4 sm:$0xff]  }
 0x4d6   : > { %6137 = vmatprep.subr.bf16.mxu1 %v14737_v14  ;;  %v14812_v14 = vld [vmem:[%s21879_s3 + $0x2b4] ss:$20 sps:$4 sm:$0xff]  }
 0x4d8   : > { %6087 = vmatpush1.bf16.msra.mxu0 %v14732_v2  ;;  %v14810_v2 = vld [vmem:[%s21879_s3 + $0x2b0] ss:$20 sps:$4 sm:$0xff]  }
 0x4d9   : > { %6138 = vmatpush1.bf16.msra.mxu1 %v14735_v9  ;;  %6088 = vmatprep.subr.bf16.mxu0 %v14740_v28  ;;  %v14813_v9 = vld [vmem:[%s21879_s3 + $0x2b8] ss:$20 sps:$4 sm:$0xff]  }
 0x4da   : > { %6139 = vmatprep.subr.bf16.mxu1 %v14743_v44  ;;  %v14816_v28 = vld [vmem:[%s21879_s3 + $0x28c] ss:$20 sps:$4 sm:$0xff]   ;;  %v14814_v44 = vld [vmem:[%s21879_s3 + $0x288] ss:$20 sps:$4 sm:$0xff]  }
 0x4dc   : > { %6089 = vmatpush1.bf16.msra.mxu0 %v14738_v45  ;;  %v18951_v45 = vpop.f32.mrf.mxu1 }
 0x4dd   : > { %6140 = vmatpush2.bf16.msra.mxu1 %v14741_v57  ;;  %6090 = vmatprep.subr.bf16.mxu0 %v14746_v11  ;;  %v14817_v57 = vld [vmem:[%s21879_s3 + $0x290] ss:$20 sps:$4 sm:$0xff]  }
 0x4de   : > { %6141 = vmatprep.subr.bf16.mxu1 %v14749_v6  ;;  %v14820_v11 = vld [vmem:[%s21879_s3 + $0x444] ss:$20 sps:$4 sm:$0xff]   ;;  %v14818_v6 = vld [vmem:[%s21879_s3 + $0x440] ss:$20 sps:$4 sm:$0xff]  }
 0x4e0   : > { %6091 = vmatpush1.bf16.msra.mxu0 %v14744_v55  ;;  %v18963_v55 = vpop.f32.mrf.mxu1 }
 0x4e1   : > { %6142 = vmatpush2.bf16.msra.mxu1 %v14747_v46  ;;  %6092 = vmatprep.subr.bf16.mxu0 %v14752_v48  ;;  %v14821_v46 = vld [vmem:[%s21879_s3 + $0x448] ss:$20 sps:$4 sm:$0xff]  }
 0x4e2   : > { %6143 = vmatprep.subr.bf16.mxu1 %v14755_v43  ;;  %v14824_v48 = vld [vmem:[%s21879_s3 + $0x41c] ss:$20 sps:$4 sm:$0xff]  }
 0x4e4   : > { %6093 = vmatpush1.bf16.msra.mxu0 %v14750_v3  ;;  %v14822_v3 = vld [vmem:[%s21879_s3 + $0x418] ss:$20 sps:$4 sm:$0xff]  }
 0x4e5   : > { %6144 = vmatpush2.bf16.msra.mxu1 %v14753_v34  ;;  %6094 = vmatprep.subr.bf16.mxu0 %v14758_v52  ;;  %v18977_v34 = vpop.f32.mrf.mxu1 }
 0x4e6   : > { %6145 = vmatprep.subr.bf16.mxu1 %v14761_v35  ;;  %v14825_v35 = vld [vmem:[%s21879_s3 + $0x420] ss:$20 sps:$4 sm:$0xff]  }
 0x4e8   : > { %6095 = vmatpush1.bf16.msra.mxu0 %v14756_v32  ;;  %v14828_v32 = vld [vmem:[%s21879_s3 + $0x3f4] ss:$20 sps:$4 sm:$0xff]  }
 0x4e9   : > { %6146 = vmatpush2.bf16.msra.mxu1 %v14759_v18  ;;  %6104 = vmatprep.subr.bf16.mxu0 %v14764_v8  ;;  %v14826_v8 = vld [vmem:[%s21879_s3 + $0x3f0] ss:$20 sps:$4 sm:$0xff]  }
 0x4ea   : > { %6147 = vmatprep.subr.bf16.mxu1 %v14767_v19  ;;  %v5093_v19 = vpop.f32.mrf.mxu1 }
 0x4ec   : > { %6105 = vmatpush2.bf16.msra.mxu0 %v14762_v29 }
 0x4ed   : > { %6148 = vmatpush2.bf16.msra.mxu1 %v14765_v1  ;;  %6106 = vmatprep.subr.bf16.mxu0 %v14770_v31  ;;  %v14829_v1 = vld [vmem:[%s21879_s3 + $0x3f8] ss:$20 sps:$4 sm:$0xff]  }
 0x4ee   : > { %6149 = vmatprep.subr.bf16.mxu1 %v14773_v30  ;;  %v14832_v31 = vld [vmem:[%s21879_s3 + $0x3cc] ss:$20 sps:$4 sm:$0xff]  }
 0x4f0   : > { %6107 = vmatpush2.bf16.msra.mxu0 %v14768_v12  ;;  %v14830_v12 = vld [vmem:[%s21879_s3 + $0x3c8] ss:$20 sps:$4 sm:$0xff]  }
 0x4f1   : > { %6150 = vmatpush2.bf16.msra.mxu1 %v14771_v5  ;;  %6108 = vmatprep.subr.bf16.mxu0 %v14776_v49  ;;  %v14833_v5 = vld [vmem:[%s21879_s3 + $0x3d0] ss:$20 sps:$4 sm:$0xff]   ;;  %v14834_v49 = vld [vmem:[%s21879_s3 + $0x268] ss:$20 sps:$4 sm:$0xff]  }
 0x4f2   : > { %6151 = vmatprep.subr.bf16.mxu1 %v14779_v22  ;;  %v14837_v22 = vld [vmem:[%s21879_s3 + $0xc5c] ss:$20 sps:$4 sm:$0xff]  }
 0x4f4   : > { %6109 = vmatpush2.bf16.msra.mxu0 %v14774_v25  ;;  %v14838_v25 = vld [vmem:[%s21879_s3 + $0x128] ss:$20 sps:$4 sm:$0xff]  }
 0x4f5   : > { %6152 = vmatpush2.bf16.msra.mxu1 %v14777_v51  ;;  %6110 = vmatprep.subr.bf16.mxu0 %v14782_v16  ;;  %v14835_v51 = vld [vmem:[%s21879_s3 + $0xc58] ss:$20 sps:$4 sm:$0xff]   ;;  %v14839_v16 = vld [vmem:[%s21879_s3 + $0x240] ss:$20 sps:$4 sm:$0xff]  }
 0x4f6   : > { %6153 = vmatprep.subr.bf16.mxu1 %v14785_v23  ;;  %v14842_v23 = vld [vmem:[%s21879_s3 + $0xc34] ss:$20 sps:$4 sm:$0xff]  }
 0x4f8   : > { %6111 = vmatpush2.bf16.msra.mxu0 %v14780_v26  ;;  %v19030_v26 = vrot.slane %v18389_v40, 1 }
 0x4f9   : > { %6154 = vmatpush2.bf16.msra.mxu1 %v14783_v50  ;;  %6166 = vmatprep.subr.bf16.mxu0 %v14788_v60  ;;  %v14843_v50 = vld [vmem:[%s21879_s3 + $0x100] ss:$20 sps:$4 sm:$0xff]  }
 0x4fa   : > { %6250 = vmatprep.subr.bf16.mxu1 %v21969_v21 }
 0x4fb   : > { %6113 = vmatmul.mubr.bf16.vlgmr.msra.gmra.mxu0 %v18385_v10 }
 0x4fc   : > { %6156 = vmatmul.mubr.bf16.vlgmr.msra.gmra.mxu1 %v18295_v63  ;;  %6167 = vmatpush1.bf16.msra.mxu0 %v14786_v61  ;;  %v14840_v61 = vld [vmem:[%s21879_s3 + $0xc30] ss:$20 sps:$4 sm:$0xff]  }
 0x4fd   : > { %12802 = vmatprep.mubr.msk.bf16.mxu0 %vm5049_vm0, %v18389_v40  ;;  %6251 = vmatpush1.bf16.msra.mxu1 %v14789_v62  ;;  %v14844_v62 = vld [vmem:[%s21879_s3 + $0x218] ss:$20 sps:$4 sm:$0xff]  }
 0x4fe   : > { %12803 = vmatprep.mubr.msk.bf16.mxu1 %vm5049_vm0, %v18389_v40  ;;  %6168 = vmatprep.subr.bf16.mxu0 %v14792_v58  ;;  %v14847_v58 = vld [vmem:[%s21879_s3 + $0xc0c] ss:$20 sps:$4 sm:$0xff]  }
 0x4ff   : > { %6252 = vmatprep.subr.bf16.mxu1 %v21969_v21 }
 0x500   : > { %6169 = vmatpush1.bf16.msra.mxu0 %v14790_v53  ;;  %v14848_v53 = vld [vmem:[%s21879_s3 + $0xd8] ss:$20 sps:$4 sm:$0xff]  }
 0x501   : > { %6253 = vmatpush1.bf16.msra.mxu1 %v14793_v0  ;;  %6170 = vmatprep.subr.bf16.mxu0 %v14796_v17  ;;  %v14845_v17 = vld [vmem:[%s21879_s3 + $0xc08] ss:$20 sps:$4 sm:$0xff]  }
 0x502   : > { %6254 = vmatprep.subr.bf16.mxu1 %v21969_v21 }
 0x504   : > { %6171 = vmatpush1.bf16.msra.mxu0 %v14794_v59  ;;  %v14849_v59 = vld [vmem:[%s21879_s3 + $0x1f0] ss:$20 sps:$4 sm:$0xff]  }
 0x505   : > { %6255 = vmatpush1.bf16.msra.mxu1 %v14797_v56  ;;  %6172 = vmatprep.subr.bf16.mxu0 %v14800_v20  ;;  %v14852_v56 = vld [vmem:[%s21879_s3 + $0xbe4] ss:$20 sps:$4 sm:$0xff]  }
 0x506   : > { %6256 = vmatprep.subr.bf16.mxu1 %v21969_v21  ;;  %v14853_v20 = vld [vmem:[%s21879_s3 + $0xb0] ss:$20 sps:$4 sm:$0xff]  }
 0x508   : > { %6173 = vmatpush1.bf16.msra.mxu0 %v14798_v39 }
 0x509   : > { %6257 = vmatpush1.bf16.msra.mxu1 %v14801_v42  ;;  %6174 = vmatprep.subr.bf16.mxu0 %v14804_v37  ;;  %v14850_v42 = vld [vmem:[%s21879_s3 + $0xbe0] ss:$20 sps:$4 sm:$0xff]   ;;  %v14854_v37 = vld [vmem:[%s21879_s3 + $0x1c8] ss:$20 sps:$4 sm:$0xff]  }
 0x50a   : > { %6258 = vmatprep.subr.bf16.mxu1 %v21969_v21 }
 0x50c   : > { %6175 = vmatpush1.bf16.msra.mxu0 %v14802_v54  ;;  %v14857_v54 = vld [vmem:[%s21879_s3 + $0xbbc] ss:$20 sps:$4 sm:$0xff]  }
 0x50d   : > { %6259 = vmatpush1.bf16.msra.mxu1 %v14805_v27  ;;  %6176 = vmatprep.subr.bf16.mxu0 %v14808_v38  ;;  %v14858_v27 = vld [vmem:[%s21879_s3 + $0x88] ss:$20 sps:$4 sm:$0xff]  }
 0x50e   : > { %6260 = vmatprep.subr.bf16.mxu1 %v21969_v21 }
 0x510   : > { %6177 = vmatpush1.bf16.msra.mxu0 %v14806_v41  ;;  %v14855_v41 = vld [vmem:[%s21879_s3 + $0xbb8] ss:$20 sps:$4 sm:$0xff]  }
 0x511   : > { %6261 = vmatpush1.bf16.msra.mxu1 %v14809_v15  ;;  %6178 = vmatprep.subr.bf16.mxu0 %v14812_v14  ;;  %v14859_v15 = vld [vmem:[%s21879_s3 + $0x1a0] ss:$20 sps:$4 sm:$0xff]  }
 0x512   : > { %6262 = vmatprep.subr.bf16.mxu1 %v21969_v21  ;;  %v14862_v14 = vld [vmem:[%s21879_s3 + $0xb94] ss:$20 sps:$4 sm:$0xff]  }
 0x514   : > { %6179 = vmatpush1.bf16.msra.mxu0 %v14810_v2 }
 0x515   : > { %6263 = vmatpush1.bf16.msra.mxu1 %v14813_v9  ;;  %6180 = vmatprep.subr.bf16.mxu0 %v14816_v28  ;;  %v14863_v9 = vld [vmem:[%s21879_s3 + $0x60] ss:$20 sps:$4 sm:$0xff]  }
 0x516   : > { %6264 = vmatprep.subr.bf16.mxu1 %v21969_v21 }
 0x518   : > { %6181 = vmatpush1.bf16.msra.mxu0 %v14814_v44  ;;  %v14860_v44 = vld [vmem:[%s21879_s3 + $0xb90] ss:$20 sps:$4 sm:$0xff]  }
 0x519   : > { %6265 = vmatpush1.bf16.msra.mxu1 %v14817_v57  ;;  %6190 = vmatprep.subr.bf16.mxu0 %v14820_v11  ;;  %v14864_v57 = vld [vmem:[%s21879_s3 + $0x178] ss:$20 sps:$4 sm:$0xff]  }
 0x51a   : > { %6274 = vmatprep.subr.bf16.mxu1 %v21969_v21 }
 0x51b   : > { %v18972_v43 = vpop.f32.mrf.mxu0  ;;  %v19035_v60 = vpop.f32.mrf.mxu1 }
 0x51c   : > { %6191 = vmatpush2.bf16.msra.mxu0 %v14818_v6  ;;  %v14867_v6 = vld [vmem:[%s21879_s3 + $0xb6c] ss:$20 sps:$4 sm:$0xff]  }
 0x51d   : > { %6275 = vmatpush2.bf16.msra.mxu1 %v14821_v46  ;;  %v18979_v52 = vpop.f32.mrf.mxu0  ;;  %6192 = vmatprep.subr.bf16.mxu0 %v14824_v48  ;;  %v19052_v0 = vpop.f32.mrf.mxu1  ;;  %v14868_v48 = vld [vmem:[%s21879_s3 + $0x38] ss:$20 sps:$4 sm:$0xff]  }
 0x51e   : > { %6276 = vmatprep.subr.bf16.mxu1 %v21969_v21 }
 0x51f   : > { %v18988_v18 = vpop.f32.mrf.mxu0  ;;  %v19066_v39 = vpop.f32.mrf.mxu1 }
 0x520   : > { %6193 = vmatpush2.bf16.msra.mxu0 %v14822_v3 }
 0x521   : > { %6277 = vmatpush2.bf16.msra.mxu1 %v14825_v35  ;;  %v5136_v29 = vpop.f32.mrf.mxu0  ;;  %6194 = vmatprep.subr.bf16.mxu0 %v14828_v32  ;;  %v19080_v38 = vpop.f32.mrf.mxu1  ;;  %v14865_v35 = vld [vmem:[%s21879_s3 + $0xb68] ss:$20 sps:$4 sm:$0xff]   ;;  %v14869_v32 = vld [vmem:[%s21879_s3 + $0x150] ss:$20 sps:$4 sm:$0xff]  }
 0x522   : > { %v18999_v30 = vadd.f32 %v5136_v29, %v5093_v19  ;;  %6278 = vmatprep.subr.bf16.mxu1 %v21969_v21  ;;  %v14872_v19 = vld [vmem:[%s21879_s3 + $0xb44] ss:$20 sps:$4 sm:$0xff]  }
 0x523   : > { %v14873_v29 = vld [vmem:[%s21879_s3 + $0x10] ss:$20 sps:$4 sm:$0xff]  }
 0x524   : > { %6195 = vmatpush2.bf16.msra.mxu0 %v14826_v8 }
 0x525   : > { %6279 = vmatpush2.bf16.msra.mxu1 %v14829_v1  ;;  %6196 = vmatprep.subr.bf16.mxu0 %v14832_v31  ;;  %v14870_v1 = vld [vmem:[%s21879_s3 + $0xb40] ss:$20 sps:$4 sm:$0xff]   ;;  %v14876_v31 = vld [vmem:[%s21879_s3 + $0x9dc] ss:$20 sps:$4 sm:$0xff]  }
 0x526   : > { %6280 = vmatprep.subr.bf16.mxu1 %v21969_v21 }
 0x528   : > { %6197 = vmatpush2.bf16.msra.mxu0 %v14830_v12  ;;  %v14879_v12 = vld [vmem:[%s21879_s3 + $0xcfc] ss:$20 sps:$4 sm:$0xff]  }
 0x529   : > { %6281 = vmatpush2.bf16.msra.mxu1 %v14833_v5  ;;  %14010 = vmatprep.subr.bf16.mxu0 %v14834_v49  ;;  %v14874_v5 = vld [vmem:[%s21879_s3 + $0x9d8] ss:$20 sps:$4 sm:$0xff]  }
 0x52a   : > { %7245 = vmatprep.subr.bf16.mxu1 %v14837_v22  ;;  %v14877_v49 = vld [vmem:[%s21879_s3 + $0xcf8] ss:$20 sps:$4 sm:$0xff]   ;;  %v14882_v22 = vld [vmem:[%s21879_s3 + $0x9b4] ss:$20 sps:$4 sm:$0xff]  }
 0x52b   : > { %6199 = vmatmul.mubr.bf16.vlgmr.msra.gmra.mxu0 %v18385_v10 }
 0x52c   : > { %6283 = vmatmul.mubr.bf16.vlgmr.msra.gmra.mxu1 %v18385_v10  ;;  %14011 = vmatpush3.bf16.msra.mxu0 %v14838_v25  ;;  %v19141_v25 = vrot.slane %v18297_v24, 1 }
 0x52d   : > { %6241 = vmatprep.mubr.bf16.mxu0 %v18297_v24  ;;  %7246 = vmatpush1.bf16.msra.mxu1 %v14835_v51  ;;  %v14885_v51 = vld [vmem:[%s21879_s3 + $0xcd4] ss:$20 sps:$4 sm:$0xff]  }
 0x52e   : > { %13112 = vmatprep.mubr.msk.bf16.mxu1 %vm5049_vm0, %v19030_v26  ;;  %14012 = vmatprep.subr.bf16.mxu0 %v14839_v16  ;;  %v14880_v16 = vld [vmem:[%s21879_s3 + $0x9b0] ss:$20 sps:$4 sm:$0xff]  }
 0x52f   : > { %7247 = vmatprep.subr.bf16.mxu1 %v14842_v23  ;;  %v14883_v23 = vld [vmem:[%s21879_s3 + $0xcd0] ss:$20 sps:$4 sm:$0xff]  }
 0x530   : > { %14013 = vmatpush3.bf16.msra.mxu0 %v14843_v50  ;;  %v14888_v50 = vld [vmem:[%s21879_s3 + $0x98c] ss:$20 sps:$4 sm:$0xff]  }
 0x531   : > { %7248 = vmatpush1.bf16.msra.mxu1 %v14840_v61  ;;  %14014 = vmatprep.subr.bf16.mxu0 %v14844_v62  ;;  %v14891_v61 = vld [vmem:[%s21879_s3 + $0xcac] ss:$20 sps:$4 sm:$0xff]   ;;  %v14886_v62 = vld [vmem:[%s21879_s3 + $0x988] ss:$20 sps:$4 sm:$0xff]  }
 0x532   : > { %7249 = vmatprep.subr.bf16.mxu1 %v14847_v58  ;;  %v14889_v58 = vld [vmem:[%s21879_s3 + $0xca8] ss:$20 sps:$4 sm:$0xff]  }
 0x534   : > { %14015 = vmatpush3.bf16.msra.mxu0 %v14848_v53  ;;  %v14894_v53 = vld [vmem:[%s21879_s3 + $0x964] ss:$20 sps:$4 sm:$0xff]  }
 0x535   : > { %7250 = vmatpush1.bf16.msra.mxu1 %v14845_v17  ;;  %14016 = vmatprep.subr.bf16.mxu0 %v14849_v59  ;;  %v14897_v17 = vld [vmem:[%s21879_s3 + $0xc84] ss:$20 sps:$4 sm:$0xff]   ;;  %v14892_v59 = vld [vmem:[%s21879_s3 + $0x960] ss:$20 sps:$4 sm:$0xff]  }
 0x536   : > { %7251 = vmatprep.subr.bf16.mxu1 %v14852_v56  ;;  %v14895_v56 = vld [vmem:[%s21879_s3 + $0xc80] ss:$20 sps:$4 sm:$0xff]  }
 0x538   : > { %14017 = vmatpush3.bf16.msra.mxu0 %v14853_v20  ;;  %v14900_v20 = vld [vmem:[%s21879_s3 + $0x93c] ss:$20 sps:$4 sm:$0xff]  }
 0x539   : > { %7252 = vmatpush1.bf16.msra.mxu1 %v14850_v42  ;;  %14018 = vmatprep.subr.bf16.mxu0 %v14854_v37  ;;  %v14903_v42 = vld [vmem:[%s21879_s3 + $0xc64] ss:$20 sps:$4 sm:$0xff]  }
 0x53a   : > { %7253 = vmatprep.subr.bf16.mxu1 %v14857_v54  ;;  %v14898_v37 = vld [vmem:[%s21879_s3 + $0x938] ss:$20 sps:$4 sm:$0xff]   ;;  %v14901_v54 = vld [vmem:[%s21879_s3 + $0xc60] ss:$20 sps:$4 sm:$0xff]  }
 0x53b   : > { %v14004_v2 = vpop.f32.mrf.mxu1 }
 0x53c   : > { %14019 = vmatpush3.bf16.msra.mxu0 %v14858_v27  ;;  %v19191_v27 = vrot.slane %v18385_v10, 1 }
 0x53d   : > { %7254 = vmatpush1.bf16.msra.mxu1 %v14855_v41  ;;  %v14005_v28 = vpop.f32.mrf.mxu1  ;;  %14020 = vmatprep.subr.bf16.mxu0 %v14859_v15  ;;  %v14906_v41 = vld [vmem:[%s21879_s3 + $0x914] ss:$20 sps:$4 sm:$0xff]   ;;  %v14909_v15 = vld [vmem:[%s21879_s3 + $0xc3c] ss:$20 sps:$4 sm:$0xff]  }
 0x53e   : > { %v19100_v11 = vadd.f32 %v14005_v28, %v14004_v2  ;;  %7255 = vmatprep.subr.bf16.mxu1 %v14862_v14 }
 0x53f   : > { %v14007_v46 = vpop.f32.mrf.mxu1 }
 0x540   : > { %14021 = vmatpush3.bf16.msra.mxu0 %v14863_v9  ;;  %v14904_v9 = vld [vmem:[%s21879_s3 + $0x910] ss:$20 sps:$4 sm:$0xff]  }
 0x541   : > { %7256 = vmatpush1.bf16.msra.mxu1 %v14860_v44  ;;  %v14008_v3 = vpop.f32.mrf.mxu1  ;;  %14022 = vmatprep.subr.bf16.mxu0 %v14864_v57  ;;  %v14907_v44 = vld [vmem:[%s21879_s3 + $0xc38] ss:$20 sps:$4 sm:$0xff]  }
 0x542   : > { %v19114_v8 = vadd.f32 %v14008_v3, %v14007_v46  ;;  %7257 = vmatprep.subr.bf16.mxu1 %v14867_v6  ;;  %v14915_v6 = vld [vmem:[%s21879_s3 + $0xc14] ss:$20 sps:$4 sm:$0xff]  }
 0x543   : > { %v14910_v3 = vld [vmem:[%s21879_s3 + $0x8e8] ss:$20 sps:$4 sm:$0xff]  }
 0x544   : > { %14023 = vmatpush3.bf16.msra.mxu0 %v14868_v48 }
 0x545   : > { %7258 = vmatpush1.bf16.msra.mxu1 %v14865_v35  ;;  %14024 = vmatprep.subr.bf16.mxu0 %v14869_v32  ;;  %v14918_v32 = vld [vmem:[%s21879_s3 + $0x8c4] ss:$20 sps:$4 sm:$0xff]  }
 0x546   : > { %7259 = vmatprep.subr.bf16.mxu1 %v14872_v19 }
 0x548   : > { %14025 = vmatpush3.bf16.msra.mxu0 %v14873_v29  ;;  %v14916_v29 = vld [vmem:[%s21879_s3 + $0x8c0] ss:$20 sps:$4 sm:$0xff]  }
 0x549   : > { %7260 = vmatpush1.bf16.msra.mxu1 %v14870_v1  ;;  %7202 = vmatprep.subr.bf16.mxu0 %v14876_v31  ;;  %v14919_v1 = vld [vmem:[%s21879_s3 + $0xbe8] ss:$20 sps:$4 sm:$0xff]   ;;  %v14927_v31 = vld [vmem:[%s21879_s3 + $0xbc4] ss:$20 sps:$4 sm:$0xff]  }
 0x54a   : > { %7269 = vmatprep.subr.bf16.mxu1 %v14879_v12  ;;  %v14922_v12 = vld [vmem:[%s21879_s3 + $0xb18] ss:$20 sps:$4 sm:$0xff]  }
 0x54b   : > { %6242 = vmatmul.mubr.bf16.vlgmr.msra.gmra.mxu0 %v18295_v63 }
 0x54c   : > { %7203 = vmatpush1.bf16.msra.mxu0 %v14874_v5  ;;  %7234 = vmatprep.mubr.bf16.mxu0 %v19141_v25  ;;  %v14925_v5 = vld [vmem:[%s21879_s3 + $0xbc0] ss:$20 sps:$4 sm:$0xff]  }
 0x54d   : > { %7270 = vmatpush2.bf16.msra.mxu1 %v14877_v49  ;;  %7204 = vmatprep.subr.bf16.mxu0 %v14882_v22  ;;  %v14930_v49 = vld [vmem:[%s21879_s3 + $0xaf4] ss:$20 sps:$4 sm:$0xff]   ;;  %v14933_v22 = vld [vmem:[%s21879_s3 + $0xb9c] ss:$20 sps:$4 sm:$0xff]  }
 0x54e   : > { %7271 = vmatprep.subr.bf16.mxu1 %v14885_v51  ;;  %v14928_v51 = vld [vmem:[%s21879_s3 + $0xaf0] ss:$20 sps:$4 sm:$0xff]  }
 0x550   : > { %7205 = vmatpush1.bf16.msra.mxu0 %v14880_v16  ;;  %v14931_v16 = vld [vmem:[%s21879_s3 + $0xb98] ss:$20 sps:$4 sm:$0xff]  }
 0x551   : > { %7272 = vmatpush2.bf16.msra.mxu1 %v14883_v23  ;;  %7206 = vmatprep.subr.bf16.mxu0 %v14888_v50  ;;  %v14936_v23 = vld [vmem:[%s21879_s3 + $0xacc] ss:$20 sps:$4 sm:$0xff]   ;;  %v14939_v50 = vld [vmem:[%s21879_s3 + $0xb74] ss:$20 sps:$4 sm:$0xff]  }
 0x552   : > { %7273 = vmatprep.subr.bf16.mxu1 %v14891_v61  ;;  %v14934_v61 = vld [vmem:[%s21879_s3 + $0xac8] ss:$20 sps:$4 sm:$0xff]  }
 0x554   : > { %7207 = vmatpush1.bf16.msra.mxu0 %v14886_v62  ;;  %v14937_v62 = vld [vmem:[%s21879_s3 + $0xb70] ss:$20 sps:$4 sm:$0xff]  }
 0x555   : > { %7274 = vmatpush2.bf16.msra.mxu1 %v14889_v58  ;;  %7208 = vmatprep.subr.bf16.mxu0 %v14894_v53  ;;  %v14942_v58 = vld [vmem:[%s21879_s3 + $0xaa4] ss:$20 sps:$4 sm:$0xff]   ;;  %v14945_v53 = vld [vmem:[%s21879_s3 + $0xb4c] ss:$20 sps:$4 sm:$0xff]  }
 0x556   : > { %7275 = vmatprep.subr.bf16.mxu1 %v14897_v17  ;;  %v14940_v17 = vld [vmem:[%s21879_s3 + $0xaa0] ss:$20 sps:$4 sm:$0xff]  }
 0x558   : > { %7209 = vmatpush1.bf16.msra.mxu0 %v14892_v59  ;;  %v14943_v59 = vld [vmem:[%s21879_s3 + $0xb48] ss:$20 sps:$4 sm:$0xff]  }
 0x559   : > { %7276 = vmatpush2.bf16.msra.mxu1 %v14895_v56  ;;  %7210 = vmatprep.subr.bf16.mxu0 %v14900_v20  ;;  %v14948_v56 = vld [vmem:[%s21879_s3 + $0xa7c] ss:$20 sps:$4 sm:$0xff]   ;;  %v14951_v20 = vld [vmem:[%s21879_s3 + $0xd04] ss:$20 sps:$4 sm:$0xff]  }
 0x55a   : > { %7331 = vmatprep.subr.bf16.mxu1 %v14903_v42  ;;  %v14946_v42 = vld [vmem:[%s21879_s3 + $0xa78] ss:$20 sps:$4 sm:$0xff]  }
 0x55b   : > { %v5173_v14 = vpop.f32.mrf.mxu0 }
 0x55c   : > { %v19200_v2 = vadd.f32 %v19035_v60, %v5173_v14  ;;  %7278 = vmatmul.mubr.bf16.vlgmr.msra.gmra.mxu1 %v19191_v27  ;;  %7211 = vmatpush1.bf16.msra.mxu0 %v14898_v37  ;;  %v14912_v60 = vld [vmem:[%s21879_s3 + $0x8ec] ss:$20 sps:$4 sm:$0xff]  }
 0x55d   : > { %7332 = vmatpush1.bf16.msra.mxu1 %v14901_v54  ;;  %13113 = vmatprep.mubr.msk.bf16.mxu1 %vm5049_vm0, %v19030_v26  ;;  %v5175_v28 = vpop.f32.mrf.mxu0  ;;  %v14949_v37 = vld [vmem:[%s21879_s3 + $0xd00] ss:$20 sps:$4 sm:$0xff]  }
 0x55e   : > { %v19215_v57 = vadd.f32 %v19052_v0, %v5175_v28  ;;  %7212 = vmatprep.subr.bf16.mxu0 %v14906_v41  ;;  %7333 = vmatprep.subr.bf16.mxu1 %v14909_v15  ;;  %v14913_v0 = vld [vmem:[%s21879_s3 + $0xc10] ss:$20 sps:$4 sm:$0xff]   ;;  %v14954_v54 = vld [vmem:[%s21879_s3 + $0xa54] ss:$20 sps:$4 sm:$0xff]   ;;  %v5131_v15 = vadd.f32 %v18972_v43, %v18951_v45  ;;  %v5133_v28 = vadd.f32 %v18979_v52, %v18963_v55  ;;  %v14960_v45 = vld [vmem:[%s21879_s3 + $0xa2c] ss:$20 sps:$4 sm:$0xff]  }
 0x55f   : > { %v5177_v46 = vpop.f32.mrf.mxu0  ;;  %v14957_v41 = vld [vmem:[%s21879_s3 + $0xcdc] ss:$20 sps:$4 sm:$0xff]   ;;  %v5135_v55 = vadd.f32 %v18988_v18, %v18977_v34  ;;  %v14966_v34 = vld [vmem:[%s21879_s3 + $0xa04] ss:$20 sps:$4 sm:$0xff]  }
 0x560   : > { %v19221_v48 = vadd.f32 %v19066_v39, %v5177_v46  ;;  %7213 = vmatpush1.bf16.msra.mxu0 %v14904_v9  ;;  %v14921_v39 = vld [vmem:[%s21879_s3 + $0xbec] ss:$20 sps:$4 sm:$0xff]   ;;  %v14952_v9 = vld [vmem:[%s21879_s3 + $0xa50] ss:$20 sps:$4 sm:$0xff]  }
 0x561   : > { %7334 = vmatpush1.bf16.msra.mxu1 %v14907_v44  ;;  %v5179_v35 = vpop.f32.mrf.mxu0  ;;  %7214 = vmatprep.subr.bf16.mxu0 %v14912_v60  ;;  %v14955_v60 = vld [vmem:[%s21879_s3 + $0xcd8] ss:$20 sps:$4 sm:$0xff]  }
 0x562   : > { %v19233_v19 = vadd.f32 %v19080_v38, %v5179_v35  ;;  %7335 = vmatprep.subr.bf16.mxu1 %v14915_v6  ;;  %v14924_v38 = vld [vmem:[%s21879_s3 + $0xb1c] ss:$20 sps:$4 sm:$0xff]   ;;  %v14963_v6 = vld [vmem:[%s21879_s3 + $0xcb4] ss:$20 sps:$4 sm:$0xff]  }
 0x564   : > { %7215 = vmatpush1.bf16.msra.mxu0 %v14910_v3  ;;  %v14958_v3 = vld [vmem:[%s21879_s3 + $0xa28] ss:$20 sps:$4 sm:$0xff]  }
 0x565   : > { %7336 = vmatpush1.bf16.msra.mxu1 %v14913_v0  ;;  %7216 = vmatprep.subr.bf16.mxu0 %v14918_v32  ;;  %v14961_v0 = vld [vmem:[%s21879_s3 + $0xcb0] ss:$20 sps:$4 sm:$0xff]   ;;  %v14969_v32 = vld [vmem:[%s21879_s3 + $0xc8c] ss:$20 sps:$4 sm:$0xff]  }
 0x566   : > { %7337 = vmatprep.subr.bf16.mxu1 %v14921_v39 }
 0x568   : > { %7217 = vmatpush1.bf16.msra.mxu0 %v14916_v29  ;;  %v14964_v29 = vld [vmem:[%s21879_s3 + $0xa00] ss:$20 sps:$4 sm:$0xff]  }
 0x569   : > { %7338 = vmatpush1.bf16.msra.mxu1 %v14919_v1  ;;  %7218 = vmatprep.subr.bf16.mxu0 %v14924_v38  ;;  %v14967_v1 = vld [vmem:[%s21879_s3 + $0xc88] ss:$20 sps:$4 sm:$0xff]   ;;  %v14972_v38 = vld [vmem:[%s21879_s3 + $0x9e4] ss:$20 sps:$4 sm:$0xff]  }
 0x56a   : > { %7339 = vmatprep.subr.bf16.mxu1 %v14927_v31  ;;  %v14970_v31 = vld [vmem:[%s21879_s3 + $0x9e0] ss:$20 sps:$4 sm:$0xff]  }
 0x56c   : > { %7219 = vmatpush2.bf16.msra.mxu0 %v14922_v12  ;;  %v19365_v12 = vrot.slane %v18295_v63, 1 }
 0x56d   : > { %7340 = vmatpush1.bf16.msra.mxu1 %v14925_v5  ;;  %7220 = vmatprep.subr.bf16.mxu0 %v14930_v49  ;;  %v14974_v5 = vld [vmem:[%s21879_s3 + $0x9e8] ss:$20 sps:$4 sm:$0xff]  }
 0x56e   : > { %7341 = vmatprep.subr.bf16.mxu1 %v14933_v22  ;;  %v14977_v49 = vld [vmem:[%s21879_s3 + $0x9bc] ss:$20 sps:$4 sm:$0xff]  }
 0x570   : > { %7221 = vmatpush2.bf16.msra.mxu0 %v14928_v51  ;;  %v14978_v51 = vld [vmem:[%s21879_s3 + $0xb00] ss:$20 sps:$4 sm:$0xff]  }
 0x571   : > { %7342 = vmatpush1.bf16.msra.mxu1 %v14931_v16  ;;  %7222 = vmatprep.subr.bf16.mxu0 %v14936_v23  ;;  %v14975_v23 = vld [vmem:[%s21879_s3 + $0x9b8] ss:$20 sps:$4 sm:$0xff]  }
 0x572   : > { %7343 = vmatprep.subr.bf16.mxu1 %v14939_v50 }
 0x574   : > { %7223 = vmatpush2.bf16.msra.mxu0 %v14934_v61  ;;  %v14979_v61 = vld [vmem:[%s21879_s3 + $0x9c0] ss:$20 sps:$4 sm:$0xff]  }
 0x575   : > { %7344 = vmatpush1.bf16.msra.mxu1 %v14937_v62  ;;  %7224 = vmatprep.subr.bf16.mxu0 %v14942_v58  ;;  %v14983_v62 = vld [vmem:[%s21879_s3 + $0xad8] ss:$20 sps:$4 sm:$0xff]  }
 0x576   : > { %7345 = vmatprep.subr.bf16.mxu1 %v14945_v53 }
 0x578   : > { %7225 = vmatpush2.bf16.msra.mxu0 %v14940_v17  ;;  %v14980_v17 = vld [vmem:[%s21879_s3 + $0x990] ss:$20 sps:$4 sm:$0xff]  }
 0x579   : > { %7346 = vmatpush1.bf16.msra.mxu1 %v14943_v59  ;;  %7226 = vmatprep.subr.bf16.mxu0 %v14948_v56  ;;  %v14987_v56 = vld [vmem:[%s21879_s3 + $0x96c] ss:$20 sps:$4 sm:$0xff]  }
 0x57a   : > { %7355 = vmatprep.subr.bf16.mxu1 %v14951_v20  ;;  %v14985_v20 = vld [vmem:[%s21879_s3 + $0x968] ss:$20 sps:$4 sm:$0xff]  }
 0x57c   : > { %v6071_v14 = vpop.f32.mrf.mxu1  ;;  %7227 = vmatpush2.bf16.msra.mxu0 %v14946_v42  ;;  %v14989_v42 = vld [vmem:[%s21879_s3 + $0x970] ss:$20 sps:$4 sm:$0xff]  }
 0x57d   : > { %v19317_v44 = vadd.f32 %v6071_v14, %v5131_v15  ;;  %7356 = vmatpush2.bf16.msra.mxu1 %v14949_v37  ;;  %7228 = vmatprep.subr.bf16.mxu0 %v14954_v54  ;;  %v14992_v37 = vld [vmem:[%s21879_s3 + $0x944] ss:$20 sps:$4 sm:$0xff]   ;;  %v14993_v54 = vld [vmem:[%s21879_s3 + $0xa88] ss:$20 sps:$4 sm:$0xff]  }
 0x57e   : > { %v6073_v43 = vpop.f32.mrf.mxu1  ;;  %7357 = vmatprep.subr.bf16.mxu1 %v14957_v41  ;;  %v14990_v41 = vld [vmem:[%s21879_s3 + $0x940] ss:$20 sps:$4 sm:$0xff]   ;;  %v14994_v15 = vld [vmem:[%s21879_s3 + $0x948] ss:$20 sps:$4 sm:$0xff]  }
 0x57f   : > { %v19330_v52 = vadd.f32 %v6073_v43, %v5133_v28  ;;  %v14997_v14 = vld [vmem:[%s21879_s3 + $0x91c] ss:$20 sps:$4 sm:$0xff]   ;;  %v14995_v28 = vld [vmem:[%s21879_s3 + $0x918] ss:$20 sps:$4 sm:$0xff]  }
 0x580   : > { %v6075_v46 = vpop.f32.mrf.mxu1  ;;  %7229 = vmatpush2.bf16.msra.mxu0 %v14952_v9  ;;  %v14998_v9 = vld [vmem:[%s21879_s3 + $0xa60] ss:$20 sps:$4 sm:$0xff]   ;;  %v15003_v43 = vld [vmem:[%s21879_s3 + $0xa38] ss:$20 sps:$4 sm:$0xff]  }
 0x581   : > { %v19335_v35 = vadd.f32 %v6075_v46, %v5135_v55  ;;  %7358 = vmatpush2.bf16.msra.mxu1 %v14955_v60  ;;  %7230 = vmatprep.subr.bf16.mxu0 %v14960_v45  ;;  %v14999_v60 = vld [vmem:[%s21879_s3 + $0x920] ss:$20 sps:$4 sm:$0xff]   ;;  %v15004_v55 = vld [vmem:[%s21879_s3 + $0x8f8] ss:$20 sps:$4 sm:$0xff]  }
 0x582   : > { %v6077_v18 = vpop.f32.mrf.mxu1  ;;  %7359 = vmatprep.subr.bf16.mxu1 %v14963_v6  ;;  %v15002_v45 = vld [vmem:[%s21879_s3 + $0x8f4] ss:$20 sps:$4 sm:$0xff]   ;;  %v15000_v6 = vld [vmem:[%s21879_s3 + $0x8f0] ss:$20 sps:$4 sm:$0xff]   ;;  %v15007_v46 = vld [vmem:[%s21879_s3 + $0x8cc] ss:$20 sps:$4 sm:$0xff]  }
 0x583   : > { %v19347_v39 = vadd.f32 %v6077_v18, %v18999_v30  ;;  %v14973_v30 = vld [vmem:[%s21879_s3 + $0xb28] ss:$20 sps:$4 sm:$0xff]   ;;  %v15012_v18 = vld [vmem:[%s21879_s3 + $0xb24] ss:$20 sps:$4 sm:$0xff]  }
 0x584   : > { %7231 = vmatpush2.bf16.msra.mxu0 %v14958_v3  ;;  %v15008_v3 = vld [vmem:[%s21879_s3 + $0xa10] ss:$20 sps:$4 sm:$0xff]  }
 0x585   : > { %7360 = vmatpush2.bf16.msra.mxu1 %v14961_v0  ;;  %7232 = vmatprep.subr.bf16.mxu0 %v14966_v34  ;;  %v15005_v0 = vld [vmem:[%s21879_s3 + $0x8c8] ss:$20 sps:$4 sm:$0xff]   ;;  %v15009_v34 = vld [vmem:[%s21879_s3 + $0x8d0] ss:$20 sps:$4 sm:$0xff]  }
 0x586   : > { %7361 = vmatprep.subr.bf16.mxu1 %v14969_v32  ;;  %v15015_v32 = vld [vmem:[%s21879_s3 + $0xe3c] ss:$20 sps:$4 sm:$0xff]  }
 0x588   : > { %7233 = vmatpush2.bf16.msra.mxu0 %v14964_v29  ;;  %v15010_v29 = vld [vmem:[%s21879_s3 + $0xb20] ss:$20 sps:$4 sm:$0xff]  }
 0x589   : > { %7362 = vmatpush2.bf16.msra.mxu1 %v14967_v1  ;;  %7288 = vmatprep.subr.bf16.mxu0 %v14972_v38  ;;  %v15013_v1 = vld [vmem:[%s21879_s3 + $0xe38] ss:$20 sps:$4 sm:$0xff]   ;;  %v15018_v38 = vld [vmem:[%s21879_s3 + $0xafc] ss:$20 sps:$4 sm:$0xff]  }
 0x58a   : > { %14032 = vmatprep.subr.bf16.mxu1 %v14973_v30  ;;  %v15021_v30 = vld [vmem:[%s21879_s3 + $0xe14] ss:$20 sps:$4 sm:$0xff]  }
 0x58b   : > { %v5300_v22 = vpop.f32.mrf.mxu0  ;;  %7235 = vmatmul.mubr.bf16.vlgmr.msra.gmra.mxu0 %v19365_v12 }
 0x58c   : > { %v19378_v16 = vadd.f32 %v19100_v11, %v5300_v22  ;;  %7364 = vmatmul.mubr.bf16.vlgmr.msra.gmra.mxu1 %v19191_v27  ;;  %7289 = vmatpush1.bf16.msra.mxu0 %v14970_v31  ;;  %v14982_v11 = vld [vmem:[%s21879_s3 + $0x994] ss:$20 sps:$4 sm:$0xff]   ;;  %v15016_v31 = vld [vmem:[%s21879_s3 + $0xaf8] ss:$20 sps:$4 sm:$0xff]  }
 0x58d   : > { %7320 = vmatprep.mubr.bf16.mxu0 %v19141_v25  ;;  %14033 = vmatpush3.bf16.msra.mxu1 %v14974_v5  ;;  %v5302_v50 = vpop.f32.mrf.mxu0  ;;  %v15019_v5 = vld [vmem:[%s21879_s3 + $0xe10] ss:$20 sps:$4 sm:$0xff]   ;;  %v15027_v22 = vld [vmem:[%s21879_s3 + $0xdec] ss:$20 sps:$4 sm:$0xff]  }
 0x58e   : > { %7406 = vmatprep.mubr.bf16.mxu1 %v19141_v25  ;;  %7290 = vmatprep.subr.bf16.mxu0 %v14977_v49  ;;  %v14984_v25 = vld [vmem:[%s21879_s3 + $0x998] ss:$20 sps:$4 sm:$0xff]   ;;  %v15024_v49 = vld [vmem:[%s21879_s3 + $0xad4] ss:$20 sps:$4 sm:$0xff]  }
 0x58f   : > { %v5303_v58 = vpop.f32.mrf.mxu0  ;;  %14034 = vmatprep.subr.bf16.mxu1 %v14978_v51  ;;  %v15022_v51 = vld [vmem:[%s21879_s3 + $0xad0] ss:$20 sps:$4 sm:$0xff]   ;;  %v15030_v50 = vld [vmem:[%s21879_s3 + $0xaac] ss:$20 sps:$4 sm:$0xff]  }
 0x590   : > { %v19396_v53 = vadd.f32 %v19114_v8, %v5303_v58  ;;  %7291 = vmatpush1.bf16.msra.mxu0 %v14975_v23  ;;  %v14988_v8 = vld [vmem:[%s21879_s3 + $0xab0] ss:$20 sps:$4 sm:$0xff]   ;;  %v15025_v23 = vld [vmem:[%s21879_s3 + $0xde8] ss:$20 sps:$4 sm:$0xff]  }
 0x591   : > { %14035 = vmatpush3.bf16.msra.mxu1 %v14979_v61  ;;  %v5305_v59 = vpop.f32.mrf.mxu0  ;;  %7292 = vmatprep.subr.bf16.mxu0 %v14982_v11  ;;  %v15033_v61 = vld [vmem:[%s21879_s3 + $0xdc4] ss:$20 sps:$4 sm:$0xff]   ;;  %v15028_v11 = vld [vmem:[%s21879_s3 + $0xaa8] ss:$20 sps:$4 sm:$0xff]  }
 0x592   : > { %14036 = vmatprep.subr.bf16.mxu1 %v14983_v62  ;;  %v15031_v62 = vld [vmem:[%s21879_s3 + $0xdc0] ss:$20 sps:$4 sm:$0xff]   ;;  %v15036_v58 = vld [vmem:[%s21879_s3 + $0xa84] ss:$20 sps:$4 sm:$0xff]  }
 0x593   : > { %v15034_v59 = vld [vmem:[%s21879_s3 + $0xa80] ss:$20 sps:$4 sm:$0xff]  }
 0x594   : > { %7293 = vmatpush1.bf16.msra.mxu0 %v14980_v17  ;;  %v15039_v17 = vld [vmem:[%s21879_s3 + $0xd9c] ss:$20 sps:$4 sm:$0xff]  }
 0x595   : > { %14037 = vmatpush3.bf16.msra.mxu1 %v14984_v25  ;;  %7294 = vmatprep.subr.bf16.mxu0 %v14987_v56  ;;  %v15037_v25 = vld [vmem:[%s21879_s3 + $0xd98] ss:$20 sps:$4 sm:$0xff]   ;;  %v15042_v56 = vld [vmem:[%s21879_s3 + $0xa5c] ss:$20 sps:$4 sm:$0xff]  }
 0x596   : > { %14038 = vmatprep.subr.bf16.mxu1 %v14988_v8  ;;  %v15045_v8 = vld [vmem:[%s21879_s3 + $0xd74] ss:$20 sps:$4 sm:$0xff]  }
 0x598   : > { %7295 = vmatpush1.bf16.msra.mxu0 %v14985_v20 }
 0x599   : > { %14039 = vmatpush3.bf16.msra.mxu1 %v14989_v42  ;;  %7296 = vmatprep.subr.bf16.mxu0 %v14992_v37 }
 0x59a   : > { %14040 = vmatprep.subr.bf16.mxu1 %v14993_v54  ;;  %v15040_v54 = vld [vmem:[%s21879_s3 + $0xa58] ss:$20 sps:$4 sm:$0xff]  }
 0x59c   : > { %7297 = vmatpush1.bf16.msra.mxu0 %v14990_v41 }
 0x59d   : > { %14041 = vmatpush3.bf16.msra.mxu1 %v14994_v15  ;;  %7298 = vmatprep.subr.bf16.mxu0 %v14997_v14  ;;  %v15043_v14 = vld [vmem:[%s21879_s3 + $0xd70] ss:$20 sps:$4 sm:$0xff]  }
 0x59e   : > { %14042 = vmatprep.subr.bf16.mxu1 %v14998_v9 }
 0x5a0   : > { %7299 = vmatpush1.bf16.msra.mxu0 %v14995_v28 }
 0x5a1   : > { %14043 = vmatpush3.bf16.msra.mxu1 %v14999_v60  ;;  %7300 = vmatprep.subr.bf16.mxu0 %v15002_v45 }
 0x5a2   : > { %14044 = vmatprep.subr.bf16.mxu1 %v15003_v43 }
 0x5a4   : > { %7301 = vmatpush1.bf16.msra.mxu0 %v15000_v6 }
 0x5a5   : > { %14045 = vmatpush3.bf16.msra.mxu1 %v15004_v55  ;;  %7302 = vmatprep.subr.bf16.mxu0 %v15007_v46 }
 0x5a6   : > { %14046 = vmatprep.subr.bf16.mxu1 %v15008_v3 }
 0x5a8   : > { %7303 = vmatpush1.bf16.msra.mxu0 %v15005_v0 }
 0x5a9   : > { %14047 = vmatpush3.bf16.msra.mxu1 %v15009_v34  ;;  %7304 = vmatprep.subr.bf16.mxu0 %v15012_v18  ;;  %v15052_v18 = vld [vmem:[%s21879_s3 + $0xa08] ss:$20 sps:$4 sm:$0xff]  }
 0x5aa   : > { %8381 = vmatprep.subr.bf16.mxu1 %v15015_v32  ;;  %v15060_v32 = vld [vmem:[%s21879_s3 + $0xf7c] ss:$20 sps:$4 sm:$0xff]  }
 0x5ac   : > { %7407 = vmatmul.mubr.bf16.vlgmr.msra.gmra.mxu1 %v19365_v12  ;;  %7305 = vmatpush2.bf16.msra.mxu0 %v15010_v29  ;;  %v15058_v29 = vld [vmem:[%s21879_s3 + $0xf78] ss:$20 sps:$4 sm:$0xff]  }
 0x5ad   : > { %8382 = vmatpush1.bf16.msra.mxu1 %v15013_v1  ;;  %8413 = vmatprep.mubr.bf16.mxu1 %v18310_v33  ;;  %v15064_v1 = vld [vmem:[%s21879_s3 + $0xf54] ss:$20 sps:$4 sm:$0xff]  }
 0x5ae   : > { %7306 = vmatprep.subr.bf16.mxu0 %v15018_v38  ;;  %8383 = vmatprep.subr.bf16.mxu1 %v15021_v30  ;;  %v15065_v38 = vld [vmem:[%s21879_s3 + $0xc40] ss:$20 sps:$4 sm:$0xff]   ;;  %v15062_v30 = vld [vmem:[%s21879_s3 + $0xf50] ss:$20 sps:$4 sm:$0xff]  }
 0x5b0   : > { %7307 = vmatpush2.bf16.msra.mxu0 %v15016_v31  ;;  %v15066_v31 = vld [vmem:[%s21879_s3 + $0xf28] ss:$20 sps:$4 sm:$0xff]  }
 0x5b1   : > { %8384 = vmatpush1.bf16.msra.mxu1 %v15019_v5  ;;  %7308 = vmatprep.subr.bf16.mxu0 %v15024_v49  ;;  %v15072_v5 = vld [vmem:[%s21879_s3 + $0xf04] ss:$20 sps:$4 sm:$0xff]  }
 0x5b2   : > { %8385 = vmatprep.subr.bf16.mxu1 %v15027_v22  ;;  %v15073_v49 = vld [vmem:[%s21879_s3 + $0xbf0] ss:$20 sps:$4 sm:$0xff]   ;;  %v15070_v22 = vld [vmem:[%s21879_s3 + $0xf00] ss:$20 sps:$4 sm:$0xff]  }
 0x5b4   : > { %7309 = vmatpush2.bf16.msra.mxu0 %v15022_v51  ;;  %v15076_v51 = vld [vmem:[%s21879_s3 + $0xedc] ss:$20 sps:$4 sm:$0xff]  }
 0x5b5   : > { %8386 = vmatpush1.bf16.msra.mxu1 %v15025_v23  ;;  %7310 = vmatprep.subr.bf16.mxu0 %v15030_v50  ;;  %v15077_v23 = vld [vmem:[%s21879_s3 + $0xbc8] ss:$20 sps:$4 sm:$0xff]   ;;  %v15074_v50 = vld [vmem:[%s21879_s3 + $0xed8] ss:$20 sps:$4 sm:$0xff]  }
 0x5b6   : > { %8387 = vmatprep.subr.bf16.mxu1 %v15033_v61  ;;  %v15080_v61 = vld [vmem:[%s21879_s3 + $0xeb4] ss:$20 sps:$4 sm:$0xff]  }
 0x5b8   : > { %7311 = vmatpush2.bf16.msra.mxu0 %v15028_v11  ;;  %v15081_v11 = vld [vmem:[%s21879_s3 + $0xba0] ss:$20 sps:$4 sm:$0xff]  }
 0x5b9   : > { %8388 = vmatpush1.bf16.msra.mxu1 %v15031_v62  ;;  %7312 = vmatprep.subr.bf16.mxu0 %v15036_v58  ;;  %v15078_v62 = vld [vmem:[%s21879_s3 + $0xeb0] ss:$20 sps:$4 sm:$0xff]   ;;  %v15084_v58 = vld [vmem:[%s21879_s3 + $0xe8c] ss:$20 sps:$4 sm:$0xff]  }
 0x5ba   : > { %8389 = vmatprep.subr.bf16.mxu1 %v15039_v17  ;;  %v15085_v17 = vld [vmem:[%s21879_s3 + $0xb78] ss:$20 sps:$4 sm:$0xff]  }
 0x5bb   : > { %v6114_v20 = vpop.f32.mrf.mxu0 }
 0x5bc   : > { %v19533_v42 = vadd.f32 %v6114_v20, %v19317_v44  ;;  %v6157_v37 = vpop.f32.mrf.mxu1  ;;  %7313 = vmatpush2.bf16.msra.mxu0 %v15034_v59  ;;  %v15048_v44 = vld [vmem:[%s21879_s3 + $0xa34] ss:$20 sps:$4 sm:$0xff]   ;;  %v15092_v20 = vld [vmem:[%s21879_s3 + $0xe44] ss:$20 sps:$4 sm:$0xff]  }
 0x5bd   : > { %v19539_v41 = vadd.f32 %v6157_v37, %v19200_v2  ;;  %8390 = vmatpush1.bf16.msra.mxu1 %v15037_v25  ;;  %v6116_v15 = vpop.f32.mrf.mxu0  ;;  %7314 = vmatprep.subr.bf16.mxu0 %v15042_v56  ;;  %v15051_v2 = vld [vmem:[%s21879_s3 + $0xd4c] ss:$20 sps:$4 sm:$0xff]   ;;  %v15082_v59 = vld [vmem:[%s21879_s3 + $0xe88] ss:$20 sps:$4 sm:$0xff]   ;;  %v15088_v25 = vld [vmem:[%s21879_s3 + $0xe64] ss:$20 sps:$4 sm:$0xff]  }
 0x5be   : > { %v19548_v9 = vadd.f32 %v6116_v15, %v19330_v52  ;;  %v6159_v28 = vpop.f32.mrf.mxu1  ;;  %8391 = vmatprep.subr.bf16.mxu1 %v15045_v8  ;;  %v15046_v52 = vld [vmem:[%s21879_s3 + $0xa30] ss:$20 sps:$4 sm:$0xff]   ;;  %v15086_v8 = vld [vmem:[%s21879_s3 + $0xe60] ss:$20 sps:$4 sm:$0xff]   ;;  %v15093_v37 = vld [vmem:[%s21879_s3 + $0xd08] ss:$20 sps:$4 sm:$0xff]  }
 0x5bf   : > { %v19554_v60 = vadd.f32 %v6159_v28, %v19215_v57  ;;  %v6118_v45 = vpop.f32.mrf.mxu0  ;;  %v15049_v57 = vld [vmem:[%s21879_s3 + $0xd48] ss:$20 sps:$4 sm:$0xff]   ;;  %v15089_v56 = vld [vmem:[%s21879_s3 + $0xb50] ss:$20 sps:$4 sm:$0xff]  }
 0x5c0   : > { %v19557_v43 = vadd.f32 %v6118_v45, %v19335_v35  ;;  %v6161_v6 = vpop.f32.mrf.mxu1  ;;  %7315 = vmatpush2.bf16.msra.mxu0 %v15040_v54  ;;  %v15054_v35 = vld [vmem:[%s21879_s3 + $0xa0c] ss:$20 sps:$4 sm:$0xff]   ;;  %v15096_v15 = vld [vmem:[%s21879_s3 + $0xe1c] ss:$20 sps:$4 sm:$0xff]  }
 0x5c1   : > { %v19563_v55 = vadd.f32 %v6161_v6, %v19221_v48  ;;  %8392 = vmatpush1.bf16.msra.mxu1 %v15043_v14  ;;  %v6120_v46 = vpop.f32.mrf.mxu0  ;;  %7316 = vmatprep.subr.bf16.mxu0 %v15048_v44  ;;  %v15057_v48 = vld [vmem:[%s21879_s3 + $0xd24] ss:$20 sps:$4 sm:$0xff]   ;;  %v15090_v54 = vld [vmem:[%s21879_s3 + $0xe40] ss:$20 sps:$4 sm:$0xff]  }
 0x5c2   : > { %v19572_v3 = vadd.f32 %v6120_v46, %v19347_v39  ;;  %v6163_v0 = vpop.f32.mrf.mxu1  ;;  %8393 = vmatprep.subr.bf16.mxu1 %v15051_v2  ;;  %v15055_v39 = vld [vmem:[%s21879_s3 + $0xd20] ss:$20 sps:$4 sm:$0xff]   ;;  %v15094_v6 = vld [vmem:[%s21879_s3 + $0xe18] ss:$20 sps:$4 sm:$0xff]  }
 0x5c3   : > { %v19578_v34 = vadd.f32 %v6163_v0, %v19233_v19  ;;  %v15061_v19 = vld [vmem:[%s21879_s3 + $0xc68] ss:$20 sps:$4 sm:$0xff]   ;;  %v15097_v2 = vld [vmem:[%s21879_s3 + $0xce0] ss:$20 sps:$4 sm:$0xff]  }
 0x5c4   : > { %7317 = vmatpush2.bf16.msra.mxu0 %v15046_v52  ;;  %v15100_v46 = vld [vmem:[%s21879_s3 + $0xdf4] ss:$20 sps:$4 sm:$0xff]  }
 0x5c5   : > { %8394 = vmatpush1.bf16.msra.mxu1 %v15049_v57  ;;  %7318 = vmatprep.subr.bf16.mxu0 %v15054_v35 }
 0x5c6   : > { %8395 = vmatprep.subr.bf16.mxu1 %v15057_v48 }
 0x5c8   : > { %7319 = vmatpush2.bf16.msra.mxu0 %v15052_v18  ;;  %v15098_v18 = vld [vmem:[%s21879_s3 + $0xdf0] ss:$20 sps:$4 sm:$0xff]  }
 0x5c9   : > { %8396 = vmatpush1.bf16.msra.mxu1 %v15055_v39  ;;  %7415 = vmatprep.subr.bf16.mxu0 %v21969_v21 }
 0x5ca   : > { %8397 = vmatprep.subr.bf16.mxu1 %v15060_v32  ;;  %v15104_v32 = vld [vmem:[%s21879_s3 + $0xdcc] ss:$20 sps:$4 sm:$0xff]  }
 0x5cb   : > { %7321 = vmatmul.mubr.bf16.vlgmr.msra.gmra.mxu0 %v19365_v12  ;;  %v15068_v12 = vld [vmem:[%s21879_s3 + $0xf2c] ss:$20 sps:$4 sm:$0xff]  }
 0x5cc   : > { %7416 = vmatpush1.bf16.msra.mxu0 %v15061_v19  ;;  %13114 = vmatprep.mubr.msk.bf16.mxu0 %vm5049_vm0, %v19030_v26  ;;  %v15069_v26 = vld [vmem:[%s21879_s3 + $0xc18] ss:$20 sps:$4 sm:$0xff]   ;;  %v15105_v19 = vld [vmem:[%s21879_s3 + $0xc90] ss:$20 sps:$4 sm:$0xff]  }
 0x5cd   : > { %8398 = vmatpush2.bf16.msra.mxu1 %v15058_v29  ;;  %7417 = vmatprep.subr.bf16.mxu0 %v21969_v21  ;;  %v15102_v29 = vld [vmem:[%s21879_s3 + $0xdc8] ss:$20 sps:$4 sm:$0xff]  }
 0x5ce   : > { %8399 = vmatprep.subr.bf16.mxu1 %v15064_v1  ;;  %v15111_v1 = vld [vmem:[%s21879_s3 + $0xda4] ss:$20 sps:$4 sm:$0xff]  }
 0x5d0   : > { %7418 = vmatpush1.bf16.msra.mxu0 %v15065_v38  ;;  %v15106_v38 = vld [vmem:[%s21879_s3 + $0x10b8] ss:$20 sps:$4 sm:$0xff]  }
 0x5d1   : > { %8400 = vmatpush2.bf16.msra.mxu1 %v15062_v30  ;;  %7419 = vmatprep.subr.bf16.mxu0 %v21969_v21  ;;  %v15109_v30 = vld [vmem:[%s21879_s3 + $0xda0] ss:$20 sps:$4 sm:$0xff]  }
 0x5d2   : > { %8401 = vmatprep.subr.bf16.mxu1 %v15068_v12  ;;  %v15114_v12 = vld [vmem:[%s21879_s3 + $0x1094] ss:$20 sps:$4 sm:$0xff]  }
 0x5d4   : > { %7420 = vmatpush1.bf16.msra.mxu0 %v15069_v26  ;;  %v15117_v26 = vld [vmem:[%s21879_s3 + $0xd7c] ss:$20 sps:$4 sm:$0xff]  }
 0x5d5   : > { %8402 = vmatpush2.bf16.msra.mxu1 %v15066_v31  ;;  %7421 = vmatprep.subr.bf16.mxu0 %v21969_v21  ;;  %v15112_v31 = vld [vmem:[%s21879_s3 + $0x1090] ss:$20 sps:$4 sm:$0xff]  }
 0x5d6   : > { %8403 = vmatprep.subr.bf16.mxu1 %v15072_v5  ;;  %v15115_v5 = vld [vmem:[%s21879_s3 + $0xd78] ss:$20 sps:$4 sm:$0xff]  }
 0x5d8   : > { %7422 = vmatpush1.bf16.msra.mxu0 %v15073_v49  ;;  %v15120_v49 = vld [vmem:[%s21879_s3 + $0x106c] ss:$20 sps:$4 sm:$0xff]  }
 0x5d9   : > { %8404 = vmatpush2.bf16.msra.mxu1 %v15070_v22  ;;  %7423 = vmatprep.subr.bf16.mxu0 %v21969_v21  ;;  %v15118_v22 = vld [vmem:[%s21879_s3 + $0x1068] ss:$20 sps:$4 sm:$0xff]  }
 0x5da   : > { %8405 = vmatprep.subr.bf16.mxu1 %v15076_v51  ;;  %v15121_v51 = vld [vmem:[%s21879_s3 + $0xd50] ss:$20 sps:$4 sm:$0xff]  }
 0x5dc   : > { %7424 = vmatpush1.bf16.msra.mxu0 %v15077_v23  ;;  %v15126_v23 = vld [vmem:[%s21879_s3 + $0x1044] ss:$20 sps:$4 sm:$0xff]  }
 0x5dd   : > { %8406 = vmatpush2.bf16.msra.mxu1 %v15074_v50  ;;  %7425 = vmatprep.subr.bf16.mxu0 %v21969_v21  ;;  %v15129_v50 = vld [vmem:[%s21879_s3 + $0xd2c] ss:$20 sps:$4 sm:$0xff]  }
 0x5de   : > { %8407 = vmatprep.subr.bf16.mxu1 %v15080_v61  ;;  %v15124_v61 = vld [vmem:[%s21879_s3 + $0x1040] ss:$20 sps:$4 sm:$0xff]  }
 0x5e0   : > { %7426 = vmatpush1.bf16.msra.mxu0 %v15081_v11  ;;  %v15127_v11 = vld [vmem:[%s21879_s3 + $0xd28] ss:$20 sps:$4 sm:$0xff]  }
 0x5e1   : > { %8408 = vmatpush2.bf16.msra.mxu1 %v15078_v62  ;;  %7427 = vmatprep.subr.bf16.mxu0 %v21969_v21  ;;  %v15132_v62 = vld [vmem:[%s21879_s3 + $0x101c] ss:$20 sps:$4 sm:$0xff]  }
 0x5e2   : > { %8409 = vmatprep.subr.bf16.mxu1 %v15084_v58  ;;  %v15135_v58 = vld [vmem:[%s21879_s3 + $0xf84] ss:$20 sps:$4 sm:$0xff]  }
 0x5e4   : > { %7428 = vmatpush1.bf16.msra.mxu0 %v15085_v17  ;;  %v15130_v17 = vld [vmem:[%s21879_s3 + $0x1018] ss:$20 sps:$4 sm:$0xff]  }
 0x5e5   : > { %8410 = vmatpush2.bf16.msra.mxu1 %v15082_v59  ;;  %7429 = vmatprep.subr.bf16.mxu0 %v21969_v21  ;;  %v15133_v59 = vld [vmem:[%s21879_s3 + $0xf80] ss:$20 sps:$4 sm:$0xff]  }
 0x5e6   : > { %8411 = vmatprep.subr.bf16.mxu1 %v15088_v25  ;;  %v15138_v25 = vld [vmem:[%s21879_s3 + $0xff4] ss:$20 sps:$4 sm:$0xff]  }
 0x5e8   : > { %7430 = vmatpush1.bf16.msra.mxu0 %v15089_v56  ;;  %v15141_v56 = vld [vmem:[%s21879_s3 + $0xf5c] ss:$20 sps:$4 sm:$0xff]  }
 0x5e9   : > { %8412 = vmatpush2.bf16.msra.mxu1 %v15086_v8  ;;  %7439 = vmatprep.subr.bf16.mxu0 %v21969_v21 }
 0x5ea   : > { %8467 = vmatprep.subr.bf16.mxu1 %v15092_v20  ;;  %v15136_v20 = vld [vmem:[%s21879_s3 + $0xff0] ss:$20 sps:$4 sm:$0xff]  }
 0x5eb   : > { %v6200_v14 = vpop.f32.mrf.mxu0 }
 0x5ec   : > { %v19683_v44 = vadd.f32 %v6200_v14, %v19539_v41  ;;  %v19685_v28 = vpop.f32.mrf.mxu1  ;;  %8414 = vmatmul.mubr.bf16.vlgmr.msra.gmra.mxu1 %v18303_v7  ;;  %7440 = vmatpush2.bf16.msra.mxu0 %v15093_v37 }
 0x5ed   : > { %8468 = vmatpush1.bf16.msra.mxu1 %v15090_v54  ;;  %8499 = vmatprep.mubr.bf16.mxu1 %v18310_v33  ;;  %v6202_v45 = vpop.f32.mrf.mxu0  ;;  %v15139_v54 = vld [vmem:[%s21879_s3 + $0xf58] ss:$20 sps:$4 sm:$0xff]  }
 0x5ee   : > { %v19696_v41 = vadd.f32 %v6202_v45, %v19554_v60  ;;  %v6286_v52 = vpop.f32.mrf.mxu1  ;;  %7441 = vmatprep.subr.bf16.mxu0 %v21969_v21  ;;  %8469 = vmatprep.subr.bf16.mxu1 %v15096_v15  ;;  %v15101_v60 = vld [vmem:[%s21879_s3 + $0xcb8] ss:$20 sps:$4 sm:$0xff]  }
 0x5ef   : > { %v6204_v57 = vpop.f32.mrf.mxu0  ;;  %v15144_v15 = vld [vmem:[%s21879_s3 + $0xfcc] ss:$20 sps:$4 sm:$0xff]   ;;  %v15142_v52 = vld [vmem:[%s21879_s3 + $0xfc8] ss:$20 sps:$4 sm:$0xff]  }
 0x5f0   : > { %v19703_v35 = vadd.f32 %v6204_v57, %v19563_v55  ;;  %v19705_v0 = vpop.f32.mrf.mxu1  ;;  %7442 = vmatpush2.bf16.msra.mxu0 %v15097_v2  ;;  %v15147_v2 = vld [vmem:[%s21879_s3 + $0xf34] ss:$20 sps:$4 sm:$0xff]   ;;  %v15145_v57 = vld [vmem:[%s21879_s3 + $0xf30] ss:$20 sps:$4 sm:$0xff]  }
 0x5f1   : > { %8470 = vmatpush1.bf16.msra.mxu1 %v15094_v6  ;;  %v6206_v48 = vpop.f32.mrf.mxu0  ;;  %7443 = vmatprep.subr.bf16.mxu0 %v21969_v21 }
 0x5f2   : > { %v19715_v39 = vadd.f32 %v6206_v48, %v19578_v34  ;;  %v6289_v55 = vpop.f32.mrf.mxu1  ;;  %8471 = vmatprep.subr.bf16.mxu1 %v15100_v46  ;;  %v15108_v34 = vld [vmem:[%s21879_s3 + $0x10bc] ss:$20 sps:$4 sm:$0xff]  }
 0x5f4   : > { %7444 = vmatpush2.bf16.msra.mxu0 %v15101_v60  ;;  %v15150_v60 = vld [vmem:[%s21879_s3 + $0xfa4] ss:$20 sps:$4 sm:$0xff]  }
 0x5f5   : > { %8472 = vmatpush1.bf16.msra.mxu1 %v15098_v18  ;;  %7445 = vmatprep.subr.bf16.mxu0 %v21969_v21 }
 0x5f6   : > { %8473 = vmatprep.subr.bf16.mxu1 %v15104_v32  ;;  %v15148_v32 = vld [vmem:[%s21879_s3 + $0xfa0] ss:$20 sps:$4 sm:$0xff]  }
 0x5f8   : > { %7446 = vmatpush2.bf16.msra.mxu0 %v15105_v19  ;;  %v15151_v19 = vld [vmem:[%s21879_s3 + $0xf08] ss:$20 sps:$4 sm:$0xff]  }
 0x5f9   : > { %8474 = vmatpush1.bf16.msra.mxu1 %v15102_v29  ;;  %8424 = vmatprep.subr.bf16.mxu0 %v15108_v34  ;;  %v15156_v29 = vld [vmem:[%s21879_s3 + $0x115c] ss:$20 sps:$4 sm:$0xff]   ;;  %v15154_v34 = vld [vmem:[%s21879_s3 + $0x1158] ss:$20 sps:$4 sm:$0xff]  }
 0x5fa   : > { %8475 = vmatprep.subr.bf16.mxu1 %v15111_v1  ;;  %v15157_v1 = vld [vmem:[%s21879_s3 + $0xee0] ss:$20 sps:$4 sm:$0xff]  }
 0x5fb   : > { %7448 = vmatmul.mubr.bf16.vlgmr.msra.gmra.mxu0 %v19191_v27  ;;  %v15123_v27 = vld [vmem:[%s21879_s3 + $0xd54] ss:$20 sps:$4 sm:$0xff]  }
 0x5fc   : > { %8425 = vmatpush1.bf16.msra.mxu0 %v15106_v38  ;;  %13423 = vmatprep.mubr.msk.bf16.mxu0 %vm5049_vm0, %v18403_v36  ;;  %v15162_v38 = vld [vmem:[%s21879_s3 + $0x1134] ss:$20 sps:$4 sm:$0xff]  }
 0x5fd   : > { %8476 = vmatpush1.bf16.msra.mxu1 %v15109_v30  ;;  %8426 = vmatprep.subr.bf16.mxu0 %v15114_v12  ;;  %v15160_v30 = vld [vmem:[%s21879_s3 + $0x1130] ss:$20 sps:$4 sm:$0xff]   ;;  %v15163_v12 = vld [vmem:[%s21879_s3 + $0xeb8] ss:$20 sps:$4 sm:$0xff]  }
 0x5fe   : > { %8477 = vmatprep.subr.bf16.mxu1 %v15117_v26  ;;  %v15168_v26 = vld [vmem:[%s21879_s3 + $0x110c] ss:$20 sps:$4 sm:$0xff]  }
 0x600   : > { %8427 = vmatpush1.bf16.msra.mxu0 %v15112_v31  ;;  %v15171_v31 = vld [vmem:[%s21879_s3 + $0xe94] ss:$20 sps:$4 sm:$0xff]  }
 0x601   : > { %8478 = vmatpush1.bf16.msra.mxu1 %v15115_v5  ;;  %8428 = vmatprep.subr.bf16.mxu0 %v15120_v49  ;;  %v15166_v5 = vld [vmem:[%s21879_s3 + $0x1108] ss:$20 sps:$4 sm:$0xff]   ;;  %v15169_v49 = vld [vmem:[%s21879_s3 + $0xe90] ss:$20 sps:$4 sm:$0xff]  }
 0x602   : > { %8479 = vmatprep.subr.bf16.mxu1 %v15123_v27  ;;  %v15174_v27 = vld [vmem:[%s21879_s3 + $0x10e4] ss:$20 sps:$4 sm:$0xff]  }
 0x604   : > { %8429 = vmatpush1.bf16.msra.mxu0 %v15118_v22  ;;  %v15177_v22 = vld [vmem:[%s21879_s3 + $0xe6c] ss:$20 sps:$4 sm:$0xff]  }
 0x605   : > { %8480 = vmatpush1.bf16.msra.mxu1 %v15121_v51  ;;  %8430 = vmatprep.subr.bf16.mxu0 %v15126_v23  ;;  %v15172_v51 = vld [vmem:[%s21879_s3 + $0x10e0] ss:$20 sps:$4 sm:$0xff]   ;;  %v15175_v23 = vld [vmem:[%s21879_s3 + $0xe68] ss:$20 sps:$4 sm:$0xff]  }
 0x606   : > { %8481 = vmatprep.subr.bf16.mxu1 %v15129_v50  ;;  %v15180_v50 = vld [vmem:[%s21879_s3 + $0x10c4] ss:$20 sps:$4 sm:$0xff]  }
 0x608   : > { %8431 = vmatpush1.bf16.msra.mxu0 %v15124_v61  ;;  %v15178_v61 = vld [vmem:[%s21879_s3 + $0x10c0] ss:$20 sps:$4 sm:$0xff]  }
 0x609   : > { %8482 = vmatpush1.bf16.msra.mxu1 %v15127_v11  ;;  %8432 = vmatprep.subr.bf16.mxu0 %v15132_v62  ;;  %v15181_v11 = vld [vmem:[%s21879_s3 + $0x10c8] ss:$20 sps:$4 sm:$0xff]  }
 0x60a   : > { %8483 = vmatprep.subr.bf16.mxu1 %v15135_v58  ;;  %v15184_v62 = vld [vmem:[%s21879_s3 + $0x109c] ss:$20 sps:$4 sm:$0xff]   ;;  %v15182_v58 = vld [vmem:[%s21879_s3 + $0x1098] ss:$20 sps:$4 sm:$0xff]  }
 0x60b   : > { %v14026_v8 = vpop.f32.mrf.mxu0 }
 0x60c   : > { %8433 = vmatpush1.bf16.msra.mxu0 %v15130_v17  ;;  %v15185_v17 = vld [vmem:[%s21879_s3 + $0x10a0] ss:$20 sps:$4 sm:$0xff]  }
 0x60d   : > { %8484 = vmatpush2.bf16.msra.mxu1 %v15133_v59  ;;  %v14027_v37 = vpop.f32.mrf.mxu0  ;;  %8434 = vmatprep.subr.bf16.mxu0 %v15138_v25  ;;  %v15188_v59 = vld [vmem:[%s21879_s3 + $0x1074] ss:$20 sps:$4 sm:$0xff]   ;;  %v15186_v25 = vld [vmem:[%s21879_s3 + $0x1070] ss:$20 sps:$4 sm:$0xff]  }
 0x60e   : > { %v14028_v14 = vadd.f32 %v14027_v37, %v14026_v8  ;;  %8485 = vmatprep.subr.bf16.mxu1 %v15141_v56  ;;  %v15189_v56 = vld [vmem:[%s21879_s3 + $0x1078] ss:$20 sps:$4 sm:$0xff]  }
 0x60f   : > { %v14029_v45 = vpop.f32.mrf.mxu0  ;;  %v15192_v8 = vld [vmem:[%s21879_s3 + $0x104c] ss:$20 sps:$4 sm:$0xff]   ;;  %v15196_v37 = vld [vmem:[%s21879_s3 + $0x1024] ss:$20 sps:$4 sm:$0xff]  }
 0x610   : > { %v6244_v6 = vadd.f32 %v14028_v14, %v19378_v16  ;;  %8435 = vmatpush1.bf16.msra.mxu0 %v15136_v20  ;;  %v15153_v16 = vld [vmem:[%s21879_s3 + $0xf0c] ss:$20 sps:$4 sm:$0xff]   ;;  %v15193_v20 = vld [vmem:[%s21879_s3 + $0x1050] ss:$20 sps:$4 sm:$0xff]  }
 0x611   : > { %8486 = vmatpush2.bf16.msra.mxu1 %v15139_v54  ;;  %v14030_v46 = vpop.f32.mrf.mxu0  ;;  %8436 = vmatprep.subr.bf16.mxu0 %v15144_v15  ;;  %v15194_v54 = vld [vmem:[%s21879_s3 + $0x1020] ss:$20 sps:$4 sm:$0xff]   ;;  %v15197_v15 = vld [vmem:[%s21879_s3 + $0x1028] ss:$20 sps:$4 sm:$0xff]  }
 0x612   : > { %v14031_v48 = vadd.f32 %v14030_v46, %v14029_v45  ;;  %8487 = vmatprep.subr.bf16.mxu1 %v15147_v2  ;;  %v19822_v18 = vadd.f32 %v19685_v28, %v6244_v6  ;;  %v15200_v14 = vld [vmem:[%s21879_s3 + $0xffc] ss:$20 sps:$4 sm:$0xff]   ;;  %v15198_v2 = vld [vmem:[%s21879_s3 + $0xff8] ss:$20 sps:$4 sm:$0xff]   ;;  %v15201_v45 = vld [vmem:[%s21879_s3 + $0x1000] ss:$20 sps:$4 sm:$0xff]  }
 0x613   : > { %v15204_v6 = vld [vmem:[%s21879_s3 + $0xfd4] ss:$20 sps:$4 sm:$0xff]   ;;  %v15205_v46 = vld [vmem:[%s21879_s3 + $0xfd8] ss:$20 sps:$4 sm:$0xff]  }
 0x614   : > { %v6247_v55 = vadd.f32 %v14031_v48, %v19396_v53  ;;  %8437 = vmatpush1.bf16.msra.mxu0 %v15142_v52  ;;  %v15159_v53 = vld [vmem:[%s21879_s3 + $0xee4] ss:$20 sps:$4 sm:$0xff]  }
 0x615   : > { %8488 = vmatpush2.bf16.msra.mxu1 %v15145_v57  ;;  %8438 = vmatprep.subr.bf16.mxu0 %v15150_v60  ;;  %v15202_v52 = vld [vmem:[%s21879_s3 + $0xfd0] ss:$20 sps:$4 sm:$0xff]   ;;  %v15208_v57 = vld [vmem:[%s21879_s3 + $0xfac] ss:$20 sps:$4 sm:$0xff]   ;;  %v15206_v60 = vld [vmem:[%s21879_s3 + $0xfa8] ss:$20 sps:$4 sm:$0xff]  }
 0x616   : > { %8489 = vmatprep.subr.bf16.mxu1 %v15153_v16  ;;  %v19838_v28 = vadd.f32 %v19705_v0, %v6247_v55  ;;  %v15165_v0 = vld [vmem:[%s21879_s3 + $0xebc] ss:$20 sps:$4 sm:$0xff]   ;;  %v15212_v55 = vld [vmem:[%s21879_s3 + $0x1164] ss:$20 sps:$4 sm:$0xff]  }
 0x617   : > { %v15209_v16 = vld [vmem:[%s21879_s3 + $0xfb0] ss:$20 sps:$4 sm:$0xff]  }
 0x618   : > { %8439 = vmatpush1.bf16.msra.mxu0 %v15148_v32  ;;  %v15210_v32 = vld [vmem:[%s21879_s3 + $0x1160] ss:$20 sps:$4 sm:$0xff]  }
 0x619   : > { %8490 = vmatpush2.bf16.msra.mxu1 %v15151_v19  ;;  %8448 = vmatprep.subr.bf16.mxu0 %v15156_v29  ;;  %v15213_v29 = vld [vmem:[%s21879_s3 + $0x1168] ss:$20 sps:$4 sm:$0xff]  }
 0x61a   : > { %8491 = vmatprep.subr.bf16.mxu1 %v15159_v53  ;;  %v15216_v53 = vld [vmem:[%s21879_s3 + $0x113c] ss:$20 sps:$4 sm:$0xff]  }
 0x61c   : > { %8449 = vmatpush2.bf16.msra.mxu0 %v15154_v34  ;;  %v7279_v48 = vpop.f32.mrf.mxu1 }
 0x61d   : > { %8492 = vmatpush2.bf16.msra.mxu1 %v15157_v1  ;;  %8450 = vmatprep.subr.bf16.mxu0 %v15162_v38  ;;  %v15214_v38 = vld [vmem:[%s21879_s3 + $0x1138] ss:$20 sps:$4 sm:$0xff]  }
 0x61e   : > { %8493 = vmatprep.subr.bf16.mxu1 %v15165_v0  ;;  %v7281_v19 = vpop.f32.mrf.mxu1 }
 0x620   : > { %8451 = vmatpush2.bf16.msra.mxu0 %v15160_v30  ;;  %v7283_v0 = vpop.f32.mrf.mxu1 }
 0x621   : > { %8494 = vmatpush2.bf16.msra.mxu1 %v15163_v12  ;;  %8452 = vmatprep.subr.bf16.mxu0 %v15168_v26  ;;  %v15217_v12 = vld [vmem:[%s21879_s3 + $0x1140] ss:$20 sps:$4 sm:$0xff]  }
 0x622   : > { %8495 = vmatprep.subr.bf16.mxu1 %v15171_v31  ;;  %v15220_v26 = vld [vmem:[%s21879_s3 + $0x1114] ss:$20 sps:$4 sm:$0xff]  }
 0x624   : > { %8453 = vmatpush2.bf16.msra.mxu0 %v15166_v5 }
 0x625   : > { %8496 = vmatpush2.bf16.msra.mxu1 %v15169_v49  ;;  %8454 = vmatprep.subr.bf16.mxu0 %v15174_v27 }
 0x626   : > { %8497 = vmatprep.subr.bf16.mxu1 %v15177_v22 }
 0x628   : > { %8455 = vmatpush2.bf16.msra.mxu0 %v15172_v51  ;;  %v15218_v51 = vld [vmem:[%s21879_s3 + $0x1110] ss:$20 sps:$4 sm:$0xff]  }
 0x629   : > { %8498 = vmatpush2.bf16.msra.mxu1 %v15175_v23  ;;  %8510 = vmatprep.subr.bf16.mxu0 %v15180_v50  ;;  %v7285_v23 = vpop.f32.mrf.mxu1 }
 0x62a   : > { %8594 = vmatprep.subr.bf16.mxu1 %v21969_v21 }
 0x62b   : > { %8457 = vmatmul.mubr.bf16.vlgmr.msra.gmra.mxu0 %v18393_v13 }
 0x62c   : > { %8500 = vmatmul.mubr.bf16.vlgmr.msra.gmra.mxu1 %v18303_v7  ;;  %8511 = vmatpush1.bf16.msra.mxu0 %v15178_v61  ;;  %v15224_v61 = vld [vmem:[%s21879_s3 + $0x10ec] ss:$20 sps:$4 sm:$0xff]  }
 0x62d   : > { %13424 = vmatprep.mubr.msk.bf16.mxu0 %vm5049_vm0, %v18403_v36  ;;  %8595 = vmatpush1.bf16.msra.mxu1 %v15181_v11 }
 0x62e   : > { %13425 = vmatprep.mubr.msk.bf16.mxu1 %vm5049_vm0, %v18403_v36  ;;  %8512 = vmatprep.subr.bf16.mxu0 %v15184_v62  ;;  %v15190_v36 = vld [vmem:[%s21879_s3 + $0x1048] ss:$20 sps:$4 sm:$0xff]  }
 0x62f   : > { %8596 = vmatprep.subr.bf16.mxu1 %v21969_v21 }
 0x630   : > { %8513 = vmatpush1.bf16.msra.mxu0 %v15182_v58  ;;  %v15222_v58 = vld [vmem:[%s21879_s3 + $0x10e8] ss:$20 sps:$4 sm:$0xff]  }
 0x631   : > { %8597 = vmatpush1.bf16.msra.mxu1 %v15185_v17  ;;  %8514 = vmatprep.subr.bf16.mxu0 %v15188_v59  ;;  %v15225_v17 = vld [vmem:[%s21879_s3 + $0x10f0] ss:$20 sps:$4 sm:$0xff]   ;;  %v15230_v59 = vld [vmem:[%s21879_s3 + $0xe48] ss:$20 sps:$4 sm:$0xff]  }
 0x632   : > { %8598 = vmatprep.subr.bf16.mxu1 %v21969_v21 }
 0x634   : > { %8515 = vmatpush1.bf16.msra.mxu0 %v15186_v25  ;;  %v15227_v25 = vld [vmem:[%s21879_s3 + $0x1518] ss:$20 sps:$4 sm:$0xff]  }
 0x635   : > { %8599 = vmatpush1.bf16.msra.mxu1 %v15189_v56  ;;  %8516 = vmatprep.subr.bf16.mxu0 %v15192_v8  ;;  %v15231_v56 = vld [vmem:[%s21879_s3 + $0xf60] ss:$20 sps:$4 sm:$0xff]  }
 0x636   : > { %8600 = vmatprep.subr.bf16.mxu1 %v21969_v21  ;;  %v15234_v8 = vld [vmem:[%s21879_s3 + $0x14f4] ss:$20 sps:$4 sm:$0xff]  }
 0x638   : > { %8517 = vmatpush1.bf16.msra.mxu0 %v15190_v36  ;;  %v20041_v36 = vrot.slane %v18389_v40, 2  ;;  %v15239_v40 = vld [vmem:[%s21879_s3 + $0x14cc] ss:$20 sps:$4 sm:$0xff]  }
 0x639   : > { %8601 = vmatpush1.bf16.msra.mxu1 %v15193_v20  ;;  %8518 = vmatprep.subr.bf16.mxu0 %v15196_v37  ;;  %v15235_v20 = vld [vmem:[%s21879_s3 + $0xe20] ss:$20 sps:$4 sm:$0xff]   ;;  %v15232_v37 = vld [vmem:[%s21879_s3 + $0x14f0] ss:$20 sps:$4 sm:$0xff]  }
 0x63a   : > { %8602 = vmatprep.subr.bf16.mxu1 %v21969_v21 }
 0x63c   : > { %8519 = vmatpush1.bf16.msra.mxu0 %v15194_v54  ;;  %v15236_v54 = vld [vmem:[%s21879_s3 + $0xf38] ss:$20 sps:$4 sm:$0xff]  }
 0x63d   : > { %8603 = vmatpush1.bf16.msra.mxu1 %v15197_v15  ;;  %8520 = vmatprep.subr.bf16.mxu0 %v15200_v14  ;;  %v15237_v15 = vld [vmem:[%s21879_s3 + $0x14c8] ss:$20 sps:$4 sm:$0xff]   ;;  %v15241_v14 = vld [vmem:[%s21879_s3 + $0xf10] ss:$20 sps:$4 sm:$0xff]  }
 0x63e   : > { %8604 = vmatprep.subr.bf16.mxu1 %v21969_v21 }
 0x640   : > { %8521 = vmatpush1.bf16.msra.mxu0 %v15198_v2 }
 0x641   : > { %8605 = vmatpush1.bf16.msra.mxu1 %v15201_v45  ;;  %8522 = vmatprep.subr.bf16.mxu0 %v15204_v6  ;;  %v15244_v45 = vld [vmem:[%s21879_s3 + $0x14a4] ss:$20 sps:$4 sm:$0xff]  }
 0x642   : > { %8606 = vmatprep.subr.bf16.mxu1 %v21969_v21  ;;  %v15245_v6 = vld [vmem:[%s21879_s3 + $0xdd0] ss:$20 sps:$4 sm:$0xff]  }
 0x644   : > { %8523 = vmatpush1.bf16.msra.mxu0 %v15202_v52  ;;  %v15242_v52 = vld [vmem:[%s21879_s3 + $0x14a0] ss:$20 sps:$4 sm:$0xff]  }
 0x645   : > { %8607 = vmatpush1.bf16.msra.mxu1 %v15205_v46  ;;  %8524 = vmatprep.subr.bf16.mxu0 %v15208_v57  ;;  %v15246_v46 = vld [vmem:[%s21879_s3 + $0xee8] ss:$20 sps:$4 sm:$0xff]  }
 0x646   : > { %8608 = vmatprep.subr.bf16.mxu1 %v21969_v21 }
 0x648   : > { %8525 = vmatpush1.bf16.msra.mxu0 %v15206_v60  ;;  %v15249_v60 = vld [vmem:[%s21879_s3 + $0x147c] ss:$20 sps:$4 sm:$0xff]  }
 0x649   : > { %8609 = vmatpush1.bf16.msra.mxu1 %v15209_v16  ;;  %8534 = vmatprep.subr.bf16.mxu0 %v15212_v55  ;;  %v15247_v16 = vld [vmem:[%s21879_s3 + $0x1478] ss:$20 sps:$4 sm:$0xff]   ;;  %v15251_v55 = vld [vmem:[%s21879_s3 + $0xec0] ss:$20 sps:$4 sm:$0xff]  }
 0x64a   : > { %8618 = vmatprep.subr.bf16.mxu1 %v21969_v21 }
 0x64b   : > { %v7236_v34 = vpop.f32.mrf.mxu0 }
 0x64c   : > { %v7280_v1 = vadd.f32 %v7279_v48, %v7236_v34  ;;  %8535 = vmatpush2.bf16.msra.mxu0 %v15210_v32  ;;  %v15250_v48 = vld [vmem:[%s21879_s3 + $0xda8] ss:$20 sps:$4 sm:$0xff]   ;;  %v15252_v34 = vld [vmem:[%s21879_s3 + $0x1450] ss:$20 sps:$4 sm:$0xff]  }
 0x64d   : > { %8619 = vmatpush2.bf16.msra.mxu1 %v15213_v29  ;;  %v7238_v30 = vpop.f32.mrf.mxu0  ;;  %8536 = vmatprep.subr.bf16.mxu0 %v15216_v53  ;;  %v15255_v53 = vld [vmem:[%s21879_s3 + $0xd80] ss:$20 sps:$4 sm:$0xff]  }
 0x64e   : > { %v19991_v31 = vadd.f32 %v7280_v1, %v19533_v42  ;;  %v7282_v5 = vadd.f32 %v7281_v19, %v7238_v30  ;;  %8620 = vmatprep.subr.bf16.mxu1 %v21969_v21  ;;  %v15221_v42 = vld [vmem:[%s21879_s3 + $0x1118] ss:$20 sps:$4 sm:$0xff]   ;;  %v15254_v19 = vld [vmem:[%s21879_s3 + $0x1454] ss:$20 sps:$4 sm:$0xff]  }
 0x64f   : > { %v7240_v49 = vpop.f32.mrf.mxu0  ;;  %v15256_v1 = vld [vmem:[%s21879_s3 + $0xe98] ss:$20 sps:$4 sm:$0xff]  }
 0x650   : > { %v19995_v27 = vadd.f32 %v7282_v5, %v19548_v9  ;;  %v7284_v22 = vadd.f32 %v7283_v0, %v7240_v49  ;;  %8537 = vmatpush2.bf16.msra.mxu0 %v15214_v38  ;;  %v15259_v0 = vld [vmem:[%s21879_s3 + $0x142c] ss:$20 sps:$4 sm:$0xff]   ;;  %v15257_v5 = vld [vmem:[%s21879_s3 + $0x1428] ss:$20 sps:$4 sm:$0xff]   ;;  %v15261_v49 = vld [vmem:[%s21879_s3 + $0xe70] ss:$20 sps:$4 sm:$0xff]  }
 0x651   : > { %8621 = vmatpush2.bf16.msra.mxu1 %v15217_v12  ;;  %v7242_v50 = vpop.f32.mrf.mxu0  ;;  %8538 = vmatprep.subr.bf16.mxu0 %v15220_v26  ;;  %v15260_v26 = vld [vmem:[%s21879_s3 + $0xd58] ss:$20 sps:$4 sm:$0xff]  }
 0x652   : > { %v20007_v9 = vadd.f32 %v7284_v22, %v19557_v43  ;;  %v7286_v11 = vadd.f32 %v7285_v23, %v7242_v50  ;;  %8622 = vmatprep.subr.bf16.mxu1 %v21969_v21  ;;  %v15226_v43 = vld [vmem:[%s21879_s3 + $0xf88] ss:$20 sps:$4 sm:$0xff]   ;;  %v15265_v50 = vld [vmem:[%s21879_s3 + $0xd30] ss:$20 sps:$4 sm:$0xff]  }
 0x654   : > { %v20011_v62 = vadd.f32 %v7286_v11, %v19572_v3  ;;  %8539 = vmatpush2.bf16.msra.mxu0 %v15218_v51  ;;  %v15229_v3 = vld [vmem:[%s21879_s3 + $0x151c] ss:$20 sps:$4 sm:$0xff]   ;;  %v15264_v51 = vld [vmem:[%s21879_s3 + $0x1404] ss:$20 sps:$4 sm:$0xff]  }
 0x655   : > { %8623 = vmatpush2.bf16.msra.mxu1 %v15221_v42  ;;  %8540 = vmatprep.subr.bf16.mxu0 %v15224_v61  ;;  %v15262_v42 = vld [vmem:[%s21879_s3 + $0x1400] ss:$20 sps:$4 sm:$0xff]   ;;  %v15268_v61 = vld [vmem:[%s21879_s3 + $0x129c] ss:$20 sps:$4 sm:$0xff]  }
 0x656   : > { %8624 = vmatprep.subr.bf16.mxu1 %v21969_v21  ;;  %v15271_v11 = vld [vmem:[%s21879_s3 + $0x15bc] ss:$20 sps:$4 sm:$0xff]  }
 0x658   : > { %8541 = vmatpush2.bf16.msra.mxu0 %v15222_v58  ;;  %v15266_v58 = vld [vmem:[%s21879_s3 + $0x1298] ss:$20 sps:$4 sm:$0xff]  }
 0x659   : > { %8625 = vmatpush2.bf16.msra.mxu1 %v15225_v17  ;;  %14054 = vmatprep.subr.bf16.mxu0 %v15226_v43  ;;  %v15269_v17 = vld [vmem:[%s21879_s3 + $0x15b8] ss:$20 sps:$4 sm:$0xff]   ;;  %v15274_v43 = vld [vmem:[%s21879_s3 + $0x1274] ss:$20 sps:$4 sm:$0xff]  }
 0x65a   : > { %9595 = vmatprep.subr.bf16.mxu1 %v15229_v3  ;;  %v20152_v3 = vrot.slane %v18297_v24, 2  ;;  %v15275_v24 = vld [vmem:[%s21879_s3 + $0x1590] ss:$20 sps:$4 sm:$0xff]  }
 0x65b   : > { %8543 = vmatmul.mubr.bf16.vlgmr.msra.gmra.mxu0 %v18393_v13 }
 0x65c   : > { %8627 = vmatmul.mubr.bf16.vlgmr.msra.gmra.mxu1 %v18393_v13  ;;  %14055 = vmatpush3.bf16.msra.mxu0 %v15230_v59  ;;  %v20053_v13 = vpop.f32.mrf.mxu1  ;;  %v15277_v59 = vld [vmem:[%s21879_s3 + $0x1594] ss:$20 sps:$4 sm:$0xff]  }
 0x65d   : > { %8585 = vmatprep.mubr.bf16.mxu0 %v18310_v33  ;;  %9596 = vmatpush1.bf16.msra.mxu1 %v15227_v25  ;;  %v15240_v33 = vld [vmem:[%s21879_s3 + $0xdf8] ss:$20 sps:$4 sm:$0xff]   ;;  %v15272_v25 = vld [vmem:[%s21879_s3 + $0x1270] ss:$20 sps:$4 sm:$0xff]  }
 0x65e   : > { %13734 = vmatprep.mubr.msk.bf16.mxu1 %vm5049_vm0, %v20041_v36  ;;  %14056 = vmatprep.subr.bf16.mxu0 %v15231_v56  ;;  %v20069_v2 = vpop.f32.mrf.mxu1  ;;  %v15280_v56 = vld [vmem:[%s21879_s3 + $0x124c] ss:$20 sps:$4 sm:$0xff]  }
 0x65f   : > { %9597 = vmatprep.subr.bf16.mxu1 %v15234_v8  ;;  %v15278_v8 = vld [vmem:[%s21879_s3 + $0x1248] ss:$20 sps:$4 sm:$0xff]  }
 0x660   : > { %14057 = vmatpush3.bf16.msra.mxu0 %v15235_v20  ;;  %v20083_v57 = vpop.f32.mrf.mxu1  ;;  %v15281_v20 = vld [vmem:[%s21879_s3 + $0x1568] ss:$20 sps:$4 sm:$0xff]  }
 0x661   : > { %9598 = vmatpush1.bf16.msra.mxu1 %v15232_v37  ;;  %14058 = vmatprep.subr.bf16.mxu0 %v15236_v54  ;;  %v15286_v37 = vld [vmem:[%s21879_s3 + $0x1224] ss:$20 sps:$4 sm:$0xff]  }
 0x662   : > { %9599 = vmatprep.subr.bf16.mxu1 %v15239_v40  ;;  %v20097_v32 = vpop.f32.mrf.mxu1  ;;  %v15289_v54 = vld [vmem:[%s21879_s3 + $0x1544] ss:$20 sps:$4 sm:$0xff]   ;;  %v15284_v40 = vld [vmem:[%s21879_s3 + $0x1220] ss:$20 sps:$4 sm:$0xff]  }
 0x664   : > { %14059 = vmatpush3.bf16.msra.mxu0 %v15240_v33  ;;  %v15287_v33 = vld [vmem:[%s21879_s3 + $0x1540] ss:$20 sps:$4 sm:$0xff]  }
 0x665   : > { %9600 = vmatpush1.bf16.msra.mxu1 %v15237_v15  ;;  %14060 = vmatprep.subr.bf16.mxu0 %v15241_v14  ;;  %v15292_v15 = vld [vmem:[%s21879_s3 + $0x11fc] ss:$20 sps:$4 sm:$0xff]   ;;  %v15295_v14 = vld [vmem:[%s21879_s3 + $0x1524] ss:$20 sps:$4 sm:$0xff]  }
 0x666   : > { %9601 = vmatprep.subr.bf16.mxu1 %v15244_v45  ;;  %v15290_v45 = vld [vmem:[%s21879_s3 + $0x11f8] ss:$20 sps:$4 sm:$0xff]  }
 0x668   : > { %14061 = vmatpush3.bf16.msra.mxu0 %v15245_v6  ;;  %v15293_v6 = vld [vmem:[%s21879_s3 + $0x1520] ss:$20 sps:$4 sm:$0xff]  }
 0x669   : > { %9602 = vmatpush1.bf16.msra.mxu1 %v15242_v52  ;;  %14062 = vmatprep.subr.bf16.mxu0 %v15246_v46  ;;  %v20202_v52 = vrot.slane %v18385_v10, 2  ;;  %v15298_v46 = vld [vmem:[%s21879_s3 + $0x11d4] ss:$20 sps:$4 sm:$0xff]   ;;  %v15296_v10 = vld [vmem:[%s21879_s3 + $0x11d0] ss:$20 sps:$4 sm:$0xff]  }
 0x66a   : > { %9603 = vmatprep.subr.bf16.mxu1 %v15249_v60  ;;  %v15301_v60 = vld [vmem:[%s21879_s3 + $0x14fc] ss:$20 sps:$4 sm:$0xff]  }
 0x66c   : > { %v14048_v29 = vpop.f32.mrf.mxu1  ;;  %14063 = vmatpush3.bf16.msra.mxu0 %v15250_v48 }
 0x66d   : > { %9604 = vmatpush1.bf16.msra.mxu1 %v15247_v16  ;;  %14064 = vmatprep.subr.bf16.mxu0 %v15251_v55 }
 0x66e   : > { %v14049_v38 = vpop.f32.mrf.mxu1  ;;  %9605 = vmatprep.subr.bf16.mxu1 %v15254_v19  ;;  %v15299_v19 = vld [vmem:[%s21879_s3 + $0x14f8] ss:$20 sps:$4 sm:$0xff]  }
 0x66f   : > { %v20114_v30 = vadd.f32 %v14049_v38, %v14048_v29 }
 0x670   : > { %v14051_v12 = vpop.f32.mrf.mxu1  ;;  %14065 = vmatpush3.bf16.msra.mxu0 %v15255_v53 }
 0x671   : > { %9606 = vmatpush1.bf16.msra.mxu1 %v15252_v34  ;;  %14066 = vmatprep.subr.bf16.mxu0 %v15256_v1  ;;  %v15307_v34 = vld [vmem:[%s21879_s3 + $0x14d4] ss:$20 sps:$4 sm:$0xff]  }
 0x672   : > { %v14052_v22 = vpop.f32.mrf.mxu1  ;;  %9607 = vmatprep.subr.bf16.mxu1 %v15259_v0 }
 0x673   : > { %v20128_v23 = vadd.f32 %v14052_v22, %v14051_v12  ;;  %v15308_v22 = vld [vmem:[%s21879_s3 + $0x1180] ss:$20 sps:$4 sm:$0xff]  }
 0x674   : > { %14067 = vmatpush3.bf16.msra.mxu0 %v15260_v26  ;;  %v15310_v26 = vld [vmem:[%s21879_s3 + $0x1184] ss:$20 sps:$4 sm:$0xff]  }
 0x675   : > { %9608 = vmatpush1.bf16.msra.mxu1 %v15257_v5  ;;  %14068 = vmatprep.subr.bf16.mxu0 %v15261_v49  ;;  %v15313_v5 = vld [vmem:[%s21879_s3 + $0x14ac] ss:$20 sps:$4 sm:$0xff]  }
 0x676   : > { %9609 = vmatprep.subr.bf16.mxu1 %v15264_v51  ;;  %v15314_v51 = vld [vmem:[%s21879_s3 + $0x13d8] ss:$20 sps:$4 sm:$0xff]  }
 0x678   : > { %14069 = vmatpush3.bf16.msra.mxu0 %v15265_v50  ;;  %v15317_v50 = vld [vmem:[%s21879_s3 + $0x1480] ss:$20 sps:$4 sm:$0xff]  }
 0x679   : > { %9610 = vmatpush1.bf16.msra.mxu1 %v15262_v42  ;;  %9552 = vmatprep.subr.bf16.mxu0 %v15268_v61  ;;  %v15322_v42 = vld [vmem:[%s21879_s3 + $0x13b4] ss:$20 sps:$4 sm:$0xff]   ;;  %v15325_v61 = vld [vmem:[%s21879_s3 + $0x145c] ss:$20 sps:$4 sm:$0xff]  }
 0x67a   : > { %9619 = vmatprep.subr.bf16.mxu1 %v15271_v11  ;;  %v15320_v11 = vld [vmem:[%s21879_s3 + $0x13b0] ss:$20 sps:$4 sm:$0xff]  }
 0x67b   : > { %8586 = vmatmul.mubr.bf16.vlgmr.msra.gmra.mxu0 %v18303_v7  ;;  %v15283_v7 = vld [vmem:[%s21879_s3 + $0x156c] ss:$20 sps:$4 sm:$0xff]  }
 0x67c   : > { %9553 = vmatpush1.bf16.msra.mxu0 %v15266_v58  ;;  %9584 = vmatprep.mubr.bf16.mxu0 %v20152_v3  ;;  %v15323_v58 = vld [vmem:[%s21879_s3 + $0x1458] ss:$20 sps:$4 sm:$0xff]  }
 0x67d   : > { %9620 = vmatpush2.bf16.msra.mxu1 %v15269_v17  ;;  %9554 = vmatprep.subr.bf16.mxu0 %v15274_v43  ;;  %v15328_v17 = vld [vmem:[%s21879_s3 + $0x138c] ss:$20 sps:$4 sm:$0xff]   ;;  %v15331_v43 = vld [vmem:[%s21879_s3 + $0x1434] ss:$20 sps:$4 sm:$0xff]  }
 0x67e   : > { %9621 = vmatprep.subr.bf16.mxu1 %v15277_v59  ;;  %v15326_v59 = vld [vmem:[%s21879_s3 + $0x1388] ss:$20 sps:$4 sm:$0xff]  }
 0x680   : > { %9555 = vmatpush1.bf16.msra.mxu0 %v15272_v25  ;;  %v15329_v25 = vld [vmem:[%s21879_s3 + $0x1430] ss:$20 sps:$4 sm:$0xff]  }
 0x681   : > { %9622 = vmatpush2.bf16.msra.mxu1 %v15275_v24  ;;  %9556 = vmatprep.subr.bf16.mxu0 %v15280_v56  ;;  %v15334_v24 = vld [vmem:[%s21879_s3 + $0x1364] ss:$20 sps:$4 sm:$0xff]   ;;  %v15337_v56 = vld [vmem:[%s21879_s3 + $0x140c] ss:$20 sps:$4 sm:$0xff]  }
 0x682   : > { %9623 = vmatprep.subr.bf16.mxu1 %v15283_v7  ;;  %v15332_v7 = vld [vmem:[%s21879_s3 + $0x1360] ss:$20 sps:$4 sm:$0xff]  }
 0x684   : > { %9557 = vmatpush1.bf16.msra.mxu0 %v15278_v8  ;;  %v15335_v8 = vld [vmem:[%s21879_s3 + $0x1408] ss:$20 sps:$4 sm:$0xff]  }
 0x685   : > { %9624 = vmatpush2.bf16.msra.mxu1 %v15281_v20  ;;  %9558 = vmatprep.subr.bf16.mxu0 %v15286_v37  ;;  %v15340_v20 = vld [vmem:[%s21879_s3 + $0x133c] ss:$20 sps:$4 sm:$0xff]   ;;  %v15343_v37 = vld [vmem:[%s21879_s3 + $0x15c4] ss:$20 sps:$4 sm:$0xff]  }
 0x686   : > { %9625 = vmatprep.subr.bf16.mxu1 %v15289_v54  ;;  %v15338_v54 = vld [vmem:[%s21879_s3 + $0x1338] ss:$20 sps:$4 sm:$0xff]  }
 0x688   : > { %9559 = vmatpush1.bf16.msra.mxu0 %v15284_v40  ;;  %v15341_v40 = vld [vmem:[%s21879_s3 + $0x15c0] ss:$20 sps:$4 sm:$0xff]  }
 0x689   : > { %9626 = vmatpush2.bf16.msra.mxu1 %v15287_v33  ;;  %9560 = vmatprep.subr.bf16.mxu0 %v15292_v15  ;;  %v15346_v33 = vld [vmem:[%s21879_s3 + $0x1314] ss:$20 sps:$4 sm:$0xff]   ;;  %v15349_v15 = vld [vmem:[%s21879_s3 + $0x159c] ss:$20 sps:$4 sm:$0xff]  }
 0x68a   : > { %9681 = vmatprep.subr.bf16.mxu1 %v15295_v14  ;;  %v15344_v14 = vld [vmem:[%s21879_s3 + $0x1310] ss:$20 sps:$4 sm:$0xff]  }
 0x68b   : > { %v7322_v48 = vpop.f32.mrf.mxu0 }
 0x68c   : > { %v7366_v16 = vadd.f32 %v20053_v13, %v7322_v48  ;;  %9628 = vmatmul.mubr.bf16.vlgmr.msra.gmra.mxu1 %v20202_v52  ;;  %9561 = vmatpush1.bf16.msra.mxu0 %v15290_v45  ;;  %v15304_v13 = vld [vmem:[%s21879_s3 + $0x11ac] ss:$20 sps:$4 sm:$0xff]   ;;  %v15353_v48 = vld [vmem:[%s21879_s3 + $0x1570] ss:$20 sps:$4 sm:$0xff]  }
 0x68d   : > { %9682 = vmatpush1.bf16.msra.mxu1 %v15293_v6  ;;  %13735 = vmatprep.mubr.msk.bf16.mxu1 %vm5049_vm0, %v20041_v36  ;;  %v7324_v55 = vpop.f32.mrf.mxu0  ;;  %v15347_v45 = vld [vmem:[%s21879_s3 + $0x1598] ss:$20 sps:$4 sm:$0xff]  }
 0x68e   : > { %v20224_v29 = vadd.f32 %v7366_v16, %v19683_v44  ;;  %v7368_v53 = vadd.f32 %v20069_v2, %v7324_v55  ;;  %9562 = vmatprep.subr.bf16.mxu0 %v15298_v46  ;;  %9683 = vmatprep.subr.bf16.mxu1 %v15301_v60  ;;  %v15302_v44 = vld [vmem:[%s21879_s3 + $0x11a8] ss:$20 sps:$4 sm:$0xff]   ;;  %v15305_v2 = vld [vmem:[%s21879_s3 + $0x14d0] ss:$20 sps:$4 sm:$0xff]   ;;  %v15352_v6 = vld [vmem:[%s21879_s3 + $0x12ec] ss:$20 sps:$4 sm:$0xff]  }
 0x68f   : > { %v7326_v1 = vpop.f32.mrf.mxu0  ;;  %v15355_v46 = vld [vmem:[%s21879_s3 + $0x1574] ss:$20 sps:$4 sm:$0xff]   ;;  %v15358_v16 = vld [vmem:[%s21879_s3 + $0x12c4] ss:$20 sps:$4 sm:$0xff]  }
 0x690   : > { %v20231_v38 = vadd.f32 %v7368_v53, %v19696_v41  ;;  %v7370_v0 = vadd.f32 %v20083_v57, %v7326_v1  ;;  %9563 = vmatpush1.bf16.msra.mxu0 %v15296_v10  ;;  %v15350_v60 = vld [vmem:[%s21879_s3 + $0x12e8] ss:$20 sps:$4 sm:$0xff]   ;;  %v15361_v10 = vld [vmem:[%s21879_s3 + $0x154c] ss:$20 sps:$4 sm:$0xff]   ;;  %v20365_v1 = vrot.slane %v18295_v63, 2 }
 0x691   : > { %9684 = vmatpush1.bf16.msra.mxu1 %v15299_v19  ;;  %v7328_v12 = vpop.f32.mrf.mxu0  ;;  %9564 = vmatprep.subr.bf16.mxu0 %v15304_v13  ;;  %v15356_v55 = vld [vmem:[%s21879_s3 + $0x12c0] ss:$20 sps:$4 sm:$0xff]   ;;  %v15359_v19 = vld [vmem:[%s21879_s3 + $0x1548] ss:$20 sps:$4 sm:$0xff]   ;;  %v15364_v13 = vld [vmem:[%s21879_s3 + $0x12a4] ss:$20 sps:$4 sm:$0xff]  }
 0x692   : > { %v20244_v41 = vadd.f32 %v7370_v0, %v19703_v35  ;;  %v7372_v57 = vadd.f32 %v20097_v32, %v7328_v12  ;;  %9685 = vmatprep.subr.bf16.mxu1 %v15307_v34  ;;  %v15311_v35 = vld [vmem:[%s21879_s3 + $0x14a8] ss:$20 sps:$4 sm:$0xff]   ;;  %v15362_v34 = vld [vmem:[%s21879_s3 + $0x12a0] ss:$20 sps:$4 sm:$0xff]  }
 0x693   : > { %v15316_v32 = vld [vmem:[%s21879_s3 + $0x13dc] ss:$20 sps:$4 sm:$0xff]  }
 0x694   : > { %v20251_v49 = vadd.f32 %v7372_v57, %v19715_v39  ;;  %9565 = vmatpush1.bf16.msra.mxu0 %v15302_v44  ;;  %v15319_v39 = vld [vmem:[%s21879_s3 + $0x1484] ss:$20 sps:$4 sm:$0xff]   ;;  %v15365_v53 = vld [vmem:[%s21879_s3 + $0x13e8] ss:$20 sps:$4 sm:$0xff]  }
 0x695   : > { %9686 = vmatpush1.bf16.msra.mxu1 %v15305_v2  ;;  %9566 = vmatprep.subr.bf16.mxu0 %v15310_v26  ;;  %v15366_v0 = vld [vmem:[%s21879_s3 + $0x12a8] ss:$20 sps:$4 sm:$0xff]   ;;  %v15370_v2 = vld [vmem:[%s21879_s3 + $0x13c0] ss:$20 sps:$4 sm:$0xff]   ;;  %v15367_v26 = vld [vmem:[%s21879_s3 + $0x1278] ss:$20 sps:$4 sm:$0xff]  }
 0x696   : > { %9687 = vmatprep.subr.bf16.mxu1 %v15313_v5  ;;  %v15369_v44 = vld [vmem:[%s21879_s3 + $0x127c] ss:$20 sps:$4 sm:$0xff]   ;;  %v15371_v5 = vld [vmem:[%s21879_s3 + $0x1280] ss:$20 sps:$4 sm:$0xff]  }
 0x698   : > { %9567 = vmatpush1.bf16.msra.mxu0 %v15308_v22  ;;  %v15374_v22 = vld [vmem:[%s21879_s3 + $0x1254] ss:$20 sps:$4 sm:$0xff]  }
 0x699   : > { %9688 = vmatpush1.bf16.msra.mxu1 %v15311_v35  ;;  %9568 = vmatprep.subr.bf16.mxu0 %v15316_v32  ;;  %v15375_v35 = vld [vmem:[%s21879_s3 + $0x1398] ss:$20 sps:$4 sm:$0xff]  }
 0x69a   : > { %9689 = vmatprep.subr.bf16.mxu1 %v15319_v39 }
 0x69c   : > { %9569 = vmatpush2.bf16.msra.mxu0 %v15314_v51  ;;  %v15372_v51 = vld [vmem:[%s21879_s3 + $0x1250] ss:$20 sps:$4 sm:$0xff]  }
 0x69d   : > { %9690 = vmatpush1.bf16.msra.mxu1 %v15317_v50  ;;  %9570 = vmatprep.subr.bf16.mxu0 %v15322_v42 }
 0x69e   : > { %9691 = vmatprep.subr.bf16.mxu1 %v15325_v61  ;;  %v15377_v61 = vld [vmem:[%s21879_s3 + $0x1228] ss:$20 sps:$4 sm:$0xff]  }
 0x6a0   : > { %9571 = vmatpush2.bf16.msra.mxu0 %v15320_v11  ;;  %v15381_v11 = vld [vmem:[%s21879_s3 + $0x1230] ss:$20 sps:$4 sm:$0xff]  }
 0x6a1   : > { %9692 = vmatpush1.bf16.msra.mxu1 %v15323_v58  ;;  %9572 = vmatprep.subr.bf16.mxu0 %v15328_v17  ;;  %v15385_v58 = vld [vmem:[%s21879_s3 + $0x1348] ss:$20 sps:$4 sm:$0xff]   ;;  %v15382_v17 = vld [vmem:[%s21879_s3 + $0x1200] ss:$20 sps:$4 sm:$0xff]  }
 0x6a2   : > { %9693 = vmatprep.subr.bf16.mxu1 %v15331_v43  ;;  %v15386_v43 = vld [vmem:[%s21879_s3 + $0x1208] ss:$20 sps:$4 sm:$0xff]  }
 0x6a4   : > { %9573 = vmatpush2.bf16.msra.mxu0 %v15326_v59  ;;  %v15389_v59 = vld [vmem:[%s21879_s3 + $0x11dc] ss:$20 sps:$4 sm:$0xff]  }
 0x6a5   : > { %9694 = vmatpush1.bf16.msra.mxu1 %v15329_v25  ;;  %9574 = vmatprep.subr.bf16.mxu0 %v15334_v24  ;;  %v15390_v25 = vld [vmem:[%s21879_s3 + $0x1320] ss:$20 sps:$4 sm:$0xff]   ;;  %v15387_v24 = vld [vmem:[%s21879_s3 + $0x11d8] ss:$20 sps:$4 sm:$0xff]  }
 0x6a6   : > { %9695 = vmatprep.subr.bf16.mxu1 %v15337_v56  ;;  %v15391_v56 = vld [vmem:[%s21879_s3 + $0x11e0] ss:$20 sps:$4 sm:$0xff]  }
 0x6a8   : > { %9575 = vmatpush2.bf16.msra.mxu0 %v15332_v7  ;;  %v15394_v7 = vld [vmem:[%s21879_s3 + $0x11b4] ss:$20 sps:$4 sm:$0xff]  }
 0x6a9   : > { %9696 = vmatpush1.bf16.msra.mxu1 %v15335_v8  ;;  %9576 = vmatprep.subr.bf16.mxu0 %v15340_v20  ;;  %v15395_v8 = vld [vmem:[%s21879_s3 + $0x12f8] ss:$20 sps:$4 sm:$0xff]   ;;  %v15392_v20 = vld [vmem:[%s21879_s3 + $0x11b0] ss:$20 sps:$4 sm:$0xff]  }
 0x6aa   : > { %9705 = vmatprep.subr.bf16.mxu1 %v15343_v37  ;;  %v15396_v37 = vld [vmem:[%s21879_s3 + $0x11b8] ss:$20 sps:$4 sm:$0xff]  }
 0x6ac   : > { %9577 = vmatpush2.bf16.msra.mxu0 %v15338_v54  ;;  %v15399_v54 = vld [vmem:[%s21879_s3 + $0x118c] ss:$20 sps:$4 sm:$0xff]  }
 0x6ad   : > { %9706 = vmatpush2.bf16.msra.mxu1 %v15341_v40  ;;  %9578 = vmatprep.subr.bf16.mxu0 %v15346_v33  ;;  %v15400_v40 = vld [vmem:[%s21879_s3 + $0x12d0] ss:$20 sps:$4 sm:$0xff]   ;;  %v15397_v33 = vld [vmem:[%s21879_s3 + $0x1188] ss:$20 sps:$4 sm:$0xff]  }
 0x6ae   : > { %9707 = vmatprep.subr.bf16.mxu1 %v15349_v15  ;;  %v15401_v15 = vld [vmem:[%s21879_s3 + $0x1190] ss:$20 sps:$4 sm:$0xff]  }
 0x6b0   : > { %9579 = vmatpush2.bf16.msra.mxu0 %v15344_v14  ;;  %v15404_v14 = vld [vmem:[%s21879_s3 + $0x13e4] ss:$20 sps:$4 sm:$0xff]  }
 0x6b1   : > { %9708 = vmatpush2.bf16.msra.mxu1 %v15347_v45  ;;  %9580 = vmatprep.subr.bf16.mxu0 %v15352_v6  ;;  %v15402_v45 = vld [vmem:[%s21879_s3 + $0x13e0] ss:$20 sps:$4 sm:$0xff]   ;;  %v15407_v6 = vld [vmem:[%s21879_s3 + $0x13bc] ss:$20 sps:$4 sm:$0xff]  }
 0x6b2   : > { %9709 = vmatprep.subr.bf16.mxu1 %v15355_v46  ;;  %v15405_v46 = vld [vmem:[%s21879_s3 + $0x13b8] ss:$20 sps:$4 sm:$0xff]  }
 0x6b4   : > { %9581 = vmatpush2.bf16.msra.mxu0 %v15350_v60  ;;  %v15410_v60 = vld [vmem:[%s21879_s3 + $0x1394] ss:$20 sps:$4 sm:$0xff]  }
 0x6b5   : > { %9710 = vmatpush2.bf16.msra.mxu1 %v15353_v48  ;;  %9582 = vmatprep.subr.bf16.mxu0 %v15358_v16  ;;  %v15408_v48 = vld [vmem:[%s21879_s3 + $0x1390] ss:$20 sps:$4 sm:$0xff]   ;;  %v15413_v16 = vld [vmem:[%s21879_s3 + $0x136c] ss:$20 sps:$4 sm:$0xff]  }
 0x6b6   : > { %9711 = vmatprep.subr.bf16.mxu1 %v15361_v10  ;;  %v15411_v10 = vld [vmem:[%s21879_s3 + $0x1368] ss:$20 sps:$4 sm:$0xff]  }
 0x6b8   : > { %9583 = vmatpush2.bf16.msra.mxu0 %v15356_v55  ;;  %v8415_v55 = vpop.f32.mrf.mxu1 }
 0x6b9   : > { %9712 = vmatpush2.bf16.msra.mxu1 %v15359_v19  ;;  %9638 = vmatprep.subr.bf16.mxu0 %v15364_v13  ;;  %v15416_v19 = vld [vmem:[%s21879_s3 + $0x1344] ss:$20 sps:$4 sm:$0xff]   ;;  %v15414_v13 = vld [vmem:[%s21879_s3 + $0x1340] ss:$20 sps:$4 sm:$0xff]  }
 0x6ba   : > { %14076 = vmatprep.subr.bf16.mxu1 %v15365_v53  ;;  %v8417_v53 = vpop.f32.mrf.mxu1 }
 0x6bb   : > { %v7449_v12 = vpop.f32.mrf.mxu0  ;;  %9585 = vmatmul.mubr.bf16.vlgmr.msra.gmra.mxu0 %v20365_v1 }
 0x6bc   : > { %v7450_v63 = vadd.f32 %v20114_v30, %v7449_v12  ;;  %9714 = vmatmul.mubr.bf16.vlgmr.msra.gmra.mxu1 %v20202_v52  ;;  %9639 = vmatpush1.bf16.msra.mxu0 %v15362_v34  ;;  %v15419_v34 = vld [vmem:[%s21879_s3 + $0x131c] ss:$20 sps:$4 sm:$0xff]   ;;  %v15417_v12 = vld [vmem:[%s21879_s3 + $0x1318] ss:$20 sps:$4 sm:$0xff]  }
 0x6bd   : > { %9670 = vmatprep.mubr.bf16.mxu0 %v20152_v3  ;;  %14077 = vmatpush3.bf16.msra.mxu1 %v15366_v0  ;;  %v7451_v57 = vpop.f32.mrf.mxu0 }
 0x6be   : > { %v20390_v30 = vadd.f32 %v7450_v63, %v19822_v18  ;;  %9756 = vmatprep.mubr.bf16.mxu1 %v20152_v3  ;;  %9640 = vmatprep.subr.bf16.mxu0 %v15369_v44  ;;  %v15376_v18 = vld [vmem:[%s21879_s3 + $0x1258] ss:$20 sps:$4 sm:$0xff]  }
 0x6bf   : > { %v7452_v32 = vpop.f32.mrf.mxu0  ;;  %14078 = vmatprep.subr.bf16.mxu1 %v15370_v2  ;;  %v15379_v3 = vld [vmem:[%s21879_s3 + $0x122c] ss:$20 sps:$4 sm:$0xff]   ;;  %v8419_v2 = vpop.f32.mrf.mxu1 }
 0x6c0   : > { %v7453_v39 = vadd.f32 %v20128_v23, %v7452_v32  ;;  %9641 = vmatpush1.bf16.msra.mxu0 %v15367_v26  ;;  %v15380_v23 = vld [vmem:[%s21879_s3 + $0x1370] ss:$20 sps:$4 sm:$0xff]   ;;  %v15422_v26 = vld [vmem:[%s21879_s3 + $0x12f4] ss:$20 sps:$4 sm:$0xff]  }
 0x6c1   : > { %14079 = vmatpush3.bf16.msra.mxu1 %v15371_v5  ;;  %v7454_v50 = vpop.f32.mrf.mxu0  ;;  %9642 = vmatprep.subr.bf16.mxu0 %v15374_v22 }
 0x6c2   : > { %v20407_v42 = vadd.f32 %v7453_v39, %v19838_v28  ;;  %14080 = vmatprep.subr.bf16.mxu1 %v15375_v35  ;;  %v15384_v28 = vld [vmem:[%s21879_s3 + $0x1204] ss:$20 sps:$4 sm:$0xff]  }
 0x6c3   : > { %v15420_v39 = vld [vmem:[%s21879_s3 + $0x12f0] ss:$20 sps:$4 sm:$0xff]  }
 0x6c4   : > { %9643 = vmatpush1.bf16.msra.mxu0 %v15372_v51  ;;  %v8421_v51 = vpop.f32.mrf.mxu1 }
 0x6c5   : > { %14081 = vmatpush3.bf16.msra.mxu1 %v15376_v18  ;;  %9644 = vmatprep.subr.bf16.mxu0 %v15379_v3  ;;  %v15425_v18 = vld [vmem:[%s21879_s3 + $0x12cc] ss:$20 sps:$4 sm:$0xff]  }
 0x6c6   : > { %14082 = vmatprep.subr.bf16.mxu1 %v15380_v23  ;;  %v15423_v23 = vld [vmem:[%s21879_s3 + $0x12c8] ss:$20 sps:$4 sm:$0xff]  }
 0x6c8   : > { %9645 = vmatpush1.bf16.msra.mxu0 %v15377_v61  ;;  %v15426_v61 = vld [vmem:[%s21879_s3 + $0x1528] ss:$20 sps:$4 sm:$0xff]  }
 0x6c9   : > { %14083 = vmatpush3.bf16.msra.mxu1 %v15381_v11  ;;  %9646 = vmatprep.subr.bf16.mxu0 %v15384_v28  ;;  %v15431_v11 = vld [vmem:[%s21879_s3 + $0x1460] ss:$20 sps:$4 sm:$0xff]  }
 0x6ca   : > { %14084 = vmatprep.subr.bf16.mxu1 %v15385_v58  ;;  %v15432_v58 = vld [vmem:[%s21879_s3 + $0x1438] ss:$20 sps:$4 sm:$0xff]  }
 0x6cc   : > { %9647 = vmatpush1.bf16.msra.mxu0 %v15382_v17 }
 0x6cd   : > { %14085 = vmatpush3.bf16.msra.mxu1 %v15386_v43  ;;  %9648 = vmatprep.subr.bf16.mxu0 %v15389_v59  ;;  %v15433_v43 = vld [vmem:[%s21879_s3 + $0x1410] ss:$20 sps:$4 sm:$0xff]  }
 0x6ce   : > { %14086 = vmatprep.subr.bf16.mxu1 %v15390_v25  ;;  %v15434_v25 = vld [vmem:[%s21879_s3 + $0x15c8] ss:$20 sps:$4 sm:$0xff]  }
 0x6d0   : > { %9649 = vmatpush1.bf16.msra.mxu0 %v15387_v24 }
 0x6d1   : > { %14087 = vmatpush3.bf16.msra.mxu1 %v15391_v56  ;;  %9650 = vmatprep.subr.bf16.mxu0 %v15394_v7 }
 0x6d2   : > { %14088 = vmatprep.subr.bf16.mxu1 %v15395_v8 }
 0x6d4   : > { %9651 = vmatpush1.bf16.msra.mxu0 %v15392_v20  ;;  %v15435_v20 = vld [vmem:[%s21879_s3 + $0x15a0] ss:$20 sps:$4 sm:$0xff]  }
 0x6d5   : > { %14089 = vmatpush3.bf16.msra.mxu1 %v15396_v37  ;;  %9652 = vmatprep.subr.bf16.mxu0 %v15399_v54 }
 0x6d6   : > { %14090 = vmatprep.subr.bf16.mxu1 %v15400_v40 }
 0x6d8   : > { %9653 = vmatpush1.bf16.msra.mxu0 %v15397_v33 }
 0x6d9   : > { %14091 = vmatpush3.bf16.msra.mxu1 %v15401_v15  ;;  %9654 = vmatprep.subr.bf16.mxu0 %v15404_v14 }
 0x6dc   : > { %9757 = vmatmul.mubr.bf16.vlgmr.msra.gmra.mxu1 %v20365_v1  ;;  %9655 = vmatpush2.bf16.msra.mxu0 %v15402_v45 }
 0x6dd   : > { %9656 = vmatprep.subr.bf16.mxu0 %v15407_v6  ;;  %10041 = vmatprep.mubr.f32.mxu1 %v15712_v47 }
 0x6e0   : > { %9657 = vmatpush2.bf16.msra.mxu0 %v15405_v46  ;;  %v15436_v46 = vld [vmem:[%s21879_s3 + $0x1578] ss:$20 sps:$4 sm:$0xff]  }
 0x6e1   : > { %9658 = vmatprep.subr.bf16.mxu0 %v15410_v60 }
 0x6e4   : > { %9659 = vmatpush2.bf16.msra.mxu0 %v15408_v48 }
 0x6e5   : > { %9660 = vmatprep.subr.bf16.mxu0 %v15413_v16 }
 0x6e8   : > { %9661 = vmatpush2.bf16.msra.mxu0 %v15411_v10 }
 0x6e9   : > { %9662 = vmatprep.subr.bf16.mxu0 %v15416_v19 }
 0x6eb   : > { %v8458_v0 = vpop.f32.mrf.mxu0 }
 0x6ec   : > { %v8459_v44 = vadd.f32 %v8458_v0, %v8415_v55  ;;  %9663 = vmatpush2.bf16.msra.mxu0 %v15414_v13  ;;  %v8501_v28 = vpop.f32.mrf.mxu1 }
 0x6ed   : > { %v8460_v63 = vpop.f32.mrf.mxu0  ;;  %9664 = vmatprep.subr.bf16.mxu0 %v15419_v34 }
 0x6ee   : > { %v20508_v57 = vadd.f32 %v8459_v44, %v19991_v31  ;;  %v8461_v5 = vadd.f32 %v8460_v63, %v8417_v53  ;;  %v8503_v17 = vpop.f32.mrf.mxu1 }
 0x6ef   : > { %v8462_v22 = vpop.f32.mrf.mxu0 }
 0x6f0   : > { %v20511_v35 = vadd.f32 %v8461_v5, %v19995_v27  ;;  %v8463_v32 = vadd.f32 %v8462_v22, %v8419_v2  ;;  %9665 = vmatpush2.bf16.msra.mxu0 %v15417_v12  ;;  %v8505_v59 = vpop.f32.mrf.mxu1 }
 0x6f1   : > { %v8464_v50 = vpop.f32.mrf.mxu0  ;;  %9666 = vmatprep.subr.bf16.mxu0 %v15422_v26 }
 0x6f2   : > { %v20520_v31 = vadd.f32 %v8463_v32, %v20007_v9  ;;  %v8465_v3 = vadd.f32 %v8464_v50, %v8421_v51  ;;  %v15427_v9 = vld [vmem:[%s21879_s3 + $0x1500] ss:$20 sps:$4 sm:$0xff]   ;;  %v8507_v24 = vpop.f32.mrf.mxu1 }
 0x6f3   : > { %v21970_v51 = vld [vmem:[#allocation37_spill] sm:$0xff] }
 0x6f4   : > { %v20523_v27 = vadd.f32 %v8465_v3, %v20011_v62  ;;  %9667 = vmatpush2.bf16.msra.mxu0 %v15420_v39  ;;  %v15428_v62 = vld [vmem:[%s21879_s3 + $0x14d8] ss:$20 sps:$4 sm:$0xff]   ;;  %v21971_v3 = vsub.s32 1, %v16349_v4 }
 0x6f5   : > { %9668 = vmatprep.subr.bf16.mxu0 %v15425_v18 }
 0x6f8   : > { %9669 = vmatpush2.bf16.msra.mxu0 %v15423_v23 }
 0x6f9   : > { %9765 = vmatprep.subr.bf16.mxu0 %v21969_v21 }
 0x6fb   : > { %9671 = vmatmul.mubr.bf16.vlgmr.msra.gmra.mxu0 %v20365_v1  ;;  %v15429_v1 = vld [vmem:[%s21879_s3 + $0x14b0] ss:$20 sps:$4 sm:$0xff]  }
 0x6fc   : > { %9766 = vmatpush1.bf16.msra.mxu0 %v15426_v61  ;;  %13736 = vmatprep.mubr.msk.bf16.mxu0 %vm5049_vm0, %v20041_v36  ;;  %v15430_v36 = vld [vmem:[%s21879_s3 + $0x1488] ss:$20 sps:$4 sm:$0xff]  }
 0x6fd   : > { %9767 = vmatprep.subr.bf16.mxu0 %v21969_v21 }
 0x700   : > { %9768 = vmatpush1.bf16.msra.mxu0 %v15427_v9 }
 0x701   : > { %9769 = vmatprep.subr.bf16.mxu0 %v21969_v21 }
 0x704   : > { %9770 = vmatpush1.bf16.msra.mxu0 %v15428_v62 }
 0x705   : > { %9771 = vmatprep.subr.bf16.mxu0 %v21969_v21 }
 0x708   : > { %9772 = vmatpush1.bf16.msra.mxu0 %v15429_v1 }
 0x709   : > { %9773 = vmatprep.subr.bf16.mxu0 %v21969_v21 }
 0x70c   : > { %9774 = vmatpush1.bf16.msra.mxu0 %v15430_v36 }
 0x70d   : > { %9775 = vmatprep.subr.bf16.mxu0 %v21969_v21 }
 0x710   : > { %9776 = vmatpush1.bf16.msra.mxu0 %v15431_v11 }
 0x711   : > { %9777 = vmatprep.subr.bf16.mxu0 %v21969_v21 }
 0x714   : > { %9778 = vmatpush1.bf16.msra.mxu0 %v15432_v58 }
 0x715   : > { %9779 = vmatprep.subr.bf16.mxu0 %v21969_v21 }
 0x718   : > { %9780 = vmatpush1.bf16.msra.mxu0 %v15433_v43 }
 0x719   : > { %9789 = vmatprep.subr.bf16.mxu0 %v21969_v21 }
 0x71b   : > { %v8544_v56 = vpop.f32.mrf.mxu0 }
 0x71c   : > { %v8545_v7 = vadd.f32 %v8544_v56, %v8501_v28  ;;  %v8628_v8 = vpop.f32.mrf.mxu1  ;;  %9790 = vmatpush2.bf16.msra.mxu0 %v15434_v25 }
 0x71d   : > { %v8546_v37 = vpop.f32.mrf.mxu0  ;;  %9791 = vmatprep.subr.bf16.mxu0 %v21969_v21 }
 0x71e   : > { %v20572_v54 = vadd.f32 %v8545_v7, %v20224_v29  ;;  %v8547_v40 = vadd.f32 %v8546_v37, %v8503_v17  ;;  %v8630_v33 = vpop.f32.mrf.mxu1 }
 0x71f   : > { %v8548_v15 = vpop.f32.mrf.mxu0 }
 0x720   : > { %v20575_v14 = vadd.f32 %v8547_v40, %v20231_v38  ;;  %v8549_v45 = vadd.f32 %v8548_v15, %v8505_v59  ;;  %v8631_v6 = vpop.f32.mrf.mxu1  ;;  %9792 = vmatpush2.bf16.msra.mxu0 %v15435_v20  ;;  %v15437_v38 = vld [vmem:[%s21879_s3 + $0x1550] ss:$20 sps:$4 sm:$0xff]  }
 0x721   : > { %v8550_v60 = vpop.f32.mrf.mxu0  ;;  %9793 = vmatprep.subr.bf16.mxu0 %v21969_v21 }
 0x722   : > { %v20582_v48 = vadd.f32 %v8549_v45, %v20244_v41  ;;  %v8551_v29 = vadd.f32 %v8550_v60, %v8507_v24  ;;  %v8633_v16 = vpop.f32.mrf.mxu1 }
 0x724   : > { %v20585_v10 = vadd.f32 %v8551_v29, %v20251_v49  ;;  %9794 = vmatpush2.bf16.msra.mxu0 %v15436_v46  ;;  %v21972_v46 = vsub.s32 2, %v16349_v4 }
 0x725   : > { %9795 = vmatprep.subr.bf16.mxu0 %v21969_v21 }
 0x728   : > { %9796 = vmatpush2.bf16.msra.mxu0 %v15437_v38 }
 0x72b   : > { %9798 = vmatmul.mubr.bf16.vlgmr.msra.gmra.mxu0 %v20202_v52  ;;  %v20601_v52 = vld [vmem:[%s21880_s4] sm:$0x1f] }
 0x72c   : > { %v9825_v23 = vrot.slane %v20601_v52, %v21971_v3  ;;  %v9829_v60 = vrot.slane %v20601_v52, %v21972_v46  ;;  %v10321_v46 = vld [vmem:[%s21886_s10 + $0x420] sm:$0xff] }
 0x73b   : > { %v14070_v55 = vpop.f32.mrf.mxu0 }
 0x73d   : > { %v14071_v19 = vpop.f32.mrf.mxu0 }
 0x73e   : > { %v14072_v13 = vadd.f32 %v14071_v19, %v14070_v55  ;;  %v21973_v55 = vsub.s32 3, %v16349_v4 }
 0x73f   : > { %v14073_v41 = vpop.f32.mrf.mxu0 }
 0x740   : > { %v8629_v53 = vadd.f32 %v14072_v13, %v8628_v8  ;;  %v9833_v19 = vrot.slane %v20601_v52, %v21973_v55  ;;  %v10313_v55 = vld [vmem:[%s21886_s10 + $0x3e0] sm:$0xff] }
 0x741   : > { %v14074_v34 = vpop.f32.mrf.mxu0 }
 0x742   : > { %v14075_v0 = vadd.f32 %v14074_v34, %v14073_v41  ;;  %v20593_v49 = vadd.f32 %v8629_v53, %v20390_v30  ;;  %v9821_v30 = vrot.slane %v20601_v52, %v21970_v51 }
 0x744   : > { %v8632_v44 = vadd.f32 %v14075_v0, %v8631_v6 }
 0x746   : > { %v20596_v12 = vadd.f32 %v8632_v44, %v20407_v42 }
 0x74c   : > { %v9629_v2 = vpop.f32.mrf.mxu1 }
 0x74e   : > { %v9631_v63 = vpop.f32.mrf.mxu1 }
 0x750   : > { %v9633_v22 = vpop.f32.mrf.mxu1 }
 0x752   : > { %v9635_v9 = vpop.f32.mrf.mxu1 }
 0x77b   : > { %v9586_v26 = vpop.f32.mrf.mxu0 }
 0x77c   : > { %v9630_v5 = vadd.f32 %v9629_v2, %v9586_v26  ;;  %v9715_v20 = vpop.f32.mrf.mxu1 }
 0x77d   : > { %v9588_v32 = vpop.f32.mrf.mxu0 }
 0x77e   : > { %v9806_v39 = vadd.f32 %v9630_v5, %v20508_v57  ;;  %v9632_v50 = vadd.f32 %v9631_v63, %v9588_v32  ;;  %v9717_v37 = vpop.f32.mrf.mxu1 }
 0x77f   : > { %v9590_v18 = vpop.f32.mrf.mxu0 }
 0x780   : > { %v9807_v42 = vadd.f32 %v9632_v50, %v20511_v35  ;;  %v9634_v61 = vadd.f32 %v9633_v22, %v9590_v18  ;;  %v9843_v1 = vadd.f32 %v9821_v30, %v9806_v39  ;;  %v9719_v15 = vpop.f32.mrf.mxu1 }
 0x781   : > { %v9592_v62 = vpop.f32.mrf.mxu0 }
 0x782   : > { %v9811_v36 = vadd.f32 %v9634_v61, %v20520_v31  ;;  %v9636_v11 = vadd.f32 %v9635_v9, %v9592_v62  ;;  %v9844_v28 = vadd.f32 %v9825_v23, %v9807_v42  ;;  %v9863_v17 = vrot.slane %v9843_v1, 1  ;;  %v9721_v41 = vpop.f32.mrf.mxu1 }
 0x784   : > { %v9848_v57 = vadd.f32 %v9821_v30, %v9811_v36  ;;  %v9812_v58 = vadd.f32 %v9636_v11, %v20523_v27  ;;  %v9866_v25 = vrot.slane %v9844_v28, 1 }
 0x786   : > { %v9849_v43 = vadd.f32 %v9825_v23, %v9812_v58  ;;  %v9864_v59 = vrot.slane %v9848_v57, 1 }
 0x788   : > { %v20612_v35 = vmax.f32 %v9848_v57, %v9864_v59  ;;  %v9865_v24 = vsel %vm1138_vm4, %v9863_v17, %v9864_v59  ;;  %v9867_v56 = vrot.slane %v9849_v43, 1  ;;  %v21974_v57 = vsub.s32 4, %v16349_v4  ;;  %v10331_v4 = vld [vmem:[%s21886_s10 + $0x470] sm:$0xff] }
 0x789   : > { %v20615_v7 = vmax.f32 %v9843_v1, %v9865_v24  ;;  %10479 = vmatprep.subr.mxu0 %v10331_v4 }
 0x78a   : > { %9918 = vrot.lane.b32.xlu0 %v20612_v35, %s15713_s26  ;;  %v9868_v31 = vsel %vm1138_vm4, %v9866_v25, %v9867_v56  ;;  %v20624_v8 = vmax.f32 %v9849_v43, %v9867_v56  ;;  %v9837_v58 = vrot.slane %v20601_v52, %v21974_v57  ;;  %v10327_v52 = vld [vmem:[%s21886_s10 + $0x450] sm:$0xff] }
 0x78b   : > { %9908 = vrot.lane.b32.xlu1 %v20615_v7, %s15713_s26  ;;  %v20622_v27 = vmax.f32 %v9844_v28, %v9868_v31  ;;  %v10367_v57 = vld [vmem:[%s21886_s10 + $0x590] sm:$0xff] }
 0x78e   : > { %9920 = vrot.lane.b32.xlu0 %v20624_v8, %s15713_s26 }
 0x78f   : > { %9910 = vrot.lane.b32.xlu1 %v20622_v27, %s15713_s26 }
 0x79c   : > { %v14092_v42 = vpop.f32.mrf.mxu1 }
 0x79e   : > { %v14093_v3 = vpop.f32.mrf.mxu1 }
 0x79f   : > { %v14094_v61 = vadd.f32 %v14093_v3, %v14092_v42  ;;  %v10286_v42 = vld [vmem:[%s21886_s10 + $0x308] sm:$0xff]  ;;  %v10285_v3 = vld [vmem:[%s21886_s10 + $0x300] sm:$0xff] }
 0x7a0   : > { %v14095_v23 = vpop.f32.mrf.mxu1 }
 0x7a2   : > { %v14096_v9 = vpop.f32.mrf.mxu1 }
 0x7a3   : > { %v14097_v11 = vadd.f32 %v14096_v9, %v14095_v23  ;;  %v10379_v23 = vld [vmem:[%s21886_s10 + $0x5f0] sm:$0xff]  ;;  %v10376_v9 = vld [vmem:[%s21886_s10 + $0x5d8] sm:$0xff] }
 0x7bb   : > { %v9672_v40 = vpop.f32.mrf.mxu0 }
 0x7bc   : > { %v9716_v33 = vadd.f32 %v9715_v20, %v9672_v40 }
 0x7bd   : > { %v9674_v45 = vpop.f32.mrf.mxu0 }
 0x7be   : > { %v9808_v6 = vadd.f32 %v9716_v33, %v20572_v54  ;;  %v9718_v29 = vadd.f32 %v9717_v37, %v9674_v45  ;;  %v10324_v45 = vld [vmem:[%s21886_s10 + $0x438] sm:$0xff] }
 0x7bf   : > { %v9676_v16 = vpop.f32.mrf.mxu0 }
 0x7c0   : > { %v9809_v38 = vadd.f32 %v9718_v29, %v20575_v14  ;;  %v9720_v13 = vadd.f32 %v9719_v15, %v9676_v16  ;;  %v9845_v34 = vadd.f32 %v9829_v60, %v9808_v6  ;;  %v10325_v15 = vld [vmem:[%s21886_s10 + $0x440] sm:$0xff]  ;;  %v10322_v6 = vld [vmem:[%s21886_s10 + $0x428] sm:$0xff]  ;;  %v10316_v16 = vld [vmem:[%s21886_s10 + $0x3f8] sm:$0xff] }
 0x7c1   : > { %v9678_v53 = vpop.f32.mrf.mxu0  ;;  %v10318_v29 = vld [vmem:[%s21886_s10 + $0x408] sm:$0xff] }
 0x7c2   : > { %v9813_v0 = vadd.f32 %v9720_v13, %v20582_v48  ;;  %v9722_v44 = vadd.f32 %v9721_v41, %v9678_v53  ;;  %v9846_v54 = vadd.f32 %v9833_v19, %v9809_v38  ;;  %v9869_v26 = vrot.slane %v9845_v34, 1  ;;  %v10315_v38 = vld [vmem:[%s21886_s10 + $0x3f0] sm:$0xff]  ;;  %v10310_v13 = vld [vmem:[%s21886_s10 + $0x3c8] sm:$0xff]  ;;  %v10309_v41 = vld [vmem:[%s21886_s10 + $0x3c0] sm:$0xff] }
 0x7c3   : > { %v10307_v53 = vld [vmem:[%s21886_s10 + $0x3b0] sm:$0xff] }
 0x7c4   : > { %v9850_v2 = vadd.f32 %v9829_v60, %v9813_v0  ;;  %v9814_v63 = vadd.f32 %v9722_v44, %v20585_v10  ;;  %v9872_v32 = vrot.slane %v9846_v54, 1  ;;  %v10319_v60 = vld [vmem:[%s21886_s10 + $0x410] sm:$0xff]  ;;  %v10304_v0 = vld [vmem:[%s21886_s10 + $0x398] sm:$0xff] }
 0x7c5   : > { %v10303_v44 = vld [vmem:[%s21886_s10 + $0x390] sm:$0xff] }
 0x7c6   : > { %v9851_v5 = vadd.f32 %v9833_v19, %v9814_v63  ;;  %v9870_v22 = vrot.slane %v9850_v2, 1  ;;  %v10312_v19 = vld [vmem:[%s21886_s10 + $0x3d8] sm:$0xff]  ;;  %v10298_v63 = vld [vmem:[%s21886_s10 + $0x368] sm:$0xff] }
 0x7c8   : > { %v20640_v14 = vmax.f32 %v9850_v2, %v9870_v22  ;;  %v9871_v39 = vsel %vm1138_vm4, %v9869_v26, %v9870_v22  ;;  %v9873_v30 = vrot.slane %v9851_v5, 1  ;;  %v10300_v2 = vld [vmem:[%s21886_s10 + $0x378] sm:$0xff]  ;;  %v10297_v26 = vld [vmem:[%s21886_s10 + $0x360] sm:$0xff]  ;;  %v10294_v22 = vld [vmem:[%s21886_s10 + $0x348] sm:$0xff] }
 0x7c9   : > { %v20643_v50 = vmax.f32 %v9845_v34, %v9871_v39  ;;  %v10306_v34 = vld [vmem:[%s21886_s10 + $0x3a8] sm:$0xff]  ;;  %v10291_v39 = vld [vmem:[%s21886_s10 + $0x330] sm:$0xff] }
 0x7ca   : > { %9922 = vrot.lane.b32.xlu1 %v20640_v14, %s15713_s26  ;;  %v9874_v48 = vsel %vm1138_vm4, %v9872_v32, %v9873_v30  ;;  %v20652_v18 = vmax.f32 %v9851_v5, %v9873_v30  ;;  %v10295_v5 = vld [vmem:[%s21886_s10 + $0x350] sm:$0xff]  ;;  %v10292_v32 = vld [vmem:[%s21886_s10 + $0x338] sm:$0xff]  ;;  %v10289_v30 = vld [vmem:[%s21886_s10 + $0x320] sm:$0xff] }
 0x7cb   : > { %9912 = vrot.lane.b32.xlu0 %v20643_v50, %s15713_s26  ;;  %v20650_v10 = vmax.f32 %v9846_v54, %v9874_v48  ;;  %v10301_v54 = vld [vmem:[%s21886_s10 + $0x380] sm:$0xff]  ;;  %v10288_v48 = vld [vmem:[%s21886_s10 + $0x318] sm:$0xff] }
 0x7cf   : > { %9924 = vrot.lane.b32.xlu0 %v20652_v18, %s15713_s26 }
 0x7d3   : > { %9914 = vrot.lane.b32.xlu0 %v20650_v10, %s15713_s26 }
 0x7eb   : > { %v9799_v62 = vpop.f32.mrf.mxu0 }
 0x7ec   : > { %v9800_v1 = vadd.f32 %v14094_v61, %v9799_v62  ;;  %v10378_v61 = vld [vmem:[%s21886_s10 + $0x5e8] sm:$0xff]  ;;  %v10375_v62 = vld [vmem:[%s21886_s10 + $0x5d0] sm:$0xff] }
 0x7ed   : > { %v9801_v36 = vpop.f32.mrf.mxu0 }
 0x7ee   : > { %v9810_v28 = vadd.f32 %v9800_v1, %v20593_v49  ;;  %v10330_v49 = vld [vmem:[%s21886_s10 + $0x468] sm:$0xff]  ;;  %v10373_v1 = vld [vmem:[%s21886_s10 + $0x5c0] sm:$0xff]  ;;  %v10372_v36 = vld [vmem:[%s21886_s10 + $0x5b8] sm:$0xff] }
 0x7ef   : > { %v9802_v17 = vpop.f32.mrf.mxu0  ;;  %10480 = vmatpush1.msra.mxu0 %v10330_v49 }
 0x7f0   : > { %v9803_v43 = vadd.f32 %v14097_v11, %v9802_v17  ;;  %v9847_v25 = vadd.f32 %v9837_v58, %v9810_v28  ;;  %v10370_v11 = vld [vmem:[%s21886_s10 + $0x5a8] sm:$0xff]  ;;  %v10369_v28 = vld [vmem:[%s21886_s10 + $0x5a0] sm:$0xff] }
 0x7f1   : > { %v9804_v59 = vpop.f32.mrf.mxu0  ;;  %v10366_v17 = vld [vmem:[%s21886_s10 + $0x588] sm:$0xff] }
 0x7f2   : > { %v9815_v24 = vadd.f32 %v9803_v43, %v20596_v12  ;;  %v9875_v31 = vrot.slane %v9847_v25, 1  ;;  %v10328_v12 = vld [vmem:[%s21886_s10 + $0x458] sm:$0xff] }
 0x7f3   : > { %10481 = vmatprep.subr.mxu0 %v10328_v12  ;;  %v10364_v59 = vld [vmem:[%s21886_s10 + $0x578] sm:$0xff] }
 0x7f4   : > { %v9852_v56 = vadd.f32 %v9837_v58, %v9815_v24  ;;  %10482 = vmatpush1.msra.mxu0 %v10327_v52  ;;  %v10361_v24 = vld [vmem:[%s21886_s10 + $0x560] sm:$0xff] }
 0x7f5   : > { %10483 = vmatprep.subr.mxu0 %v10325_v15 }
 0x7f6   : > { %v9876_v20 = vrot.slane %v9852_v56, 1  ;;  %10484 = vmatpush1.msra.mxu0 %v10324_v45 }
 0x7f7   : > { %10485 = vmatprep.subr.mxu0 %v10322_v6 }
 0x7f8   : > { %v20663_v37 = vmax.f32 %v9852_v56, %v9876_v20  ;;  %v9877_v40 = vsel %vm1138_vm4, %v9875_v31, %v9876_v20  ;;  %10486 = vmatpush1.msra.mxu0 %v10321_v46  ;;  %v10360_v56 = vld [vmem:[%s21886_s10 + $0x558] sm:$0xff] }
 0x7f9   : > { %v20666_v33 = vmax.f32 %v9847_v25, %v9877_v40  ;;  %10487 = vmatprep.subr.mxu0 %v10319_v60  ;;  %v10363_v25 = vld [vmem:[%s21886_s10 + $0x570] sm:$0xff] }
 0x7fa   : > { %9926 = vrot.lane.b32.xlu1 %v20663_v37, %s15713_s26  ;;  %10488 = vmatpush1.msra.mxu0 %v10318_v29  ;;  %v9956_v29 = vld [vmem:[%s21885_s9] sm:$0x1f] }
 0x7fb   : > { %10489 = vmatprep.subr.mxu0 %v10316_v16 }
 0x7fc   : > { %10490 = vmatpush1.msra.mxu0 %v10315_v38  ;;  %v9919_v43 = vpop.permute.xlu0 %9918 }
 0x7fd   : > { %10491 = vmatprep.subr.mxu0 %v10313_v55  ;;  %v9909_v58 = vpop.permute.xlu1 %9908 }
 0x7fe   : > { %9916 = vrot.lane.b32.xlu1 %v20666_v33, %s15713_s26  ;;  %10492 = vmatpush1.msra.mxu0 %v10312_v19 }
 0x7ff   : > { %10493 = vmatprep.subr.mxu0 %v10310_v13 }
 0x800   : > { %10494 = vmatpush1.msra.mxu0 %v10309_v41  ;;  %v9921_v20 = vpop.permute.xlu0 %9920 }
 0x801   : > { %10495 = vmatprep.subr.mxu0 %v10307_v53  ;;  %v9911_v31 = vpop.permute.xlu1 %9910  ;;  %v9932_v40 = vsel %vm5049_vm0, %v9919_v43, %v9921_v20  ;;  %v10204_v43 = vld [vmem:[%s21886_s10 + $0x78] sm:$0xff] }
 0x802   : > { %10496 = vmatpush1.msra.mxu0 %v10306_v34  ;;  %v9928_v52 = vsel %vm5049_vm0, %v9909_v58, %v9911_v31  ;;  %v9951_v6 = vmax.f32 %v20612_v35, %v9932_v40  ;;  %v10205_v58 = vld [vmem:[%s21886_s10 + $0x80] sm:$0xff]  ;;  %v10342_v40 = vld [vmem:[%s21886_s10 + $0x4c8] sm:$0xff] }
 0x803   : > { %10497 = vmatprep.subr.mxu0 %v10304_v0  ;;  %v9946_v60 = vmax.f32 %v20615_v7, %v9928_v52  ;;  %v10339_v52 = vld [vmem:[%s21886_s10 + $0x4b0] sm:$0xff] }
 0x804   : > { %10498 = vmatpush1.msra.mxu0 %v10303_v44  ;;  %v10228_v44 = vld [vmem:[%s21886_s10 + $0x138] sm:$0xff] }
 0x805   : > { %10499 = vmatprep.subr.mxu0 %v10301_v54  ;;  %v10226_v54 = vld [vmem:[%s21886_s10 + $0x128] sm:$0xff] }
 0x806   : > { %10500 = vmatpush1.msra.mxu0 %v10300_v2  ;;  %v10225_v2 = vld [vmem:[%s21886_s10 + $0x120] sm:$0xff] }
 0x807   : > { %10501 = vmatprep.subr.mxu0 %v10298_v63  ;;  %v10223_v63 = vld [vmem:[%s21886_s10 + $0x110] sm:$0xff] }
 0x808   : > { %10502 = vmatpush1.msra.mxu0 %v10297_v26  ;;  %v10222_v26 = vld [vmem:[%s21886_s10 + $0x108] sm:$0xff] }
 0x809   : > { %10503 = vmatprep.subr.mxu0 %v10295_v5  ;;  %v10220_v5 = vld [vmem:[%s21886_s10 + $0xf8] sm:$0xff] }
 0x80a   : > { %10504 = vmatpush1.msra.mxu0 %v10294_v22  ;;  %v10219_v22 = vld [vmem:[%s21886_s10 + $0xf0] sm:$0xff] }
 0x80b   : > { %10505 = vmatprep.subr.mxu0 %v10292_v32  ;;  %v10217_v32 = vld [vmem:[%s21886_s10 + $0xe0] sm:$0xff] }
 0x80c   : > { %10506 = vmatpush1.msra.mxu0 %v10291_v39  ;;  %v10216_v39 = vld [vmem:[%s21886_s10 + $0xd8] sm:$0xff] }
 0x80d   : > { %10507 = vmatprep.subr.mxu0 %v10289_v30  ;;  %v10358_v30 = vld [vmem:[%s21886_s10 + $0x548] sm:$0xff] }
 0x80e   : > { %10508 = vmatpush1.msra.mxu0 %v10288_v48  ;;  %v10214_v48 = vld [vmem:[%s21886_s10 + $0xc8] sm:$0xff] }
 0x80f   : > { %10509 = vmatprep.subr.mxu0 %v10286_v42  ;;  %v10357_v42 = vld [vmem:[%s21886_s10 + $0x540] sm:$0xff] }
 0x810   : > { %10510 = vmatpush1.msra.mxu0 %v10285_v3  ;;  %v10213_v3 = vld [vmem:[%s21886_s10 + $0xc0] sm:$0xff] }
 0x811   : > { %10511 = vmatprep.subr.mxu0 %v10379_v23  ;;  %v10355_v23 = vld [vmem:[%s21886_s10 + $0x530] sm:$0xff] }
 0x812   : > { %10512 = vmatpush2.msra.mxu0 %v10378_v61  ;;  %v10211_v61 = vld [vmem:[%s21886_s10 + $0xb0] sm:$0xff] }
 0x813   : > { %10513 = vmatprep.subr.mxu0 %v10376_v9  ;;  %v10354_v9 = vld [vmem:[%s21886_s10 + $0x528] sm:$0xff] }
 0x814   : > { %10514 = vmatpush2.msra.mxu0 %v10375_v62  ;;  %v10210_v62 = vld [vmem:[%s21886_s10 + $0xa8] sm:$0xff] }
 0x815   : > { %10515 = vmatprep.subr.mxu0 %v10373_v1  ;;  %v10352_v1 = vld [vmem:[%s21886_s10 + $0x518] sm:$0xff] }
 0x816   : > { %10516 = vmatpush2.msra.mxu0 %v10372_v36  ;;  %v10208_v36 = vld [vmem:[%s21886_s10 + $0x98] sm:$0xff] }
 0x817   : > { %10517 = vmatprep.subr.mxu0 %v10370_v11  ;;  %v10351_v11 = vld [vmem:[%s21886_s10 + $0x510] sm:$0xff] }
 0x818   : > { %10518 = vmatpush2.msra.mxu0 %v10369_v28  ;;  %v10207_v28 = vld [vmem:[%s21886_s10 + $0x90] sm:$0xff] }
 0x819   : > { %10519 = vmatprep.subr.mxu0 %v10367_v57  ;;  %v10349_v57 = vld [vmem:[%s21886_s10 + $0x500] sm:$0xff] }
 0x81a   : > { %10520 = vmatpush2.msra.mxu0 %v10366_v17  ;;  %v10348_v17 = vld [vmem:[%s21886_s10 + $0x4f8] sm:$0xff] }
 0x81b   : > { %10521 = vmatprep.subr.mxu0 %v10364_v59  ;;  %v10346_v59 = vld [vmem:[%s21886_s10 + $0x4e8] sm:$0xff] }
 0x81c   : > { %10522 = vmatpush2.msra.mxu0 %v10363_v25  ;;  %v10202_v25 = vld [vmem:[%s21886_s10 + $0x68] sm:$0xff] }
 0x81d   : > { %10523 = vmatprep.subr.mxu0 %v10361_v24  ;;  %v10345_v24 = vld [vmem:[%s21886_s10 + $0x4e0] sm:$0xff] }
 0x81e   : > { %10524 = vmatpush2.msra.mxu0 %v10360_v56  ;;  %v10201_v56 = vld [vmem:[%s21886_s10 + $0x60] sm:$0xff] }
 0x81f   : > { %10525 = vmatprep.subr.mxu0 %v10358_v30  ;;  %v10241_v30 = vld [vmem:[%s21886_s10 + $0x1a0] sm:$0xff] }
 0x820   : > { %10526 = vmatpush2.msra.mxu0 %v10357_v42  ;;  %v10238_v42 = vld [vmem:[%s21886_s10 + $0x188] sm:$0xff] }
 0x821   : > { %10527 = vmatprep.subr.mxu0 %v10355_v23  ;;  %v10336_v23 = vld [vmem:[%s21886_s10 + $0x498] sm:$0xff] }
 0x822   : > { %10528 = vmatpush2.msra.mxu0 %v10354_v9  ;;  %v10403_v9 = vld [vmem:[%s21886_s10 + $0x6b0] sm:$0xff] }
 0x823   : > { %10529 = vmatprep.subr.mxu0 %v10352_v1  ;;  %v10284_v1 = vld [vmem:[%s21886_s10 + $0x2f8] sm:$0xff] }
 0x824   : > { %10530 = vmatpush2.msra.mxu0 %v10351_v11 }
 0x825   : > { %10531 = vmatprep.subr.mxu0 %v10349_v57  ;;  %v10400_v57 = vld [vmem:[%s21886_s10 + $0x698] sm:$0xff] }
 0x826   : > { %10532 = vmatpush2.msra.mxu0 %v10348_v17  ;;  %v10397_v17 = vld [vmem:[%s21886_s10 + $0x680] sm:$0xff] }
 0x827   : > { %10533 = vmatprep.subr.mxu0 %v10346_v59  ;;  %v10394_v59 = vld [vmem:[%s21886_s10 + $0x668] sm:$0xff] }
 0x828   : > { %10534 = vmatpush2.msra.mxu0 %v10345_v24  ;;  %v10391_v24 = vld [vmem:[%s21886_s10 + $0x650] sm:$0xff] }
 0x83c   : > { %v9923_v4 = vpop.permute.xlu1 %9922 }
 0x83d   : > { %v9933_v49 = vsel %vm5049_vm0, %v9921_v20, %v9923_v4  ;;  %v9913_v12 = vpop.permute.xlu0 %9912  ;;  %v10199_v20 = vld [vmem:[%s21886_s10 + $0x50] sm:$0xff] }
 0x83e   : > { %v9952_v15 = vmax.f32 %v20624_v8, %v9933_v49  ;;  %v9929_v45 = vsel %vm5049_vm0, %v9911_v31, %v9913_v12  ;;  %v10343_v31 = vld [vmem:[%s21886_s10 + $0x4d0] sm:$0xff]  ;;  %v10340_v49 = vld [vmem:[%s21886_s10 + $0x4b8] sm:$0xff] }
 0x83f   : > { %v9947_v46 = vmax.f32 %v20622_v27, %v9929_v45  ;;  %10535 = vmatprep.subr.mxu0 %v10343_v31  ;;  %v10337_v45 = vld [vmem:[%s21886_s10 + $0x4a0] sm:$0xff]  ;;  %v10388_v31 = vld [vmem:[%s21886_s10 + $0x638] sm:$0xff] }
 0x840   : > { %13737 = vmatprep.subr.msk.mxu1 %vm9961_vm1, %v9952_v15  ;;  %10536 = vmatpush2.msra.mxu0 %v10342_v40  ;;  %v10195_v15 = vld [vmem:[%s21886_s10 + $0x30] sm:$0xff]  ;;  %v10385_v40 = vld [vmem:[%s21886_s10 + $0x620] sm:$0xff] }
 0x841   : > { %13738 = vmatpush1.msk.msra.mxu1 %vm9961_vm1, %v9951_v6  ;;  %v9925_v35 = vpop.permute.xlu0 %9924  ;;  %10537 = vmatprep.subr.mxu0 %v10340_v49  ;;  %v10193_v6 = vld [vmem:[%s21886_s10 + $0x20] sm:$0xff]  ;;  %v10382_v49 = vld [vmem:[%s21886_s10 + $0x608] sm:$0xff] }
 0x842   : > { %10007 = vmatprep.subr.mxu1 %v9947_v46  ;;  %v9934_v27 = vsel %vm5049_vm0, %v9923_v4, %v9925_v35  ;;  %v10198_v4 = vld [vmem:[%s21886_s10 + $0x48] sm:$0xff]  ;;  %10538 = vmatpush2.msra.mxu0 %v10339_v52  ;;  %v10192_v46 = vld [vmem:[%s21886_s10 + $0x18] sm:$0xff] }
 0x843   : > { %10008 = vmatpush1.msra.mxu1 %v9946_v60  ;;  %v9953_v55 = vmax.f32 %v20640_v14, %v9934_v27  ;;  %10539 = vmatprep.subr.mxu0 %v10337_v45  ;;  %v10190_v60 = vld [vmem:[%s21886_s10 + $0x8] sm:$0xff]  ;;  %v10380_v52 = vld [vmem:[%s21886_s10 + $0x5f8] sm:$0xff] }
 0x844   : > { %13739 = vmatmul.mubr.msk.f32.vlgmr.msra.gmra.mxu1 %vm9957_vm2, %v9956_v29  ;;  %v10282_v27 = vld [vmem:[%s21886_s10 + $0x2e8] sm:$0xff]  ;;  %10540 = vmatpush2.msra.mxu0 %v10336_v23  ;;  %v10308_v23 = vld [vmem:[%s21886_s10 + $0x3b8] sm:$0xff] }
 0x845   : > { %10112 = vmatprep.mubr.f32.mxu1 %v15712_v47  ;;  %v9915_v16 = vpop.permute.xlu0 %9914 }
 0x846   : > { %v9930_v19 = vsel %vm5049_vm0, %v9913_v12, %v9915_v16  ;;  %v10196_v12 = vld [vmem:[%s21886_s10 + $0x38] sm:$0xff] }
 0x847   : > { %v9948_v34 = vmax.f32 %v20643_v50, %v9930_v19  ;;  %v10235_v50 = vld [vmem:[%s21886_s10 + $0x170] sm:$0xff]  ;;  %v10273_v19 = vld [vmem:[%s21886_s10 + $0x2a0] sm:$0xff] }
 0x86c   : > { %v9927_v8 = vpop.permute.xlu1 %9926 }
 0x86d   : > { %v9935_v7 = vsel %vm5049_vm0, %v9925_v35, %v9927_v8  ;;  %v9955_v0 = vmax.f32 %v20663_v37, %v9927_v8  ;;  %v10231_v37 = vld [vmem:[%s21886_s10 + $0x150] sm:$0xff]  ;;  %v10280_v8 = vld [vmem:[%s21886_s10 + $0x2d8] sm:$0xff] }
 0x86e   : > { %v9954_v38 = vmax.f32 %v20652_v18, %v9935_v7  ;;  %v10232_v18 = vld [vmem:[%s21886_s10 + $0x158] sm:$0xff]  ;;  %v10283_v35 = vld [vmem:[%s21886_s10 + $0x2f0] sm:$0xff]  ;;  %v10277_v7 = vld [vmem:[%s21886_s10 + $0x2c0] sm:$0xff] }
 0x870   : > { %13740 = vmatprep.subr.msk.mxu1 %vm9961_vm1, %v9954_v38  ;;  %v9917_v13 = vpop.permute.xlu1 %9916  ;;  %v10276_v38 = vld [vmem:[%s21886_s10 + $0x2b8] sm:$0xff] }
 0x871   : > { %v9931_v41 = vsel %vm5049_vm0, %v9915_v16, %v9917_v13  ;;  %13741 = vmatpush1.msk.msra.mxu1 %vm9961_vm1, %v9953_v55  ;;  %v9950_v14 = vmax.f32 %v20666_v33, %v9917_v13  ;;  %v10229_v33 = vld [vmem:[%s21886_s10 + $0x140] sm:$0xff]  ;;  %v10279_v16 = vld [vmem:[%s21886_s10 + $0x2d0] sm:$0xff]  ;;  %v10274_v55 = vld [vmem:[%s21886_s10 + $0x2a8] sm:$0xff] }
 0x872   : > { %v9949_v53 = vmax.f32 %v20650_v10, %v9931_v41  ;;  %v10234_v10 = vld [vmem:[%s21886_s10 + $0x168] sm:$0xff]  ;;  %v10271_v13 = vld [vmem:[%s21886_s10 + $0x290] sm:$0xff] }
 0x873   : > { %v10270_v41 = vld [vmem:[%s21886_s10 + $0x288] sm:$0xff] }
 0x874   : > { %10078 = vmatprep.subr.mxu1 %v9949_v53  ;;  %v10268_v53 = vld [vmem:[%s21886_s10 + $0x278] sm:$0xff] }
 0x875   : > { %10079 = vmatpush1.msra.mxu1 %v9948_v34  ;;  %v10267_v34 = vld [vmem:[%s21886_s10 + $0x270] sm:$0xff] }
 0x876   : > { %13742 = vmatmul.mubr.msk.f32.vlgmr.msra.gmra.mxu1 %vm9957_vm2, %v9956_v29  ;;  %14248 = vmatprep.subr.mxu1 %v15712_v47 }
 0x877   : > { %14249 = vmatpush3.msk.msra.mxu1 %vm9961_vm1, %v9955_v0  ;;  %14252 = vmatprep.mubr.msk.f32.mxu1 %vm15714_vm3, %v15712_v47  ;;  %v10265_v0 = vld [vmem:[%s21886_s10 + $0x260] sm:$0xff] }
 0x878   : > { %14250 = vmatprep.subr.mxu1 %v15712_v47 }
 0x879   : > { %14251 = vmatpush3.msra.mxu1 %v9950_v14  ;;  %v10264_v14 = vld [vmem:[%s21886_s10 + $0x258] sm:$0xff] }
 0x87a   : > { %14253 = vmatmul.mubr.msk.f32.vlgmr.msra.gmra.mxu1 %vm9957_vm2, %v9956_v29  ;;  %10408 = vmatprep.subr.mxu1 %v10235_v50  ;;  %v10189_v29 = vld [vmem:[%s21886_s10] sm:$0xff]  ;;  %v10262_v50 = vld [vmem:[%s21886_s10 + $0x248] sm:$0xff] }
 0x87b   : > { %10409 = vmatpush1.msra.mxu1 %v10234_v10  ;;  %v10261_v10 = vld [vmem:[%s21886_s10 + $0x240] sm:$0xff] }
 0x87c   : > { %10410 = vmatprep.subr.mxu1 %v10232_v18  ;;  %v10259_v18 = vld [vmem:[%s21886_s10 + $0x230] sm:$0xff] }
 0x87d   : > { %10411 = vmatpush1.msra.mxu1 %v10231_v37  ;;  %v10258_v37 = vld [vmem:[%s21886_s10 + $0x228] sm:$0xff] }
 0x87e   : > { %10412 = vmatprep.subr.mxu1 %v10229_v33  ;;  %v10256_v33 = vld [vmem:[%s21886_s10 + $0x218] sm:$0xff] }
 0x87f   : > { %10413 = vmatpush1.msra.mxu1 %v10228_v44  ;;  %v10255_v44 = vld [vmem:[%s21886_s10 + $0x210] sm:$0xff] }
 0x880   : > { %10414 = vmatprep.subr.mxu1 %v10226_v54  ;;  %v10253_v54 = vld [vmem:[%s21886_s10 + $0x200] sm:$0xff] }
 0x881   : > { %10415 = vmatpush1.msra.mxu1 %v10225_v2  ;;  %v10252_v2 = vld [vmem:[%s21886_s10 + $0x1f8] sm:$0xff] }
 0x882   : > { %10416 = vmatprep.subr.mxu1 %v10223_v63  ;;  %v10250_v63 = vld [vmem:[%s21886_s10 + $0x1e8] sm:$0xff] }
 0x883   : > { %10417 = vmatpush1.msra.mxu1 %v10222_v26  ;;  %v10249_v26 = vld [vmem:[%s21886_s10 + $0x1e0] sm:$0xff] }
 0x884   : > { %10418 = vmatprep.subr.mxu1 %v10220_v5  ;;  %v10247_v5 = vld [vmem:[%s21886_s10 + $0x1d0] sm:$0xff] }
 0x885   : > { %10419 = vmatpush1.msra.mxu1 %v10219_v22  ;;  %v10246_v22 = vld [vmem:[%s21886_s10 + $0x1c8] sm:$0xff] }
 0x886   : > { %10420 = vmatprep.subr.mxu1 %v10217_v32  ;;  %v10244_v32 = vld [vmem:[%s21886_s10 + $0x1b8] sm:$0xff] }
 0x887   : > { %10421 = vmatpush1.msra.mxu1 %v10216_v39  ;;  %v10243_v39 = vld [vmem:[%s21886_s10 + $0x1b0] sm:$0xff] }
 0x888   : > { %10422 = vmatprep.subr.mxu1 %v10214_v48  ;;  %v10240_v48 = vld [vmem:[%s21886_s10 + $0x198] sm:$0xff] }
 0x889   : > { %10423 = vmatpush1.msra.mxu1 %v10213_v3  ;;  %v10237_v3 = vld [vmem:[%s21886_s10 + $0x180] sm:$0xff] }
 0x88a   : > { %10424 = vmatprep.subr.mxu1 %v10211_v61  ;;  %v10334_v61 = vld [vmem:[%s21886_s10 + $0x488] sm:$0xff] }
 0x88b   : > { %10425 = vmatpush1.msra.mxu1 %v10210_v62  ;;  %10541 = vmatprep.subr.mxu0 %v10334_v61  ;;  %v10333_v62 = vld [vmem:[%s21886_s10 + $0x480] sm:$0xff] }
 0x88c   : > { %10426 = vmatprep.subr.mxu1 %v10208_v36  ;;  %10542 = vmatpush2.msra.mxu0 %v10333_v62  ;;  %v10209_v61 = vld [vmem:[%s21886_s10 + $0xa0] sm:$0xff]  ;;  %v10254_v62 = vld [vmem:[%s21886_s10 + $0x208] sm:$0xff] }
 0x88d   : > { %10427 = vmatpush1.msra.mxu1 %v10207_v28  ;;  %14101 = vmatprep.subr.mxu0 %v10284_v1  ;;  %v10402_v28 = vld [vmem:[%s21886_s10 + $0x6a8] sm:$0xff]  ;;  %v10305_v1 = vld [vmem:[%s21886_s10 + $0x3a0] sm:$0xff] }
 0x88e   : > { %10428 = vmatprep.subr.mxu1 %v10205_v58  ;;  %v10399_v58 = vld [vmem:[%s21886_s10 + $0x690] sm:$0xff] }
 0x88f   : > { %10429 = vmatpush1.msra.mxu1 %v10204_v43  ;;  %v10396_v43 = vld [vmem:[%s21886_s10 + $0x678] sm:$0xff] }
 0x890   : > { %10430 = vmatprep.subr.mxu1 %v10202_v25  ;;  %v10393_v25 = vld [vmem:[%s21886_s10 + $0x660] sm:$0xff] }
 0x891   : > { %10431 = vmatpush1.msra.mxu1 %v10201_v56  ;;  %v10390_v56 = vld [vmem:[%s21886_s10 + $0x648] sm:$0xff] }
 0x892   : > { %10432 = vmatprep.subr.mxu1 %v10199_v20  ;;  %v10387_v20 = vld [vmem:[%s21886_s10 + $0x630] sm:$0xff] }
 0x893   : > { %10433 = vmatpush1.msra.mxu1 %v10198_v4  ;;  %v10384_v4 = vld [vmem:[%s21886_s10 + $0x618] sm:$0xff] }
 0x894   : > { %10434 = vmatprep.subr.mxu1 %v10196_v12  ;;  %v10381_v12 = vld [vmem:[%s21886_s10 + $0x600] sm:$0xff] }
 0x895   : > { %10435 = vmatpush1.msra.mxu1 %v10195_v15 }
 0x896   : > { %10436 = vmatprep.subr.mxu1 %v10193_v6  ;;  %v10236_v6 = vld [vmem:[%s21886_s10 + $0x178] sm:$0xff] }
 0x897   : > { %10437 = vmatpush1.msra.mxu1 %v10192_v46  ;;  %v10281_v46 = vld [vmem:[%s21886_s10 + $0x2e0] sm:$0xff] }
 0x898   : > { %10438 = vmatprep.subr.mxu1 %v10190_v60 }
 0x899   : > { %10439 = vmatpush1.msra.mxu1 %v10189_v29  ;;  %v10332_v29 = vld [vmem:[%s21886_s10 + $0x478] sm:$0xff] }
 0x89a   : > { %10440 = vmatprep.subr.mxu1 %v10283_v35  ;;  %v10233_v35 = vld [vmem:[%s21886_s10 + $0x160] sm:$0xff] }
 0x89b   : > { %10441 = vmatpush2.msra.mxu1 %v10282_v27  ;;  %v10377_v27 = vld [vmem:[%s21886_s10 + $0x5e0] sm:$0xff] }
 0x89c   : > { %10442 = vmatprep.subr.mxu1 %v10280_v8  ;;  %v10278_v8 = vld [vmem:[%s21886_s10 + $0x2c8] sm:$0xff] }
 0x89d   : > { %10443 = vmatpush2.msra.mxu1 %v10279_v16  ;;  %v10329_v16 = vld [vmem:[%s21886_s10 + $0x460] sm:$0xff] }
 0x89e   : > { %10444 = vmatprep.subr.mxu1 %v10277_v7 }
 0x89f   : > { %10445 = vmatpush2.msra.mxu1 %v10276_v38  ;;  %v10230_v38 = vld [vmem:[%s21886_s10 + $0x148] sm:$0xff] }
 0x8a0   : > { %10446 = vmatprep.subr.mxu1 %v10274_v55  ;;  %v10374_v55 = vld [vmem:[%s21886_s10 + $0x5c8] sm:$0xff] }
 0x8a1   : > { %10447 = vmatpush2.msra.mxu1 %v10273_v19  ;;  %v10275_v19 = vld [vmem:[%s21886_s10 + $0x2b0] sm:$0xff] }
 0x8a2   : > { %10448 = vmatprep.subr.mxu1 %v10271_v13  ;;  %v10326_v13 = vld [vmem:[%s21886_s10 + $0x448] sm:$0xff] }
 0x8a3   : > { %10449 = vmatpush2.msra.mxu1 %v10270_v41  ;;  %v10227_v41 = vld [vmem:[%s21886_s10 + $0x130] sm:$0xff] }
 0x8a4   : > { %10450 = vmatprep.subr.mxu1 %v10268_v53  ;;  %v10371_v53 = vld [vmem:[%s21886_s10 + $0x5b0] sm:$0xff] }
 0x8a5   : > { %10451 = vmatpush2.msra.mxu1 %v10267_v34  ;;  %v10272_v34 = vld [vmem:[%s21886_s10 + $0x298] sm:$0xff] }
 0x8a6   : > { %10452 = vmatprep.subr.mxu1 %v10265_v0  ;;  %v10323_v0 = vld [vmem:[%s21886_s10 + $0x430] sm:$0xff] }
 0x8a7   : > { %10453 = vmatpush2.msra.mxu1 %v10264_v14  ;;  %v10224_v14 = vld [vmem:[%s21886_s10 + $0x118] sm:$0xff] }
 0x8a8   : > { %10454 = vmatprep.subr.mxu1 %v10262_v50  ;;  %v10368_v50 = vld [vmem:[%s21886_s10 + $0x598] sm:$0xff] }
 0x8a9   : > { %10455 = vmatpush2.msra.mxu1 %v10261_v10  ;;  %v10269_v10 = vld [vmem:[%s21886_s10 + $0x280] sm:$0xff] }
 0x8aa   : > { %10456 = vmatprep.subr.mxu1 %v10259_v18  ;;  %v10320_v18 = vld [vmem:[%s21886_s10 + $0x418] sm:$0xff] }
 0x8ab   : > { %10457 = vmatpush2.msra.mxu1 %v10258_v37  ;;  %v10221_v37 = vld [vmem:[%s21886_s10 + $0x100] sm:$0xff] }
 0x8ac   : > { %10458 = vmatprep.subr.mxu1 %v10256_v33  ;;  %v10365_v33 = vld [vmem:[%s21886_s10 + $0x580] sm:$0xff] }
 0x8ad   : > { %10459 = vmatpush2.msra.mxu1 %v10255_v44  ;;  %v10266_v44 = vld [vmem:[%s21886_s10 + $0x268] sm:$0xff] }
 0x8ae   : > { %10460 = vmatprep.subr.mxu1 %v10253_v54  ;;  %v10317_v54 = vld [vmem:[%s21886_s10 + $0x400] sm:$0xff] }
 0x8af   : > { %10461 = vmatpush2.msra.mxu1 %v10252_v2  ;;  %v10218_v2 = vld [vmem:[%s21886_s10 + $0xe8] sm:$0xff] }
 0x8b0   : > { %10462 = vmatprep.subr.mxu1 %v10250_v63  ;;  %v10362_v63 = vld [vmem:[%s21886_s10 + $0x568] sm:$0xff] }
 0x8b1   : > { %10463 = vmatpush2.msra.mxu1 %v10249_v26  ;;  %v10263_v26 = vld [vmem:[%s21886_s10 + $0x250] sm:$0xff] }
 0x8b2   : > { %10464 = vmatprep.subr.mxu1 %v10247_v5  ;;  %v10314_v5 = vld [vmem:[%s21886_s10 + $0x3e8] sm:$0xff] }
 0x8b3   : > { %10465 = vmatpush2.msra.mxu1 %v10246_v22  ;;  %v10215_v22 = vld [vmem:[%s21886_s10 + $0xd0] sm:$0xff] }
 0x8b4   : > { %10466 = vmatprep.subr.mxu1 %v10244_v32  ;;  %v10359_v32 = vld [vmem:[%s21886_s10 + $0x550] sm:$0xff] }
 0x8b5   : > { %10467 = vmatpush2.msra.mxu1 %v10243_v39  ;;  %v10260_v39 = vld [vmem:[%s21886_s10 + $0x238] sm:$0xff] }
 0x8b6   : > { %10468 = vmatprep.subr.mxu1 %v10241_v30  ;;  %v10311_v30 = vld [vmem:[%s21886_s10 + $0x3d0] sm:$0xff] }
 0x8b7   : > { %10469 = vmatpush2.msra.mxu1 %v10240_v48  ;;  %v10212_v48 = vld [vmem:[%s21886_s10 + $0xb8] sm:$0xff] }
 0x8b8   : > { %10470 = vmatprep.subr.mxu1 %v10238_v42  ;;  %v10356_v42 = vld [vmem:[%s21886_s10 + $0x538] sm:$0xff] }
 0x8b9   : > { %10471 = vmatpush2.msra.mxu1 %v10237_v3  ;;  %v10257_v3 = vld [vmem:[%s21886_s10 + $0x220] sm:$0xff] }
 0x8ba   : > { %10566 = vmatprep.subr.mxu1 %v10403_v9  ;;  %v10353_v9 = vld [vmem:[%s21886_s10 + $0x520] sm:$0xff] }
 0x904   : > { %v21096_v36 = vpop.f32.mrf.mxu1 }
 0x906   : > { %v10045_v11 = vpop.f32.mrf.mxu1 }
 0x907   : > { %10472 = vmatprep.mubr.f32.mxu1 %v10045_v11 }
 0x908   : > { %10473 = vmatmul.mubr.f32.vlgmr.msra.gmra.mxu1 %v21096_v36 }
 0x909   : > { %10567 = vmatpush1.msra.mxu1 %v10402_v28  ;;  %10614 = vmatprep.mubr.f32.mxu1 %v15712_v47  ;;  %v10350_v28 = vld [vmem:[%s21886_s10 + $0x508] sm:$0xff] }
 0x90a   : > { %10568 = vmatprep.subr.mxu1 %v10400_v57  ;;  %v10251_v57 = vld [vmem:[%s21886_s10 + $0x1f0] sm:$0xff] }
 0x90b   : > { %10569 = vmatpush1.msra.mxu1 %v10399_v58  ;;  %v10302_v58 = vld [vmem:[%s21886_s10 + $0x388] sm:$0xff] }
 0x90c   : > { %10570 = vmatprep.subr.mxu1 %v10397_v17  ;;  %v10203_v17 = vld [vmem:[%s21886_s10 + $0x70] sm:$0xff] }
 0x90d   : > { %10571 = vmatpush1.msra.mxu1 %v10396_v43  ;;  %v10347_v43 = vld [vmem:[%s21886_s10 + $0x4f0] sm:$0xff] }
 0x90e   : > { %10572 = vmatprep.subr.mxu1 %v10394_v59  ;;  %v10248_v59 = vld [vmem:[%s21886_s10 + $0x1d8] sm:$0xff] }
 0x90f   : > { %10573 = vmatpush1.msra.mxu1 %v10393_v25  ;;  %v10299_v25 = vld [vmem:[%s21886_s10 + $0x370] sm:$0xff] }
 0x910   : > { %10574 = vmatprep.subr.mxu1 %v10391_v24  ;;  %v10200_v24 = vld [vmem:[%s21886_s10 + $0x58] sm:$0xff] }
 0x911   : > { %10575 = vmatpush1.msra.mxu1 %v10390_v56  ;;  %v10344_v56 = vld [vmem:[%s21886_s10 + $0x4d8] sm:$0xff] }
 0x912   : > { %10576 = vmatprep.subr.mxu1 %v10388_v31  ;;  %v10245_v31 = vld [vmem:[%s21886_s10 + $0x1c0] sm:$0xff] }
 0x913   : > { %10577 = vmatpush1.msra.mxu1 %v10387_v20  ;;  %v10296_v20 = vld [vmem:[%s21886_s10 + $0x358] sm:$0xff] }
 0x914   : > { %10578 = vmatprep.subr.mxu1 %v10385_v40  ;;  %v10197_v40 = vld [vmem:[%s21886_s10 + $0x40] sm:$0xff] }
 0x915   : > { %10579 = vmatpush1.msra.mxu1 %v10384_v4  ;;  %v10341_v4 = vld [vmem:[%s21886_s10 + $0x4c0] sm:$0xff] }
 0x916   : > { %10580 = vmatprep.subr.mxu1 %v10382_v49  ;;  %v10242_v49 = vld [vmem:[%s21886_s10 + $0x1a8] sm:$0xff] }
 0x917   : > { %10581 = vmatpush1.msra.mxu1 %v10381_v12  ;;  %v10293_v12 = vld [vmem:[%s21886_s10 + $0x340] sm:$0xff] }
 0x918   : > { %14136 = vmatprep.subr.mxu1 %v10380_v52  ;;  %v10194_v52 = vld [vmem:[%s21886_s10 + $0x28] sm:$0xff] }
 0x936   : > { %v21148_v15 = vpop.f32.mrf.mxu1 }
 0x938   : > { %v10116_v45 = vpop.f32.mrf.mxu1 }
 0x939   : > { %10543 = vmatprep.mubr.f32.mxu0 %v10116_v45 }
 0x93a   : > { %v21156_v60 = vpop.f32.mrf.mxu1  ;;  %10544 = vmatmul.mubr.f32.vlgmr.msra.gmra.mxu0 %v21148_v15 }
 0x93b   : > { %14102 = vmatpush3.msra.mxu0 %v10236_v6  ;;  %13745 = vmatmul.mubr.msk.f32.vlgmr.msra.gmra.mxu1 %vm5049_vm0, %v21156_v60  ;;  %v10239_v6 = vld [vmem:[%s21886_s10 + $0x190] sm:$0xff] }
 0x93c   : > { %14103 = vmatprep.subr.mxu0 %v10281_v46  ;;  %10685 = vmatprep.mubr.f32.mxu0 %v10045_v11  ;;  %v14254_v7 = vpop.f32.mrf.mxu1  ;;  %v10206_v11 = vld [vmem:[%s21886_s10 + $0x88] sm:$0xff] }
 0x93d   : > { %14137 = vmatpush3.msra.mxu1 %v10332_v29  ;;  %14104 = vmatpush3.msra.mxu0 %v10233_v35  ;;  %v10290_v46 = vld [vmem:[%s21886_s10 + $0x328] sm:$0xff]  ;;  %v10191_v29 = vld [vmem:[%s21886_s10 + $0x10] sm:$0xff] }
 0x93e   : > { %14138 = vmatprep.subr.mxu1 %v10377_v27  ;;  %10755 = vmatprep.mubr.f32.mxu1 %v10116_v45  ;;  %v10338_v45 = vld [vmem:[%s21886_s10 + $0x4a8] sm:$0xff]  ;;  %v10335_v35 = vld [vmem:[%s21886_s10 + $0x490] sm:$0xff] }
 0x93f   : > { %14105 = vmatprep.subr.mxu0 %v10278_v8  ;;  %14139 = vmatpush3.msra.mxu1 %v10329_v16  ;;  %v10287_v27 = vld [vmem:[%s21886_s10 + $0x310] sm:$0xff]  ;;  %v10404_v8 = vld [vmem:[%s21886_s10 + $0x6b8] sm:$0xff] }
 0x940   : > { %14106 = vmatpush3.msra.mxu0 %v10230_v38  ;;  %14140 = vmatprep.subr.mxu1 %v10374_v55  ;;  %v15440_v16 = vld [vmem:[%s21881_s5 + $0x1b4] ss:$8 sps:$4 sm:$0xff]   ;;  %v15438_v7 = vld [vmem:[%s21881_s5 + $0x1b0] ss:$8 sps:$4 sm:$0xff]   ;;  %v10401_v38 = vld [vmem:[%s21886_s10 + $0x6a0] sm:$0xff] }
 0x941   : > { %14107 = vmatprep.subr.mxu0 %v10275_v19  ;;  %14141 = vmatpush3.msra.mxu1 %v10326_v13  ;;  %v15443_v55 = vld [vmem:[%s21881_s5 + $0x1a4] ss:$8 sps:$4 sm:$0xff]   ;;  %v10395_v19 = vld [vmem:[%s21886_s10 + $0x670] sm:$0xff] }
 0x942   : > { %14108 = vmatpush3.msra.mxu0 %v10227_v41  ;;  %14142 = vmatprep.subr.mxu1 %v10371_v53  ;;  %v15446_v13 = vld [vmem:[%s21881_s5 + $0x194] ss:$8 sps:$4 sm:$0xff]   ;;  %v15444_v53 = vld [vmem:[%s21881_s5 + $0x190] ss:$8 sps:$4 sm:$0xff]  }
 0x943   : > { %14109 = vmatprep.subr.mxu0 %v10272_v34  ;;  %14143 = vmatpush3.msra.mxu1 %v10323_v0  ;;  %v10392_v41 = vld [vmem:[%s21886_s10 + $0x658] sm:$0xff]  ;;  %v10389_v34 = vld [vmem:[%s21886_s10 + $0x640] sm:$0xff] }
 0x944   : > { %14110 = vmatpush3.msra.mxu0 %v10224_v14  ;;  %14144 = vmatprep.subr.mxu1 %v10368_v50  ;;  %v15449_v0 = vld [vmem:[%s21881_s5 + $0x184] ss:$8 sps:$4 sm:$0xff]   ;;  %v15447_v50 = vld [vmem:[%s21881_s5 + $0x180] ss:$8 sps:$4 sm:$0xff]  }
 0x945   : > { %14111 = vmatprep.subr.mxu0 %v10269_v10  ;;  %14145 = vmatpush3.msra.mxu1 %v10320_v18  ;;  %v10386_v14 = vld [vmem:[%s21886_s10 + $0x628] sm:$0xff]  ;;  %v10383_v10 = vld [vmem:[%s21886_s10 + $0x610] sm:$0xff] }
 0x946   : > { %14112 = vmatpush3.msra.mxu0 %v10221_v37  ;;  %14146 = vmatprep.subr.mxu1 %v10365_v33  ;;  %v15452_v18 = vld [vmem:[%s21881_s5 + $0x174] ss:$8 sps:$4 sm:$0xff]   ;;  %v15450_v37 = vld [vmem:[%s21881_s5 + $0x170] ss:$8 sps:$4 sm:$0xff]   ;;  %v15455_v33 = vld [vmem:[%s21881_s5 + $0x164] ss:$8 sps:$4 sm:$0xff]  }
 0x947   : > { %14113 = vmatprep.subr.mxu0 %v10266_v44  ;;  %14147 = vmatpush3.msra.mxu1 %v10317_v54  ;;  %v15453_v44 = vld [vmem:[%s21881_s5 + $0x160] ss:$8 sps:$4 sm:$0xff]   ;;  %v15456_v54 = vld [vmem:[%s21881_s5 + $0x150] ss:$8 sps:$4 sm:$0xff]  }
 0x948   : > { %14114 = vmatpush3.msra.mxu0 %v10218_v2  ;;  %14148 = vmatprep.subr.mxu1 %v10362_v63  ;;  %v15461_v2 = vld [vmem:[%s21881_s5 + $0x144] ss:$8 sps:$4 sm:$0xff]   ;;  %v15459_v63 = vld [vmem:[%s21881_s5 + $0x140] ss:$8 sps:$4 sm:$0xff]  }
 0x949   : > { %14115 = vmatprep.subr.mxu0 %v10263_v26  ;;  %14149 = vmatpush3.msra.mxu1 %v10314_v5  ;;  %v15464_v26 = vld [vmem:[%s21881_s5 + $0x234] ss:$8 sps:$4 sm:$0xff]   ;;  %v15462_v5 = vld [vmem:[%s21881_s5 + $0x230] ss:$8 sps:$4 sm:$0xff]  }
 0x94a   : > { %14116 = vmatpush3.msra.mxu0 %v10215_v22  ;;  %14150 = vmatprep.subr.mxu1 %v10359_v32  ;;  %v15467_v22 = vld [vmem:[%s21881_s5 + $0x224] ss:$8 sps:$4 sm:$0xff]   ;;  %v15465_v32 = vld [vmem:[%s21881_s5 + $0x220] ss:$8 sps:$4 sm:$0xff]  }
 0x94b   : > { %14117 = vmatprep.subr.mxu0 %v10260_v39  ;;  %14151 = vmatpush3.msra.mxu1 %v10311_v30  ;;  %v15470_v39 = vld [vmem:[%s21881_s5 + $0x214] ss:$8 sps:$4 sm:$0xff]   ;;  %v15468_v30 = vld [vmem:[%s21881_s5 + $0x210] ss:$8 sps:$4 sm:$0xff]  }
 0x94c   : > { %14118 = vmatpush3.msra.mxu0 %v10212_v48  ;;  %14152 = vmatprep.subr.mxu1 %v10356_v42  ;;  %v15473_v48 = vld [vmem:[%s21881_s5 + $0x204] ss:$8 sps:$4 sm:$0xff]   ;;  %v15471_v42 = vld [vmem:[%s21881_s5 + $0x200] ss:$8 sps:$4 sm:$0xff]  }
 0x94d   : > { %14119 = vmatprep.subr.mxu0 %v10257_v3  ;;  %14153 = vmatpush3.msra.mxu1 %v10308_v23  ;;  %v15476_v3 = vld [vmem:[%s21881_s5 + $0x1f4] ss:$8 sps:$4 sm:$0xff]   ;;  %v15474_v23 = vld [vmem:[%s21881_s5 + $0x1f0] ss:$8 sps:$4 sm:$0xff]  }
 0x94e   : > { %14120 = vmatpush3.msra.mxu0 %v10209_v61  ;;  %14154 = vmatprep.subr.mxu1 %v10353_v9  ;;  %v15479_v61 = vld [vmem:[%s21881_s5 + $0x1e4] ss:$8 sps:$4 sm:$0xff]   ;;  %v15477_v9 = vld [vmem:[%s21881_s5 + $0x1e0] ss:$8 sps:$4 sm:$0xff]  }
 0x94f   : > { %14121 = vmatprep.subr.mxu0 %v10254_v62  ;;  %14155 = vmatpush3.msra.mxu1 %v10305_v1  ;;  %v15482_v62 = vld [vmem:[%s21881_s5 + $0x1d4] ss:$8 sps:$4 sm:$0xff]   ;;  %v15480_v1 = vld [vmem:[%s21881_s5 + $0x1d0] ss:$8 sps:$4 sm:$0xff]  }
 0x950   : > { %14122 = vmatpush3.msra.mxu0 %v10206_v11  ;;  %14156 = vmatprep.subr.mxu1 %v10350_v28  ;;  %v15483_v11 = vld [vmem:[%s21881_s5 + $0x1c0] ss:$8 sps:$4 sm:$0xff]   ;;  %v15485_v28 = vld [vmem:[%s21881_s5 + $0x1c4] ss:$8 sps:$4 sm:$0xff]  }
 0x951   : > { %14123 = vmatprep.subr.mxu0 %v10251_v57  ;;  %14157 = vmatpush3.msra.mxu1 %v10302_v58  ;;  %v15488_v57 = vld [vmem:[%s21881_s5 + $0x134] ss:$8 sps:$4 sm:$0xff]  }
 0x952   : > { %14124 = vmatpush3.msra.mxu0 %v10203_v17  ;;  %14158 = vmatprep.subr.mxu1 %v10347_v43  ;;  %v15494_v58 = vld [vmem:[%s21881_s5 + $0x274] ss:$8 sps:$4 sm:$0xff]   ;;  %v15492_v17 = vld [vmem:[%s21881_s5 + $0x270] ss:$8 sps:$4 sm:$0xff]   ;;  %v15500_v43 = vld [vmem:[%s21881_s5 + $0x264] ss:$8 sps:$4 sm:$0xff]  }
 0x953   : > { %14125 = vmatprep.subr.mxu0 %v10248_v59  ;;  %14159 = vmatpush3.msra.mxu1 %v10299_v25  ;;  %v15498_v59 = vld [vmem:[%s21881_s5 + $0x260] ss:$8 sps:$4 sm:$0xff]   ;;  %v15506_v25 = vld [vmem:[%s21881_s5 + $0x254] ss:$8 sps:$4 sm:$0xff]  }
 0x954   : > { %14126 = vmatpush3.msra.mxu0 %v10200_v24  ;;  %14160 = vmatprep.subr.mxu1 %v10344_v56  ;;  %v15504_v24 = vld [vmem:[%s21881_s5 + $0x250] ss:$8 sps:$4 sm:$0xff]   ;;  %v15512_v56 = vld [vmem:[%s21881_s5 + $0x244] ss:$8 sps:$4 sm:$0xff]  }
 0x955   : > { %14127 = vmatprep.subr.mxu0 %v10245_v31  ;;  %14161 = vmatpush3.msra.mxu1 %v10296_v20  ;;  %v15510_v31 = vld [vmem:[%s21881_s5 + $0x240] ss:$8 sps:$4 sm:$0xff]   ;;  %v15518_v20 = vld [vmem:[%s21881_s5 + $0x74] ss:$8 sps:$4 sm:$0xff]  }
 0x956   : > { %14128 = vmatpush3.msra.mxu0 %v10197_v40  ;;  %14162 = vmatprep.subr.mxu1 %v10341_v4 }
 0x957   : > { %14129 = vmatprep.subr.mxu0 %v10242_v49  ;;  %14163 = vmatpush3.msra.mxu1 %v10293_v12 }
 0x958   : > { %14130 = vmatpush3.msra.mxu0 %v10194_v52  ;;  %14164 = vmatprep.subr.mxu1 %v10338_v45 }
 0x959   : > { %14131 = vmatprep.subr.mxu0 %v10239_v6  ;;  %14165 = vmatpush3.msra.mxu1 %v10290_v46 }
 0x95a   : > { %14132 = vmatpush3.msra.mxu0 %v10191_v29  ;;  %14166 = vmatprep.subr.mxu1 %v10335_v35 }
 0x95b   : > { %10686 = vmatmul.mubr.f32.vlgmr.msra.gmra.mxu0 %v21096_v36  ;;  %14167 = vmatpush3.msra.mxu1 %v10287_v27  ;;  %v10398_v36 = vld [vmem:[%s21886_s10 + $0x688] sm:$0xff] }
 0x95c   : > { %14255 = vmatprep.subr.mxu0 %v15712_v47  ;;  %10756 = vmatmul.mubr.f32.vlgmr.msra.gmra.mxu1 %v21148_v15  ;;  %v15441_v15 = vld [vmem:[%s21881_s5 + $0x1a0] ss:$8 sps:$4 sm:$0xff]  }
 0x95d   : > { %14256 = vmatpush3.msra.mxu0 %v10404_v8  ;;  %14271 = vmatprep.mubr.msk.f32.mxu0 %vm15714_vm3, %v15712_v47 }
 0x95e   : > { %14257 = vmatprep.subr.mxu0 %v15712_v47  ;;  %11165 = vmatprep.subr.bf16.mxu1 %v15440_v16 }
 0x95f   : > { %14258 = vmatpush3.msra.mxu0 %v10401_v38  ;;  %11166 = vmatpush1.bf16.msra.mxu1 %v15438_v7 }
 0x960   : > { %14259 = vmatprep.subr.mxu0 %v15712_v47  ;;  %11167 = vmatprep.subr.bf16.mxu1 %v15443_v55 }
 0x961   : > { %14260 = vmatpush3.msra.mxu0 %v10398_v36 }
 0x962   : > { %14261 = vmatprep.subr.mxu0 %v15712_v47 }
 0x963   : > { %14262 = vmatpush3.msra.mxu0 %v10395_v19  ;;  %11168 = vmatpush1.bf16.msra.mxu1 %v15441_v15 }
 0x964   : > { %14263 = vmatprep.subr.mxu0 %v15712_v47  ;;  %11169 = vmatprep.subr.bf16.mxu1 %v15446_v13 }
 0x965   : > { %14264 = vmatpush3.msra.mxu0 %v10392_v41 }
 0x966   : > { %14265 = vmatprep.subr.mxu0 %v15712_v47 }
 0x967   : > { %14266 = vmatpush3.msra.mxu0 %v10389_v34  ;;  %11170 = vmatpush1.bf16.msra.mxu1 %v15444_v53 }
 0x968   : > { %14267 = vmatprep.subr.mxu0 %v15712_v47  ;;  %11171 = vmatprep.subr.bf16.mxu1 %v15449_v0 }
 0x969   : > { %14268 = vmatpush3.msra.mxu0 %v10386_v14 }
 0x96a   : > { %14269 = vmatprep.subr.mxu0 %v15712_v47 }
 0x96b   : > { %14270 = vmatpush3.msra.mxu0 %v10383_v10  ;;  %11172 = vmatpush1.bf16.msra.mxu1 %v15447_v50 }
 0x96c   : > { %14272 = vmatmul.mubr.msk.f32.vlgmr.msra.gmra.mxu0 %vm5049_vm0, %v21156_v60  ;;  %11173 = vmatprep.subr.bf16.mxu1 %v15452_v18  ;;  %v15458_v60 = vld [vmem:[%s21881_s5 + $0x154] ss:$8 sps:$4 sm:$0xff]  }
 0x96d   : > { %11237 = vmatprep.mubr.bf16.mxu0 %v21969_v21  ;;  %11213 = vmatprep.subr.bf16.mxu0 %v15494_v58 }
 0x96e   : > { %11214 = vmatpush1.bf16.msra.mxu0 %v15492_v17 }
 0x96f   : > { %11174 = vmatpush1.bf16.msra.mxu1 %v15450_v37  ;;  %11215 = vmatprep.subr.bf16.mxu0 %v15500_v43 }
 0x970   : > { %11175 = vmatprep.subr.bf16.mxu1 %v15455_v33 }
 0x972   : > { %11216 = vmatpush1.bf16.msra.mxu0 %v15498_v59 }
 0x973   : > { %11176 = vmatpush1.bf16.msra.mxu1 %v15453_v44  ;;  %11217 = vmatprep.subr.bf16.mxu0 %v15506_v25 }
 0x974   : > { %11177 = vmatprep.subr.bf16.mxu1 %v15458_v60 }
 0x976   : > { %11218 = vmatpush1.bf16.msra.mxu0 %v15504_v24 }
 0x977   : > { %11178 = vmatpush1.bf16.msra.mxu1 %v15456_v54  ;;  %11219 = vmatprep.subr.bf16.mxu0 %v15512_v56 }
 0x978   : > { %11179 = vmatprep.subr.bf16.mxu1 %v15461_v2 }
 0x97a   : > { %11220 = vmatpush1.bf16.msra.mxu0 %v15510_v31  ;;  %v15507_v31 = vld [vmem:[%s21881_s5 + $0x2f0] ss:$8 sps:$4 sm:$0xff]  }
 0x97b   : > { %11180 = vmatpush1.bf16.msra.mxu1 %v15459_v63  ;;  %11447 = vmatprep.subr.bf16.mxu0 %v15518_v20 }
 0x97c   : > { %11181 = vmatprep.subr.bf16.mxu1 %v15464_v26  ;;  %v15486_v26 = vld [vmem:[%s21881_s5 + $0x130] ss:$8 sps:$4 sm:$0xff]  }
 0x97f   : > { %11182 = vmatpush2.bf16.msra.mxu1 %v15462_v5 }
 0x980   : > { %11183 = vmatprep.subr.bf16.mxu1 %v15467_v22  ;;  %v15491_v22 = vld [vmem:[%s21881_s5 + $0x124] ss:$8 sps:$4 sm:$0xff]  }
 0x983   : > { %11184 = vmatpush2.bf16.msra.mxu1 %v15465_v32 }
 0x984   : > { %11185 = vmatprep.subr.bf16.mxu1 %v15470_v39 }
 0x987   : > { %11186 = vmatpush2.bf16.msra.mxu1 %v15468_v30  ;;  %v15489_v30 = vld [vmem:[%s21881_s5 + $0x120] ss:$8 sps:$4 sm:$0xff]  }
 0x988   : > { %11187 = vmatprep.subr.bf16.mxu1 %v15473_v48  ;;  %v15497_v48 = vld [vmem:[%s21881_s5 + $0x114] ss:$8 sps:$4 sm:$0xff]  }
 0x98b   : > { %11188 = vmatpush2.bf16.msra.mxu1 %v15471_v42 }
 0x98c   : > { %11189 = vmatprep.subr.bf16.mxu1 %v15476_v3 }
 0x98f   : > { %11190 = vmatpush2.bf16.msra.mxu1 %v15474_v23  ;;  %v15495_v23 = vld [vmem:[%s21881_s5 + $0x110] ss:$8 sps:$4 sm:$0xff]  }
 0x990   : > { %11191 = vmatprep.subr.bf16.mxu1 %v15479_v61  ;;  %v15503_v61 = vld [vmem:[%s21881_s5 + $0x104] ss:$8 sps:$4 sm:$0xff]  }
 0x993   : > { %11192 = vmatpush2.bf16.msra.mxu1 %v15477_v9 }
 0x994   : > { %11193 = vmatprep.subr.bf16.mxu1 %v15482_v62 }
 0x997   : > { %11194 = vmatpush2.bf16.msra.mxu1 %v15480_v1  ;;  %v15501_v1 = vld [vmem:[%s21881_s5 + $0x100] ss:$8 sps:$4 sm:$0xff]  }
 0x998   : > { %11195 = vmatprep.subr.bf16.mxu1 %v15485_v28  ;;  %v15509_v28 = vld [vmem:[%s21881_s5 + $0x2f4] ss:$8 sps:$4 sm:$0xff]  }
 0x99b   : > { %11196 = vmatpush2.bf16.msra.mxu1 %v15483_v11 }
 0x99c   : > { %11495 = vmatprep.subr.bf16.mxu1 %v15488_v57 }
 0x9c8   : > { %v10474_v40 = vpop.f32.mrf.mxu1 }
 0x9ca   : > { %v10476_v4 = vpop.f32.mrf.mxu1 }
 0x9fa   : > { %v10545_v49 = vpop.f32.mrf.mxu0 }
 0x9fb   : > { %v10546_v12 = vadd.f32 %v10545_v49, %v10474_v40  ;;  %v10616_v52 = vpop.f32.mrf.mxu1  ;;  %v15515_v40 = vld [vmem:[%s21881_s5 + $0x2e4] ss:$8 sps:$4 sm:$0xff]  }
 0x9fc   : > { %v10547_v45 = vpop.f32.mrf.mxu0 }
 0x9fd   : > { %v10548_v6 = vadd.f32 %v10547_v45, %v10476_v4  ;;  %v10617_v46 = vadd.f32 %v10616_v52, %v10546_v12  ;;  %v10618_v29 = vpop.f32.mrf.mxu1  ;;  %v15513_v12 = vld [vmem:[%s21881_s5 + $0x2e0] ss:$8 sps:$4 sm:$0xff]  }
 0x9ff   : > { %v10831_v35 = vmin.f32 %v10617_v46, 0.0  ;;  %v10619_v27 = vadd.f32 %v10618_v29, %v10548_v6  ;;  %vm10846_vm4 = vcmp.gt.f32.partialorder %v10617_v46, 0.0  ;;  %v15521_v6 = vld [vmem:[%s21881_s5 + $0x2d4] ss:$8 sps:$4 sm:$0xff]  }
 0xa01   : > { %v10834_v8 = vmul.f32 1.442695, %v10831_v35  ;;  %v10832_v16 = vmin.f32 %v10619_v27, 0.0  ;;  %vm10847_vm5 = vcmp.gt.f32.partialorder %v10619_v27, 0.0  ;;  %v15524_v35 = vld [vmem:[%s21881_s5 + $0x64] ss:$8 sps:$4 sm:$0xff]  }
 0xa03   : > { %15634 = vpow2.f32 %v10834_v8  ;;  %v10836_v7 = vmul.f32 1.442695, %v10832_v16  ;;  %v15527_v8 = vld [vmem:[%s21881_s5 + $0x2c4] ss:$8 sps:$4 sm:$0xff]   ;;  %v15522_v16 = vld [vmem:[%s21881_s5 + $0x60] ss:$8 sps:$4 sm:$0xff]  }
 0xa05   : > { %15636 = vpow2.f32 %v10836_v7  ;;  %v15530_v7 = vld [vmem:[%s21881_s5 + $0x54] ss:$8 sps:$4 sm:$0xff]  }
 0xa10   : > { %v15635_v38 = vpop.eup %15634 }
 0xa11   : > { %v13747_v55 = vadd.f32 -1.0, %v15635_v38  ;;  %v15525_v38 = vld [vmem:[%s21881_s5 + $0x2c0] ss:$8 sps:$4 sm:$0xff]  }
 0xa12   : > { %v15637_v36 = vpop.eup %15636 }
 0xa13   : > { %v10843_v15 = vmul.f32 1.6732632, %v13747_v55  ;;  %v13748_v19 = vadd.f32 -1.0, %v15637_v36  ;;  %v15533_v55 = vld [vmem:[%s21881_s5 + $0x2b4] ss:$8 sps:$4 sm:$0xff]  }
 0xa14   : > { %v15528_v36 = vld [vmem:[%s21881_s5 + $0x50] ss:$8 sps:$4 sm:$0xff]  }
 0xa15   : > { %v10849_v13 = vsel %vm10846_vm4, %v10617_v46, %v10843_v15  ;;  %v10844_v41 = vmul.f32 1.6732632, %v13748_v19  ;;  %v15516_v46 = vld [vmem:[%s21881_s5 + $0x70] ss:$8 sps:$4 sm:$0xff]   ;;  %v15536_v15 = vld [vmem:[%s21881_s5 + $0x44] ss:$8 sps:$4 sm:$0xff]  }
 0xa16   : > { %v10852_v53 = vmul.f32 1.050701, %v10849_v13  ;;  %v15531_v19 = vld [vmem:[%s21881_s5 + $0x2b0] ss:$8 sps:$4 sm:$0xff]   ;;  %v15539_v13 = vld [vmem:[%s21881_s5 + $0x2a4] ss:$8 sps:$4 sm:$0xff]  }
 0xa17   : > { %v10850_v34 = vsel %vm10847_vm5, %v10619_v27, %v10844_v41  ;;  %v15519_v27 = vld [vmem:[%s21881_s5 + $0x2d0] ss:$8 sps:$4 sm:$0xff]   ;;  %v15534_v41 = vld [vmem:[%s21881_s5 + $0x40] ss:$8 sps:$4 sm:$0xff]  }
 0xa18   : > { %v21506_v0 = vpack.c.bf16 %v10852_v53, %v10852_v53  ;;  %v10853_v14 = vmul.f32 1.050701, %v10850_v34  ;;  %v15542_v53 = vld [vmem:[%s21881_s5 + $0x34] ss:$8 sps:$4 sm:$0xff]   ;;  %v15537_v34 = vld [vmem:[%s21881_s5 + $0x2a0] ss:$8 sps:$4 sm:$0xff]  }
 0xa1a   : > { %v10942_v50 = vshll.u32 %v21506_v0, 16  ;;  %v21509_v10 = vpack.c.bf16 %v10853_v14, %v10853_v14  ;;  %v10940_v54 = vshrl.u32 %v21506_v0, 16  ;;  %v15545_v14 = vld [vmem:[%s21881_s5 + $0x294] ss:$8 sps:$4 sm:$0xff]  }
 0xa1b   : > { %v14133_v60 = vpop.f32.mrf.mxu0 }
 0xa1c   : > { %v10949_v18 = vshll.u32 %v21509_v10, 16  ;;  %v10944_v37 = vrot.slane %v10942_v50, 1  ;;  %v10947_v33 = vshrl.u32 %v21509_v10, 16  ;;  %v14168_v2 = vpop.f32.mrf.mxu1  ;;  %v11572_v4 = vrot.slane %v21509_v10, 1  ;;  %v15540_v50 = vld [vmem:[%s21881_s5 + $0x30] ss:$8 sps:$4 sm:$0xff]  }
 0xa1d   : > { %v14134_v32 = vpop.f32.mrf.mxu0 }
 0xa1e   : > { %v10951_v44 = vrot.slane %v10949_v18, 1  ;;  %v10945_v5 = vor.u32 %v10944_v37, %v10940_v54  ;;  %v14169_v39 = vpop.f32.mrf.mxu1  ;;  %v14135_v42 = vadd.f32 %v14134_v32, %v14133_v60  ;;  %v15543_v18 = vld [vmem:[%s21881_s5 + $0x290] ss:$8 sps:$4 sm:$0xff]   ;;  %v15551_v37 = vld [vmem:[%s21881_s5 + $0x284] ss:$8 sps:$4 sm:$0xff]  }
 0xa1f   : > { %v14170_v3 = vadd.f32 %v14169_v39, %v14168_v2  ;;  %v15549_v54 = vld [vmem:[%s21881_s5 + $0x280] ss:$8 sps:$4 sm:$0xff]   ;;  %v15557_v60 = vld [vmem:[%s21881_s5 + $0x374] ss:$8 sps:$4 sm:$0xff]   ;;  %v15552_v2 = vld [vmem:[%s21881_s5 + $0x10] ss:$8 sps:$4 sm:$0xff]  }
 0xa20   : > { %v10952_v63 = vor.u32 %v10951_v44, %v10947_v33  ;;  %v15546_v33 = vld [vmem:[%s21881_s5 + $0x20] ss:$8 sps:$4 sm:$0xff]   ;;  %v15554_v44 = vld [vmem:[%s21881_s5 + $0x14] ss:$8 sps:$4 sm:$0xff]  }
 0xa21   : > { %v10758_v9 = vadd.f32 %v14170_v3, %v14135_v42  ;;  %v15566_v32 = vld [vmem:[%s21881_s5 + $0xf4] ss:$8 sps:$4 sm:$0xff]   ;;  %v15561_v39 = vld [vmem:[%s21881_s5 + $0x360] ss:$8 sps:$4 sm:$0xff]   ;;  %v15572_v42 = vld [vmem:[%s21881_s5 + $0xe4] ss:$8 sps:$4 sm:$0xff]  }
 0xa22   : > { %11197 = vmatprep.mubr.bf16.mxu1 %v10952_v63  ;;  %v15560_v63 = vld [vmem:[%s21881_s5 + $0x4] ss:$8 sps:$4 sm:$0xff]   ;;  %v15567_v3 = vld [vmem:[%s21881_s5 + $0x350] ss:$8 sps:$4 sm:$0xff]  }
 0xa23   : > { %11198 = vmatmul.mubr.bf16.vlgmr.msra.gmra.mxu1 %v10945_v5  ;;  %v15563_v5 = vld [vmem:[%s21881_s5 + $0x364] ss:$8 sps:$4 sm:$0xff]  }
 0xa24   : > { %11496 = vmatpush1.bf16.msra.mxu1 %v15486_v26  ;;  %11519 = vmatprep.mubr.bf16.mxu1 %v21969_v21  ;;  %v15555_v26 = vld [vmem:[%s21881_s5 + $0x370] ss:$8 sps:$4 sm:$0xff]  }
 0xa25   : > { %11497 = vmatprep.subr.bf16.mxu1 %v15491_v22  ;;  %v15558_v22 = vld [vmem:[%s21881_s5] ss:$8 sps:$4 sm:$0xff]  }
 0xa28   : > { %11498 = vmatpush1.bf16.msra.mxu1 %v15489_v30  ;;  %v15569_v30 = vld [vmem:[%s21881_s5 + $0x354] ss:$8 sps:$4 sm:$0xff]  }
 0xa29   : > { %11499 = vmatprep.subr.bf16.mxu1 %v15497_v48  ;;  %v15564_v48 = vld [vmem:[%s21881_s5 + $0xf0] ss:$8 sps:$4 sm:$0xff]  }
 0xa2c   : > { %v10827_v62 = vpop.f32.mrf.mxu0  ;;  %11500 = vmatpush1.bf16.msra.mxu1 %v15495_v23  ;;  %v15575_v23 = vld [vmem:[%s21881_s5 + $0x344] ss:$8 sps:$4 sm:$0xff]  }
 0xa2d   : > { %v10828_v11 = vadd.f32 %v10827_v62, %v10758_v9  ;;  %11501 = vmatprep.subr.bf16.mxu1 %v15503_v61  ;;  %v15570_v61 = vld [vmem:[%s21881_s5 + $0xe0] ss:$8 sps:$4 sm:$0xff]   ;;  %v15578_v9 = vld [vmem:[%s21881_s5 + $0xd4] ss:$8 sps:$4 sm:$0xff]  }
 0xa2e   : > { %v14273_v57 = vpop.f32.mrf.mxu0  ;;  %v15573_v62 = vld [vmem:[%s21881_s5 + $0x340] ss:$8 sps:$4 sm:$0xff]  }
 0xa2f   : > { %v10833_v58 = vmin.f32 %v10828_v11, 0.0  ;;  %vm10848_vm6 = vcmp.gt.f32.partialorder %v10828_v11, 0.0  ;;  %v15579_v57 = vld [vmem:[%s21881_s5 + $0x330] ss:$8 sps:$4 sm:$0xff]  }
 0xa30   : > { %11502 = vmatpush1.bf16.msra.mxu1 %v15501_v1  ;;  %v15581_v1 = vld [vmem:[%s21881_s5 + $0x334] ss:$8 sps:$4 sm:$0xff]  }
 0xa31   : > { %v10838_v17 = vmul.f32 1.442695, %v10833_v58  ;;  %11779 = vmatprep.subr.bf16.mxu1 %v15509_v28  ;;  %v15584_v28 = vld [vmem:[%s21881_s5 + $0xc4] ss:$8 sps:$4 sm:$0xff]  }
 0xa32   : > { %v15587_v58 = vld [vmem:[%s21881_s5 + $0x324] ss:$8 sps:$4 sm:$0xff]  }
 0xa33   : > { %15638 = vpow2.f32 %v10838_v17  ;;  %v15582_v17 = vld [vmem:[%s21881_s5 + $0xc0] ss:$8 sps:$4 sm:$0xff]  }
 0xa40   : > { %v15639_v43 = vpop.eup %15638 }
 0xa41   : > { %v13749_v59 = vadd.f32 -1.0, %v15639_v43  ;;  %v15590_v43 = vld [vmem:[%s21881_s5 + $0xb4] ss:$8 sps:$4 sm:$0xff]  }
 0xa43   : > { %v10845_v25 = vmul.f32 1.6732632, %v13749_v59  ;;  %v15585_v59 = vld [vmem:[%s21881_s5 + $0x320] ss:$8 sps:$4 sm:$0xff]  }
 0xa45   : > { %v10851_v24 = vsel %vm10848_vm6, %v10828_v11, %v10845_v25  ;;  %v15576_v11 = vld [vmem:[%s21881_s5 + $0xd0] ss:$8 sps:$4 sm:$0xff]   ;;  %v15593_v25 = vld [vmem:[%s21881_s5 + $0x314] ss:$8 sps:$4 sm:$0xff]  }
 0xa46   : > { %v10854_v56 = vmul.f32 1.050701, %v10851_v24  ;;  %v15588_v24 = vld [vmem:[%s21881_s5 + $0xb0] ss:$8 sps:$4 sm:$0xff]  }
 0xa48   : > { %v21542_v20 = vpack.c.bf16 %v10854_v56, %v10854_v56  ;;  %v15596_v56 = vld [vmem:[%s21881_s5 + $0xa4] ss:$8 sps:$4 sm:$0xff]  }
 0xa4a   : > { %v10956_v49 = vshll.u32 %v21542_v20, 16  ;;  %13871 = vmatmul.mubr.msk.bf16.vlgmr.msra.gmra.mxu1 %vm5049_vm0, %v21542_v20  ;;  %v10954_v52 = vshrl.u32 %v21542_v20, 16 }
 0xa4b   : > { %11780 = vmatpush1.bf16.msra.mxu1 %v15507_v31  ;;  %11811 = vmatprep.mubr.bf16.mxu1 %v11572_v4  ;;  %v15591_v31 = vld [vmem:[%s21881_s5 + $0x310] ss:$8 sps:$4 sm:$0xff]   ;;  %v15594_v4 = vld [vmem:[%s21881_s5 + $0xa0] ss:$8 sps:$4 sm:$0xff]  }
 0xa4c   : > { %v10958_v45 = vrot.slane %v10956_v49, 1  ;;  %11781 = vmatprep.subr.bf16.mxu1 %v15515_v40  ;;  %v15599_v40 = vld [vmem:[%s21881_s5 + $0x304] ss:$8 sps:$4 sm:$0xff]   ;;  %v15602_v49 = vld [vmem:[%s21881_s5 + $0x94] ss:$8 sps:$4 sm:$0xff]  }
 0xa4e   : > { %v10959_v29 = vor.u32 %v10958_v45, %v10954_v52  ;;  %v15600_v52 = vld [vmem:[%s21881_s5 + $0x90] ss:$8 sps:$4 sm:$0xff]   ;;  %v15605_v45 = vld [vmem:[%s21881_s5 + $0x84] ss:$8 sps:$4 sm:$0xff]  }
 0xa4f   : > { %11782 = vmatpush1.bf16.msra.mxu1 %v15513_v12  ;;  %v15597_v12 = vld [vmem:[%s21881_s5 + $0x300] ss:$8 sps:$4 sm:$0xff]  }
 0xa50   : > { %13830 = vmatmul.mubr.msk.bf16.vlgmr.msra.gmra.mxu0 %vm5049_vm0, %v10959_v29  ;;  %11783 = vmatprep.subr.bf16.mxu1 %v15521_v6  ;;  %v11571_v6 = vrot.slane %v21506_v0, 1  ;;  %v15608_v29 = vld [vmem:[%s21881_s5 + $0x3b4] ss:$8 sps:$4 sm:$0xff]  }
 0xa51   : > { %11448 = vmatpush1.bf16.msra.mxu0 %v15516_v46  ;;  %11479 = vmatprep.mubr.bf16.mxu0 %v21509_v10  ;;  %v15548_v10 = vld [vmem:[%s21881_s5 + $0x24] ss:$8 sps:$4 sm:$0xff]   ;;  %v15603_v46 = vld [vmem:[%s21881_s5 + $0x80] ss:$8 sps:$4 sm:$0xff]  }
 0xa52   : > { %11449 = vmatprep.subr.bf16.mxu0 %v15524_v35  ;;  %v15606_v35 = vld [vmem:[%s21881_s5 + $0x3b0] ss:$8 sps:$4 sm:$0xff]  }
 0xa53   : > { %11784 = vmatpush1.bf16.msra.mxu1 %v15519_v27  ;;  %v15611_v27 = vld [vmem:[%s21881_s5 + $0x3a4] ss:$8 sps:$4 sm:$0xff]  }
 0xa54   : > { %11785 = vmatprep.subr.bf16.mxu1 %v15527_v8  ;;  %v15609_v8 = vld [vmem:[%s21881_s5 + $0x3a0] ss:$8 sps:$4 sm:$0xff]  }
 0xa55   : > { %11450 = vmatpush1.bf16.msra.mxu0 %v15522_v16  ;;  %v15614_v16 = vld [vmem:[%s21881_s5 + $0x394] ss:$8 sps:$4 sm:$0xff]  }
 0xa56   : > { %11451 = vmatprep.subr.bf16.mxu0 %v15530_v7  ;;  %v15612_v7 = vld [vmem:[%s21881_s5 + $0x390] ss:$8 sps:$4 sm:$0xff]  }
 0xa57   : > { %11786 = vmatpush1.bf16.msra.mxu1 %v15525_v38  ;;  %v11573_v38 = vrot.slane %v21542_v20, 1 }
 0xa58   : > { %11787 = vmatprep.subr.bf16.mxu1 %v15533_v55 }
 0xa59   : > { %11452 = vmatpush1.bf16.msra.mxu0 %v15528_v36 }
 0xa5a   : > { %11453 = vmatprep.subr.bf16.mxu0 %v15536_v15 }
 0xa5b   : > { %11788 = vmatpush1.bf16.msra.mxu1 %v15531_v19 }
 0xa5c   : > { %11789 = vmatprep.subr.bf16.mxu1 %v15539_v13 }
 0xa5d   : > { %11454 = vmatpush1.bf16.msra.mxu0 %v15534_v41 }
 0xa5e   : > { %11455 = vmatprep.subr.bf16.mxu0 %v15542_v53 }
 0xa5f   : > { %11790 = vmatpush1.bf16.msra.mxu1 %v15537_v34 }
 0xa60   : > { %11791 = vmatprep.subr.bf16.mxu1 %v15545_v14 }
 0xa61   : > { %11456 = vmatpush1.bf16.msra.mxu0 %v15540_v50 }
 0xa62   : > { %11457 = vmatprep.subr.bf16.mxu0 %v15548_v10 }
 0xa63   : > { %11792 = vmatpush1.bf16.msra.mxu1 %v15543_v18 }
 0xa64   : > { %11793 = vmatprep.subr.bf16.mxu1 %v15551_v37 }
 0xa65   : > { %11458 = vmatpush1.bf16.msra.mxu0 %v15546_v33 }
 0xa66   : > { %11459 = vmatprep.subr.bf16.mxu0 %v15554_v44 }
 0xa67   : > { %11794 = vmatpush1.bf16.msra.mxu1 %v15549_v54 }
 0xa68   : > { %11795 = vmatprep.subr.bf16.mxu1 %v15557_v60 }
 0xa69   : > { %11460 = vmatpush1.bf16.msra.mxu0 %v15552_v2 }
 0xa6a   : > { %11461 = vmatprep.subr.bf16.mxu0 %v15560_v63 }
 0xa6b   : > { %11796 = vmatpush2.bf16.msra.mxu1 %v15555_v26 }
 0xa6c   : > { %11797 = vmatprep.subr.bf16.mxu1 %v15563_v5 }
 0xa6d   : > { %11462 = vmatpush1.bf16.msra.mxu0 %v15558_v22  ;;  %v11860_v22 = vld [vmem:[%s21882_s6] sm:$0x3] }
 0xa6e   : > { %11463 = vmatprep.subr.bf16.mxu0 %v15566_v32 }
 0xa6f   : > { %11798 = vmatpush2.bf16.msra.mxu1 %v15561_v39 }
 0xa70   : > { %11799 = vmatprep.subr.bf16.mxu1 %v15569_v30 }
 0xa71   : > { %11464 = vmatpush2.bf16.msra.mxu0 %v15564_v48  ;;  %v11865_v48 = vrot.slane %v11860_v22, %v21970_v51  ;;  %v11891_v51 = vld [vmem:[%s21887_s11 + $0x30] sm:$0xff] }
 0xa72   : > { %11465 = vmatprep.subr.bf16.mxu0 %v15572_v42 }
 0xa73   : > { %11800 = vmatpush2.bf16.msra.mxu1 %v15567_v3 }
 0xa74   : > { %11801 = vmatprep.subr.bf16.mxu1 %v15575_v23 }
 0xa75   : > { %11466 = vmatpush2.bf16.msra.mxu0 %v15570_v61 }
 0xa76   : > { %11467 = vmatprep.subr.bf16.mxu0 %v15578_v9 }
 0xa77   : > { %11802 = vmatpush2.bf16.msra.mxu1 %v15573_v62 }
 0xa78   : > { %11803 = vmatprep.subr.bf16.mxu1 %v15581_v1 }
 0xa79   : > { %11468 = vmatpush2.bf16.msra.mxu0 %v15576_v11  ;;  %v11892_v11 = vld [vmem:[%s21887_s11 + $0x38] sm:$0xff] }
 0xa7a   : > { %11469 = vmatprep.subr.bf16.mxu0 %v15584_v28  ;;  %v11890_v28 = vld [vmem:[%s21887_s11 + $0x28] sm:$0xff] }
 0xa7b   : > { %11804 = vmatpush2.bf16.msra.mxu1 %v15579_v57  ;;  %v11889_v57 = vld [vmem:[%s21887_s11 + $0x20] sm:$0xff] }
 0xa7c   : > { %11805 = vmatprep.subr.bf16.mxu1 %v15587_v58  ;;  %v11888_v58 = vld [vmem:[%s21887_s11 + $0x18] sm:$0xff] }
 0xa7d   : > { %11470 = vmatpush2.bf16.msra.mxu0 %v15582_v17  ;;  %v11887_v17 = vld [vmem:[%s21887_s11 + $0x10] sm:$0xff] }
 0xa7e   : > { %11471 = vmatprep.subr.bf16.mxu0 %v15590_v43  ;;  %v11886_v43 = vld [vmem:[%s21887_s11 + $0x8] sm:$0xff] }
 0xa7f   : > { %11806 = vmatpush2.bf16.msra.mxu1 %v15585_v59  ;;  %v11885_v59 = vld [vmem:[%s21887_s11] sm:$0xff] }
 0xa80   : > { %11807 = vmatprep.subr.bf16.mxu1 %v15593_v25 }
 0xa81   : > { %11472 = vmatpush2.bf16.msra.mxu0 %v15588_v24 }
 0xa82   : > { %11473 = vmatprep.subr.bf16.mxu0 %v15596_v56 }
 0xa83   : > { %11808 = vmatpush2.bf16.msra.mxu1 %v15591_v31 }
 0xa84   : > { %11809 = vmatprep.subr.bf16.mxu1 %v15599_v40 }
 0xa85   : > { %11474 = vmatpush2.bf16.msra.mxu0 %v15594_v4 }
 0xa86   : > { %11475 = vmatprep.subr.bf16.mxu0 %v15602_v49 }
 0xa87   : > { %11810 = vmatpush2.bf16.msra.mxu1 %v15597_v12 }
 0xa89   : > { %11476 = vmatpush2.bf16.msra.mxu0 %v15600_v52 }
 0xa8a   : > { %11812 = vmatmul.mubr.bf16.vlgmr.msra.gmra.mxu1 %v11571_v6  ;;  %11477 = vmatprep.subr.bf16.mxu0 %v15605_v45  ;;  %v11981_v45 = vld [vmem:[%s21889_s13 + $0x30] sm:$0x3]  ;;  %v11980_v6 = vld [vmem:[%s21889_s13 + $0x28] sm:$0xff] }
 0xa8d   : > { %11478 = vmatpush2.bf16.msra.mxu0 %v15603_v46  ;;  %v11979_v46 = vld [vmem:[%s21889_s13 + $0x20] sm:$0xff] }
 0xa8e   : > { %11827 = vmatprep.subr.bf16.mxu0 %v15608_v29  ;;  %v11978_v29 = vld [vmem:[%s21889_s13 + $0x18] sm:$0xff] }
 0xa90   : > { %11480 = vmatmul.mubr.bf16.vlgmr.msra.gmra.mxu0 %v21506_v0  ;;  %v15617_v0 = vld [vmem:[%s21881_s5 + $0x384] ss:$8 sps:$4 sm:$0xff]  }
 0xa91   : > { %11828 = vmatpush1.bf16.msra.mxu0 %v15606_v35  ;;  %11851 = vmatprep.mubr.bf16.mxu0 %v21969_v21  ;;  %v15615_v21 = vld [vmem:[%s21881_s5 + $0x380] ss:$8 sps:$4 sm:$0xff]   ;;  %v11977_v35 = vld [vmem:[%s21889_s13 + $0x10] sm:$0xff] }
 0xa92   : > { %11829 = vmatprep.subr.bf16.mxu0 %v15611_v27  ;;  %v11976_v27 = vld [vmem:[%s21889_s13 + $0x8] sm:$0xff] }
 0xa95   : > { %11830 = vmatpush1.bf16.msra.mxu0 %v15609_v8  ;;  %v11975_v8 = vld [vmem:[%s21889_s13] sm:$0xff] }
 0xa96   : > { %11831 = vmatprep.subr.bf16.mxu0 %v15614_v16  ;;  %v11893_v16 = vld [vmem:[%s21888_s12] sm:$0x1] }
 0xa99   : > { %11832 = vmatpush1.bf16.msra.mxu0 %v15612_v7 }
 0xa9a   : > { %11833 = vmatprep.subr.bf16.mxu0 %v15617_v0 }
 0xa9d   : > { %11834 = vmatpush1.bf16.msra.mxu0 %v15615_v21 }
 0xa9e   : > { %14274 = vmatprep.subr.mxu0 %v15712_v47 }
 0xaa0   : > { %13952 = vmatmul.mubr.msk.bf16.vlgmr.msra.gmra.mxu0 %vm5049_vm0, %v11573_v38 }
 0xaa1   : > { %14290 = vmatprep.mubr.msk.f32.mxu0 %vm15714_vm3, %v15712_v47  ;;  %14275 = vmatpush3.msra.mxu0 %v11892_v11 }
 0xaa2   : > { %14276 = vmatprep.subr.mxu0 %v15712_v47 }
 0xaa3   : > { %14277 = vmatpush3.msra.mxu0 %v11891_v51 }
 0xaa4   : > { %14278 = vmatprep.subr.mxu0 %v15712_v47 }
 0xaa5   : > { %14279 = vmatpush3.msra.mxu0 %v11890_v28 }
 0xaa6   : > { %14280 = vmatprep.subr.mxu0 %v15712_v47 }
 0xaa7   : > { %14281 = vmatpush3.msra.mxu0 %v11889_v57 }
 0xaa8   : > { %14282 = vmatprep.subr.mxu0 %v15712_v47 }
 0xaa9   : > { %14283 = vmatpush3.msra.mxu0 %v11888_v58 }
 0xaaa   : > { %14284 = vmatprep.subr.mxu0 %v15712_v47 }
 0xaab   : > { %14285 = vmatpush3.msra.mxu0 %v11887_v17 }
 0xaac   : > { %14286 = vmatprep.subr.mxu0 %v15712_v47 }
 0xaad   : > { %14287 = vmatpush3.msra.mxu0 %v11886_v43 }
 0xaae   : > { %14288 = vmatprep.subr.mxu0 %v15712_v47 }
 0xaaf   : > { %14289 = vmatpush3.msra.mxu0 %v11885_v59 }
 0xab0   : > { %14293 = vmatprep.subr.mxu0 %v15712_v47 }
 0xae3   : > { %v11199_v55 = vpop.f32.mrf.mxu1 }
 0xae5   : > { %v11201_v36 = vpop.f32.mrf.mxu1 }
 0xae7   : > { %v11202_v15 = vpop.f32.mrf.mxu1 }
 0xae9   : > { %v11203_v19 = vpop.f32.mrf.mxu1 }
 0xb0a   : > { %v11521_v13 = vpop.f32.mrf.mxu1 }
 0xb0c   : > { %v11523_v41 = vpop.f32.mrf.mxu1 }
 0xb0d   : > { %v11982_v41 = vld [vmem:[%s21890_s14] sm:$0x1] }
 0xb0e   : > { %v11524_v53 = vpop.f32.mrf.mxu1 }
 0xb10   : > { %v11239_v34 = vpop.f32.mrf.mxu0  ;;  %v11525_v14 = vpop.f32.mrf.mxu1 }
 0xb11   : > { %v11240_v50 = vadd.f32 %v11239_v34, %v11199_v55 }
 0xb12   : > { %v11241_v10 = vpop.f32.mrf.mxu0 }
 0xb14   : > { %v11242_v18 = vpop.f32.mrf.mxu0 }
 0xb16   : > { %v11243_v20 = vpop.f32.mrf.mxu0 }
 0xb4a   : > { %v11813_v37 = vpop.f32.mrf.mxu1 }
 0xb4c   : > { %v11815_v33 = vpop.f32.mrf.mxu1 }
 0xb4e   : > { %v11816_v44 = vpop.f32.mrf.mxu1 }
 0xb50   : > { %v11481_v54 = vpop.f32.mrf.mxu0  ;;  %v11817_v60 = vpop.f32.mrf.mxu1 }
 0xb51   : > { %v11482_v5 = vadd.f32 %v11481_v54, %v11240_v50 }
 0xb52   : > { %v11483_v2 = vpop.f32.mrf.mxu0 }
 0xb53   : > { %v11522_v39 = vadd.f32 %v11521_v13, %v11482_v5 }
 0xb54   : > { %v11484_v63 = vpop.f32.mrf.mxu0 }
 0xb56   : > { %v11485_v26 = vpop.f32.mrf.mxu0 }
 0xb60   : > { %v11853_v32 = vpop.f32.mrf.mxu0 }
 0xb61   : > { %v11854_v30 = vadd.f32 %v11853_v32, %v11813_v37 }
 0xb62   : > { %v11855_v42 = vpop.f32.mrf.mxu0 }
 0xb63   : > { %v11859_v3 = vadd.f32 %v11854_v30, %v11522_v39 }
 0xb64   : > { %v11856_v23 = vpop.f32.mrf.mxu0 }
 0xb65   : > { %v11867_v61 = vadd.f32 %v11865_v48, %v11859_v3 }
 0xb66   : > { %v11857_v9 = vpop.f32.mrf.mxu0 }
 0xb67   : > { %v11869_v62 = vrot.slane %v11867_v61, 1 }
 0xb69   : > { %v11871_v1 = vmax.f32 %v11867_v61, %v11869_v62 }
 0xb6b   : > { %11873 = vrot.lane.b32.xlu0 %v11871_v1, %s15713_s26  ;;  %s15652_s26 = sshll.u32 %s15715_s20, 4  ;;  %s15653_s26 = int_to_ptr.vmem [resolvable:$false] %s15652_s26 }
 0xb6c   : > { %s15654_s22 = scalar_lea.vmem %s15653_s26, 32  ;;  %p15655_p0 = scmp.lt.s32.totalorder %s12089_s29, %s15653_s26 }
 0xb6d   : > { %p15656_p1 = scmp.lt.s32.totalorder %s15654_s22, %s15648_s30 }
 0xb6f   : > { %p15657_p2 = por %p15656_p1, %p15655_p0 }
 0xb71   : > { %p15658_p3 = pnand %p15657_p2, %p15651_p13 }
 0xbdd   : > { %v11874_v25 = vpop.permute.xlu0 %11873 }
 0xbde   : > { %v11876_v24 = vmax.f32 %v11871_v1, %v11874_v25 }
 0xbe0   : > { %v11877_v56 = vmin.f32 %v11876_v24, 0.0  ;;  %vm11882_vm7 = vcmp.gt.f32.partialorder %v11876_v24, 0.0 }
 0xbe2   : > { %v11878_v31 = vmul.f32 1.442695, %v11877_v56 }
 0xbe4   : > { %15640 = vpow2.f32 %v11878_v31 }
 0xbf1   : > { %v15641_v40 = vpop.eup %15640 }
 0xbf2   : > { %v13953_v4 = vadd.f32 -1.0, %v15641_v40 }
 0xbf4   : > { %v11881_v49 = vmul.f32 1.6732632, %v13953_v4 }
 0xbf6   : > { %v11883_v12 = vsel %vm11882_vm7, %v11876_v24, %v11881_v49 }
 0xbf7   : > { %v11884_v52 = vmul.f32 1.050701, %v11883_v12 }
 0xbf9   : > { %14291 = vmatmul.mubr.msk.f32.vlgmr.msra.gmra.mxu0 %vm5049_vm0, %v11884_v52 }
 0xbfa   : > { %14307 = vmatprep.mubr.msk.f32.mxu0 %vm15714_vm3, %v15712_v47  ;;  %14294 = vmatpush3.msk.msra.mxu0 %vm11987_vm8, %v11981_v45 }
 0xbfb   : > { %14295 = vmatprep.subr.mxu0 %v15712_v47 }
 0xbfc   : > { %14296 = vmatpush3.msra.mxu0 %v11980_v6 }
 0xbfd   : > { %14297 = vmatprep.subr.mxu0 %v15712_v47 }
 0xbfe   : > { %14298 = vmatpush3.msra.mxu0 %v11979_v46 }
 0xbff   : > { %14299 = vmatprep.subr.mxu0 %v15712_v47 }
 0xc00   : > { %14300 = vmatpush3.msra.mxu0 %v11978_v29 }
 0xc01   : > { %14301 = vmatprep.subr.mxu0 %v15712_v47 }
 0xc02   : > { %14302 = vmatpush3.msra.mxu0 %v11977_v35 }
 0xc03   : > { %14303 = vmatprep.subr.mxu0 %v15712_v47 }
 0xc04   : > { %14304 = vmatpush3.msra.mxu0 %v11976_v27 }
 0xc05   : > { %14305 = vmatprep.subr.mxu0 %v15712_v47 }
 0xc06   : > { %14306 = vmatpush3.msra.mxu0 %v11975_v8 }
 0xcb9   : > { %v11963_v7 = vpop.f32.mrf.mxu0 }
 0xcba   : > { %v11964_v0 = vadd.f32 %v11963_v7, %v11893_v16 }
 0xcbb   : > { %v14292_v21 = vpop.f32.mrf.mxu0 }
 0xcbc   : > { %v11967_v38 = vmin.f32 %v11964_v0, 0.0  ;;  %vm11972_vm9 = vcmp.gt.f32.partialorder %v11964_v0, 0.0 }
 0xcbe   : > { %v11968_v55 = vmul.f32 1.442695, %v11967_v38 }
 0xcc0   : > { %15642 = vpow2.f32 %v11968_v55 }
 0xccd   : > { %v15643_v36 = vpop.eup %15642 }
 0xcce   : > { %v13955_v15 = vadd.f32 -1.0, %v15643_v36 }
 0xcd0   : > { %v11971_v19 = vmul.f32 1.6732632, %v13955_v15 }
 0xcd2   : > { %v11973_v47 = vsel %vm11972_vm9, %v11964_v0, %v11971_v19 }
 0xcd3   : > { %v11974_v13 = vmul.f32 1.050701, %v11973_v47 }
 0xcd5   : > { %14308 = vmatmul.mubr.msk.f32.vlgmr.msra.gmra.mxu0 %vm11983_vm10, %v11974_v13 }
 0xd95   : > { %v12057_v53 = vpop.f32.mrf.mxu0 }
 0xd96   : > { %v12058_v34 = vadd.f32 %v12057_v53, %v11982_v41 }
 0xd97   : > { %v14309_v14 = vpop.f32.mrf.mxu0 }
 0xd98   : > { %v12062_v50 = vsel %vm12061_vm11, %v12058_v34, -inf }
 0xd99   : > { %12063 = vmax.xlane.f32.xlu1 %v12062_v50 }
 0xe22   : > { %v12064_v10 = vpop.xlane.xlu1 %12063 }
 0xe23   : > { %v12065_v18 = vsub.f32 %v12058_v34, %v12064_v10 }
 0xe25   : > { %v12066_v20 = vmul.f32 1.442695, %v12065_v18 }
 0xe27   : > { %15644 = vpow2.f32 %v12066_v20 }
 0xe34   : > { %v15645_v37 = vpop.eup %15644 }
 0xe35   : > { %v12068_v33 = vsel %vm12061_vm11, %v15645_v37, 0.0 }
 0xe36   : > { %12069 = vadd.xlane.f32.xlu0 %v12068_v33 }
 0xebf   : > { %v12070_v44 = vpop.xlane.xlu0 %12069 }
 0xec0   : > { %15646 = vlog2.f32 %v12070_v44 }
 0xecd   : > { %v15647_v54 = vpop.eup %15646 }
 0xece   : > { %v12072_v60 = vmul.f32 0.6931472, %v15647_v54 }
 0xed0   : > { %v12073_v2 = vsub.f32 %v12065_v18, %v12072_v60 }
 0xed2   : > { %12074 = vst.msk [vmem:[%s486_s21] sm:$0x1] %vm12061_vm11, %v12073_v2 }
 0xed3   : > { %15661 = shalt.err (!%p15658_p3)
}
 0xed4   : > { %s15662_s24 = scalar_lea.hbm %s12086_s25, 16  ;;  %s15666_s21 = scalar_lea.hbm %s21891_s15, 32 }
 0xed5   : > { %p15663_p4 = scmp.ne.s32.totalorder %s12086_s25, %s15662_s24  ;;  %p15667_p9 = scmp.lt.s32.totalorder %s12086_s25, %s21891_s15 }
 0xed6   : > { %p15668_p10 = scmp.lt.s32.totalorder %s15666_s21, %s15662_s24 }
 0xed7   : > { %p15664_p7 = pnand %p15663_p4, %p15834_p5 }
 0xed8   : > { %p15669_p11 = por %p15668_p10, %p15667_p9 }
 0xed9   : > { %p15665_p8 = pneg %p15664_p7 }
 0xedb   : > { %p15670_p12 = pnand %p15669_p11, %p15665_p8 }
 0xedd   : > { %15673 = shalt.err (!%p15670_p12)
}
 0xede   : > { %14314 = dma.vmem_to_hbm [thread:$0]  (%p15834_p5), %s12089_s29, 16, %s12086_s25, %s12076_s27  }
 0xedf PF: > { %s21975_s30 = sld [smem:[#allocation7_spill]] }
 0xee0   : > { %s21976_s20 = sld [smem:[#allocation5_spill]] }
 0xee5   : > { %p14320_p13 = scmp.ge.s32.totalorder %s21975_s30, 2 }
 0xee6   : > { %s12100_s22 = sand.u32 1, %s21976_s20  }
 0xee7   : > { %p14317_p0 = pnand %p14320_p13, %p15838_p6  ;;  %s12101_s17 = scalar_lea.sflag [#allocation3], %s12100_s22 }
 0xee9   : > { %p14318_p1 = pneg %p14317_p0 }
 0xeeb   : > { %15691 = dma.done.wait (%p14318_p1), %s12101_s17, 16  }
 0xeec   : > { %15693 = vsyncadd (%p14318_p1), %s12101_s17, 4294967280  ;;  %s21978_s21 = sld [smem:[#allocation8_spill]]  ;;  %s21981_s18 = smov %s15700_s19 }
 0xeed   : > { %s21979_s24 = sld [smem:[#allocation6_spill]] }
 0xeee   : > { %s21980_s20 = sld [smem:[#allocation9_spill]] }
 0xef2   : > { %p25_p2 = scmp.ge.s32.totalorder %s21978_s21, 4  }
 0xef3   : > { %s21982_s19 = smov %s21979_s24 }
 0xef4   :  { %27 = sbr.rel (!%p25_p2) target bundleno = 3 (0x3), region = 125 }
 0xef9   :  { %12105 = vsyncpa [#allocation3], 1 }
 0xefa   :  { %12107 = vsyncpa [#allocation3 + $0x1], 1 }

</bundles_post_ra>
